<compile_context>
chip_gen: v7x
topology: tpu7x:2x2x1
jax: 0.10.0
libtpu: 0.0.40
codegen_flags: <defaults>
</compile_context>

<pallas_src>
import jax
import jax.numpy as jnp
from jax import lax
from jax.experimental import pallas as pl
from jax.experimental.pallas import tpu as pltpu


# ----------------------------------------------------------------------------
# Kernel 1: fused bidirectional LSTM layer (encoder).  Single pallas_call,
# whole sequence in VMEM, fwd+bwd recurrences interleaved in one fori_loop.
# ----------------------------------------------------------------------------
def _bilstm_kernel(x_ref, wfi_ref, wfh_ref, bf_ref, wbi_ref, wbh_ref, bb_ref,
                   yf_ref, yb_ref):
    S, B, _ = x_ref.shape
    Hh = wfh_ref.shape[0]

    # Weights are loop-invariant: load once, keep in vregs/VMEM.
    wfi = wfi_ref[...]
    wfh = wfh_ref[...]
    bf = bf_ref[...]
    wbi = wbi_ref[...]
    wbh = wbh_ref[...]
    bb = bb_ref[...]

    def cell(x, h, c, wi, wh, b):
        gates = (jnp.dot(x, wi, preferred_element_type=jnp.float32)
                 + jnp.dot(h, wh, preferred_element_type=jnp.float32)
                 + b)                                  # (B, 4*Hh)
        i = jax.nn.sigmoid(gates[:, 0 * Hh:1 * Hh])
        f = jax.nn.sigmoid(gates[:, 1 * Hh:2 * Hh])
        g = jnp.tanh(gates[:, 2 * Hh:3 * Hh])
        o = jax.nn.sigmoid(gates[:, 3 * Hh:4 * Hh])
        c_new = f * c + i * g
        h_new = o * jnp.tanh(c_new)
        return h_new, c_new

    def step(t, carry):
        hf, cf, hb, cb = carry
        # forward direction processes t = 0 .. S-1
        hf, cf = cell(x_ref[t], hf, cf, wfi, wfh, bf)
        yf_ref[t] = hf
        # backward direction processes tb = S-1 .. 0 (time reversal in-kernel)
        tb = S - 1 - t
        hb, cb = cell(x_ref[tb], hb, cb, wbi, wbh, bb)
        yb_ref[tb] = hb
        return hf, cf, hb, cb

    z = jnp.zeros((B, Hh), jnp.float32)
    lax.fori_loop(0, S, step, (z, z, z, z), unroll=True)


def bilstm_layer(x_seq, layer_params):
    S, B, Din = x_seq.shape
    Hh = layer_params["fwd"]["whh"].shape[0]
    yf, yb = pl.pallas_call(
        _bilstm_kernel,
        out_shape=(jax.ShapeDtypeStruct((S, B, Hh), jnp.float32),
                   jax.ShapeDtypeStruct((S, B, Hh), jnp.float32)),
    )(x_seq,
      layer_params["fwd"]["wih"], layer_params["fwd"]["whh"],
      layer_params["fwd"]["b"],
      layer_params["bwd"]["wih"], layer_params["bwd"]["whh"],
      layer_params["bwd"]["b"])
    # torch bidirectional LSTM output order: [forward | backward] on last dim.
    return jnp.concatenate([yf, yb], axis=-1)          # (S, B, H)


# ----------------------------------------------------------------------------
# Kernel 2: LSTMAttentionDot decoder fused with the discriminator head.
# Single pallas_call; T-step recurrence inside the kernel; only the final
# h_tilde is used -> Linear(H,1)+Sigmoid fused so nothing round-trips HBM.
# ----------------------------------------------------------------------------
def _decoder_disc_kernel(x_ref, ctx_ref, wih_ref, whh_ref, b_ref,
                         win_ref, wout_ref, wp_ref, bp_ref, pred_ref):
    T, B, _ = x_ref.shape
    H = whh_ref.shape[0]

    ctx = ctx_ref[...]                                 # (B, S, H), loop invariant
    wih = wih_ref[...]
    whh = whh_ref[...]
    b = b_ref[...]
    win = win_ref[...]
    wout_c = wout_ref[0:H, :]                          # applied to weighted ctx
    wout_h = wout_ref[H:2 * H, :]                      # applied to hy

    def step(t, carry):
        h, c = carry                                   # h is previous h_tilde
        x = x_ref[t]                                   # (B, E)
        gates = (jnp.dot(x, wih, preferred_element_type=jnp.float32)
                 + jnp.dot(h, whh, preferred_element_type=jnp.float32)
                 + b)                                  # (B, 4H)
        i = jax.nn.sigmoid(gates[:, 0 * H:1 * H])
        f = jax.nn.sigmoid(gates[:, 1 * H:2 * H])
        g = jnp.tanh(gates[:, 2 * H:3 * H])
        o = jax.nn.sigmoid(gates[:, 3 * H:4 * H])
        cy = f * c + i * g
        hy = o * jnp.tanh(cy)                          # (B, H)

        # SoftDotAttention (no mask) — MXU contractions instead of VPU/XLU.
        target = jnp.dot(hy, win,
                         preferred_element_type=jnp.float32)[:, None, :]  # (B,1,H)
        scores = jnp.einsum('bqh,bsh->bqs', target, ctx,
                            preferred_element_type=jnp.float32)           # (B,1,S)
        m = jnp.max(scores, axis=-1, keepdims=True)
        e = jnp.exp(scores - m)
        attn = e * pl.reciprocal(jnp.sum(e, axis=-1, keepdims=True),
                                 approx=True)                             # (B,1,S)
        weighted = jnp.einsum('bqs,bsh->bqh', attn, ctx,
                              preferred_element_type=jnp.float32)[:, 0, :]  # (B,H)
        # linear_out(cat(weighted, hy)) done as two matmuls (no concat).
        h_tilde = jnp.tanh(
            jnp.dot(weighted, wout_c, preferred_element_type=jnp.float32)
            + jnp.dot(hy, wout_h, preferred_element_type=jnp.float32))
        return h_tilde, cy

    z = jnp.zeros((B, H), jnp.float32)                 # h0 = c0 = 0 (per spec)
    h_final, _ = lax.fori_loop(0, T, step, (z, z), unroll=True)

    # Discriminator head: Linear(H, 1) -> Sigmoid, fused.
    logits = jnp.dot(h_final, wp_ref[...],
                     preferred_element_type=jnp.float32) + bp_ref[...]
    pred_ref[...] = jax.nn.sigmoid(logits)             # (B, 1)


def decoder_discriminator(x_seq, ctx_bf, p_lstm, p_pred):
    T, B, _ = x_seq.shape
    return pl.pallas_call(
        _decoder_disc_kernel,
        out_shape=jax.ShapeDtypeStruct((B, 1), jnp.float32),
    )(x_seq, ctx_bf, p_lstm["wih"], p_lstm["whh"], p_lstm["b"],
      p_lstm["win"], p_lstm["wout"], p_pred["w"], p_pred["b"])


# ----------------------------------------------------------------------------
# Parameter init (deterministic, synthetic; weights pre-transposed for x @ W)
# ----------------------------------------------------------------------------
def init_params(config, key):
    V = config["vocab_size"]
    E = config["embedding_size"]
    H = config["hidden_size"]
    L = config["num_layers"]
    Hh = H // 2

    def nrm(k, shape, scale=0.1):
        return scale * jax.random.normal(k, shape, dtype=jnp.float32)

    keys = iter(jax.random.split(key, 128))
    params = {"embedding": nrm(next(keys), (V, E))}

    enc = []
    for l in range(L):
        din = (E + 1) if l == 0 else H
        layer = {}
        for d in ("fwd", "bwd"):
            layer[d] = {
                "wih": nrm(next(keys), (din, 4 * Hh)),
                "whh": nrm(next(keys), (Hh, 4 * Hh)),
                "b":   nrm(next(keys), (1, 4 * Hh)),
            }
        enc.append(layer)
    params["enc"] = enc

    # LSTMAttentionDot (base_lstm)
    params["base_lstm"] = {
        "wih":  nrm(next(keys), (E, 4 * H)),
        "whh":  nrm(next(keys), (H, 4 * H)),
        "b":    nrm(next(keys), (1, 4 * H)),
        "win":  nrm(next(keys), (H, H)),       # SoftDotAttention linear_in.T
        "wout": nrm(next(keys), (2 * H, H)),   # SoftDotAttention linear_out.T
    }

    # discriminator head: Linear(H, 1) -> Sigmoid
    params["predictor"] = {
        "w": nrm(next(keys), (H, 1)),
        "b": nrm(next(keys), (1, 1)),
    }
    return params


# ----------------------------------------------------------------------------
# Full forward pass (embedding gathers / concat / transpose glue in XLA,
# recurrent hot paths in the two Pallas kernels above).
# ----------------------------------------------------------------------------
def language_discriminator_forward(params, inputs, contexts, answer_features):
    # inputs: (T, B) int32      contexts: (S, B) int32
    # answer_features: (S, B) float32
    emb = params["embedding"]

    # TODO(synk): embedding lookups stay as XLA gathers; a Pallas DMA-gather
    # kernel is not worthwhile at these sizes.
    ctx_emb = emb[contexts]                                        # (S, B, E)
    x = jnp.concatenate([ctx_emb, answer_features[..., None]],
                        axis=-1)                                   # (S, B, E+1)
    for layer in params["enc"]:                                    # bi-LSTM enc
        x = bilstm_layer(x, layer)
    ctx_bf = jnp.transpose(x, (1, 0, 2))                           # (B, S, H)

    input_emb = emb[inputs]                                        # (T, B, E)
    pred = decoder_discriminator(input_emb, ctx_bf,
                                 params["base_lstm"],
                                 params["predictor"])              # (B, 1)
    return jnp.squeeze(pred, axis=-1)                              # (B,)


if __name__ == "__main__":
    config = {
        "vocab_size": 64,
        "embedding_size": 32,
        "hidden_size": 128,      # lane-dense hidden (multiple of 128)
        "num_layers": 1,
        "dropout": 0.0,
        "batch_first": False,
        "use_pretrained_embeddings": False,
    }
    T, B, S = 6, 8, 16           # B >= 8 so matmuls fill the f32 sublane height
    key = jax.random.PRNGKey(0)
    k_par, k_in, k_ctx, k_ans = jax.random.split(key, 4)

    params = init_params(config, k_par)
    inputs = jax.random.randint(k_in, (T, B), 0,
                                config["vocab_size"], dtype=jnp.int32)
    contexts = jax.random.randint(k_ctx, (S, B), 0,
                                  config["vocab_size"], dtype=jnp.int32)
    answer_features = jax.random.normal(k_ans, (S, B), dtype=jnp.float32)

    fwd = jax.jit(language_discriminator_forward)
    pred = fwd(params, inputs, contexts, answer_features)
    pred = jax.block_until_ready(pred)

    assert pred.shape == (B,)
    assert bool(jnp.all(jnp.isfinite(pred)))
    assert bool(jnp.all((pred >= 0.0) & (pred <= 1.0)))
    print("KERNEL_OK")
</pallas_src>

<mosaic_0001>
module attributes {stable_mosaic.version = 11 : i64} {
  func.func @_bilstm_kernel(%arg0: memref<16x8x33xf32, #tpu.memory_space<vmem>>, %arg1: memref<33x256xf32, #tpu.memory_space<vmem>>, %arg2: memref<64x256xf32, #tpu.memory_space<vmem>>, %arg3: memref<1x256xf32, #tpu.memory_space<vmem>>, %arg4: memref<33x256xf32, #tpu.memory_space<vmem>>, %arg5: memref<64x256xf32, #tpu.memory_space<vmem>>, %arg6: memref<1x256xf32, #tpu.memory_space<vmem>>, %arg7: memref<16x8x64xf32, #tpu.memory_space<vmem>>, %arg8: memref<16x8x64xf32, #tpu.memory_space<vmem>>) attributes {dimension_semantics = [], scalar_prefetch = 0 : i64, scratch_operands = 0 : i64, tpu.core_type = #tpu.core_type<tc>} {
    %c0 = arith.constant 0 : index
    %c0_0 = arith.constant 0 : index
    %0 = vector.load %arg1[%c0, %c0_0] : memref<33x256xf32, #tpu.memory_space<vmem>>, vector<33x256xf32>
    %c0_1 = arith.constant 0 : index
    %c0_2 = arith.constant 0 : index
    %1 = vector.load %arg2[%c0_1, %c0_2] : memref<64x256xf32, #tpu.memory_space<vmem>>, vector<64x256xf32>
    %c0_3 = arith.constant 0 : index
    %c0_4 = arith.constant 0 : index
    %2 = vector.load %arg3[%c0_3, %c0_4] : memref<1x256xf32, #tpu.memory_space<vmem>>, vector<1x256xf32>
    %c0_5 = arith.constant 0 : index
    %c0_6 = arith.constant 0 : index
    %3 = vector.load %arg4[%c0_5, %c0_6] : memref<33x256xf32, #tpu.memory_space<vmem>>, vector<33x256xf32>
    %c0_7 = arith.constant 0 : index
    %c0_8 = arith.constant 0 : index
    %4 = vector.load %arg5[%c0_7, %c0_8] : memref<64x256xf32, #tpu.memory_space<vmem>>, vector<64x256xf32>
    %c0_9 = arith.constant 0 : index
    %c0_10 = arith.constant 0 : index
    %5 = vector.load %arg6[%c0_9, %c0_10] : memref<1x256xf32, #tpu.memory_space<vmem>>, vector<1x256xf32>
    %cst = arith.constant 0.000000e+00 : f32
    %6 = vector.broadcast %cst : f32 to vector<8x64xf32>
    %c0_i32 = arith.constant 0 : i32
    %7 = arith.index_cast %c0_i32 : i32 to index
    %c0_11 = arith.constant 0 : index
    %c0_12 = arith.constant 0 : index
    %8 = vector.load %arg0[%7, %c0_11, %c0_12] : memref<16x8x33xf32, #tpu.memory_space<vmem>>, vector<1x8x33xf32>
    %9 = vector.shape_cast %8 : vector<1x8x33xf32> to vector<8x33xf32>
    %cst_13 = arith.constant dense<0.000000e+00> : vector<8x256xf32>
    %10 = tpu.matmul %9, %0, %cst_13 {dimension_numbers = #tpu.dot_dimension_numbers<[1], [0], [0], [1], [0, 0, 1, 1], [], []>} : vector<8x33xf32>, vector<33x256xf32>, vector<8x256xf32> -> vector<8x256xf32>
    %cst_14 = arith.constant dense<0.000000e+00> : vector<8x256xf32>
    %11 = tpu.matmul %6, %1, %cst_14 {dimension_numbers = #tpu.dot_dimension_numbers<[1], [0], [0], [1], [0, 0, 1, 1], [], []>} : vector<8x64xf32>, vector<64x256xf32>, vector<8x256xf32> -> vector<8x256xf32>
    %12 = arith.addf %10, %11 : vector<8x256xf32>
    %13 = vector.broadcast %2 : vector<1x256xf32> to vector<8x256xf32>
    %14 = arith.addf %12, %13 : vector<8x256xf32>
    %15 = vector.extract_strided_slice %14 {offsets = [0, 0], sizes = [8, 64], strides = [1, 1]} : vector<8x256xf32> to vector<8x64xf32>
    %16 = arith.negf %15 : vector<8x64xf32>
    %17 = math.exp %16 : vector<8x64xf32>
    %cst_15 = arith.constant 1.000000e+00 : f32
    %18 = vector.broadcast %cst_15 : f32 to vector<8x64xf32>
    %19 = arith.addf %18, %17 : vector<8x64xf32>
    %20 = arith.divf %18, %19 : vector<8x64xf32>
    %21 = vector.extract_strided_slice %14 {offsets = [0, 64], sizes = [8, 64], strides = [1, 1]} : vector<8x256xf32> to vector<8x64xf32>
    %22 = arith.negf %21 : vector<8x64xf32>
    %23 = math.exp %22 : vector<8x64xf32>
    %cst_16 = arith.constant 1.000000e+00 : f32
    %24 = vector.broadcast %cst_16 : f32 to vector<8x64xf32>
    %25 = arith.addf %24, %23 : vector<8x64xf32>
    %26 = arith.divf %24, %25 : vector<8x64xf32>
    %27 = vector.extract_strided_slice %14 {offsets = [0, 128], sizes = [8, 64], strides = [1, 1]} : vector<8x256xf32> to vector<8x64xf32>
    %28 = math.tanh %27 : vector<8x64xf32>
    %29 = vector.extract_strided_slice %14 {offsets = [0, 192], sizes = [8, 64], strides = [1, 1]} : vector<8x256xf32> to vector<8x64xf32>
    %30 = arith.negf %29 : vector<8x64xf32>
    %31 = math.exp %30 : vector<8x64xf32>
    %cst_17 = arith.constant 1.000000e+00 : f32
    %32 = vector.broadcast %cst_17 : f32 to vector<8x64xf32>
    %33 = arith.addf %32, %31 : vector<8x64xf32>
    %34 = arith.divf %32, %33 : vector<8x64xf32>
    %35 = arith.mulf %26, %6 : vector<8x64xf32>
    %36 = arith.mulf %20, %28 : vector<8x64xf32>
    %37 = arith.addf %35, %36 : vector<8x64xf32>
    %38 = math.tanh %37 : vector<8x64xf32>
    %39 = arith.mulf %34, %38 : vector<8x64xf32>
    %40 = arith.index_cast %c0_i32 : i32 to index
    %c0_18 = arith.constant 0 : index
    %c0_19 = arith.constant 0 : index
    %41 = vector.load %arg7[%40, %c0_18, %c0_19] : memref<16x8x64xf32, #tpu.memory_space<vmem>>, vector<1x8x64xf32>
    %42 = vector.shape_cast %41 : vector<1x8x64xf32> to vector<8x64xf32>
    %43 = vector.shape_cast %39 : vector<8x64xf32> to vector<1x8x64xf32>
    tpu.vector_store %arg7[%40, %c0_18, %c0_19], %43 {strides = array<i32>} : memref<16x8x64xf32, #tpu.memory_space<vmem>>, vector<1x8x64xf32>,
    %c15_i32 = arith.constant 15 : i32
    %44 = arith.subi %c15_i32, %c0_i32 : i32
    %45 = arith.index_cast %44 : i32 to index
    %c0_20 = arith.constant 0 : index
    %c0_21 = arith.constant 0 : index
    %46 = vector.load %arg0[%45, %c0_20, %c0_21] : memref<16x8x33xf32, #tpu.memory_space<vmem>>, vector<1x8x33xf32>
    %47 = vector.shape_cast %46 : vector<1x8x33xf32> to vector<8x33xf32>
    %cst_22 = arith.constant dense<0.000000e+00> : vector<8x256xf32>
    %48 = tpu.matmul %47, %3, %cst_22 {dimension_numbers = #tpu.dot_dimension_numbers<[1], [0], [0], [1], [0, 0, 1, 1], [], []>} : vector<8x33xf32>, vector<33x256xf32>, vector<8x256xf32> -> vector<8x256xf32>
    %cst_23 = arith.constant dense<0.000000e+00> : vector<8x256xf32>
    %49 = tpu.matmul %6, %4, %cst_23 {dimension_numbers = #tpu.dot_dimension_numbers<[1], [0], [0], [1], [0, 0, 1, 1], [], []>} : vector<8x64xf32>, vector<64x256xf32>, vector<8x256xf32> -> vector<8x256xf32>
    %50 = arith.addf %48, %49 : vector<8x256xf32>
    %51 = vector.broadcast %5 : vector<1x256xf32> to vector<8x256xf32>
    %52 = arith.addf %50, %51 : vector<8x256xf32>
    %53 = vector.extract_strided_slice %52 {offsets = [0, 0], sizes = [8, 64], strides = [1, 1]} : vector<8x256xf32> to vector<8x64xf32>
    %54 = arith.negf %53 : vector<8x64xf32>
    %55 = math.exp %54 : vector<8x64xf32>
    %cst_24 = arith.constant 1.000000e+00 : f32
    %56 = vector.broadcast %cst_24 : f32 to vector<8x64xf32>
    %57 = arith.addf %56, %55 : vector<8x64xf32>
    %58 = arith.divf %56, %57 : vector<8x64xf32>
    %59 = vector.extract_strided_slice %52 {offsets = [0, 64], sizes = [8, 64], strides = [1, 1]} : vector<8x256xf32> to vector<8x64xf32>
    %60 = arith.negf %59 : vector<8x64xf32>
    %61 = math.exp %60 : vector<8x64xf32>
    %cst_25 = arith.constant 1.000000e+00 : f32
    %62 = vector.broadcast %cst_25 : f32 to vector<8x64xf32>
    %63 = arith.addf %62, %61 : vector<8x64xf32>
    %64 = arith.divf %62, %63 : vector<8x64xf32>
    %65 = vector.extract_strided_slice %52 {offsets = [0, 128], sizes = [8, 64], strides = [1, 1]} : vector<8x256xf32> to vector<8x64xf32>
    %66 = math.tanh %65 : vector<8x64xf32>
    %67 = vector.extract_strided_slice %52 {offsets = [0, 192], sizes = [8, 64], strides = [1, 1]} : vector<8x256xf32> to vector<8x64xf32>
    %68 = arith.negf %67 : vector<8x64xf32>
    %69 = math.exp %68 : vector<8x64xf32>
    %cst_26 = arith.constant 1.000000e+00 : f32
    %70 = vector.broadcast %cst_26 : f32 to vector<8x64xf32>
    %71 = arith.addf %70, %69 : vector<8x64xf32>
    %72 = arith.divf %70, %71 : vector<8x64xf32>
    %73 = arith.mulf %64, %6 : vector<8x64xf32>
    %74 = arith.mulf %58, %66 : vector<8x64xf32>
    %75 = arith.addf %73, %74 : vector<8x64xf32>
    %76 = math.tanh %75 : vector<8x64xf32>
    %77 = arith.mulf %72, %76 : vector<8x64xf32>
    %78 = arith.index_cast %44 : i32 to index
    %c0_27 = arith.constant 0 : index
    %c0_28 = arith.constant 0 : index
    %79 = vector.load %arg8[%78, %c0_27, %c0_28] : memref<16x8x64xf32, #tpu.memory_space<vmem>>, vector<1x8x64xf32>
    %80 = vector.shape_cast %79 : vector<1x8x64xf32> to vector<8x64xf32>
    %81 = vector.shape_cast %77 : vector<8x64xf32> to vector<1x8x64xf32>
    tpu.vector_store %arg8[%78, %c0_27, %c0_28], %81 {strides = array<i32>} : memref<16x8x64xf32, #tpu.memory_space<vmem>>, vector<1x8x64xf32>,
    %c1_i32 = arith.constant 1 : i32
    %82 = arith.index_cast %c1_i32 : i32 to index
    %c0_29 = arith.constant 0 : index
    %c0_30 = arith.constant 0 : index
    %83 = vector.load %arg0[%82, %c0_29, %c0_30] : memref<16x8x33xf32, #tpu.memory_space<vmem>>, vector<1x8x33xf32>
    %84 = vector.shape_cast %83 : vector<1x8x33xf32> to vector<8x33xf32>
    %cst_31 = arith.constant dense<0.000000e+00> : vector<8x256xf32>
    %85 = tpu.matmul %84, %0, %cst_31 {dimension_numbers = #tpu.dot_dimension_numbers<[1], [0], [0], [1], [0, 0, 1, 1], [], []>} : vector<8x33xf32>, vector<33x256xf32>, vector<8x256xf32> -> vector<8x256xf32>
    %cst_32 = arith.constant dense<0.000000e+00> : vector<8x256xf32>
    %86 = tpu.matmul %39, %1, %cst_32 {dimension_numbers = #tpu.dot_dimension_numbers<[1], [0], [0], [1], [0, 0, 1, 1], [], []>} : vector<8x64xf32>, vector<64x256xf32>, vector<8x256xf32> -> vector<8x256xf32>
    %87 = arith.addf %85, %86 : vector<8x256xf32>
    %88 = vector.broadcast %2 : vector<1x256xf32> to vector<8x256xf32>
    %89 = arith.addf %87, %88 : vector<8x256xf32>
    %90 = vector.extract_strided_slice %89 {offsets = [0, 0], sizes = [8, 64], strides = [1, 1]} : vector<8x256xf32> to vector<8x64xf32>
    %91 = arith.negf %90 : vector<8x64xf32>
    %92 = math.exp %91 : vector<8x64xf32>
    %cst_33 = arith.constant 1.000000e+00 : f32
    %93 = vector.broadcast %cst_33 : f32 to vector<8x64xf32>
    %94 = arith.addf %93, %92 : vector<8x64xf32>
    %95 = arith.divf %93, %94 : vector<8x64xf32>
    %96 = vector.extract_strided_slice %89 {offsets = [0, 64], sizes = [8, 64], strides = [1, 1]} : vector<8x256xf32> to vector<8x64xf32>
    %97 = arith.negf %96 : vector<8x64xf32>
    %98 = math.exp %97 : vector<8x64xf32>
    %cst_34 = arith.constant 1.000000e+00 : f32
    %99 = vector.broadcast %cst_34 : f32 to vector<8x64xf32>
    %100 = arith.addf %99, %98 : vector<8x64xf32>
    %101 = arith.divf %99, %100 : vector<8x64xf32>
    %102 = vector.extract_strided_slice %89 {offsets = [0, 128], sizes = [8, 64], strides = [1, 1]} : vector<8x256xf32> to vector<8x64xf32>
    %103 = math.tanh %102 : vector<8x64xf32>
    %104 = vector.extract_strided_slice %89 {offsets = [0, 192], sizes = [8, 64], strides = [1, 1]} : vector<8x256xf32> to vector<8x64xf32>
    %105 = arith.negf %104 : vector<8x64xf32>
    %106 = math.exp %105 : vector<8x64xf32>
    %cst_35 = arith.constant 1.000000e+00 : f32
    %107 = vector.broadcast %cst_35 : f32 to vector<8x64xf32>
    %108 = arith.addf %107, %106 : vector<8x64xf32>
    %109 = arith.divf %107, %108 : vector<8x64xf32>
    %110 = arith.mulf %101, %37 : vector<8x64xf32>
    %111 = arith.mulf %95, %103 : vector<8x64xf32>
    %112 = arith.addf %110, %111 : vector<8x64xf32>
    %113 = math.tanh %112 : vector<8x64xf32>
    %114 = arith.mulf %109, %113 : vector<8x64xf32>
    %115 = arith.index_cast %c1_i32 : i32 to index
    %c0_36 = arith.constant 0 : index
    %c0_37 = arith.constant 0 : index
    %116 = vector.load %arg7[%115, %c0_36, %c0_37] : memref<16x8x64xf32, #tpu.memory_space<vmem>>, vector<1x8x64xf32>
    %117 = vector.shape_cast %116 : vector<1x8x64xf32> to vector<8x64xf32>
    %118 = vector.shape_cast %114 : vector<8x64xf32> to vector<1x8x64xf32>
    tpu.vector_store %arg7[%115, %c0_36, %c0_37], %118 {strides = array<i32>} : memref<16x8x64xf32, #tpu.memory_space<vmem>>, vector<1x8x64xf32>,
    %c15_i32_38 = arith.constant 15 : i32
    %119 = arith.subi %c15_i32_38, %c1_i32 : i32
    %120 = arith.index_cast %119 : i32 to index
    %c0_39 = arith.constant 0 : index
    %c0_40 = arith.constant 0 : index
    %121 = vector.load %arg0[%120, %c0_39, %c0_40] : memref<16x8x33xf32, #tpu.memory_space<vmem>>, vector<1x8x33xf32>
    %122 = vector.shape_cast %121 : vector<1x8x33xf32> to vector<8x33xf32>
    %cst_41 = arith.constant dense<0.000000e+00> : vector<8x256xf32>
    %123 = tpu.matmul %122, %3, %cst_41 {dimension_numbers = #tpu.dot_dimension_numbers<[1], [0], [0], [1], [0, 0, 1, 1], [], []>} : vector<8x33xf32>, vector<33x256xf32>, vector<8x256xf32> -> vector<8x256xf32>
    %cst_42 = arith.constant dense<0.000000e+00> : vector<8x256xf32>
    %124 = tpu.matmul %77, %4, %cst_42 {dimension_numbers = #tpu.dot_dimension_numbers<[1], [0], [0], [1], [0, 0, 1, 1], [], []>} : vector<8x64xf32>, vector<64x256xf32>, vector<8x256xf32> -> vector<8x256xf32>
    %125 = arith.addf %123, %124 : vector<8x256xf32>
    %126 = vector.broadcast %5 : vector<1x256xf32> to vector<8x256xf32>
    %127 = arith.addf %125, %126 : vector<8x256xf32>
    %128 = vector.extract_strided_slice %127 {offsets = [0, 0], sizes = [8, 64], strides = [1, 1]} : vector<8x256xf32> to vector<8x64xf32>
    %129 = arith.negf %128 : vector<8x64xf32>
    %130 = math.exp %129 : vector<8x64xf32>
    %cst_43 = arith.constant 1.000000e+00 : f32
    %131 = vector.broadcast %cst_43 : f32 to vector<8x64xf32>
    %132 = arith.addf %131, %130 : vector<8x64xf32>
    %133 = arith.divf %131, %132 : vector<8x64xf32>
    %134 = vector.extract_strided_slice %127 {offsets = [0, 64], sizes = [8, 64], strides = [1, 1]} : vector<8x256xf32> to vector<8x64xf32>
    %135 = arith.negf %134 : vector<8x64xf32>
    %136 = math.exp %135 : vector<8x64xf32>
    %cst_44 = arith.constant 1.000000e+00 : f32
    %137 = vector.broadcast %cst_44 : f32 to vector<8x64xf32>
    %138 = arith.addf %137, %136 : vector<8x64xf32>
    %139 = arith.divf %137, %138 : vector<8x64xf32>
    %140 = vector.extract_strided_slice %127 {offsets = [0, 128], sizes = [8, 64], strides = [1, 1]} : vector<8x256xf32> to vector<8x64xf32>
    %141 = math.tanh %140 : vector<8x64xf32>
    %142 = vector.extract_strided_slice %127 {offsets = [0, 192], sizes = [8, 64], strides = [1, 1]} : vector<8x256xf32> to vector<8x64xf32>
    %143 = arith.negf %142 : vector<8x64xf32>
    %144 = math.exp %143 : vector<8x64xf32>
    %cst_45 = arith.constant 1.000000e+00 : f32
    %145 = vector.broadcast %cst_45 : f32 to vector<8x64xf32>
    %146 = arith.addf %145, %144 : vector<8x64xf32>
    %147 = arith.divf %145, %146 : vector<8x64xf32>
    %148 = arith.mulf %139, %75 : vector<8x64xf32>
    %149 = arith.mulf %133, %141 : vector<8x64xf32>
    %150 = arith.addf %148, %149 : vector<8x64xf32>
    %151 = math.tanh %150 : vector<8x64xf32>
    %152 = arith.mulf %147, %151 : vector<8x64xf32>
    %153 = arith.index_cast %119 : i32 to index
    %c0_46 = arith.constant 0 : index
    %c0_47 = arith.constant 0 : index
    %154 = vector.load %arg8[%153, %c0_46, %c0_47] : memref<16x8x64xf32, #tpu.memory_space<vmem>>, vector<1x8x64xf32>
    %155 = vector.shape_cast %154 : vector<1x8x64xf32> to vector<8x64xf32>
    %156 = vector.shape_cast %152 : vector<8x64xf32> to vector<1x8x64xf32>
    tpu.vector_store %arg8[%153, %c0_46, %c0_47], %156 {strides = array<i32>} : memref<16x8x64xf32, #tpu.memory_space<vmem>>, vector<1x8x64xf32>,
    %c2_i32 = arith.constant 2 : i32
    %157 = arith.index_cast %c2_i32 : i32 to index
    %c0_48 = arith.constant 0 : index
    %c0_49 = arith.constant 0 : index
    %158 = vector.load %arg0[%157, %c0_48, %c0_49] : memref<16x8x33xf32, #tpu.memory_space<vmem>>, vector<1x8x33xf32>
    %159 = vector.shape_cast %158 : vector<1x8x33xf32> to vector<8x33xf32>
    %cst_50 = arith.constant dense<0.000000e+00> : vector<8x256xf32>
    %160 = tpu.matmul %159, %0, %cst_50 {dimension_numbers = #tpu.dot_dimension_numbers<[1], [0], [0], [1], [0, 0, 1, 1], [], []>} : vector<8x33xf32>, vector<33x256xf32>, vector<8x256xf32> -> vector<8x256xf32>
    %cst_51 = arith.constant dense<0.000000e+00> : vector<8x256xf32>
    %161 = tpu.matmul %114, %1, %cst_51 {dimension_numbers = #tpu.dot_dimension_numbers<[1], [0], [0], [1], [0, 0, 1, 1], [], []>} : vector<8x64xf32>, vector<64x256xf32>, vector<8x256xf32> -> vector<8x256xf32>
    %162 = arith.addf %160, %161 : vector<8x256xf32>
    %163 = vector.broadcast %2 : vector<1x256xf32> to vector<8x256xf32>
    %164 = arith.addf %162, %163 : vector<8x256xf32>
    %165 = vector.extract_strided_slice %164 {offsets = [0, 0], sizes = [8, 64], strides = [1, 1]} : vector<8x256xf32> to vector<8x64xf32>
    %166 = arith.negf %165 : vector<8x64xf32>
    %167 = math.exp %166 : vector<8x64xf32>
    %cst_52 = arith.constant 1.000000e+00 : f32
    %168 = vector.broadcast %cst_52 : f32 to vector<8x64xf32>
    %169 = arith.addf %168, %167 : vector<8x64xf32>
    %170 = arith.divf %168, %169 : vector<8x64xf32>
    %171 = vector.extract_strided_slice %164 {offsets = [0, 64], sizes = [8, 64], strides = [1, 1]} : vector<8x256xf32> to vector<8x64xf32>
    %172 = arith.negf %171 : vector<8x64xf32>
    %173 = math.exp %172 : vector<8x64xf32>
    %cst_53 = arith.constant 1.000000e+00 : f32
    %174 = vector.broadcast %cst_53 : f32 to vector<8x64xf32>
    %175 = arith.addf %174, %173 : vector<8x64xf32>
    %176 = arith.divf %174, %175 : vector<8x64xf32>
    %177 = vector.extract_strided_slice %164 {offsets = [0, 128], sizes = [8, 64], strides = [1, 1]} : vector<8x256xf32> to vector<8x64xf32>
    %178 = math.tanh %177 : vector<8x64xf32>
    %179 = vector.extract_strided_slice %164 {offsets = [0, 192], sizes = [8, 64], strides = [1, 1]} : vector<8x256xf32> to vector<8x64xf32>
    %180 = arith.negf %179 : vector<8x64xf32>
    %181 = math.exp %180 : vector<8x64xf32>
    %cst_54 = arith.constant 1.000000e+00 : f32
    %182 = vector.broadcast %cst_54 : f32 to vector<8x64xf32>
    %183 = arith.addf %182, %181 : vector<8x64xf32>
    %184 = arith.divf %182, %183 : vector<8x64xf32>
    %185 = arith.mulf %176, %112 : vector<8x64xf32>
    %186 = arith.mulf %170, %178 : vector<8x64xf32>
    %187 = arith.addf %185, %186 : vector<8x64xf32>
    %188 = math.tanh %187 : vector<8x64xf32>
    %189 = arith.mulf %184, %188 : vector<8x64xf32>
    %190 = arith.index_cast %c2_i32 : i32 to index
    %c0_55 = arith.constant 0 : index
    %c0_56 = arith.constant 0 : index
    %191 = vector.load %arg7[%190, %c0_55, %c0_56] : memref<16x8x64xf32, #tpu.memory_space<vmem>>, vector<1x8x64xf32>
    %192 = vector.shape_cast %191 : vector<1x8x64xf32> to vector<8x64xf32>
    %193 = vector.shape_cast %189 : vector<8x64xf32> to vector<1x8x64xf32>
    tpu.vector_store %arg7[%190, %c0_55, %c0_56], %193 {strides = array<i32>} : memref<16x8x64xf32, #tpu.memory_space<vmem>>, vector<1x8x64xf32>,
    %c15_i32_57 = arith.constant 15 : i32
    %194 = arith.subi %c15_i32_57, %c2_i32 : i32
    %195 = arith.index_cast %194 : i32 to index
    %c0_58 = arith.constant 0 : index
    %c0_59 = arith.constant 0 : index
    %196 = vector.load %arg0[%195, %c0_58, %c0_59] : memref<16x8x33xf32, #tpu.memory_space<vmem>>, vector<1x8x33xf32>
    %197 = vector.shape_cast %196 : vector<1x8x33xf32> to vector<8x33xf32>
    %cst_60 = arith.constant dense<0.000000e+00> : vector<8x256xf32>
    %198 = tpu.matmul %197, %3, %cst_60 {dimension_numbers = #tpu.dot_dimension_numbers<[1], [0], [0], [1], [0, 0, 1, 1], [], []>} : vector<8x33xf32>, vector<33x256xf32>, vector<8x256xf32> -> vector<8x256xf32>
    %cst_61 = arith.constant dense<0.000000e+00> : vector<8x256xf32>
    %199 = tpu.matmul %152, %4, %cst_61 {dimension_numbers = #tpu.dot_dimension_numbers<[1], [0], [0], [1], [0, 0, 1, 1], [], []>} : vector<8x64xf32>, vector<64x256xf32>, vector<8x256xf32> -> vector<8x256xf32>
    %200 = arith.addf %198, %199 : vector<8x256xf32>
    %201 = vector.broadcast %5 : vector<1x256xf32> to vector<8x256xf32>
    %202 = arith.addf %200, %201 : vector<8x256xf32>
    %203 = vector.extract_strided_slice %202 {offsets = [0, 0], sizes = [8, 64], strides = [1, 1]} : vector<8x256xf32> to vector<8x64xf32>
    %204 = arith.negf %203 : vector<8x64xf32>
    %205 = math.exp %204 : vector<8x64xf32>
    %cst_62 = arith.constant 1.000000e+00 : f32
    %206 = vector.broadcast %cst_62 : f32 to vector<8x64xf32>
    %207 = arith.addf %206, %205 : vector<8x64xf32>
    %208 = arith.divf %206, %207 : vector<8x64xf32>
    %209 = vector.extract_strided_slice %202 {offsets = [0, 64], sizes = [8, 64], strides = [1, 1]} : vector<8x256xf32> to vector<8x64xf32>
    %210 = arith.negf %209 : vector<8x64xf32>
    %211 = math.exp %210 : vector<8x64xf32>
    %cst_63 = arith.constant 1.000000e+00 : f32
    %212 = vector.broadcast %cst_63 : f32 to vector<8x64xf32>
    %213 = arith.addf %212, %211 : vector<8x64xf32>
    %214 = arith.divf %212, %213 : vector<8x64xf32>
    %215 = vector.extract_strided_slice %202 {offsets = [0, 128], sizes = [8, 64], strides = [1, 1]} : vector<8x256xf32> to vector<8x64xf32>
    %216 = math.tanh %215 : vector<8x64xf32>
    %217 = vector.extract_strided_slice %202 {offsets = [0, 192], sizes = [8, 64], strides = [1, 1]} : vector<8x256xf32> to vector<8x64xf32>
    %218 = arith.negf %217 : vector<8x64xf32>
    %219 = math.exp %218 : vector<8x64xf32>
    %cst_64 = arith.constant 1.000000e+00 : f32
    %220 = vector.broadcast %cst_64 : f32 to vector<8x64xf32>
    %221 = arith.addf %220, %219 : vector<8x64xf32>
    %222 = arith.divf %220, %221 : vector<8x64xf32>
    %223 = arith.mulf %214, %150 : vector<8x64xf32>
    %224 = arith.mulf %208, %216 : vector<8x64xf32>
    %225 = arith.addf %223, %224 : vector<8x64xf32>
    %226 = math.tanh %225 : vector<8x64xf32>
    %227 = arith.mulf %222, %226 : vector<8x64xf32>
    %228 = arith.index_cast %194 : i32 to index
    %c0_65 = arith.constant 0 : index
    %c0_66 = arith.constant 0 : index
    %229 = vector.load %arg8[%228, %c0_65, %c0_66] : memref<16x8x64xf32, #tpu.memory_space<vmem>>, vector<1x8x64xf32>
    %230 = vector.shape_cast %229 : vector<1x8x64xf32> to vector<8x64xf32>
    %231 = vector.shape_cast %227 : vector<8x64xf32> to vector<1x8x64xf32>
    tpu.vector_store %arg8[%228, %c0_65, %c0_66], %231 {strides = array<i32>} : memref<16x8x64xf32, #tpu.memory_space<vmem>>, vector<1x8x64xf32>,
    %c3_i32 = arith.constant 3 : i32
    %232 = arith.index_cast %c3_i32 : i32 to index
    %c0_67 = arith.constant 0 : index
    %c0_68 = arith.constant 0 : index
    %233 = vector.load %arg0[%232, %c0_67, %c0_68] : memref<16x8x33xf32, #tpu.memory_space<vmem>>, vector<1x8x33xf32>
    %234 = vector.shape_cast %233 : vector<1x8x33xf32> to vector<8x33xf32>
    %cst_69 = arith.constant dense<0.000000e+00> : vector<8x256xf32>
    %235 = tpu.matmul %234, %0, %cst_69 {dimension_numbers = #tpu.dot_dimension_numbers<[1], [0], [0], [1], [0, 0, 1, 1], [], []>} : vector<8x33xf32>, vector<33x256xf32>, vector<8x256xf32> -> vector<8x256xf32>
    %cst_70 = arith.constant dense<0.000000e+00> : vector<8x256xf32>
    %236 = tpu.matmul %189, %1, %cst_70 {dimension_numbers = #tpu.dot_dimension_numbers<[1], [0], [0], [1], [0, 0, 1, 1], [], []>} : vector<8x64xf32>, vector<64x256xf32>, vector<8x256xf32> -> vector<8x256xf32>
    %237 = arith.addf %235, %236 : vector<8x256xf32>
    %238 = vector.broadcast %2 : vector<1x256xf32> to vector<8x256xf32>
    %239 = arith.addf %237, %238 : vector<8x256xf32>
    %240 = vector.extract_strided_slice %239 {offsets = [0, 0], sizes = [8, 64], strides = [1, 1]} : vector<8x256xf32> to vector<8x64xf32>
    %241 = arith.negf %240 : vector<8x64xf32>
    %242 = math.exp %241 : vector<8x64xf32>
    %cst_71 = arith.constant 1.000000e+00 : f32
    %243 = vector.broadcast %cst_71 : f32 to vector<8x64xf32>
    %244 = arith.addf %243, %242 : vector<8x64xf32>
    %245 = arith.divf %243, %244 : vector<8x64xf32>
    %246 = vector.extract_strided_slice %239 {offsets = [0, 64], sizes = [8, 64], strides = [1, 1]} : vector<8x256xf32> to vector<8x64xf32>
    %247 = arith.negf %246 : vector<8x64xf32>
    %248 = math.exp %247 : vector<8x64xf32>
    %cst_72 = arith.constant 1.000000e+00 : f32
    %249 = vector.broadcast %cst_72 : f32 to vector<8x64xf32>
    %250 = arith.addf %249, %248 : vector<8x64xf32>
    %251 = arith.divf %249, %250 : vector<8x64xf32>
    %252 = vector.extract_strided_slice %239 {offsets = [0, 128], sizes = [8, 64], strides = [1, 1]} : vector<8x256xf32> to vector<8x64xf32>
    %253 = math.tanh %252 : vector<8x64xf32>
    %254 = vector.extract_strided_slice %239 {offsets = [0, 192], sizes = [8, 64], strides = [1, 1]} : vector<8x256xf32> to vector<8x64xf32>
    %255 = arith.negf %254 : vector<8x64xf32>
    %256 = math.exp %255 : vector<8x64xf32>
    %cst_73 = arith.constant 1.000000e+00 : f32
    %257 = vector.broadcast %cst_73 : f32 to vector<8x64xf32>
    %258 = arith.addf %257, %256 : vector<8x64xf32>
    %259 = arith.divf %257, %258 : vector<8x64xf32>
    %260 = arith.mulf %251, %187 : vector<8x64xf32>
    %261 = arith.mulf %245, %253 : vector<8x64xf32>
    %262 = arith.addf %260, %261 : vector<8x64xf32>
    %263 = math.tanh %262 : vector<8x64xf32>
    %264 = arith.mulf %259, %263 : vector<8x64xf32>
    %265 = arith.index_cast %c3_i32 : i32 to index
    %c0_74 = arith.constant 0 : index
    %c0_75 = arith.constant 0 : index
    %266 = vector.load %arg7[%265, %c0_74, %c0_75] : memref<16x8x64xf32, #tpu.memory_space<vmem>>, vector<1x8x64xf32>
    %267 = vector.shape_cast %266 : vector<1x8x64xf32> to vector<8x64xf32>
    %268 = vector.shape_cast %264 : vector<8x64xf32> to vector<1x8x64xf32>
    tpu.vector_store %arg7[%265, %c0_74, %c0_75], %268 {strides = array<i32>} : memref<16x8x64xf32, #tpu.memory_space<vmem>>, vector<1x8x64xf32>,
    %c15_i32_76 = arith.constant 15 : i32
    %269 = arith.subi %c15_i32_76, %c3_i32 : i32
    %270 = arith.index_cast %269 : i32 to index
    %c0_77 = arith.constant 0 : index
    %c0_78 = arith.constant 0 : index
    %271 = vector.load %arg0[%270, %c0_77, %c0_78] : memref<16x8x33xf32, #tpu.memory_space<vmem>>, vector<1x8x33xf32>
    %272 = vector.shape_cast %271 : vector<1x8x33xf32> to vector<8x33xf32>
    %cst_79 = arith.constant dense<0.000000e+00> : vector<8x256xf32>
    %273 = tpu.matmul %272, %3, %cst_79 {dimension_numbers = #tpu.dot_dimension_numbers<[1], [0], [0], [1], [0, 0, 1, 1], [], []>} : vector<8x33xf32>, vector<33x256xf32>, vector<8x256xf32> -> vector<8x256xf32>
    %cst_80 = arith.constant dense<0.000000e+00> : vector<8x256xf32>
    %274 = tpu.matmul %227, %4, %cst_80 {dimension_numbers = #tpu.dot_dimension_numbers<[1], [0], [0], [1], [0, 0, 1, 1], [], []>} : vector<8x64xf32>, vector<64x256xf32>, vector<8x256xf32> -> vector<8x256xf32>
    %275 = arith.addf %273, %274 : vector<8x256xf32>
    %276 = vector.broadcast %5 : vector<1x256xf32> to vector<8x256xf32>
    %277 = arith.addf %275, %276 : vector<8x256xf32>
    %278 = vector.extract_strided_slice %277 {offsets = [0, 0], sizes = [8, 64], strides = [1, 1]} : vector<8x256xf32> to vector<8x64xf32>
    %279 = arith.negf %278 : vector<8x64xf32>
    %280 = math.exp %279 : vector<8x64xf32>
    %cst_81 = arith.constant 1.000000e+00 : f32
    %281 = vector.broadcast %cst_81 : f32 to vector<8x64xf32>
    %282 = arith.addf %281, %280 : vector<8x64xf32>
    %283 = arith.divf %281, %282 : vector<8x64xf32>
    %284 = vector.extract_strided_slice %277 {offsets = [0, 64], sizes = [8, 64], strides = [1, 1]} : vector<8x256xf32> to vector<8x64xf32>
    %285 = arith.negf %284 : vector<8x64xf32>
    %286 = math.exp %285 : vector<8x64xf32>
    %cst_82 = arith.constant 1.000000e+00 : f32
    %287 = vector.broadcast %cst_82 : f32 to vector<8x64xf32>
    %288 = arith.addf %287, %286 : vector<8x64xf32>
    %289 = arith.divf %287, %288 : vector<8x64xf32>
    %290 = vector.extract_strided_slice %277 {offsets = [0, 128], sizes = [8, 64], strides = [1, 1]} : vector<8x256xf32> to vector<8x64xf32>
    %291 = math.tanh %290 : vector<8x64xf32>
    %292 = vector.extract_strided_slice %277 {offsets = [0, 192], sizes = [8, 64], strides = [1, 1]} : vector<8x256xf32> to vector<8x64xf32>
    %293 = arith.negf %292 : vector<8x64xf32>
    %294 = math.exp %293 : vector<8x64xf32>
    %cst_83 = arith.constant 1.000000e+00 : f32
    %295 = vector.broadcast %cst_83 : f32 to vector<8x64xf32>
    %296 = arith.addf %295, %294 : vector<8x64xf32>
    %297 = arith.divf %295, %296 : vector<8x64xf32>
    %298 = arith.mulf %289, %225 : vector<8x64xf32>
    %299 = arith.mulf %283, %291 : vector<8x64xf32>
    %300 = arith.addf %298, %299 : vector<8x64xf32>
    %301 = math.tanh %300 : vector<8x64xf32>
    %302 = arith.mulf %297, %301 : vector<8x64xf32>
    %303 = arith.index_cast %269 : i32 to index
    %c0_84 = arith.constant 0 : index
    %c0_85 = arith.constant 0 : index
    %304 = vector.load %arg8[%303, %c0_84, %c0_85] : memref<16x8x64xf32, #tpu.memory_space<vmem>>, vector<1x8x64xf32>
    %305 = vector.shape_cast %304 : vector<1x8x64xf32> to vector<8x64xf32>
    %306 = vector.shape_cast %302 : vector<8x64xf32> to vector<1x8x64xf32>
    tpu.vector_store %arg8[%303, %c0_84, %c0_85], %306 {strides = array<i32>} : memref<16x8x64xf32, #tpu.memory_space<vmem>>, vector<1x8x64xf32>,
    %c4_i32 = arith.constant 4 : i32
    %307 = arith.index_cast %c4_i32 : i32 to index
    %c0_86 = arith.constant 0 : index
    %c0_87 = arith.constant 0 : index
    %308 = vector.load %arg0[%307, %c0_86, %c0_87] : memref<16x8x33xf32, #tpu.memory_space<vmem>>, vector<1x8x33xf32>
    %309 = vector.shape_cast %308 : vector<1x8x33xf32> to vector<8x33xf32>
    %cst_88 = arith.constant dense<0.000000e+00> : vector<8x256xf32>
    %310 = tpu.matmul %309, %0, %cst_88 {dimension_numbers = #tpu.dot_dimension_numbers<[1], [0], [0], [1], [0, 0, 1, 1], [], []>} : vector<8x33xf32>, vector<33x256xf32>, vector<8x256xf32> -> vector<8x256xf32>
    %cst_89 = arith.constant dense<0.000000e+00> : vector<8x256xf32>
    %311 = tpu.matmul %264, %1, %cst_89 {dimension_numbers = #tpu.dot_dimension_numbers<[1], [0], [0], [1], [0, 0, 1, 1], [], []>} : vector<8x64xf32>, vector<64x256xf32>, vector<8x256xf32> -> vector<8x256xf32>
    %312 = arith.addf %310, %311 : vector<8x256xf32>
    %313 = vector.broadcast %2 : vector<1x256xf32> to vector<8x256xf32>
    %314 = arith.addf %312, %313 : vector<8x256xf32>
    %315 = vector.extract_strided_slice %314 {offsets = [0, 0], sizes = [8, 64], strides = [1, 1]} : vector<8x256xf32> to vector<8x64xf32>
    %316 = arith.negf %315 : vector<8x64xf32>
    %317 = math.exp %316 : vector<8x64xf32>
    %cst_90 = arith.constant 1.000000e+00 : f32
    %318 = vector.broadcast %cst_90 : f32 to vector<8x64xf32>
    %319 = arith.addf %318, %317 : vector<8x64xf32>
    %320 = arith.divf %318, %319 : vector<8x64xf32>
    %321 = vector.extract_strided_slice %314 {offsets = [0, 64], sizes = [8, 64], strides = [1, 1]} : vector<8x256xf32> to vector<8x64xf32>
    %322 = arith.negf %321 : vector<8x64xf32>
    %323 = math.exp %322 : vector<8x64xf32>
    %cst_91 = arith.constant 1.000000e+00 : f32
    %324 = vector.broadcast %cst_91 : f32 to vector<8x64xf32>
    %325 = arith.addf %324, %323 : vector<8x64xf32>
    %326 = arith.divf %324, %325 : vector<8x64xf32>
    %327 = vector.extract_strided_slice %314 {offsets = [0, 128], sizes = [8, 64], strides = [1, 1]} : vector<8x256xf32> to vector<8x64xf32>
    %328 = math.tanh %327 : vector<8x64xf32>
    %329 = vector.extract_strided_slice %314 {offsets = [0, 192], sizes = [8, 64], strides = [1, 1]} : vector<8x256xf32> to vector<8x64xf32>
    %330 = arith.negf %329 : vector<8x64xf32>
    %331 = math.exp %330 : vector<8x64xf32>
    %cst_92 = arith.constant 1.000000e+00 : f32
    %332 = vector.broadcast %cst_92 : f32 to vector<8x64xf32>
    %333 = arith.addf %332, %331 : vector<8x64xf32>
    %334 = arith.divf %332, %333 : vector<8x64xf32>
    %335 = arith.mulf %326, %262 : vector<8x64xf32>
    %336 = arith.mulf %320, %328 : vector<8x64xf32>
    %337 = arith.addf %335, %336 : vector<8x64xf32>
    %338 = math.tanh %337 : vector<8x64xf32>
    %339 = arith.mulf %334, %338 : vector<8x64xf32>
    %340 = arith.index_cast %c4_i32 : i32 to index
    %c0_93 = arith.constant 0 : index
    %c0_94 = arith.constant 0 : index
    %341 = vector.load %arg7[%340, %c0_93, %c0_94] : memref<16x8x64xf32, #tpu.memory_space<vmem>>, vector<1x8x64xf32>
    %342 = vector.shape_cast %341 : vector<1x8x64xf32> to vector<8x64xf32>
    %343 = vector.shape_cast %339 : vector<8x64xf32> to vector<1x8x64xf32>
    tpu.vector_store %arg7[%340, %c0_93, %c0_94], %343 {strides = array<i32>} : memref<16x8x64xf32, #tpu.memory_space<vmem>>, vector<1x8x64xf32>,
    %c15_i32_95 = arith.constant 15 : i32
    %344 = arith.subi %c15_i32_95, %c4_i32 : i32
    %345 = arith.index_cast %344 : i32 to index
    %c0_96 = arith.constant 0 : index
    %c0_97 = arith.constant 0 : index
    %346 = vector.load %arg0[%345, %c0_96, %c0_97] : memref<16x8x33xf32, #tpu.memory_space<vmem>>, vector<1x8x33xf32>
    %347 = vector.shape_cast %346 : vector<1x8x33xf32> to vector<8x33xf32>
    %cst_98 = arith.constant dense<0.000000e+00> : vector<8x256xf32>
    %348 = tpu.matmul %347, %3, %cst_98 {dimension_numbers = #tpu.dot_dimension_numbers<[1], [0], [0], [1], [0, 0, 1, 1], [], []>} : vector<8x33xf32>, vector<33x256xf32>, vector<8x256xf32> -> vector<8x256xf32>
    %cst_99 = arith.constant dense<0.000000e+00> : vector<8x256xf32>
    %349 = tpu.matmul %302, %4, %cst_99 {dimension_numbers = #tpu.dot_dimension_numbers<[1], [0], [0], [1], [0, 0, 1, 1], [], []>} : vector<8x64xf32>, vector<64x256xf32>, vector<8x256xf32> -> vector<8x256xf32>
    %350 = arith.addf %348, %349 : vector<8x256xf32>
    %351 = vector.broadcast %5 : vector<1x256xf32> to vector<8x256xf32>
    %352 = arith.addf %350, %351 : vector<8x256xf32>
    %353 = vector.extract_strided_slice %352 {offsets = [0, 0], sizes = [8, 64], strides = [1, 1]} : vector<8x256xf32> to vector<8x64xf32>
    %354 = arith.negf %353 : vector<8x64xf32>
    %355 = math.exp %354 : vector<8x64xf32>
    %cst_100 = arith.constant 1.000000e+00 : f32
    %356 = vector.broadcast %cst_100 : f32 to vector<8x64xf32>
    %357 = arith.addf %356, %355 : vector<8x64xf32>
    %358 = arith.divf %356, %357 : vector<8x64xf32>
    %359 = vector.extract_strided_slice %352 {offsets = [0, 64], sizes = [8, 64], strides = [1, 1]} : vector<8x256xf32> to vector<8x64xf32>
    %360 = arith.negf %359 : vector<8x64xf32>
    %361 = math.exp %360 : vector<8x64xf32>
    %cst_101 = arith.constant 1.000000e+00 : f32
    %362 = vector.broadcast %cst_101 : f32 to vector<8x64xf32>
    %363 = arith.addf %362, %361 : vector<8x64xf32>
    %364 = arith.divf %362, %363 : vector<8x64xf32>
    %365 = vector.extract_strided_slice %352 {offsets = [0, 128], sizes = [8, 64], strides = [1, 1]} : vector<8x256xf32> to vector<8x64xf32>
    %366 = math.tanh %365 : vector<8x64xf32>
    %367 = vector.extract_strided_slice %352 {offsets = [0, 192], sizes = [8, 64], strides = [1, 1]} : vector<8x256xf32> to vector<8x64xf32>
    %368 = arith.negf %367 : vector<8x64xf32>
    %369 = math.exp %368 : vector<8x64xf32>
    %cst_102 = arith.constant 1.000000e+00 : f32
    %370 = vector.broadcast %cst_102 : f32 to vector<8x64xf32>
    %371 = arith.addf %370, %369 : vector<8x64xf32>
    %372 = arith.divf %370, %371 : vector<8x64xf32>
    %373 = arith.mulf %364, %300 : vector<8x64xf32>
    %374 = arith.mulf %358, %366 : vector<8x64xf32>
    %375 = arith.addf %373, %374 : vector<8x64xf32>
    %376 = math.tanh %375 : vector<8x64xf32>
    %377 = arith.mulf %372, %376 : vector<8x64xf32>
    %378 = arith.index_cast %344 : i32 to index
    %c0_103 = arith.constant 0 : index
    %c0_104 = arith.constant 0 : index
    %379 = vector.load %arg8[%378, %c0_103, %c0_104] : memref<16x8x64xf32, #tpu.memory_space<vmem>>, vector<1x8x64xf32>
    %380 = vector.shape_cast %379 : vector<1x8x64xf32> to vector<8x64xf32>
    %381 = vector.shape_cast %377 : vector<8x64xf32> to vector<1x8x64xf32>
    tpu.vector_store %arg8[%378, %c0_103, %c0_104], %381 {strides = array<i32>} : memref<16x8x64xf32, #tpu.memory_space<vmem>>, vector<1x8x64xf32>,
    %c5_i32 = arith.constant 5 : i32
    %382 = arith.index_cast %c5_i32 : i32 to index
    %c0_105 = arith.constant 0 : index
    %c0_106 = arith.constant 0 : index
    %383 = vector.load %arg0[%382, %c0_105, %c0_106] : memref<16x8x33xf32, #tpu.memory_space<vmem>>, vector<1x8x33xf32>
    %384 = vector.shape_cast %383 : vector<1x8x33xf32> to vector<8x33xf32>
    %cst_107 = arith.constant dense<0.000000e+00> : vector<8x256xf32>
    %385 = tpu.matmul %384, %0, %cst_107 {dimension_numbers = #tpu.dot_dimension_numbers<[1], [0], [0], [1], [0, 0, 1, 1], [], []>} : vector<8x33xf32>, vector<33x256xf32>, vector<8x256xf32> -> vector<8x256xf32>
    %cst_108 = arith.constant dense<0.000000e+00> : vector<8x256xf32>
    %386 = tpu.matmul %339, %1, %cst_108 {dimension_numbers = #tpu.dot_dimension_numbers<[1], [0], [0], [1], [0, 0, 1, 1], [], []>} : vector<8x64xf32>, vector<64x256xf32>, vector<8x256xf32> -> vector<8x256xf32>
    %387 = arith.addf %385, %386 : vector<8x256xf32>
    %388 = vector.broadcast %2 : vector<1x256xf32> to vector<8x256xf32>
    %389 = arith.addf %387, %388 : vector<8x256xf32>
    %390 = vector.extract_strided_slice %389 {offsets = [0, 0], sizes = [8, 64], strides = [1, 1]} : vector<8x256xf32> to vector<8x64xf32>
    %391 = arith.negf %390 : vector<8x64xf32>
    %392 = math.exp %391 : vector<8x64xf32>
    %cst_109 = arith.constant 1.000000e+00 : f32
    %393 = vector.broadcast %cst_109 : f32 to vector<8x64xf32>
    %394 = arith.addf %393, %392 : vector<8x64xf32>
    %395 = arith.divf %393, %394 : vector<8x64xf32>
    %396 = vector.extract_strided_slice %389 {offsets = [0, 64], sizes = [8, 64], strides = [1, 1]} : vector<8x256xf32> to vector<8x64xf32>
    %397 = arith.negf %396 : vector<8x64xf32>
    %398 = math.exp %397 : vector<8x64xf32>
    %cst_110 = arith.constant 1.000000e+00 : f32
    %399 = vector.broadcast %cst_110 : f32 to vector<8x64xf32>
    %400 = arith.addf %399, %398 : vector<8x64xf32>
    %401 = arith.divf %399, %400 : vector<8x64xf32>
    %402 = vector.extract_strided_slice %389 {offsets = [0, 128], sizes = [8, 64], strides = [1, 1]} : vector<8x256xf32> to vector<8x64xf32>
    %403 = math.tanh %402 : vector<8x64xf32>
    %404 = vector.extract_strided_slice %389 {offsets = [0, 192], sizes = [8, 64], strides = [1, 1]} : vector<8x256xf32> to vector<8x64xf32>
    %405 = arith.negf %404 : vector<8x64xf32>
    %406 = math.exp %405 : vector<8x64xf32>
    %cst_111 = arith.constant 1.000000e+00 : f32
    %407 = vector.broadcast %cst_111 : f32 to vector<8x64xf32>
    %408 = arith.addf %407, %406 : vector<8x64xf32>
    %409 = arith.divf %407, %408 : vector<8x64xf32>
    %410 = arith.mulf %401, %337 : vector<8x64xf32>
    %411 = arith.mulf %395, %403 : vector<8x64xf32>
    %412 = arith.addf %410, %411 : vector<8x64xf32>
    %413 = math.tanh %412 : vector<8x64xf32>
    %414 = arith.mulf %409, %413 : vector<8x64xf32>
    %415 = arith.index_cast %c5_i32 : i32 to index
    %c0_112 = arith.constant 0 : index
    %c0_113 = arith.constant 0 : index
    %416 = vector.load %arg7[%415, %c0_112, %c0_113] : memref<16x8x64xf32, #tpu.memory_space<vmem>>, vector<1x8x64xf32>
    %417 = vector.shape_cast %416 : vector<1x8x64xf32> to vector<8x64xf32>
    %418 = vector.shape_cast %414 : vector<8x64xf32> to vector<1x8x64xf32>
    tpu.vector_store %arg7[%415, %c0_112, %c0_113], %418 {strides = array<i32>} : memref<16x8x64xf32, #tpu.memory_space<vmem>>, vector<1x8x64xf32>,
    %c15_i32_114 = arith.constant 15 : i32
    %419 = arith.subi %c15_i32_114, %c5_i32 : i32
    %420 = arith.index_cast %419 : i32 to index
    %c0_115 = arith.constant 0 : index
    %c0_116 = arith.constant 0 : index
    %421 = vector.load %arg0[%420, %c0_115, %c0_116] : memref<16x8x33xf32, #tpu.memory_space<vmem>>, vector<1x8x33xf32>
    %422 = vector.shape_cast %421 : vector<1x8x33xf32> to vector<8x33xf32>
    %cst_117 = arith.constant dense<0.000000e+00> : vector<8x256xf32>
    %423 = tpu.matmul %422, %3, %cst_117 {dimension_numbers = #tpu.dot_dimension_numbers<[1], [0], [0], [1], [0, 0, 1, 1], [], []>} : vector<8x33xf32>, vector<33x256xf32>, vector<8x256xf32> -> vector<8x256xf32>
    %cst_118 = arith.constant dense<0.000000e+00> : vector<8x256xf32>
    %424 = tpu.matmul %377, %4, %cst_118 {dimension_numbers = #tpu.dot_dimension_numbers<[1], [0], [0], [1], [0, 0, 1, 1], [], []>} : vector<8x64xf32>, vector<64x256xf32>, vector<8x256xf32> -> vector<8x256xf32>
    %425 = arith.addf %423, %424 : vector<8x256xf32>
    %426 = vector.broadcast %5 : vector<1x256xf32> to vector<8x256xf32>
    %427 = arith.addf %425, %426 : vector<8x256xf32>
    %428 = vector.extract_strided_slice %427 {offsets = [0, 0], sizes = [8, 64], strides = [1, 1]} : vector<8x256xf32> to vector<8x64xf32>
    %429 = arith.negf %428 : vector<8x64xf32>
    %430 = math.exp %429 : vector<8x64xf32>
    %cst_119 = arith.constant 1.000000e+00 : f32
    %431 = vector.broadcast %cst_119 : f32 to vector<8x64xf32>
    %432 = arith.addf %431, %430 : vector<8x64xf32>
    %433 = arith.divf %431, %432 : vector<8x64xf32>
    %434 = vector.extract_strided_slice %427 {offsets = [0, 64], sizes = [8, 64], strides = [1, 1]} : vector<8x256xf32> to vector<8x64xf32>
    %435 = arith.negf %434 : vector<8x64xf32>
    %436 = math.exp %435 : vector<8x64xf32>
    %cst_120 = arith.constant 1.000000e+00 : f32
    %437 = vector.broadcast %cst_120 : f32 to vector<8x64xf32>
    %438 = arith.addf %437, %436 : vector<8x64xf32>
    %439 = arith.divf %437, %438 : vector<8x64xf32>
    %440 = vector.extract_strided_slice %427 {offsets = [0, 128], sizes = [8, 64], strides = [1, 1]} : vector<8x256xf32> to vector<8x64xf32>
    %441 = math.tanh %440 : vector<8x64xf32>
    %442 = vector.extract_strided_slice %427 {offsets = [0, 192], sizes = [8, 64], strides = [1, 1]} : vector<8x256xf32> to vector<8x64xf32>
    %443 = arith.negf %442 : vector<8x64xf32>
    %444 = math.exp %443 : vector<8x64xf32>
    %cst_121 = arith.constant 1.000000e+00 : f32
    %445 = vector.broadcast %cst_121 : f32 to vector<8x64xf32>
    %446 = arith.addf %445, %444 : vector<8x64xf32>
    %447 = arith.divf %445, %446 : vector<8x64xf32>
    %448 = arith.mulf %439, %375 : vector<8x64xf32>
    %449 = arith.mulf %433, %441 : vector<8x64xf32>
    %450 = arith.addf %448, %449 : vector<8x64xf32>
    %451 = math.tanh %450 : vector<8x64xf32>
    %452 = arith.mulf %447, %451 : vector<8x64xf32>
    %453 = arith.index_cast %419 : i32 to index
    %c0_122 = arith.constant 0 : index
    %c0_123 = arith.constant 0 : index
    %454 = vector.load %arg8[%453, %c0_122, %c0_123] : memref<16x8x64xf32, #tpu.memory_space<vmem>>, vector<1x8x64xf32>
    %455 = vector.shape_cast %454 : vector<1x8x64xf32> to vector<8x64xf32>
    %456 = vector.shape_cast %452 : vector<8x64xf32> to vector<1x8x64xf32>
    tpu.vector_store %arg8[%453, %c0_122, %c0_123], %456 {strides = array<i32>} : memref<16x8x64xf32, #tpu.memory_space<vmem>>, vector<1x8x64xf32>,
    %c6_i32 = arith.constant 6 : i32
    %457 = arith.index_cast %c6_i32 : i32 to index
    %c0_124 = arith.constant 0 : index
    %c0_125 = arith.constant 0 : index
    %458 = vector.load %arg0[%457, %c0_124, %c0_125] : memref<16x8x33xf32, #tpu.memory_space<vmem>>, vector<1x8x33xf32>
    %459 = vector.shape_cast %458 : vector<1x8x33xf32> to vector<8x33xf32>
    %cst_126 = arith.constant dense<0.000000e+00> : vector<8x256xf32>
    %460 = tpu.matmul %459, %0, %cst_126 {dimension_numbers = #tpu.dot_dimension_numbers<[1], [0], [0], [1], [0, 0, 1, 1], [], []>} : vector<8x33xf32>, vector<33x256xf32>, vector<8x256xf32> -> vector<8x256xf32>
    %cst_127 = arith.constant dense<0.000000e+00> : vector<8x256xf32>
    %461 = tpu.matmul %414, %1, %cst_127 {dimension_numbers = #tpu.dot_dimension_numbers<[1], [0], [0], [1], [0, 0, 1, 1], [], []>} : vector<8x64xf32>, vector<64x256xf32>, vector<8x256xf32> -> vector<8x256xf32>
    %462 = arith.addf %460, %461 : vector<8x256xf32>
    %463 = vector.broadcast %2 : vector<1x256xf32> to vector<8x256xf32>
    %464 = arith.addf %462, %463 : vector<8x256xf32>
    %465 = vector.extract_strided_slice %464 {offsets = [0, 0], sizes = [8, 64], strides = [1, 1]} : vector<8x256xf32> to vector<8x64xf32>
    %466 = arith.negf %465 : vector<8x64xf32>
    %467 = math.exp %466 : vector<8x64xf32>
    %cst_128 = arith.constant 1.000000e+00 : f32
    %468 = vector.broadcast %cst_128 : f32 to vector<8x64xf32>
    %469 = arith.addf %468, %467 : vector<8x64xf32>
    %470 = arith.divf %468, %469 : vector<8x64xf32>
    %471 = vector.extract_strided_slice %464 {offsets = [0, 64], sizes = [8, 64], strides = [1, 1]} : vector<8x256xf32> to vector<8x64xf32>
    %472 = arith.negf %471 : vector<8x64xf32>
    %473 = math.exp %472 : vector<8x64xf32>
    %cst_129 = arith.constant 1.000000e+00 : f32
    %474 = vector.broadcast %cst_129 : f32 to vector<8x64xf32>
    %475 = arith.addf %474, %473 : vector<8x64xf32>
    %476 = arith.divf %474, %475 : vector<8x64xf32>
    %477 = vector.extract_strided_slice %464 {offsets = [0, 128], sizes = [8, 64], strides = [1, 1]} : vector<8x256xf32> to vector<8x64xf32>
    %478 = math.tanh %477 : vector<8x64xf32>
    %479 = vector.extract_strided_slice %464 {offsets = [0, 192], sizes = [8, 64], strides = [1, 1]} : vector<8x256xf32> to vector<8x64xf32>
    %480 = arith.negf %479 : vector<8x64xf32>
    %481 = math.exp %480 : vector<8x64xf32>
    %cst_130 = arith.constant 1.000000e+00 : f32
    %482 = vector.broadcast %cst_130 : f32 to vector<8x64xf32>
    %483 = arith.addf %482, %481 : vector<8x64xf32>
    %484 = arith.divf %482, %483 : vector<8x64xf32>
    %485 = arith.mulf %476, %412 : vector<8x64xf32>
    %486 = arith.mulf %470, %478 : vector<8x64xf32>
    %487 = arith.addf %485, %486 : vector<8x64xf32>
    %488 = math.tanh %487 : vector<8x64xf32>
    %489 = arith.mulf %484, %488 : vector<8x64xf32>
    %490 = arith.index_cast %c6_i32 : i32 to index
    %c0_131 = arith.constant 0 : index
    %c0_132 = arith.constant 0 : index
    %491 = vector.load %arg7[%490, %c0_131, %c0_132] : memref<16x8x64xf32, #tpu.memory_space<vmem>>, vector<1x8x64xf32>
    %492 = vector.shape_cast %491 : vector<1x8x64xf32> to vector<8x64xf32>
    %493 = vector.shape_cast %489 : vector<8x64xf32> to vector<1x8x64xf32>
    tpu.vector_store %arg7[%490, %c0_131, %c0_132], %493 {strides = array<i32>} : memref<16x8x64xf32, #tpu.memory_space<vmem>>, vector<1x8x64xf32>,
    %c15_i32_133 = arith.constant 15 : i32
    %494 = arith.subi %c15_i32_133, %c6_i32 : i32
    %495 = arith.index_cast %494 : i32 to index
    %c0_134 = arith.constant 0 : index
    %c0_135 = arith.constant 0 : index
    %496 = vector.load %arg0[%495, %c0_134, %c0_135] : memref<16x8x33xf32, #tpu.memory_space<vmem>>, vector<1x8x33xf32>
    %497 = vector.shape_cast %496 : vector<1x8x33xf32> to vector<8x33xf32>
    %cst_136 = arith.constant dense<0.000000e+00> : vector<8x256xf32>
    %498 = tpu.matmul %497, %3, %cst_136 {dimension_numbers = #tpu.dot_dimension_numbers<[1], [0], [0], [1], [0, 0, 1, 1], [], []>} : vector<8x33xf32>, vector<33x256xf32>, vector<8x256xf32> -> vector<8x256xf32>
    %cst_137 = arith.constant dense<0.000000e+00> : vector<8x256xf32>
    %499 = tpu.matmul %452, %4, %cst_137 {dimension_numbers = #tpu.dot_dimension_numbers<[1], [0], [0], [1], [0, 0, 1, 1], [], []>} : vector<8x64xf32>, vector<64x256xf32>, vector<8x256xf32> -> vector<8x256xf32>
    %500 = arith.addf %498, %499 : vector<8x256xf32>
    %501 = vector.broadcast %5 : vector<1x256xf32> to vector<8x256xf32>
    %502 = arith.addf %500, %501 : vector<8x256xf32>
    %503 = vector.extract_strided_slice %502 {offsets = [0, 0], sizes = [8, 64], strides = [1, 1]} : vector<8x256xf32> to vector<8x64xf32>
    %504 = arith.negf %503 : vector<8x64xf32>
    %505 = math.exp %504 : vector<8x64xf32>
    %cst_138 = arith.constant 1.000000e+00 : f32
    %506 = vector.broadcast %cst_138 : f32 to vector<8x64xf32>
    %507 = arith.addf %506, %505 : vector<8x64xf32>
    %508 = arith.divf %506, %507 : vector<8x64xf32>
    %509 = vector.extract_strided_slice %502 {offsets = [0, 64], sizes = [8, 64], strides = [1, 1]} : vector<8x256xf32> to vector<8x64xf32>
    %510 = arith.negf %509 : vector<8x64xf32>
    %511 = math.exp %510 : vector<8x64xf32>
    %cst_139 = arith.constant 1.000000e+00 : f32
    %512 = vector.broadcast %cst_139 : f32 to vector<8x64xf32>
    %513 = arith.addf %512, %511 : vector<8x64xf32>
    %514 = arith.divf %512, %513 : vector<8x64xf32>
    %515 = vector.extract_strided_slice %502 {offsets = [0, 128], sizes = [8, 64], strides = [1, 1]} : vector<8x256xf32> to vector<8x64xf32>
    %516 = math.tanh %515 : vector<8x64xf32>
    %517 = vector.extract_strided_slice %502 {offsets = [0, 192], sizes = [8, 64], strides = [1, 1]} : vector<8x256xf32> to vector<8x64xf32>
    %518 = arith.negf %517 : vector<8x64xf32>
    %519 = math.exp %518 : vector<8x64xf32>
    %cst_140 = arith.constant 1.000000e+00 : f32
    %520 = vector.broadcast %cst_140 : f32 to vector<8x64xf32>
    %521 = arith.addf %520, %519 : vector<8x64xf32>
    %522 = arith.divf %520, %521 : vector<8x64xf32>
    %523 = arith.mulf %514, %450 : vector<8x64xf32>
    %524 = arith.mulf %508, %516 : vector<8x64xf32>
    %525 = arith.addf %523, %524 : vector<8x64xf32>
    %526 = math.tanh %525 : vector<8x64xf32>
    %527 = arith.mulf %522, %526 : vector<8x64xf32>
    %528 = arith.index_cast %494 : i32 to index
    %c0_141 = arith.constant 0 : index
    %c0_142 = arith.constant 0 : index
    %529 = vector.load %arg8[%528, %c0_141, %c0_142] : memref<16x8x64xf32, #tpu.memory_space<vmem>>, vector<1x8x64xf32>
    %530 = vector.shape_cast %529 : vector<1x8x64xf32> to vector<8x64xf32>
    %531 = vector.shape_cast %527 : vector<8x64xf32> to vector<1x8x64xf32>
    tpu.vector_store %arg8[%528, %c0_141, %c0_142], %531 {strides = array<i32>} : memref<16x8x64xf32, #tpu.memory_space<vmem>>, vector<1x8x64xf32>,
    %c7_i32 = arith.constant 7 : i32
    %532 = arith.index_cast %c7_i32 : i32 to index
    %c0_143 = arith.constant 0 : index
    %c0_144 = arith.constant 0 : index
    %533 = vector.load %arg0[%532, %c0_143, %c0_144] : memref<16x8x33xf32, #tpu.memory_space<vmem>>, vector<1x8x33xf32>
    %534 = vector.shape_cast %533 : vector<1x8x33xf32> to vector<8x33xf32>
    %cst_145 = arith.constant dense<0.000000e+00> : vector<8x256xf32>
    %535 = tpu.matmul %534, %0, %cst_145 {dimension_numbers = #tpu.dot_dimension_numbers<[1], [0], [0], [1], [0, 0, 1, 1], [], []>} : vector<8x33xf32>, vector<33x256xf32>, vector<8x256xf32> -> vector<8x256xf32>
    %cst_146 = arith.constant dense<0.000000e+00> : vector<8x256xf32>
    %536 = tpu.matmul %489, %1, %cst_146 {dimension_numbers = #tpu.dot_dimension_numbers<[1], [0], [0], [1], [0, 0, 1, 1], [], []>} : vector<8x64xf32>, vector<64x256xf32>, vector<8x256xf32> -> vector<8x256xf32>
    %537 = arith.addf %535, %536 : vector<8x256xf32>
    %538 = vector.broadcast %2 : vector<1x256xf32> to vector<8x256xf32>
    %539 = arith.addf %537, %538 : vector<8x256xf32>
    %540 = vector.extract_strided_slice %539 {offsets = [0, 0], sizes = [8, 64], strides = [1, 1]} : vector<8x256xf32> to vector<8x64xf32>
    %541 = arith.negf %540 : vector<8x64xf32>
    %542 = math.exp %541 : vector<8x64xf32>
    %cst_147 = arith.constant 1.000000e+00 : f32
    %543 = vector.broadcast %cst_147 : f32 to vector<8x64xf32>
    %544 = arith.addf %543, %542 : vector<8x64xf32>
    %545 = arith.divf %543, %544 : vector<8x64xf32>
    %546 = vector.extract_strided_slice %539 {offsets = [0, 64], sizes = [8, 64], strides = [1, 1]} : vector<8x256xf32> to vector<8x64xf32>
    %547 = arith.negf %546 : vector<8x64xf32>
    %548 = math.exp %547 : vector<8x64xf32>
    %cst_148 = arith.constant 1.000000e+00 : f32
    %549 = vector.broadcast %cst_148 : f32 to vector<8x64xf32>
    %550 = arith.addf %549, %548 : vector<8x64xf32>
    %551 = arith.divf %549, %550 : vector<8x64xf32>
    %552 = vector.extract_strided_slice %539 {offsets = [0, 128], sizes = [8, 64], strides = [1, 1]} : vector<8x256xf32> to vector<8x64xf32>
    %553 = math.tanh %552 : vector<8x64xf32>
    %554 = vector.extract_strided_slice %539 {offsets = [0, 192], sizes = [8, 64], strides = [1, 1]} : vector<8x256xf32> to vector<8x64xf32>
    %555 = arith.negf %554 : vector<8x64xf32>
    %556 = math.exp %555 : vector<8x64xf32>
    %cst_149 = arith.constant 1.000000e+00 : f32
    %557 = vector.broadcast %cst_149 : f32 to vector<8x64xf32>
    %558 = arith.addf %557, %556 : vector<8x64xf32>
    %559 = arith.divf %557, %558 : vector<8x64xf32>
    %560 = arith.mulf %551, %487 : vector<8x64xf32>
    %561 = arith.mulf %545, %553 : vector<8x64xf32>
    %562 = arith.addf %560, %561 : vector<8x64xf32>
    %563 = math.tanh %562 : vector<8x64xf32>
    %564 = arith.mulf %559, %563 : vector<8x64xf32>
    %565 = arith.index_cast %c7_i32 : i32 to index
    %c0_150 = arith.constant 0 : index
    %c0_151 = arith.constant 0 : index
    %566 = vector.load %arg7[%565, %c0_150, %c0_151] : memref<16x8x64xf32, #tpu.memory_space<vmem>>, vector<1x8x64xf32>
    %567 = vector.shape_cast %566 : vector<1x8x64xf32> to vector<8x64xf32>
    %568 = vector.shape_cast %564 : vector<8x64xf32> to vector<1x8x64xf32>
    tpu.vector_store %arg7[%565, %c0_150, %c0_151], %568 {strides = array<i32>} : memref<16x8x64xf32, #tpu.memory_space<vmem>>, vector<1x8x64xf32>,
    %c15_i32_152 = arith.constant 15 : i32
    %569 = arith.subi %c15_i32_152, %c7_i32 : i32
    %570 = arith.index_cast %569 : i32 to index
    %c0_153 = arith.constant 0 : index
    %c0_154 = arith.constant 0 : index
    %571 = vector.load %arg0[%570, %c0_153, %c0_154] : memref<16x8x33xf32, #tpu.memory_space<vmem>>, vector<1x8x33xf32>
    %572 = vector.shape_cast %571 : vector<1x8x33xf32> to vector<8x33xf32>
    %cst_155 = arith.constant dense<0.000000e+00> : vector<8x256xf32>
    %573 = tpu.matmul %572, %3, %cst_155 {dimension_numbers = #tpu.dot_dimension_numbers<[1], [0], [0], [1], [0, 0, 1, 1], [], []>} : vector<8x33xf32>, vector<33x256xf32>, vector<8x256xf32> -> vector<8x256xf32>
    %cst_156 = arith.constant dense<0.000000e+00> : vector<8x256xf32>
    %574 = tpu.matmul %527, %4, %cst_156 {dimension_numbers = #tpu.dot_dimension_numbers<[1], [0], [0], [1], [0, 0, 1, 1], [], []>} : vector<8x64xf32>, vector<64x256xf32>, vector<8x256xf32> -> vector<8x256xf32>
    %575 = arith.addf %573, %574 : vector<8x256xf32>
    %576 = vector.broadcast %5 : vector<1x256xf32> to vector<8x256xf32>
    %577 = arith.addf %575, %576 : vector<8x256xf32>
    %578 = vector.extract_strided_slice %577 {offsets = [0, 0], sizes = [8, 64], strides = [1, 1]} : vector<8x256xf32> to vector<8x64xf32>
    %579 = arith.negf %578 : vector<8x64xf32>
    %580 = math.exp %579 : vector<8x64xf32>
    %cst_157 = arith.constant 1.000000e+00 : f32
    %581 = vector.broadcast %cst_157 : f32 to vector<8x64xf32>
    %582 = arith.addf %581, %580 : vector<8x64xf32>
    %583 = arith.divf %581, %582 : vector<8x64xf32>
    %584 = vector.extract_strided_slice %577 {offsets = [0, 64], sizes = [8, 64], strides = [1, 1]} : vector<8x256xf32> to vector<8x64xf32>
    %585 = arith.negf %584 : vector<8x64xf32>
    %586 = math.exp %585 : vector<8x64xf32>
    %cst_158 = arith.constant 1.000000e+00 : f32
    %587 = vector.broadcast %cst_158 : f32 to vector<8x64xf32>
    %588 = arith.addf %587, %586 : vector<8x64xf32>
    %589 = arith.divf %587, %588 : vector<8x64xf32>
    %590 = vector.extract_strided_slice %577 {offsets = [0, 128], sizes = [8, 64], strides = [1, 1]} : vector<8x256xf32> to vector<8x64xf32>
    %591 = math.tanh %590 : vector<8x64xf32>
    %592 = vector.extract_strided_slice %577 {offsets = [0, 192], sizes = [8, 64], strides = [1, 1]} : vector<8x256xf32> to vector<8x64xf32>
    %593 = arith.negf %592 : vector<8x64xf32>
    %594 = math.exp %593 : vector<8x64xf32>
    %cst_159 = arith.constant 1.000000e+00 : f32
    %595 = vector.broadcast %cst_159 : f32 to vector<8x64xf32>
    %596 = arith.addf %595, %594 : vector<8x64xf32>
    %597 = arith.divf %595, %596 : vector<8x64xf32>
    %598 = arith.mulf %589, %525 : vector<8x64xf32>
    %599 = arith.mulf %583, %591 : vector<8x64xf32>
    %600 = arith.addf %598, %599 : vector<8x64xf32>
    %601 = math.tanh %600 : vector<8x64xf32>
    %602 = arith.mulf %597, %601 : vector<8x64xf32>
    %603 = arith.index_cast %569 : i32 to index
    %c0_160 = arith.constant 0 : index
    %c0_161 = arith.constant 0 : index
    %604 = vector.load %arg8[%603, %c0_160, %c0_161] : memref<16x8x64xf32, #tpu.memory_space<vmem>>, vector<1x8x64xf32>
    %605 = vector.shape_cast %604 : vector<1x8x64xf32> to vector<8x64xf32>
    %606 = vector.shape_cast %602 : vector<8x64xf32> to vector<1x8x64xf32>
    tpu.vector_store %arg8[%603, %c0_160, %c0_161], %606 {strides = array<i32>} : memref<16x8x64xf32, #tpu.memory_space<vmem>>, vector<1x8x64xf32>,
    %c8_i32 = arith.constant 8 : i32
    %607 = arith.index_cast %c8_i32 : i32 to index
    %c0_162 = arith.constant 0 : index
    %c0_163 = arith.constant 0 : index
    %608 = vector.load %arg0[%607, %c0_162, %c0_163] : memref<16x8x33xf32, #tpu.memory_space<vmem>>, vector<1x8x33xf32>
    %609 = vector.shape_cast %608 : vector<1x8x33xf32> to vector<8x33xf32>
    %cst_164 = arith.constant dense<0.000000e+00> : vector<8x256xf32>
    %610 = tpu.matmul %609, %0, %cst_164 {dimension_numbers = #tpu.dot_dimension_numbers<[1], [0], [0], [1], [0, 0, 1, 1], [], []>} : vector<8x33xf32>, vector<33x256xf32>, vector<8x256xf32> -> vector<8x256xf32>
    %cst_165 = arith.constant dense<0.000000e+00> : vector<8x256xf32>
    %611 = tpu.matmul %564, %1, %cst_165 {dimension_numbers = #tpu.dot_dimension_numbers<[1], [0], [0], [1], [0, 0, 1, 1], [], []>} : vector<8x64xf32>, vector<64x256xf32>, vector<8x256xf32> -> vector<8x256xf32>
    %612 = arith.addf %610, %611 : vector<8x256xf32>
    %613 = vector.broadcast %2 : vector<1x256xf32> to vector<8x256xf32>
    %614 = arith.addf %612, %613 : vector<8x256xf32>
    %615 = vector.extract_strided_slice %614 {offsets = [0, 0], sizes = [8, 64], strides = [1, 1]} : vector<8x256xf32> to vector<8x64xf32>
    %616 = arith.negf %615 : vector<8x64xf32>
    %617 = math.exp %616 : vector<8x64xf32>
    %cst_166 = arith.constant 1.000000e+00 : f32
    %618 = vector.broadcast %cst_166 : f32 to vector<8x64xf32>
    %619 = arith.addf %618, %617 : vector<8x64xf32>
    %620 = arith.divf %618, %619 : vector<8x64xf32>
    %621 = vector.extract_strided_slice %614 {offsets = [0, 64], sizes = [8, 64], strides = [1, 1]} : vector<8x256xf32> to vector<8x64xf32>
    %622 = arith.negf %621 : vector<8x64xf32>
    %623 = math.exp %622 : vector<8x64xf32>
    %cst_167 = arith.constant 1.000000e+00 : f32
    %624 = vector.broadcast %cst_167 : f32 to vector<8x64xf32>
    %625 = arith.addf %624, %623 : vector<8x64xf32>
    %626 = arith.divf %624, %625 : vector<8x64xf32>
    %627 = vector.extract_strided_slice %614 {offsets = [0, 128], sizes = [8, 64], strides = [1, 1]} : vector<8x256xf32> to vector<8x64xf32>
    %628 = math.tanh %627 : vector<8x64xf32>
    %629 = vector.extract_strided_slice %614 {offsets = [0, 192], sizes = [8, 64], strides = [1, 1]} : vector<8x256xf32> to vector<8x64xf32>
    %630 = arith.negf %629 : vector<8x64xf32>
    %631 = math.exp %630 : vector<8x64xf32>
    %cst_168 = arith.constant 1.000000e+00 : f32
    %632 = vector.broadcast %cst_168 : f32 to vector<8x64xf32>
    %633 = arith.addf %632, %631 : vector<8x64xf32>
    %634 = arith.divf %632, %633 : vector<8x64xf32>
    %635 = arith.mulf %626, %562 : vector<8x64xf32>
    %636 = arith.mulf %620, %628 : vector<8x64xf32>
    %637 = arith.addf %635, %636 : vector<8x64xf32>
    %638 = math.tanh %637 : vector<8x64xf32>
    %639 = arith.mulf %634, %638 : vector<8x64xf32>
    %640 = arith.index_cast %c8_i32 : i32 to index
    %c0_169 = arith.constant 0 : index
    %c0_170 = arith.constant 0 : index
    %641 = vector.load %arg7[%640, %c0_169, %c0_170] : memref<16x8x64xf32, #tpu.memory_space<vmem>>, vector<1x8x64xf32>
    %642 = vector.shape_cast %641 : vector<1x8x64xf32> to vector<8x64xf32>
    %643 = vector.shape_cast %639 : vector<8x64xf32> to vector<1x8x64xf32>
    tpu.vector_store %arg7[%640, %c0_169, %c0_170], %643 {strides = array<i32>} : memref<16x8x64xf32, #tpu.memory_space<vmem>>, vector<1x8x64xf32>,
    %c15_i32_171 = arith.constant 15 : i32
    %644 = arith.subi %c15_i32_171, %c8_i32 : i32
    %645 = arith.index_cast %644 : i32 to index
    %c0_172 = arith.constant 0 : index
    %c0_173 = arith.constant 0 : index
    %646 = vector.load %arg0[%645, %c0_172, %c0_173] : memref<16x8x33xf32, #tpu.memory_space<vmem>>, vector<1x8x33xf32>
    %647 = vector.shape_cast %646 : vector<1x8x33xf32> to vector<8x33xf32>
    %cst_174 = arith.constant dense<0.000000e+00> : vector<8x256xf32>
    %648 = tpu.matmul %647, %3, %cst_174 {dimension_numbers = #tpu.dot_dimension_numbers<[1], [0], [0], [1], [0, 0, 1, 1], [], []>} : vector<8x33xf32>, vector<33x256xf32>, vector<8x256xf32> -> vector<8x256xf32>
    %cst_175 = arith.constant dense<0.000000e+00> : vector<8x256xf32>
    %649 = tpu.matmul %602, %4, %cst_175 {dimension_numbers = #tpu.dot_dimension_numbers<[1], [0], [0], [1], [0, 0, 1, 1], [], []>} : vector<8x64xf32>, vector<64x256xf32>, vector<8x256xf32> -> vector<8x256xf32>
    %650 = arith.addf %648, %649 : vector<8x256xf32>
    %651 = vector.broadcast %5 : vector<1x256xf32> to vector<8x256xf32>
    %652 = arith.addf %650, %651 : vector<8x256xf32>
    %653 = vector.extract_strided_slice %652 {offsets = [0, 0], sizes = [8, 64], strides = [1, 1]} : vector<8x256xf32> to vector<8x64xf32>
    %654 = arith.negf %653 : vector<8x64xf32>
    %655 = math.exp %654 : vector<8x64xf32>
    %cst_176 = arith.constant 1.000000e+00 : f32
    %656 = vector.broadcast %cst_176 : f32 to vector<8x64xf32>
    %657 = arith.addf %656, %655 : vector<8x64xf32>
    %658 = arith.divf %656, %657 : vector<8x64xf32>
    %659 = vector.extract_strided_slice %652 {offsets = [0, 64], sizes = [8, 64], strides = [1, 1]} : vector<8x256xf32> to vector<8x64xf32>
    %660 = arith.negf %659 : vector<8x64xf32>
    %661 = math.exp %660 : vector<8x64xf32>
    %cst_177 = arith.constant 1.000000e+00 : f32
    %662 = vector.broadcast %cst_177 : f32 to vector<8x64xf32>
    %663 = arith.addf %662, %661 : vector<8x64xf32>
    %664 = arith.divf %662, %663 : vector<8x64xf32>
    %665 = vector.extract_strided_slice %652 {offsets = [0, 128], sizes = [8, 64], strides = [1, 1]} : vector<8x256xf32> to vector<8x64xf32>
    %666 = math.tanh %665 : vector<8x64xf32>
    %667 = vector.extract_strided_slice %652 {offsets = [0, 192], sizes = [8, 64], strides = [1, 1]} : vector<8x256xf32> to vector<8x64xf32>
    %668 = arith.negf %667 : vector<8x64xf32>
    %669 = math.exp %668 : vector<8x64xf32>
    %cst_178 = arith.constant 1.000000e+00 : f32
    %670 = vector.broadcast %cst_178 : f32 to vector<8x64xf32>
    %671 = arith.addf %670, %669 : vector<8x64xf32>
    %672 = arith.divf %670, %671 : vector<8x64xf32>
    %673 = arith.mulf %664, %600 : vector<8x64xf32>
    %674 = arith.mulf %658, %666 : vector<8x64xf32>
    %675 = arith.addf %673, %674 : vector<8x64xf32>
    %676 = math.tanh %675 : vector<8x64xf32>
    %677 = arith.mulf %672, %676 : vector<8x64xf32>
    %678 = arith.index_cast %644 : i32 to index
    %c0_179 = arith.constant 0 : index
    %c0_180 = arith.constant 0 : index
    %679 = vector.load %arg8[%678, %c0_179, %c0_180] : memref<16x8x64xf32, #tpu.memory_space<vmem>>, vector<1x8x64xf32>
    %680 = vector.shape_cast %679 : vector<1x8x64xf32> to vector<8x64xf32>
    %681 = vector.shape_cast %677 : vector<8x64xf32> to vector<1x8x64xf32>
    tpu.vector_store %arg8[%678, %c0_179, %c0_180], %681 {strides = array<i32>} : memref<16x8x64xf32, #tpu.memory_space<vmem>>, vector<1x8x64xf32>,
    %c9_i32 = arith.constant 9 : i32
    %682 = arith.index_cast %c9_i32 : i32 to index
    %c0_181 = arith.constant 0 : index
    %c0_182 = arith.constant 0 : index
    %683 = vector.load %arg0[%682, %c0_181, %c0_182] : memref<16x8x33xf32, #tpu.memory_space<vmem>>, vector<1x8x33xf32>
    %684 = vector.shape_cast %683 : vector<1x8x33xf32> to vector<8x33xf32>
    %cst_183 = arith.constant dense<0.000000e+00> : vector<8x256xf32>
    %685 = tpu.matmul %684, %0, %cst_183 {dimension_numbers = #tpu.dot_dimension_numbers<[1], [0], [0], [1], [0, 0, 1, 1], [], []>} : vector<8x33xf32>, vector<33x256xf32>, vector<8x256xf32> -> vector<8x256xf32>
    %cst_184 = arith.constant dense<0.000000e+00> : vector<8x256xf32>
    %686 = tpu.matmul %639, %1, %cst_184 {dimension_numbers = #tpu.dot_dimension_numbers<[1], [0], [0], [1], [0, 0, 1, 1], [], []>} : vector<8x64xf32>, vector<64x256xf32>, vector<8x256xf32> -> vector<8x256xf32>
    %687 = arith.addf %685, %686 : vector<8x256xf32>
    %688 = vector.broadcast %2 : vector<1x256xf32> to vector<8x256xf32>
    %689 = arith.addf %687, %688 : vector<8x256xf32>
    %690 = vector.extract_strided_slice %689 {offsets = [0, 0], sizes = [8, 64], strides = [1, 1]} : vector<8x256xf32> to vector<8x64xf32>
    %691 = arith.negf %690 : vector<8x64xf32>
    %692 = math.exp %691 : vector<8x64xf32>
    %cst_185 = arith.constant 1.000000e+00 : f32
    %693 = vector.broadcast %cst_185 : f32 to vector<8x64xf32>
    %694 = arith.addf %693, %692 : vector<8x64xf32>
    %695 = arith.divf %693, %694 : vector<8x64xf32>
    %696 = vector.extract_strided_slice %689 {offsets = [0, 64], sizes = [8, 64], strides = [1, 1]} : vector<8x256xf32> to vector<8x64xf32>
    %697 = arith.negf %696 : vector<8x64xf32>
    %698 = math.exp %697 : vector<8x64xf32>
    %cst_186 = arith.constant 1.000000e+00 : f32
    %699 = vector.broadcast %cst_186 : f32 to vector<8x64xf32>
    %700 = arith.addf %699, %698 : vector<8x64xf32>
    %701 = arith.divf %699, %700 : vector<8x64xf32>
    %702 = vector.extract_strided_slice %689 {offsets = [0, 128], sizes = [8, 64], strides = [1, 1]} : vector<8x256xf32> to vector<8x64xf32>
    %703 = math.tanh %702 : vector<8x64xf32>
    %704 = vector.extract_strided_slice %689 {offsets = [0, 192], sizes = [8, 64], strides = [1, 1]} : vector<8x256xf32> to vector<8x64xf32>
    %705 = arith.negf %704 : vector<8x64xf32>
    %706 = math.exp %705 : vector<8x64xf32>
    %cst_187 = arith.constant 1.000000e+00 : f32
    %707 = vector.broadcast %cst_187 : f32 to vector<8x64xf32>
    %708 = arith.addf %707, %706 : vector<8x64xf32>
    %709 = arith.divf %707, %708 : vector<8x64xf32>
    %710 = arith.mulf %701, %637 : vector<8x64xf32>
    %711 = arith.mulf %695, %703 : vector<8x64xf32>
    %712 = arith.addf %710, %711 : vector<8x64xf32>
    %713 = math.tanh %712 : vector<8x64xf32>
    %714 = arith.mulf %709, %713 : vector<8x64xf32>
    %715 = arith.index_cast %c9_i32 : i32 to index
    %c0_188 = arith.constant 0 : index
    %c0_189 = arith.constant 0 : index
    %716 = vector.load %arg7[%715, %c0_188, %c0_189] : memref<16x8x64xf32, #tpu.memory_space<vmem>>, vector<1x8x64xf32>
    %717 = vector.shape_cast %716 : vector<1x8x64xf32> to vector<8x64xf32>
    %718 = vector.shape_cast %714 : vector<8x64xf32> to vector<1x8x64xf32>
    tpu.vector_store %arg7[%715, %c0_188, %c0_189], %718 {strides = array<i32>} : memref<16x8x64xf32, #tpu.memory_space<vmem>>, vector<1x8x64xf32>,
    %c15_i32_190 = arith.constant 15 : i32
    %719 = arith.subi %c15_i32_190, %c9_i32 : i32
    %720 = arith.index_cast %719 : i32 to index
    %c0_191 = arith.constant 0 : index
    %c0_192 = arith.constant 0 : index
    %721 = vector.load %arg0[%720, %c0_191, %c0_192] : memref<16x8x33xf32, #tpu.memory_space<vmem>>, vector<1x8x33xf32>
    %722 = vector.shape_cast %721 : vector<1x8x33xf32> to vector<8x33xf32>
    %cst_193 = arith.constant dense<0.000000e+00> : vector<8x256xf32>
    %723 = tpu.matmul %722, %3, %cst_193 {dimension_numbers = #tpu.dot_dimension_numbers<[1], [0], [0], [1], [0, 0, 1, 1], [], []>} : vector<8x33xf32>, vector<33x256xf32>, vector<8x256xf32> -> vector<8x256xf32>
    %cst_194 = arith.constant dense<0.000000e+00> : vector<8x256xf32>
    %724 = tpu.matmul %677, %4, %cst_194 {dimension_numbers = #tpu.dot_dimension_numbers<[1], [0], [0], [1], [0, 0, 1, 1], [], []>} : vector<8x64xf32>, vector<64x256xf32>, vector<8x256xf32> -> vector<8x256xf32>
    %725 = arith.addf %723, %724 : vector<8x256xf32>
    %726 = vector.broadcast %5 : vector<1x256xf32> to vector<8x256xf32>
    %727 = arith.addf %725, %726 : vector<8x256xf32>
    %728 = vector.extract_strided_slice %727 {offsets = [0, 0], sizes = [8, 64], strides = [1, 1]} : vector<8x256xf32> to vector<8x64xf32>
    %729 = arith.negf %728 : vector<8x64xf32>
    %730 = math.exp %729 : vector<8x64xf32>
    %cst_195 = arith.constant 1.000000e+00 : f32
    %731 = vector.broadcast %cst_195 : f32 to vector<8x64xf32>
    %732 = arith.addf %731, %730 : vector<8x64xf32>
    %733 = arith.divf %731, %732 : vector<8x64xf32>
    %734 = vector.extract_strided_slice %727 {offsets = [0, 64], sizes = [8, 64], strides = [1, 1]} : vector<8x256xf32> to vector<8x64xf32>
    %735 = arith.negf %734 : vector<8x64xf32>
    %736 = math.exp %735 : vector<8x64xf32>
    %cst_196 = arith.constant 1.000000e+00 : f32
    %737 = vector.broadcast %cst_196 : f32 to vector<8x64xf32>
    %738 = arith.addf %737, %736 : vector<8x64xf32>
    %739 = arith.divf %737, %738 : vector<8x64xf32>
    %740 = vector.extract_strided_slice %727 {offsets = [0, 128], sizes = [8, 64], strides = [1, 1]} : vector<8x256xf32> to vector<8x64xf32>
    %741 = math.tanh %740 : vector<8x64xf32>
    %742 = vector.extract_strided_slice %727 {offsets = [0, 192], sizes = [8, 64], strides = [1, 1]} : vector<8x256xf32> to vector<8x64xf32>
    %743 = arith.negf %742 : vector<8x64xf32>
    %744 = math.exp %743 : vector<8x64xf32>
    %cst_197 = arith.constant 1.000000e+00 : f32
    %745 = vector.broadcast %cst_197 : f32 to vector<8x64xf32>
    %746 = arith.addf %745, %744 : vector<8x64xf32>
    %747 = arith.divf %745, %746 : vector<8x64xf32>
    %748 = arith.mulf %739, %675 : vector<8x64xf32>
    %749 = arith.mulf %733, %741 : vector<8x64xf32>
    %750 = arith.addf %748, %749 : vector<8x64xf32>
    %751 = math.tanh %750 : vector<8x64xf32>
    %752 = arith.mulf %747, %751 : vector<8x64xf32>
    %753 = arith.index_cast %719 : i32 to index
    %c0_198 = arith.constant 0 : index
    %c0_199 = arith.constant 0 : index
    %754 = vector.load %arg8[%753, %c0_198, %c0_199] : memref<16x8x64xf32, #tpu.memory_space<vmem>>, vector<1x8x64xf32>
    %755 = vector.shape_cast %754 : vector<1x8x64xf32> to vector<8x64xf32>
    %756 = vector.shape_cast %752 : vector<8x64xf32> to vector<1x8x64xf32>
    tpu.vector_store %arg8[%753, %c0_198, %c0_199], %756 {strides = array<i32>} : memref<16x8x64xf32, #tpu.memory_space<vmem>>, vector<1x8x64xf32>,
    %c10_i32 = arith.constant 10 : i32
    %757 = arith.index_cast %c10_i32 : i32 to index
    %c0_200 = arith.constant 0 : index
    %c0_201 = arith.constant 0 : index
    %758 = vector.load %arg0[%757, %c0_200, %c0_201] : memref<16x8x33xf32, #tpu.memory_space<vmem>>, vector<1x8x33xf32>
    %759 = vector.shape_cast %758 : vector<1x8x33xf32> to vector<8x33xf32>
    %cst_202 = arith.constant dense<0.000000e+00> : vector<8x256xf32>
    %760 = tpu.matmul %759, %0, %cst_202 {dimension_numbers = #tpu.dot_dimension_numbers<[1], [0], [0], [1], [0, 0, 1, 1], [], []>} : vector<8x33xf32>, vector<33x256xf32>, vector<8x256xf32> -> vector<8x256xf32>
    %cst_203 = arith.constant dense<0.000000e+00> : vector<8x256xf32>
    %761 = tpu.matmul %714, %1, %cst_203 {dimension_numbers = #tpu.dot_dimension_numbers<[1], [0], [0], [1], [0, 0, 1, 1], [], []>} : vector<8x64xf32>, vector<64x256xf32>, vector<8x256xf32> -> vector<8x256xf32>
    %762 = arith.addf %760, %761 : vector<8x256xf32>
    %763 = vector.broadcast %2 : vector<1x256xf32> to vector<8x256xf32>
    %764 = arith.addf %762, %763 : vector<8x256xf32>
    %765 = vector.extract_strided_slice %764 {offsets = [0, 0], sizes = [8, 64], strides = [1, 1]} : vector<8x256xf32> to vector<8x64xf32>
    %766 = arith.negf %765 : vector<8x64xf32>
    %767 = math.exp %766 : vector<8x64xf32>
    %cst_204 = arith.constant 1.000000e+00 : f32
    %768 = vector.broadcast %cst_204 : f32 to vector<8x64xf32>
    %769 = arith.addf %768, %767 : vector<8x64xf32>
    %770 = arith.divf %768, %769 : vector<8x64xf32>
    %771 = vector.extract_strided_slice %764 {offsets = [0, 64], sizes = [8, 64], strides = [1, 1]} : vector<8x256xf32> to vector<8x64xf32>
    %772 = arith.negf %771 : vector<8x64xf32>
    %773 = math.exp %772 : vector<8x64xf32>
    %cst_205 = arith.constant 1.000000e+00 : f32
    %774 = vector.broadcast %cst_205 : f32 to vector<8x64xf32>
    %775 = arith.addf %774, %773 : vector<8x64xf32>
    %776 = arith.divf %774, %775 : vector<8x64xf32>
    %777 = vector.extract_strided_slice %764 {offsets = [0, 128], sizes = [8, 64], strides = [1, 1]} : vector<8x256xf32> to vector<8x64xf32>
    %778 = math.tanh %777 : vector<8x64xf32>
    %779 = vector.extract_strided_slice %764 {offsets = [0, 192], sizes = [8, 64], strides = [1, 1]} : vector<8x256xf32> to vector<8x64xf32>
    %780 = arith.negf %779 : vector<8x64xf32>
    %781 = math.exp %780 : vector<8x64xf32>
    %cst_206 = arith.constant 1.000000e+00 : f32
    %782 = vector.broadcast %cst_206 : f32 to vector<8x64xf32>
    %783 = arith.addf %782, %781 : vector<8x64xf32>
    %784 = arith.divf %782, %783 : vector<8x64xf32>
    %785 = arith.mulf %776, %712 : vector<8x64xf32>
    %786 = arith.mulf %770, %778 : vector<8x64xf32>
    %787 = arith.addf %785, %786 : vector<8x64xf32>
    %788 = math.tanh %787 : vector<8x64xf32>
    %789 = arith.mulf %784, %788 : vector<8x64xf32>
    %790 = arith.index_cast %c10_i32 : i32 to index
    %c0_207 = arith.constant 0 : index
    %c0_208 = arith.constant 0 : index
    %791 = vector.load %arg7[%790, %c0_207, %c0_208] : memref<16x8x64xf32, #tpu.memory_space<vmem>>, vector<1x8x64xf32>
    %792 = vector.shape_cast %791 : vector<1x8x64xf32> to vector<8x64xf32>
    %793 = vector.shape_cast %789 : vector<8x64xf32> to vector<1x8x64xf32>
    tpu.vector_store %arg7[%790, %c0_207, %c0_208], %793 {strides = array<i32>} : memref<16x8x64xf32, #tpu.memory_space<vmem>>, vector<1x8x64xf32>,
    %c15_i32_209 = arith.constant 15 : i32
    %794 = arith.subi %c15_i32_209, %c10_i32 : i32
    %795 = arith.index_cast %794 : i32 to index
    %c0_210 = arith.constant 0 : index
    %c0_211 = arith.constant 0 : index
    %796 = vector.load %arg0[%795, %c0_210, %c0_211] : memref<16x8x33xf32, #tpu.memory_space<vmem>>, vector<1x8x33xf32>
    %797 = vector.shape_cast %796 : vector<1x8x33xf32> to vector<8x33xf32>
    %cst_212 = arith.constant dense<0.000000e+00> : vector<8x256xf32>
    %798 = tpu.matmul %797, %3, %cst_212 {dimension_numbers = #tpu.dot_dimension_numbers<[1], [0], [0], [1], [0, 0, 1, 1], [], []>} : vector<8x33xf32>, vector<33x256xf32>, vector<8x256xf32> -> vector<8x256xf32>
    %cst_213 = arith.constant dense<0.000000e+00> : vector<8x256xf32>
    %799 = tpu.matmul %752, %4, %cst_213 {dimension_numbers = #tpu.dot_dimension_numbers<[1], [0], [0], [1], [0, 0, 1, 1], [], []>} : vector<8x64xf32>, vector<64x256xf32>, vector<8x256xf32> -> vector<8x256xf32>
    %800 = arith.addf %798, %799 : vector<8x256xf32>
    %801 = vector.broadcast %5 : vector<1x256xf32> to vector<8x256xf32>
    %802 = arith.addf %800, %801 : vector<8x256xf32>
    %803 = vector.extract_strided_slice %802 {offsets = [0, 0], sizes = [8, 64], strides = [1, 1]} : vector<8x256xf32> to vector<8x64xf32>
    %804 = arith.negf %803 : vector<8x64xf32>
    %805 = math.exp %804 : vector<8x64xf32>
    %cst_214 = arith.constant 1.000000e+00 : f32
    %806 = vector.broadcast %cst_214 : f32 to vector<8x64xf32>
    %807 = arith.addf %806, %805 : vector<8x64xf32>
    %808 = arith.divf %806, %807 : vector<8x64xf32>
    %809 = vector.extract_strided_slice %802 {offsets = [0, 64], sizes = [8, 64], strides = [1, 1]} : vector<8x256xf32> to vector<8x64xf32>
    %810 = arith.negf %809 : vector<8x64xf32>
    %811 = math.exp %810 : vector<8x64xf32>
    %cst_215 = arith.constant 1.000000e+00 : f32
    %812 = vector.broadcast %cst_215 : f32 to vector<8x64xf32>
    %813 = arith.addf %812, %811 : vector<8x64xf32>
    %814 = arith.divf %812, %813 : vector<8x64xf32>
    %815 = vector.extract_strided_slice %802 {offsets = [0, 128], sizes = [8, 64], strides = [1, 1]} : vector<8x256xf32> to vector<8x64xf32>
    %816 = math.tanh %815 : vector<8x64xf32>
    %817 = vector.extract_strided_slice %802 {offsets = [0, 192], sizes = [8, 64], strides = [1, 1]} : vector<8x256xf32> to vector<8x64xf32>
    %818 = arith.negf %817 : vector<8x64xf32>
    %819 = math.exp %818 : vector<8x64xf32>
    %cst_216 = arith.constant 1.000000e+00 : f32
    %820 = vector.broadcast %cst_216 : f32 to vector<8x64xf32>
    %821 = arith.addf %820, %819 : vector<8x64xf32>
    %822 = arith.divf %820, %821 : vector<8x64xf32>
    %823 = arith.mulf %814, %750 : vector<8x64xf32>
    %824 = arith.mulf %808, %816 : vector<8x64xf32>
    %825 = arith.addf %823, %824 : vector<8x64xf32>
    %826 = math.tanh %825 : vector<8x64xf32>
    %827 = arith.mulf %822, %826 : vector<8x64xf32>
    %828 = arith.index_cast %794 : i32 to index
    %c0_217 = arith.constant 0 : index
    %c0_218 = arith.constant 0 : index
    %829 = vector.load %arg8[%828, %c0_217, %c0_218] : memref<16x8x64xf32, #tpu.memory_space<vmem>>, vector<1x8x64xf32>
    %830 = vector.shape_cast %829 : vector<1x8x64xf32> to vector<8x64xf32>
    %831 = vector.shape_cast %827 : vector<8x64xf32> to vector<1x8x64xf32>
    tpu.vector_store %arg8[%828, %c0_217, %c0_218], %831 {strides = array<i32>} : memref<16x8x64xf32, #tpu.memory_space<vmem>>, vector<1x8x64xf32>,
    %c11_i32 = arith.constant 11 : i32
    %832 = arith.index_cast %c11_i32 : i32 to index
    %c0_219 = arith.constant 0 : index
    %c0_220 = arith.constant 0 : index
    %833 = vector.load %arg0[%832, %c0_219, %c0_220] : memref<16x8x33xf32, #tpu.memory_space<vmem>>, vector<1x8x33xf32>
    %834 = vector.shape_cast %833 : vector<1x8x33xf32> to vector<8x33xf32>
    %cst_221 = arith.constant dense<0.000000e+00> : vector<8x256xf32>
    %835 = tpu.matmul %834, %0, %cst_221 {dimension_numbers = #tpu.dot_dimension_numbers<[1], [0], [0], [1], [0, 0, 1, 1], [], []>} : vector<8x33xf32>, vector<33x256xf32>, vector<8x256xf32> -> vector<8x256xf32>
    %cst_222 = arith.constant dense<0.000000e+00> : vector<8x256xf32>
    %836 = tpu.matmul %789, %1, %cst_222 {dimension_numbers = #tpu.dot_dimension_numbers<[1], [0], [0], [1], [0, 0, 1, 1], [], []>} : vector<8x64xf32>, vector<64x256xf32>, vector<8x256xf32> -> vector<8x256xf32>
    %837 = arith.addf %835, %836 : vector<8x256xf32>
    %838 = vector.broadcast %2 : vector<1x256xf32> to vector<8x256xf32>
    %839 = arith.addf %837, %838 : vector<8x256xf32>
    %840 = vector.extract_strided_slice %839 {offsets = [0, 0], sizes = [8, 64], strides = [1, 1]} : vector<8x256xf32> to vector<8x64xf32>
    %841 = arith.negf %840 : vector<8x64xf32>
    %842 = math.exp %841 : vector<8x64xf32>
    %cst_223 = arith.constant 1.000000e+00 : f32
    %843 = vector.broadcast %cst_223 : f32 to vector<8x64xf32>
    %844 = arith.addf %843, %842 : vector<8x64xf32>
    %845 = arith.divf %843, %844 : vector<8x64xf32>
    %846 = vector.extract_strided_slice %839 {offsets = [0, 64], sizes = [8, 64], strides = [1, 1]} : vector<8x256xf32> to vector<8x64xf32>
    %847 = arith.negf %846 : vector<8x64xf32>
    %848 = math.exp %847 : vector<8x64xf32>
    %cst_224 = arith.constant 1.000000e+00 : f32
    %849 = vector.broadcast %cst_224 : f32 to vector<8x64xf32>
    %850 = arith.addf %849, %848 : vector<8x64xf32>
    %851 = arith.divf %849, %850 : vector<8x64xf32>
    %852 = vector.extract_strided_slice %839 {offsets = [0, 128], sizes = [8, 64], strides = [1, 1]} : vector<8x256xf32> to vector<8x64xf32>
    %853 = math.tanh %852 : vector<8x64xf32>
    %854 = vector.extract_strided_slice %839 {offsets = [0, 192], sizes = [8, 64], strides = [1, 1]} : vector<8x256xf32> to vector<8x64xf32>
    %855 = arith.negf %854 : vector<8x64xf32>
    %856 = math.exp %855 : vector<8x64xf32>
    %cst_225 = arith.constant 1.000000e+00 : f32
    %857 = vector.broadcast %cst_225 : f32 to vector<8x64xf32>
    %858 = arith.addf %857, %856 : vector<8x64xf32>
    %859 = arith.divf %857, %858 : vector<8x64xf32>
    %860 = arith.mulf %851, %787 : vector<8x64xf32>
    %861 = arith.mulf %845, %853 : vector<8x64xf32>
    %862 = arith.addf %860, %861 : vector<8x64xf32>
    %863 = math.tanh %862 : vector<8x64xf32>
    %864 = arith.mulf %859, %863 : vector<8x64xf32>
    %865 = arith.index_cast %c11_i32 : i32 to index
    %c0_226 = arith.constant 0 : index
    %c0_227 = arith.constant 0 : index
    %866 = vector.load %arg7[%865, %c0_226, %c0_227] : memref<16x8x64xf32, #tpu.memory_space<vmem>>, vector<1x8x64xf32>
    %867 = vector.shape_cast %866 : vector<1x8x64xf32> to vector<8x64xf32>
    %868 = vector.shape_cast %864 : vector<8x64xf32> to vector<1x8x64xf32>
    tpu.vector_store %arg7[%865, %c0_226, %c0_227], %868 {strides = array<i32>} : memref<16x8x64xf32, #tpu.memory_space<vmem>>, vector<1x8x64xf32>,
    %c15_i32_228 = arith.constant 15 : i32
    %869 = arith.subi %c15_i32_228, %c11_i32 : i32
    %870 = arith.index_cast %869 : i32 to index
    %c0_229 = arith.constant 0 : index
    %c0_230 = arith.constant 0 : index
    %871 = vector.load %arg0[%870, %c0_229, %c0_230] : memref<16x8x33xf32, #tpu.memory_space<vmem>>, vector<1x8x33xf32>
    %872 = vector.shape_cast %871 : vector<1x8x33xf32> to vector<8x33xf32>
    %cst_231 = arith.constant dense<0.000000e+00> : vector<8x256xf32>
    %873 = tpu.matmul %872, %3, %cst_231 {dimension_numbers = #tpu.dot_dimension_numbers<[1], [0], [0], [1], [0, 0, 1, 1], [], []>} : vector<8x33xf32>, vector<33x256xf32>, vector<8x256xf32> -> vector<8x256xf32>
    %cst_232 = arith.constant dense<0.000000e+00> : vector<8x256xf32>
    %874 = tpu.matmul %827, %4, %cst_232 {dimension_numbers = #tpu.dot_dimension_numbers<[1], [0], [0], [1], [0, 0, 1, 1], [], []>} : vector<8x64xf32>, vector<64x256xf32>, vector<8x256xf32> -> vector<8x256xf32>
    %875 = arith.addf %873, %874 : vector<8x256xf32>
    %876 = vector.broadcast %5 : vector<1x256xf32> to vector<8x256xf32>
    %877 = arith.addf %875, %876 : vector<8x256xf32>
    %878 = vector.extract_strided_slice %877 {offsets = [0, 0], sizes = [8, 64], strides = [1, 1]} : vector<8x256xf32> to vector<8x64xf32>
    %879 = arith.negf %878 : vector<8x64xf32>
    %880 = math.exp %879 : vector<8x64xf32>
    %cst_233 = arith.constant 1.000000e+00 : f32
    %881 = vector.broadcast %cst_233 : f32 to vector<8x64xf32>
    %882 = arith.addf %881, %880 : vector<8x64xf32>
    %883 = arith.divf %881, %882 : vector<8x64xf32>
    %884 = vector.extract_strided_slice %877 {offsets = [0, 64], sizes = [8, 64], strides = [1, 1]} : vector<8x256xf32> to vector<8x64xf32>
    %885 = arith.negf %884 : vector<8x64xf32>
    %886 = math.exp %885 : vector<8x64xf32>
    %cst_234 = arith.constant 1.000000e+00 : f32
    %887 = vector.broadcast %cst_234 : f32 to vector<8x64xf32>
    %888 = arith.addf %887, %886 : vector<8x64xf32>
    %889 = arith.divf %887, %888 : vector<8x64xf32>
    %890 = vector.extract_strided_slice %877 {offsets = [0, 128], sizes = [8, 64], strides = [1, 1]} : vector<8x256xf32> to vector<8x64xf32>
    %891 = math.tanh %890 : vector<8x64xf32>
    %892 = vector.extract_strided_slice %877 {offsets = [0, 192], sizes = [8, 64], strides = [1, 1]} : vector<8x256xf32> to vector<8x64xf32>
    %893 = arith.negf %892 : vector<8x64xf32>
    %894 = math.exp %893 : vector<8x64xf32>
    %cst_235 = arith.constant 1.000000e+00 : f32
    %895 = vector.broadcast %cst_235 : f32 to vector<8x64xf32>
    %896 = arith.addf %895, %894 : vector<8x64xf32>
    %897 = arith.divf %895, %896 : vector<8x64xf32>
    %898 = arith.mulf %889, %825 : vector<8x64xf32>
    %899 = arith.mulf %883, %891 : vector<8x64xf32>
    %900 = arith.addf %898, %899 : vector<8x64xf32>
    %901 = math.tanh %900 : vector<8x64xf32>
    %902 = arith.mulf %897, %901 : vector<8x64xf32>
    %903 = arith.index_cast %869 : i32 to index
    %c0_236 = arith.constant 0 : index
    %c0_237 = arith.constant 0 : index
    %904 = vector.load %arg8[%903, %c0_236, %c0_237] : memref<16x8x64xf32, #tpu.memory_space<vmem>>, vector<1x8x64xf32>
    %905 = vector.shape_cast %904 : vector<1x8x64xf32> to vector<8x64xf32>
    %906 = vector.shape_cast %902 : vector<8x64xf32> to vector<1x8x64xf32>
    tpu.vector_store %arg8[%903, %c0_236, %c0_237], %906 {strides = array<i32>} : memref<16x8x64xf32, #tpu.memory_space<vmem>>, vector<1x8x64xf32>,
    %c12_i32 = arith.constant 12 : i32
    %907 = arith.index_cast %c12_i32 : i32 to index
    %c0_238 = arith.constant 0 : index
    %c0_239 = arith.constant 0 : index
    %908 = vector.load %arg0[%907, %c0_238, %c0_239] : memref<16x8x33xf32, #tpu.memory_space<vmem>>, vector<1x8x33xf32>
    %909 = vector.shape_cast %908 : vector<1x8x33xf32> to vector<8x33xf32>
    %cst_240 = arith.constant dense<0.000000e+00> : vector<8x256xf32>
    %910 = tpu.matmul %909, %0, %cst_240 {dimension_numbers = #tpu.dot_dimension_numbers<[1], [0], [0], [1], [0, 0, 1, 1], [], []>} : vector<8x33xf32>, vector<33x256xf32>, vector<8x256xf32> -> vector<8x256xf32>
    %cst_241 = arith.constant dense<0.000000e+00> : vector<8x256xf32>
    %911 = tpu.matmul %864, %1, %cst_241 {dimension_numbers = #tpu.dot_dimension_numbers<[1], [0], [0], [1], [0, 0, 1, 1], [], []>} : vector<8x64xf32>, vector<64x256xf32>, vector<8x256xf32> -> vector<8x256xf32>
    %912 = arith.addf %910, %911 : vector<8x256xf32>
    %913 = vector.broadcast %2 : vector<1x256xf32> to vector<8x256xf32>
    %914 = arith.addf %912, %913 : vector<8x256xf32>
    %915 = vector.extract_strided_slice %914 {offsets = [0, 0], sizes = [8, 64], strides = [1, 1]} : vector<8x256xf32> to vector<8x64xf32>
    %916 = arith.negf %915 : vector<8x64xf32>
    %917 = math.exp %916 : vector<8x64xf32>
    %cst_242 = arith.constant 1.000000e+00 : f32
    %918 = vector.broadcast %cst_242 : f32 to vector<8x64xf32>
    %919 = arith.addf %918, %917 : vector<8x64xf32>
    %920 = arith.divf %918, %919 : vector<8x64xf32>
    %921 = vector.extract_strided_slice %914 {offsets = [0, 64], sizes = [8, 64], strides = [1, 1]} : vector<8x256xf32> to vector<8x64xf32>
    %922 = arith.negf %921 : vector<8x64xf32>
    %923 = math.exp %922 : vector<8x64xf32>
    %cst_243 = arith.constant 1.000000e+00 : f32
    %924 = vector.broadcast %cst_243 : f32 to vector<8x64xf32>
    %925 = arith.addf %924, %923 : vector<8x64xf32>
    %926 = arith.divf %924, %925 : vector<8x64xf32>
    %927 = vector.extract_strided_slice %914 {offsets = [0, 128], sizes = [8, 64], strides = [1, 1]} : vector<8x256xf32> to vector<8x64xf32>
    %928 = math.tanh %927 : vector<8x64xf32>
    %929 = vector.extract_strided_slice %914 {offsets = [0, 192], sizes = [8, 64], strides = [1, 1]} : vector<8x256xf32> to vector<8x64xf32>
    %930 = arith.negf %929 : vector<8x64xf32>
    %931 = math.exp %930 : vector<8x64xf32>
    %cst_244 = arith.constant 1.000000e+00 : f32
    %932 = vector.broadcast %cst_244 : f32 to vector<8x64xf32>
    %933 = arith.addf %932, %931 : vector<8x64xf32>
    %934 = arith.divf %932, %933 : vector<8x64xf32>
    %935 = arith.mulf %926, %862 : vector<8x64xf32>
    %936 = arith.mulf %920, %928 : vector<8x64xf32>
    %937 = arith.addf %935, %936 : vector<8x64xf32>
    %938 = math.tanh %937 : vector<8x64xf32>
    %939 = arith.mulf %934, %938 : vector<8x64xf32>
    %940 = arith.index_cast %c12_i32 : i32 to index
    %c0_245 = arith.constant 0 : index
    %c0_246 = arith.constant 0 : index
    %941 = vector.load %arg7[%940, %c0_245, %c0_246] : memref<16x8x64xf32, #tpu.memory_space<vmem>>, vector<1x8x64xf32>
    %942 = vector.shape_cast %941 : vector<1x8x64xf32> to vector<8x64xf32>
    %943 = vector.shape_cast %939 : vector<8x64xf32> to vector<1x8x64xf32>
    tpu.vector_store %arg7[%940, %c0_245, %c0_246], %943 {strides = array<i32>} : memref<16x8x64xf32, #tpu.memory_space<vmem>>, vector<1x8x64xf32>,
    %c15_i32_247 = arith.constant 15 : i32
    %944 = arith.subi %c15_i32_247, %c12_i32 : i32
    %945 = arith.index_cast %944 : i32 to index
    %c0_248 = arith.constant 0 : index
    %c0_249 = arith.constant 0 : index
    %946 = vector.load %arg0[%945, %c0_248, %c0_249] : memref<16x8x33xf32, #tpu.memory_space<vmem>>, vector<1x8x33xf32>
    %947 = vector.shape_cast %946 : vector<1x8x33xf32> to vector<8x33xf32>
    %cst_250 = arith.constant dense<0.000000e+00> : vector<8x256xf32>
    %948 = tpu.matmul %947, %3, %cst_250 {dimension_numbers = #tpu.dot_dimension_numbers<[1], [0], [0], [1], [0, 0, 1, 1], [], []>} : vector<8x33xf32>, vector<33x256xf32>, vector<8x256xf32> -> vector<8x256xf32>
    %cst_251 = arith.constant dense<0.000000e+00> : vector<8x256xf32>
    %949 = tpu.matmul %902, %4, %cst_251 {dimension_numbers = #tpu.dot_dimension_numbers<[1], [0], [0], [1], [0, 0, 1, 1], [], []>} : vector<8x64xf32>, vector<64x256xf32>, vector<8x256xf32> -> vector<8x256xf32>
    %950 = arith.addf %948, %949 : vector<8x256xf32>
    %951 = vector.broadcast %5 : vector<1x256xf32> to vector<8x256xf32>
    %952 = arith.addf %950, %951 : vector<8x256xf32>
    %953 = vector.extract_strided_slice %952 {offsets = [0, 0], sizes = [8, 64], strides = [1, 1]} : vector<8x256xf32> to vector<8x64xf32>
    %954 = arith.negf %953 : vector<8x64xf32>
    %955 = math.exp %954 : vector<8x64xf32>
    %cst_252 = arith.constant 1.000000e+00 : f32
    %956 = vector.broadcast %cst_252 : f32 to vector<8x64xf32>
    %957 = arith.addf %956, %955 : vector<8x64xf32>
    %958 = arith.divf %956, %957 : vector<8x64xf32>
    %959 = vector.extract_strided_slice %952 {offsets = [0, 64], sizes = [8, 64], strides = [1, 1]} : vector<8x256xf32> to vector<8x64xf32>
    %960 = arith.negf %959 : vector<8x64xf32>
    %961 = math.exp %960 : vector<8x64xf32>
    %cst_253 = arith.constant 1.000000e+00 : f32
    %962 = vector.broadcast %cst_253 : f32 to vector<8x64xf32>
    %963 = arith.addf %962, %961 : vector<8x64xf32>
    %964 = arith.divf %962, %963 : vector<8x64xf32>
    %965 = vector.extract_strided_slice %952 {offsets = [0, 128], sizes = [8, 64], strides = [1, 1]} : vector<8x256xf32> to vector<8x64xf32>
    %966 = math.tanh %965 : vector<8x64xf32>
    %967 = vector.extract_strided_slice %952 {offsets = [0, 192], sizes = [8, 64], strides = [1, 1]} : vector<8x256xf32> to vector<8x64xf32>
    %968 = arith.negf %967 : vector<8x64xf32>
    %969 = math.exp %968 : vector<8x64xf32>
    %cst_254 = arith.constant 1.000000e+00 : f32
    %970 = vector.broadcast %cst_254 : f32 to vector<8x64xf32>
    %971 = arith.addf %970, %969 : vector<8x64xf32>
    %972 = arith.divf %970, %971 : vector<8x64xf32>
    %973 = arith.mulf %964, %900 : vector<8x64xf32>
    %974 = arith.mulf %958, %966 : vector<8x64xf32>
    %975 = arith.addf %973, %974 : vector<8x64xf32>
    %976 = math.tanh %975 : vector<8x64xf32>
    %977 = arith.mulf %972, %976 : vector<8x64xf32>
    %978 = arith.index_cast %944 : i32 to index
    %c0_255 = arith.constant 0 : index
    %c0_256 = arith.constant 0 : index
    %979 = vector.load %arg8[%978, %c0_255, %c0_256] : memref<16x8x64xf32, #tpu.memory_space<vmem>>, vector<1x8x64xf32>
    %980 = vector.shape_cast %979 : vector<1x8x64xf32> to vector<8x64xf32>
    %981 = vector.shape_cast %977 : vector<8x64xf32> to vector<1x8x64xf32>
    tpu.vector_store %arg8[%978, %c0_255, %c0_256], %981 {strides = array<i32>} : memref<16x8x64xf32, #tpu.memory_space<vmem>>, vector<1x8x64xf32>,
    %c13_i32 = arith.constant 13 : i32
    %982 = arith.index_cast %c13_i32 : i32 to index
    %c0_257 = arith.constant 0 : index
    %c0_258 = arith.constant 0 : index
    %983 = vector.load %arg0[%982, %c0_257, %c0_258] : memref<16x8x33xf32, #tpu.memory_space<vmem>>, vector<1x8x33xf32>
    %984 = vector.shape_cast %983 : vector<1x8x33xf32> to vector<8x33xf32>
    %cst_259 = arith.constant dense<0.000000e+00> : vector<8x256xf32>
    %985 = tpu.matmul %984, %0, %cst_259 {dimension_numbers = #tpu.dot_dimension_numbers<[1], [0], [0], [1], [0, 0, 1, 1], [], []>} : vector<8x33xf32>, vector<33x256xf32>, vector<8x256xf32> -> vector<8x256xf32>
    %cst_260 = arith.constant dense<0.000000e+00> : vector<8x256xf32>
    %986 = tpu.matmul %939, %1, %cst_260 {dimension_numbers = #tpu.dot_dimension_numbers<[1], [0], [0], [1], [0, 0, 1, 1], [], []>} : vector<8x64xf32>, vector<64x256xf32>, vector<8x256xf32> -> vector<8x256xf32>
    %987 = arith.addf %985, %986 : vector<8x256xf32>
    %988 = vector.broadcast %2 : vector<1x256xf32> to vector<8x256xf32>
    %989 = arith.addf %987, %988 : vector<8x256xf32>
    %990 = vector.extract_strided_slice %989 {offsets = [0, 0], sizes = [8, 64], strides = [1, 1]} : vector<8x256xf32> to vector<8x64xf32>
    %991 = arith.negf %990 : vector<8x64xf32>
    %992 = math.exp %991 : vector<8x64xf32>
    %cst_261 = arith.constant 1.000000e+00 : f32
    %993 = vector.broadcast %cst_261 : f32 to vector<8x64xf32>
    %994 = arith.addf %993, %992 : vector<8x64xf32>
    %995 = arith.divf %993, %994 : vector<8x64xf32>
    %996 = vector.extract_strided_slice %989 {offsets = [0, 64], sizes = [8, 64], strides = [1, 1]} : vector<8x256xf32> to vector<8x64xf32>
    %997 = arith.negf %996 : vector<8x64xf32>
    %998 = math.exp %997 : vector<8x64xf32>
    %cst_262 = arith.constant 1.000000e+00 : f32
    %999 = vector.broadcast %cst_262 : f32 to vector<8x64xf32>
    %1000 = arith.addf %999, %998 : vector<8x64xf32>
    %1001 = arith.divf %999, %1000 : vector<8x64xf32>
    %1002 = vector.extract_strided_slice %989 {offsets = [0, 128], sizes = [8, 64], strides = [1, 1]} : vector<8x256xf32> to vector<8x64xf32>
    %1003 = math.tanh %1002 : vector<8x64xf32>
    %1004 = vector.extract_strided_slice %989 {offsets = [0, 192], sizes = [8, 64], strides = [1, 1]} : vector<8x256xf32> to vector<8x64xf32>
    %1005 = arith.negf %1004 : vector<8x64xf32>
    %1006 = math.exp %1005 : vector<8x64xf32>
    %cst_263 = arith.constant 1.000000e+00 : f32
    %1007 = vector.broadcast %cst_263 : f32 to vector<8x64xf32>
    %1008 = arith.addf %1007, %1006 : vector<8x64xf32>
    %1009 = arith.divf %1007, %1008 : vector<8x64xf32>
    %1010 = arith.mulf %1001, %937 : vector<8x64xf32>
    %1011 = arith.mulf %995, %1003 : vector<8x64xf32>
    %1012 = arith.addf %1010, %1011 : vector<8x64xf32>
    %1013 = math.tanh %1012 : vector<8x64xf32>
    %1014 = arith.mulf %1009, %1013 : vector<8x64xf32>
    %1015 = arith.index_cast %c13_i32 : i32 to index
    %c0_264 = arith.constant 0 : index
    %c0_265 = arith.constant 0 : index
    %1016 = vector.load %arg7[%1015, %c0_264, %c0_265] : memref<16x8x64xf32, #tpu.memory_space<vmem>>, vector<1x8x64xf32>
    %1017 = vector.shape_cast %1016 : vector<1x8x64xf32> to vector<8x64xf32>
    %1018 = vector.shape_cast %1014 : vector<8x64xf32> to vector<1x8x64xf32>
    tpu.vector_store %arg7[%1015, %c0_264, %c0_265], %1018 {strides = array<i32>} : memref<16x8x64xf32, #tpu.memory_space<vmem>>, vector<1x8x64xf32>,
    %c15_i32_266 = arith.constant 15 : i32
    %1019 = arith.subi %c15_i32_266, %c13_i32 : i32
    %1020 = arith.index_cast %1019 : i32 to index
    %c0_267 = arith.constant 0 : index
    %c0_268 = arith.constant 0 : index
    %1021 = vector.load %arg0[%1020, %c0_267, %c0_268] : memref<16x8x33xf32, #tpu.memory_space<vmem>>, vector<1x8x33xf32>
    %1022 = vector.shape_cast %1021 : vector<1x8x33xf32> to vector<8x33xf32>
    %cst_269 = arith.constant dense<0.000000e+00> : vector<8x256xf32>
    %1023 = tpu.matmul %1022, %3, %cst_269 {dimension_numbers = #tpu.dot_dimension_numbers<[1], [0], [0], [1], [0, 0, 1, 1], [], []>} : vector<8x33xf32>, vector<33x256xf32>, vector<8x256xf32> -> vector<8x256xf32>
    %cst_270 = arith.constant dense<0.000000e+00> : vector<8x256xf32>
    %1024 = tpu.matmul %977, %4, %cst_270 {dimension_numbers = #tpu.dot_dimension_numbers<[1], [0], [0], [1], [0, 0, 1, 1], [], []>} : vector<8x64xf32>, vector<64x256xf32>, vector<8x256xf32> -> vector<8x256xf32>
    %1025 = arith.addf %1023, %1024 : vector<8x256xf32>
    %1026 = vector.broadcast %5 : vector<1x256xf32> to vector<8x256xf32>
    %1027 = arith.addf %1025, %1026 : vector<8x256xf32>
    %1028 = vector.extract_strided_slice %1027 {offsets = [0, 0], sizes = [8, 64], strides = [1, 1]} : vector<8x256xf32> to vector<8x64xf32>
    %1029 = arith.negf %1028 : vector<8x64xf32>
    %1030 = math.exp %1029 : vector<8x64xf32>
    %cst_271 = arith.constant 1.000000e+00 : f32
    %1031 = vector.broadcast %cst_271 : f32 to vector<8x64xf32>
    %1032 = arith.addf %1031, %1030 : vector<8x64xf32>
    %1033 = arith.divf %1031, %1032 : vector<8x64xf32>
    %1034 = vector.extract_strided_slice %1027 {offsets = [0, 64], sizes = [8, 64], strides = [1, 1]} : vector<8x256xf32> to vector<8x64xf32>
    %1035 = arith.negf %1034 : vector<8x64xf32>
    %1036 = math.exp %1035 : vector<8x64xf32>
    %cst_272 = arith.constant 1.000000e+00 : f32
    %1037 = vector.broadcast %cst_272 : f32 to vector<8x64xf32>
    %1038 = arith.addf %1037, %1036 : vector<8x64xf32>
    %1039 = arith.divf %1037, %1038 : vector<8x64xf32>
    %1040 = vector.extract_strided_slice %1027 {offsets = [0, 128], sizes = [8, 64], strides = [1, 1]} : vector<8x256xf32> to vector<8x64xf32>
    %1041 = math.tanh %1040 : vector<8x64xf32>
    %1042 = vector.extract_strided_slice %1027 {offsets = [0, 192], sizes = [8, 64], strides = [1, 1]} : vector<8x256xf32> to vector<8x64xf32>
    %1043 = arith.negf %1042 : vector<8x64xf32>
    %1044 = math.exp %1043 : vector<8x64xf32>
    %cst_273 = arith.constant 1.000000e+00 : f32
    %1045 = vector.broadcast %cst_273 : f32 to vector<8x64xf32>
    %1046 = arith.addf %1045, %1044 : vector<8x64xf32>
    %1047 = arith.divf %1045, %1046 : vector<8x64xf32>
    %1048 = arith.mulf %1039, %975 : vector<8x64xf32>
    %1049 = arith.mulf %1033, %1041 : vector<8x64xf32>
    %1050 = arith.addf %1048, %1049 : vector<8x64xf32>
    %1051 = math.tanh %1050 : vector<8x64xf32>
    %1052 = arith.mulf %1047, %1051 : vector<8x64xf32>
    %1053 = arith.index_cast %1019 : i32 to index
    %c0_274 = arith.constant 0 : index
    %c0_275 = arith.constant 0 : index
    %1054 = vector.load %arg8[%1053, %c0_274, %c0_275] : memref<16x8x64xf32, #tpu.memory_space<vmem>>, vector<1x8x64xf32>
    %1055 = vector.shape_cast %1054 : vector<1x8x64xf32> to vector<8x64xf32>
    %1056 = vector.shape_cast %1052 : vector<8x64xf32> to vector<1x8x64xf32>
    tpu.vector_store %arg8[%1053, %c0_274, %c0_275], %1056 {strides = array<i32>} : memref<16x8x64xf32, #tpu.memory_space<vmem>>, vector<1x8x64xf32>,
    %c14_i32 = arith.constant 14 : i32
    %1057 = arith.index_cast %c14_i32 : i32 to index
    %c0_276 = arith.constant 0 : index
    %c0_277 = arith.constant 0 : index
    %1058 = vector.load %arg0[%1057, %c0_276, %c0_277] : memref<16x8x33xf32, #tpu.memory_space<vmem>>, vector<1x8x33xf32>
    %1059 = vector.shape_cast %1058 : vector<1x8x33xf32> to vector<8x33xf32>
    %cst_278 = arith.constant dense<0.000000e+00> : vector<8x256xf32>
    %1060 = tpu.matmul %1059, %0, %cst_278 {dimension_numbers = #tpu.dot_dimension_numbers<[1], [0], [0], [1], [0, 0, 1, 1], [], []>} : vector<8x33xf32>, vector<33x256xf32>, vector<8x256xf32> -> vector<8x256xf32>
    %cst_279 = arith.constant dense<0.000000e+00> : vector<8x256xf32>
    %1061 = tpu.matmul %1014, %1, %cst_279 {dimension_numbers = #tpu.dot_dimension_numbers<[1], [0], [0], [1], [0, 0, 1, 1], [], []>} : vector<8x64xf32>, vector<64x256xf32>, vector<8x256xf32> -> vector<8x256xf32>
    %1062 = arith.addf %1060, %1061 : vector<8x256xf32>
    %1063 = vector.broadcast %2 : vector<1x256xf32> to vector<8x256xf32>
    %1064 = arith.addf %1062, %1063 : vector<8x256xf32>
    %1065 = vector.extract_strided_slice %1064 {offsets = [0, 0], sizes = [8, 64], strides = [1, 1]} : vector<8x256xf32> to vector<8x64xf32>
    %1066 = arith.negf %1065 : vector<8x64xf32>
    %1067 = math.exp %1066 : vector<8x64xf32>
    %cst_280 = arith.constant 1.000000e+00 : f32
    %1068 = vector.broadcast %cst_280 : f32 to vector<8x64xf32>
    %1069 = arith.addf %1068, %1067 : vector<8x64xf32>
    %1070 = arith.divf %1068, %1069 : vector<8x64xf32>
    %1071 = vector.extract_strided_slice %1064 {offsets = [0, 64], sizes = [8, 64], strides = [1, 1]} : vector<8x256xf32> to vector<8x64xf32>
    %1072 = arith.negf %1071 : vector<8x64xf32>
    %1073 = math.exp %1072 : vector<8x64xf32>
    %cst_281 = arith.constant 1.000000e+00 : f32
    %1074 = vector.broadcast %cst_281 : f32 to vector<8x64xf32>
    %1075 = arith.addf %1074, %1073 : vector<8x64xf32>
    %1076 = arith.divf %1074, %1075 : vector<8x64xf32>
    %1077 = vector.extract_strided_slice %1064 {offsets = [0, 128], sizes = [8, 64], strides = [1, 1]} : vector<8x256xf32> to vector<8x64xf32>
    %1078 = math.tanh %1077 : vector<8x64xf32>
    %1079 = vector.extract_strided_slice %1064 {offsets = [0, 192], sizes = [8, 64], strides = [1, 1]} : vector<8x256xf32> to vector<8x64xf32>
    %1080 = arith.negf %1079 : vector<8x64xf32>
    %1081 = math.exp %1080 : vector<8x64xf32>
    %cst_282 = arith.constant 1.000000e+00 : f32
    %1082 = vector.broadcast %cst_282 : f32 to vector<8x64xf32>
    %1083 = arith.addf %1082, %1081 : vector<8x64xf32>
    %1084 = arith.divf %1082, %1083 : vector<8x64xf32>
    %1085 = arith.mulf %1076, %1012 : vector<8x64xf32>
    %1086 = arith.mulf %1070, %1078 : vector<8x64xf32>
    %1087 = arith.addf %1085, %1086 : vector<8x64xf32>
    %1088 = math.tanh %1087 : vector<8x64xf32>
    %1089 = arith.mulf %1084, %1088 : vector<8x64xf32>
    %1090 = arith.index_cast %c14_i32 : i32 to index
    %c0_283 = arith.constant 0 : index
    %c0_284 = arith.constant 0 : index
    %1091 = vector.load %arg7[%1090, %c0_283, %c0_284] : memref<16x8x64xf32, #tpu.memory_space<vmem>>, vector<1x8x64xf32>
    %1092 = vector.shape_cast %1091 : vector<1x8x64xf32> to vector<8x64xf32>
    %1093 = vector.shape_cast %1089 : vector<8x64xf32> to vector<1x8x64xf32>
    tpu.vector_store %arg7[%1090, %c0_283, %c0_284], %1093 {strides = array<i32>} : memref<16x8x64xf32, #tpu.memory_space<vmem>>, vector<1x8x64xf32>,
    %c15_i32_285 = arith.constant 15 : i32
    %1094 = arith.subi %c15_i32_285, %c14_i32 : i32
    %1095 = arith.index_cast %1094 : i32 to index
    %c0_286 = arith.constant 0 : index
    %c0_287 = arith.constant 0 : index
    %1096 = vector.load %arg0[%1095, %c0_286, %c0_287] : memref<16x8x33xf32, #tpu.memory_space<vmem>>, vector<1x8x33xf32>
    %1097 = vector.shape_cast %1096 : vector<1x8x33xf32> to vector<8x33xf32>
    %cst_288 = arith.constant dense<0.000000e+00> : vector<8x256xf32>
    %1098 = tpu.matmul %1097, %3, %cst_288 {dimension_numbers = #tpu.dot_dimension_numbers<[1], [0], [0], [1], [0, 0, 1, 1], [], []>} : vector<8x33xf32>, vector<33x256xf32>, vector<8x256xf32> -> vector<8x256xf32>
    %cst_289 = arith.constant dense<0.000000e+00> : vector<8x256xf32>
    %1099 = tpu.matmul %1052, %4, %cst_289 {dimension_numbers = #tpu.dot_dimension_numbers<[1], [0], [0], [1], [0, 0, 1, 1], [], []>} : vector<8x64xf32>, vector<64x256xf32>, vector<8x256xf32> -> vector<8x256xf32>
    %1100 = arith.addf %1098, %1099 : vector<8x256xf32>
    %1101 = vector.broadcast %5 : vector<1x256xf32> to vector<8x256xf32>
    %1102 = arith.addf %1100, %1101 : vector<8x256xf32>
    %1103 = vector.extract_strided_slice %1102 {offsets = [0, 0], sizes = [8, 64], strides = [1, 1]} : vector<8x256xf32> to vector<8x64xf32>
    %1104 = arith.negf %1103 : vector<8x64xf32>
    %1105 = math.exp %1104 : vector<8x64xf32>
    %cst_290 = arith.constant 1.000000e+00 : f32
    %1106 = vector.broadcast %cst_290 : f32 to vector<8x64xf32>
    %1107 = arith.addf %1106, %1105 : vector<8x64xf32>
    %1108 = arith.divf %1106, %1107 : vector<8x64xf32>
    %1109 = vector.extract_strided_slice %1102 {offsets = [0, 64], sizes = [8, 64], strides = [1, 1]} : vector<8x256xf32> to vector<8x64xf32>
    %1110 = arith.negf %1109 : vector<8x64xf32>
    %1111 = math.exp %1110 : vector<8x64xf32>
    %cst_291 = arith.constant 1.000000e+00 : f32
    %1112 = vector.broadcast %cst_291 : f32 to vector<8x64xf32>
    %1113 = arith.addf %1112, %1111 : vector<8x64xf32>
    %1114 = arith.divf %1112, %1113 : vector<8x64xf32>
    %1115 = vector.extract_strided_slice %1102 {offsets = [0, 128], sizes = [8, 64], strides = [1, 1]} : vector<8x256xf32> to vector<8x64xf32>
    %1116 = math.tanh %1115 : vector<8x64xf32>
    %1117 = vector.extract_strided_slice %1102 {offsets = [0, 192], sizes = [8, 64], strides = [1, 1]} : vector<8x256xf32> to vector<8x64xf32>
    %1118 = arith.negf %1117 : vector<8x64xf32>
    %1119 = math.exp %1118 : vector<8x64xf32>
    %cst_292 = arith.constant 1.000000e+00 : f32
    %1120 = vector.broadcast %cst_292 : f32 to vector<8x64xf32>
    %1121 = arith.addf %1120, %1119 : vector<8x64xf32>
    %1122 = arith.divf %1120, %1121 : vector<8x64xf32>
    %1123 = arith.mulf %1114, %1050 : vector<8x64xf32>
    %1124 = arith.mulf %1108, %1116 : vector<8x64xf32>
    %1125 = arith.addf %1123, %1124 : vector<8x64xf32>
    %1126 = math.tanh %1125 : vector<8x64xf32>
    %1127 = arith.mulf %1122, %1126 : vector<8x64xf32>
    %1128 = arith.index_cast %1094 : i32 to index
    %c0_293 = arith.constant 0 : index
    %c0_294 = arith.constant 0 : index
    %1129 = vector.load %arg8[%1128, %c0_293, %c0_294] : memref<16x8x64xf32, #tpu.memory_space<vmem>>, vector<1x8x64xf32>
    %1130 = vector.shape_cast %1129 : vector<1x8x64xf32> to vector<8x64xf32>
    %1131 = vector.shape_cast %1127 : vector<8x64xf32> to vector<1x8x64xf32>
    tpu.vector_store %arg8[%1128, %c0_293, %c0_294], %1131 {strides = array<i32>} : memref<16x8x64xf32, #tpu.memory_space<vmem>>, vector<1x8x64xf32>,
    %c15_i32_295 = arith.constant 15 : i32
    %1132 = arith.index_cast %c15_i32_295 : i32 to index
    %c0_296 = arith.constant 0 : index
    %c0_297 = arith.constant 0 : index
    %1133 = vector.load %arg0[%1132, %c0_296, %c0_297] : memref<16x8x33xf32, #tpu.memory_space<vmem>>, vector<1x8x33xf32>
    %1134 = vector.shape_cast %1133 : vector<1x8x33xf32> to vector<8x33xf32>
    %cst_298 = arith.constant dense<0.000000e+00> : vector<8x256xf32>
    %1135 = tpu.matmul %1134, %0, %cst_298 {dimension_numbers = #tpu.dot_dimension_numbers<[1], [0], [0], [1], [0, 0, 1, 1], [], []>} : vector<8x33xf32>, vector<33x256xf32>, vector<8x256xf32> -> vector<8x256xf32>
    %cst_299 = arith.constant dense<0.000000e+00> : vector<8x256xf32>
    %1136 = tpu.matmul %1089, %1, %cst_299 {dimension_numbers = #tpu.dot_dimension_numbers<[1], [0], [0], [1], [0, 0, 1, 1], [], []>} : vector<8x64xf32>, vector<64x256xf32>, vector<8x256xf32> -> vector<8x256xf32>
    %1137 = arith.addf %1135, %1136 : vector<8x256xf32>
    %1138 = vector.broadcast %2 : vector<1x256xf32> to vector<8x256xf32>
    %1139 = arith.addf %1137, %1138 : vector<8x256xf32>
    %1140 = vector.extract_strided_slice %1139 {offsets = [0, 0], sizes = [8, 64], strides = [1, 1]} : vector<8x256xf32> to vector<8x64xf32>
    %1141 = arith.negf %1140 : vector<8x64xf32>
    %1142 = math.exp %1141 : vector<8x64xf32>
    %cst_300 = arith.constant 1.000000e+00 : f32
    %1143 = vector.broadcast %cst_300 : f32 to vector<8x64xf32>
    %1144 = arith.addf %1143, %1142 : vector<8x64xf32>
    %1145 = arith.divf %1143, %1144 : vector<8x64xf32>
    %1146 = vector.extract_strided_slice %1139 {offsets = [0, 64], sizes = [8, 64], strides = [1, 1]} : vector<8x256xf32> to vector<8x64xf32>
    %1147 = arith.negf %1146 : vector<8x64xf32>
    %1148 = math.exp %1147 : vector<8x64xf32>
    %cst_301 = arith.constant 1.000000e+00 : f32
    %1149 = vector.broadcast %cst_301 : f32 to vector<8x64xf32>
    %1150 = arith.addf %1149, %1148 : vector<8x64xf32>
    %1151 = arith.divf %1149, %1150 : vector<8x64xf32>
    %1152 = vector.extract_strided_slice %1139 {offsets = [0, 128], sizes = [8, 64], strides = [1, 1]} : vector<8x256xf32> to vector<8x64xf32>
    %1153 = math.tanh %1152 : vector<8x64xf32>
    %1154 = vector.extract_strided_slice %1139 {offsets = [0, 192], sizes = [8, 64], strides = [1, 1]} : vector<8x256xf32> to vector<8x64xf32>
    %1155 = arith.negf %1154 : vector<8x64xf32>
    %1156 = math.exp %1155 : vector<8x64xf32>
    %cst_302 = arith.constant 1.000000e+00 : f32
    %1157 = vector.broadcast %cst_302 : f32 to vector<8x64xf32>
    %1158 = arith.addf %1157, %1156 : vector<8x64xf32>
    %1159 = arith.divf %1157, %1158 : vector<8x64xf32>
    %1160 = arith.mulf %1151, %1087 : vector<8x64xf32>
    %1161 = arith.mulf %1145, %1153 : vector<8x64xf32>
    %1162 = arith.addf %1160, %1161 : vector<8x64xf32>
    %1163 = math.tanh %1162 : vector<8x64xf32>
    %1164 = arith.mulf %1159, %1163 : vector<8x64xf32>
    %1165 = arith.index_cast %c15_i32_295 : i32 to index
    %c0_303 = arith.constant 0 : index
    %c0_304 = arith.constant 0 : index
    %1166 = vector.load %arg7[%1165, %c0_303, %c0_304] : memref<16x8x64xf32, #tpu.memory_space<vmem>>, vector<1x8x64xf32>
    %1167 = vector.shape_cast %1166 : vector<1x8x64xf32> to vector<8x64xf32>
    %1168 = vector.shape_cast %1164 : vector<8x64xf32> to vector<1x8x64xf32>
    tpu.vector_store %arg7[%1165, %c0_303, %c0_304], %1168 {strides = array<i32>} : memref<16x8x64xf32, #tpu.memory_space<vmem>>, vector<1x8x64xf32>,
    %c15_i32_305 = arith.constant 15 : i32
    %1169 = arith.subi %c15_i32_305, %c15_i32_295 : i32
    %1170 = arith.index_cast %1169 : i32 to index
    %c0_306 = arith.constant 0 : index
    %c0_307 = arith.constant 0 : index
    %1171 = vector.load %arg0[%1170, %c0_306, %c0_307] : memref<16x8x33xf32, #tpu.memory_space<vmem>>, vector<1x8x33xf32>
    %1172 = vector.shape_cast %1171 : vector<1x8x33xf32> to vector<8x33xf32>
    %cst_308 = arith.constant dense<0.000000e+00> : vector<8x256xf32>
    %1173 = tpu.matmul %1172, %3, %cst_308 {dimension_numbers = #tpu.dot_dimension_numbers<[1], [0], [0], [1], [0, 0, 1, 1], [], []>} : vector<8x33xf32>, vector<33x256xf32>, vector<8x256xf32> -> vector<8x256xf32>
    %cst_309 = arith.constant dense<0.000000e+00> : vector<8x256xf32>
    %1174 = tpu.matmul %1127, %4, %cst_309 {dimension_numbers = #tpu.dot_dimension_numbers<[1], [0], [0], [1], [0, 0, 1, 1], [], []>} : vector<8x64xf32>, vector<64x256xf32>, vector<8x256xf32> -> vector<8x256xf32>
    %1175 = arith.addf %1173, %1174 : vector<8x256xf32>
    %1176 = vector.broadcast %5 : vector<1x256xf32> to vector<8x256xf32>
    %1177 = arith.addf %1175, %1176 : vector<8x256xf32>
    %1178 = vector.extract_strided_slice %1177 {offsets = [0, 0], sizes = [8, 64], strides = [1, 1]} : vector<8x256xf32> to vector<8x64xf32>
    %1179 = arith.negf %1178 : vector<8x64xf32>
    %1180 = math.exp %1179 : vector<8x64xf32>
    %cst_310 = arith.constant 1.000000e+00 : f32
    %1181 = vector.broadcast %cst_310 : f32 to vector<8x64xf32>
    %1182 = arith.addf %1181, %1180 : vector<8x64xf32>
    %1183 = arith.divf %1181, %1182 : vector<8x64xf32>
    %1184 = vector.extract_strided_slice %1177 {offsets = [0, 64], sizes = [8, 64], strides = [1, 1]} : vector<8x256xf32> to vector<8x64xf32>
    %1185 = arith.negf %1184 : vector<8x64xf32>
    %1186 = math.exp %1185 : vector<8x64xf32>
    %cst_311 = arith.constant 1.000000e+00 : f32
    %1187 = vector.broadcast %cst_311 : f32 to vector<8x64xf32>
    %1188 = arith.addf %1187, %1186 : vector<8x64xf32>
    %1189 = arith.divf %1187, %1188 : vector<8x64xf32>
    %1190 = vector.extract_strided_slice %1177 {offsets = [0, 128], sizes = [8, 64], strides = [1, 1]} : vector<8x256xf32> to vector<8x64xf32>
    %1191 = math.tanh %1190 : vector<8x64xf32>
    %1192 = vector.extract_strided_slice %1177 {offsets = [0, 192], sizes = [8, 64], strides = [1, 1]} : vector<8x256xf32> to vector<8x64xf32>
    %1193 = arith.negf %1192 : vector<8x64xf32>
    %1194 = math.exp %1193 : vector<8x64xf32>
    %cst_312 = arith.constant 1.000000e+00 : f32
    %1195 = vector.broadcast %cst_312 : f32 to vector<8x64xf32>
    %1196 = arith.addf %1195, %1194 : vector<8x64xf32>
    %1197 = arith.divf %1195, %1196 : vector<8x64xf32>
    %1198 = arith.mulf %1189, %1125 : vector<8x64xf32>
    %1199 = arith.mulf %1183, %1191 : vector<8x64xf32>
    %1200 = arith.addf %1198, %1199 : vector<8x64xf32>
    %1201 = math.tanh %1200 : vector<8x64xf32>
    %1202 = arith.mulf %1197, %1201 : vector<8x64xf32>
    %1203 = arith.index_cast %1169 : i32 to index
    %c0_313 = arith.constant 0 : index
    %c0_314 = arith.constant 0 : index
    %1204 = vector.load %arg8[%1203, %c0_313, %c0_314] : memref<16x8x64xf32, #tpu.memory_space<vmem>>, vector<1x8x64xf32>
    %1205 = vector.shape_cast %1204 : vector<1x8x64xf32> to vector<8x64xf32>
    %1206 = vector.shape_cast %1202 : vector<8x64xf32> to vector<1x8x64xf32>
    tpu.vector_store %arg8[%1203, %c0_313, %c0_314], %1206 {strides = array<i32>} : memref<16x8x64xf32, #tpu.memory_space<vmem>>, vector<1x8x64xf32>,
    %c16_i32 = arith.constant 16 : i32
    return
  }
}

module attributes {stable_mosaic.version = 11 : i64} {
  func.func @_decoder_disc_kernel(%arg0: memref<6x8x32xf32, #tpu.memory_space<vmem>>, %arg1: memref<8x16x128xf32, #tpu.memory_space<vmem>>, %arg2: memref<32x512xf32, #tpu.memory_space<vmem>>, %arg3: memref<128x512xf32, #tpu.memory_space<vmem>>, %arg4: memref<1x512xf32, #tpu.memory_space<vmem>>, %arg5: memref<128x128xf32, #tpu.memory_space<vmem>>, %arg6: memref<256x128xf32, #tpu.memory_space<vmem>>, %arg7: memref<128x1xf32, #tpu.memory_space<vmem>>, %arg8: memref<1x1xf32, #tpu.memory_space<vmem>>, %arg9: memref<8x1xf32, #tpu.memory_space<vmem>>) attributes {dimension_semantics = [], scalar_prefetch = 0 : i64, scratch_operands = 0 : i64, tpu.core_type = #tpu.core_type<tc>} {
    %c0 = arith.constant 0 : index
    %c0_0 = arith.constant 0 : index
    %c0_1 = arith.constant 0 : index
    %0 = vector.load %arg1[%c0, %c0_0, %c0_1] : memref<8x16x128xf32, #tpu.memory_space<vmem>>, vector<8x16x128xf32>
    %c0_2 = arith.constant 0 : index
    %c0_3 = arith.constant 0 : index
    %1 = vector.load %arg2[%c0_2, %c0_3] : memref<32x512xf32, #tpu.memory_space<vmem>>, vector<32x512xf32>
    %c0_4 = arith.constant 0 : index
    %c0_5 = arith.constant 0 : index
    %2 = vector.load %arg3[%c0_4, %c0_5] : memref<128x512xf32, #tpu.memory_space<vmem>>, vector<128x512xf32>
    %c0_6 = arith.constant 0 : index
    %c0_7 = arith.constant 0 : index
    %3 = vector.load %arg4[%c0_6, %c0_7] : memref<1x512xf32, #tpu.memory_space<vmem>>, vector<1x512xf32>
    %c0_8 = arith.constant 0 : index
    %c0_9 = arith.constant 0 : index
    %4 = vector.load %arg5[%c0_8, %c0_9] : memref<128x128xf32, #tpu.memory_space<vmem>>, vector<128x128xf32>
    %c0_10 = arith.constant 0 : index
    %c0_11 = arith.constant 0 : index
    %5 = vector.load %arg6[%c0_10, %c0_11] : memref<256x128xf32, #tpu.memory_space<vmem>>, vector<128x128xf32>
    %c128 = arith.constant 128 : index
    %c0_12 = arith.constant 0 : index
    %6 = vector.load %arg6[%c128, %c0_12] : memref<256x128xf32, #tpu.memory_space<vmem>>, vector<128x128xf32>
    %cst = arith.constant 0.000000e+00 : f32
    %7 = vector.broadcast %cst : f32 to vector<8x128xf32>
    %c0_i32 = arith.constant 0 : i32
    %8 = arith.index_cast %c0_i32 : i32 to index
    %c0_13 = arith.constant 0 : index
    %c0_14 = arith.constant 0 : index
    %9 = vector.load %arg0[%8, %c0_13, %c0_14] : memref<6x8x32xf32, #tpu.memory_space<vmem>>, vector<1x8x32xf32>
    %10 = vector.shape_cast %9 : vector<1x8x32xf32> to vector<8x32xf32>
    %cst_15 = arith.constant dense<0.000000e+00> : vector<8x512xf32>
    %11 = tpu.matmul %10, %1, %cst_15 {dimension_numbers = #tpu.dot_dimension_numbers<[1], [0], [0], [1], [0, 0, 1, 1], [], []>} : vector<8x32xf32>, vector<32x512xf32>, vector<8x512xf32> -> vector<8x512xf32>
    %cst_16 = arith.constant dense<0.000000e+00> : vector<8x512xf32>
    %12 = tpu.matmul %7, %2, %cst_16 {dimension_numbers = #tpu.dot_dimension_numbers<[1], [0], [0], [1], [0, 0, 1, 1], [], []>} : vector<8x128xf32>, vector<128x512xf32>, vector<8x512xf32> -> vector<8x512xf32>
    %13 = arith.addf %11, %12 : vector<8x512xf32>
    %14 = vector.broadcast %3 : vector<1x512xf32> to vector<8x512xf32>
    %15 = arith.addf %13, %14 : vector<8x512xf32>
    %16 = vector.extract_strided_slice %15 {offsets = [0, 0], sizes = [8, 128], strides = [1, 1]} : vector<8x512xf32> to vector<8x128xf32>
    %17 = arith.negf %16 : vector<8x128xf32>
    %18 = math.exp %17 : vector<8x128xf32>
    %cst_17 = arith.constant 1.000000e+00 : f32
    %19 = vector.broadcast %cst_17 : f32 to vector<8x128xf32>
    %20 = arith.addf %19, %18 : vector<8x128xf32>
    %21 = arith.divf %19, %20 : vector<8x128xf32>
    %22 = vector.extract_strided_slice %15 {offsets = [0, 128], sizes = [8, 128], strides = [1, 1]} : vector<8x512xf32> to vector<8x128xf32>
    %23 = arith.negf %22 : vector<8x128xf32>
    %24 = math.exp %23 : vector<8x128xf32>
    %cst_18 = arith.constant 1.000000e+00 : f32
    %25 = vector.broadcast %cst_18 : f32 to vector<8x128xf32>
    %26 = arith.addf %25, %24 : vector<8x128xf32>
    %27 = arith.divf %25, %26 : vector<8x128xf32>
    %28 = vector.extract_strided_slice %15 {offsets = [0, 256], sizes = [8, 128], strides = [1, 1]} : vector<8x512xf32> to vector<8x128xf32>
    %29 = math.tanh %28 : vector<8x128xf32>
    %30 = vector.extract_strided_slice %15 {offsets = [0, 384], sizes = [8, 128], strides = [1, 1]} : vector<8x512xf32> to vector<8x128xf32>
    %31 = arith.negf %30 : vector<8x128xf32>
    %32 = math.exp %31 : vector<8x128xf32>
    %cst_19 = arith.constant 1.000000e+00 : f32
    %33 = vector.broadcast %cst_19 : f32 to vector<8x128xf32>
    %34 = arith.addf %33, %32 : vector<8x128xf32>
    %35 = arith.divf %33, %34 : vector<8x128xf32>
    %36 = arith.mulf %27, %7 : vector<8x128xf32>
    %37 = arith.mulf %21, %29 : vector<8x128xf32>
    %38 = arith.addf %36, %37 : vector<8x128xf32>
    %39 = math.tanh %38 : vector<8x128xf32>
    %40 = arith.mulf %35, %39 : vector<8x128xf32>
    %cst_20 = arith.constant dense<0.000000e+00> : vector<8x128xf32>
    %41 = tpu.matmul %40, %4, %cst_20 {dimension_numbers = #tpu.dot_dimension_numbers<[1], [0], [0], [1], [0, 0, 1, 1], [], []>} : vector<8x128xf32>, vector<128x128xf32>, vector<8x128xf32> -> vector<8x128xf32>
    %42 = vector.shape_cast %41 : vector<8x128xf32> to vector<8x1x128xf32>
    "tpu.trace_start"() <{level = 10 : i32, message = "bqh,bsh->bqs"}> : () -> ()
    %cst_21 = arith.constant dense<0.000000e+00> : vector<8x1x16xf32>
    %43 = tpu.matmul %42, %0, %cst_21 {dimension_numbers = #tpu.dot_dimension_numbers<[2], [2], [1], [1], [0, 0, 0, 1, 1, 1], [0], [0]>} : vector<8x1x128xf32>, vector<8x16x128xf32>, vector<8x1x16xf32> -> vector<8x1x16xf32>
    "tpu.trace_stop"() : () -> ()
    %cst_22 = arith.constant dense<0xFF800000> : vector<8x1xf32>
    %44 = vector.multi_reduction <maximumf>, %43, %cst_22 [2] : vector<8x1x16xf32> to vector<8x1xf32>
    %45 = vector.shape_cast %44 : vector<8x1xf32> to vector<8x1x1xf32>
    %46 = vector.broadcast %45 : vector<8x1x1xf32> to vector<8x1x16xf32>
    %47 = arith.subf %43, %46 : vector<8x1x16xf32>
    %48 = math.exp %47 : vector<8x1x16xf32>
    %cst_23 = arith.constant dense<0.000000e+00> : vector<8x1xf32>
    %49 = vector.multi_reduction <add>, %48, %cst_23 [2] : vector<8x1x16xf32> to vector<8x1xf32>
    %50 = vector.shape_cast %49 : vector<8x1xf32> to vector<8x1x1xf32>
    %51 = tpu.reciprocal %50 {approx = true} : vector<8x1x1xf32> -> vector<8x1x1xf32>
    %52 = vector.broadcast %51 : vector<8x1x1xf32> to vector<8x1x16xf32>
    %53 = arith.mulf %48, %52 : vector<8x1x16xf32>
    "tpu.trace_start"() <{level = 10 : i32, message = "bqs,bsh->bqh"}> : () -> ()
    %cst_24 = arith.constant dense<0.000000e+00> : vector<8x1x128xf32>
    %54 = tpu.matmul %53, %0, %cst_24 {dimension_numbers = #tpu.dot_dimension_numbers<[2], [1], [1], [2], [0, 0, 0, 1, 1, 2], [0], [0]>} : vector<8x1x16xf32>, vector<8x16x128xf32>, vector<8x1x128xf32> -> vector<8x1x128xf32>
    "tpu.trace_stop"() : () -> ()
    %55 = vector.shape_cast %54 : vector<8x1x128xf32> to vector<8x128xf32>
    %cst_25 = arith.constant dense<0.000000e+00> : vector<8x128xf32>
    %56 = tpu.matmul %55, %5, %cst_25 {dimension_numbers = #tpu.dot_dimension_numbers<[1], [0], [0], [1], [0, 0, 1, 1], [], []>} : vector<8x128xf32>, vector<128x128xf32>, vector<8x128xf32> -> vector<8x128xf32>
    %cst_26 = arith.constant dense<0.000000e+00> : vector<8x128xf32>
    %57 = tpu.matmul %40, %6, %cst_26 {dimension_numbers = #tpu.dot_dimension_numbers<[1], [0], [0], [1], [0, 0, 1, 1], [], []>} : vector<8x128xf32>, vector<128x128xf32>, vector<8x128xf32> -> vector<8x128xf32>
    %58 = arith.addf %56, %57 : vector<8x128xf32>
    %59 = math.tanh %58 : vector<8x128xf32>
    %c1_i32 = arith.constant 1 : i32
    %60 = arith.index_cast %c1_i32 : i32 to index
    %c0_27 = arith.constant 0 : index
    %c0_28 = arith.constant 0 : index
    %61 = vector.load %arg0[%60, %c0_27, %c0_28] : memref<6x8x32xf32, #tpu.memory_space<vmem>>, vector<1x8x32xf32>
    %62 = vector.shape_cast %61 : vector<1x8x32xf32> to vector<8x32xf32>
    %cst_29 = arith.constant dense<0.000000e+00> : vector<8x512xf32>
    %63 = tpu.matmul %62, %1, %cst_29 {dimension_numbers = #tpu.dot_dimension_numbers<[1], [0], [0], [1], [0, 0, 1, 1], [], []>} : vector<8x32xf32>, vector<32x512xf32>, vector<8x512xf32> -> vector<8x512xf32>
    %cst_30 = arith.constant dense<0.000000e+00> : vector<8x512xf32>
    %64 = tpu.matmul %59, %2, %cst_30 {dimension_numbers = #tpu.dot_dimension_numbers<[1], [0], [0], [1], [0, 0, 1, 1], [], []>} : vector<8x128xf32>, vector<128x512xf32>, vector<8x512xf32> -> vector<8x512xf32>
    %65 = arith.addf %63, %64 : vector<8x512xf32>
    %66 = vector.broadcast %3 : vector<1x512xf32> to vector<8x512xf32>
    %67 = arith.addf %65, %66 : vector<8x512xf32>
    %68 = vector.extract_strided_slice %67 {offsets = [0, 0], sizes = [8, 128], strides = [1, 1]} : vector<8x512xf32> to vector<8x128xf32>
    %69 = arith.negf %68 : vector<8x128xf32>
    %70 = math.exp %69 : vector<8x128xf32>
    %cst_31 = arith.constant 1.000000e+00 : f32
    %71 = vector.broadcast %cst_31 : f32 to vector<8x128xf32>
    %72 = arith.addf %71, %70 : vector<8x128xf32>
    %73 = arith.divf %71, %72 : vector<8x128xf32>
    %74 = vector.extract_strided_slice %67 {offsets = [0, 128], sizes = [8, 128], strides = [1, 1]} : vector<8x512xf32> to vector<8x128xf32>
    %75 = arith.negf %74 : vector<8x128xf32>
    %76 = math.exp %75 : vector<8x128xf32>
    %cst_32 = arith.constant 1.000000e+00 : f32
    %77 = vector.broadcast %cst_32 : f32 to vector<8x128xf32>
    %78 = arith.addf %77, %76 : vector<8x128xf32>
    %79 = arith.divf %77, %78 : vector<8x128xf32>
    %80 = vector.extract_strided_slice %67 {offsets = [0, 256], sizes = [8, 128], strides = [1, 1]} : vector<8x512xf32> to vector<8x128xf32>
    %81 = math.tanh %80 : vector<8x128xf32>
    %82 = vector.extract_strided_slice %67 {offsets = [0, 384], sizes = [8, 128], strides = [1, 1]} : vector<8x512xf32> to vector<8x128xf32>
    %83 = arith.negf %82 : vector<8x128xf32>
    %84 = math.exp %83 : vector<8x128xf32>
    %cst_33 = arith.constant 1.000000e+00 : f32
    %85 = vector.broadcast %cst_33 : f32 to vector<8x128xf32>
    %86 = arith.addf %85, %84 : vector<8x128xf32>
    %87 = arith.divf %85, %86 : vector<8x128xf32>
    %88 = arith.mulf %79, %38 : vector<8x128xf32>
    %89 = arith.mulf %73, %81 : vector<8x128xf32>
    %90 = arith.addf %88, %89 : vector<8x128xf32>
    %91 = math.tanh %90 : vector<8x128xf32>
    %92 = arith.mulf %87, %91 : vector<8x128xf32>
    %cst_34 = arith.constant dense<0.000000e+00> : vector<8x128xf32>
    %93 = tpu.matmul %92, %4, %cst_34 {dimension_numbers = #tpu.dot_dimension_numbers<[1], [0], [0], [1], [0, 0, 1, 1], [], []>} : vector<8x128xf32>, vector<128x128xf32>, vector<8x128xf32> -> vector<8x128xf32>
    %94 = vector.shape_cast %93 : vector<8x128xf32> to vector<8x1x128xf32>
    "tpu.trace_start"() <{level = 10 : i32, message = "bqh,bsh->bqs"}> : () -> ()
    %cst_35 = arith.constant dense<0.000000e+00> : vector<8x1x16xf32>
    %95 = tpu.matmul %94, %0, %cst_35 {dimension_numbers = #tpu.dot_dimension_numbers<[2], [2], [1], [1], [0, 0, 0, 1, 1, 1], [0], [0]>} : vector<8x1x128xf32>, vector<8x16x128xf32>, vector<8x1x16xf32> -> vector<8x1x16xf32>
    "tpu.trace_stop"() : () -> ()
    %cst_36 = arith.constant dense<0xFF800000> : vector<8x1xf32>
    %96 = vector.multi_reduction <maximumf>, %95, %cst_36 [2] : vector<8x1x16xf32> to vector<8x1xf32>
    %97 = vector.shape_cast %96 : vector<8x1xf32> to vector<8x1x1xf32>
    %98 = vector.broadcast %97 : vector<8x1x1xf32> to vector<8x1x16xf32>
    %99 = arith.subf %95, %98 : vector<8x1x16xf32>
    %100 = math.exp %99 : vector<8x1x16xf32>
    %cst_37 = arith.constant dense<0.000000e+00> : vector<8x1xf32>
    %101 = vector.multi_reduction <add>, %100, %cst_37 [2] : vector<8x1x16xf32> to vector<8x1xf32>
    %102 = vector.shape_cast %101 : vector<8x1xf32> to vector<8x1x1xf32>
    %103 = tpu.reciprocal %102 {approx = true} : vector<8x1x1xf32> -> vector<8x1x1xf32>
    %104 = vector.broadcast %103 : vector<8x1x1xf32> to vector<8x1x16xf32>
    %105 = arith.mulf %100, %104 : vector<8x1x16xf32>
    "tpu.trace_start"() <{level = 10 : i32, message = "bqs,bsh->bqh"}> : () -> ()
    %cst_38 = arith.constant dense<0.000000e+00> : vector<8x1x128xf32>
    %106 = tpu.matmul %105, %0, %cst_38 {dimension_numbers = #tpu.dot_dimension_numbers<[2], [1], [1], [2], [0, 0, 0, 1, 1, 2], [0], [0]>} : vector<8x1x16xf32>, vector<8x16x128xf32>, vector<8x1x128xf32> -> vector<8x1x128xf32>
    "tpu.trace_stop"() : () -> ()
    %107 = vector.shape_cast %106 : vector<8x1x128xf32> to vector<8x128xf32>
    %cst_39 = arith.constant dense<0.000000e+00> : vector<8x128xf32>
    %108 = tpu.matmul %107, %5, %cst_39 {dimension_numbers = #tpu.dot_dimension_numbers<[1], [0], [0], [1], [0, 0, 1, 1], [], []>} : vector<8x128xf32>, vector<128x128xf32>, vector<8x128xf32> -> vector<8x128xf32>
    %cst_40 = arith.constant dense<0.000000e+00> : vector<8x128xf32>
    %109 = tpu.matmul %92, %6, %cst_40 {dimension_numbers = #tpu.dot_dimension_numbers<[1], [0], [0], [1], [0, 0, 1, 1], [], []>} : vector<8x128xf32>, vector<128x128xf32>, vector<8x128xf32> -> vector<8x128xf32>
    %110 = arith.addf %108, %109 : vector<8x128xf32>
    %111 = math.tanh %110 : vector<8x128xf32>
    %c2_i32 = arith.constant 2 : i32
    %112 = arith.index_cast %c2_i32 : i32 to index
    %c0_41 = arith.constant 0 : index
    %c0_42 = arith.constant 0 : index
    %113 = vector.load %arg0[%112, %c0_41, %c0_42] : memref<6x8x32xf32, #tpu.memory_space<vmem>>, vector<1x8x32xf32>
    %114 = vector.shape_cast %113 : vector<1x8x32xf32> to vector<8x32xf32>
    %cst_43 = arith.constant dense<0.000000e+00> : vector<8x512xf32>
    %115 = tpu.matmul %114, %1, %cst_43 {dimension_numbers = #tpu.dot_dimension_numbers<[1], [0], [0], [1], [0, 0, 1, 1], [], []>} : vector<8x32xf32>, vector<32x512xf32>, vector<8x512xf32> -> vector<8x512xf32>
    %cst_44 = arith.constant dense<0.000000e+00> : vector<8x512xf32>
    %116 = tpu.matmul %111, %2, %cst_44 {dimension_numbers = #tpu.dot_dimension_numbers<[1], [0], [0], [1], [0, 0, 1, 1], [], []>} : vector<8x128xf32>, vector<128x512xf32>, vector<8x512xf32> -> vector<8x512xf32>
    %117 = arith.addf %115, %116 : vector<8x512xf32>
    %118 = vector.broadcast %3 : vector<1x512xf32> to vector<8x512xf32>
    %119 = arith.addf %117, %118 : vector<8x512xf32>
    %120 = vector.extract_strided_slice %119 {offsets = [0, 0], sizes = [8, 128], strides = [1, 1]} : vector<8x512xf32> to vector<8x128xf32>
    %121 = arith.negf %120 : vector<8x128xf32>
    %122 = math.exp %121 : vector<8x128xf32>
    %cst_45 = arith.constant 1.000000e+00 : f32
    %123 = vector.broadcast %cst_45 : f32 to vector<8x128xf32>
    %124 = arith.addf %123, %122 : vector<8x128xf32>
    %125 = arith.divf %123, %124 : vector<8x128xf32>
    %126 = vector.extract_strided_slice %119 {offsets = [0, 128], sizes = [8, 128], strides = [1, 1]} : vector<8x512xf32> to vector<8x128xf32>
    %127 = arith.negf %126 : vector<8x128xf32>
    %128 = math.exp %127 : vector<8x128xf32>
    %cst_46 = arith.constant 1.000000e+00 : f32
    %129 = vector.broadcast %cst_46 : f32 to vector<8x128xf32>
    %130 = arith.addf %129, %128 : vector<8x128xf32>
    %131 = arith.divf %129, %130 : vector<8x128xf32>
    %132 = vector.extract_strided_slice %119 {offsets = [0, 256], sizes = [8, 128], strides = [1, 1]} : vector<8x512xf32> to vector<8x128xf32>
    %133 = math.tanh %132 : vector<8x128xf32>
    %134 = vector.extract_strided_slice %119 {offsets = [0, 384], sizes = [8, 128], strides = [1, 1]} : vector<8x512xf32> to vector<8x128xf32>
    %135 = arith.negf %134 : vector<8x128xf32>
    %136 = math.exp %135 : vector<8x128xf32>
    %cst_47 = arith.constant 1.000000e+00 : f32
    %137 = vector.broadcast %cst_47 : f32 to vector<8x128xf32>
    %138 = arith.addf %137, %136 : vector<8x128xf32>
    %139 = arith.divf %137, %138 : vector<8x128xf32>
    %140 = arith.mulf %131, %90 : vector<8x128xf32>
    %141 = arith.mulf %125, %133 : vector<8x128xf32>
    %142 = arith.addf %140, %141 : vector<8x128xf32>
    %143 = math.tanh %142 : vector<8x128xf32>
    %144 = arith.mulf %139, %143 : vector<8x128xf32>
    %cst_48 = arith.constant dense<0.000000e+00> : vector<8x128xf32>
    %145 = tpu.matmul %144, %4, %cst_48 {dimension_numbers = #tpu.dot_dimension_numbers<[1], [0], [0], [1], [0, 0, 1, 1], [], []>} : vector<8x128xf32>, vector<128x128xf32>, vector<8x128xf32> -> vector<8x128xf32>
    %146 = vector.shape_cast %145 : vector<8x128xf32> to vector<8x1x128xf32>
    "tpu.trace_start"() <{level = 10 : i32, message = "bqh,bsh->bqs"}> : () -> ()
    %cst_49 = arith.constant dense<0.000000e+00> : vector<8x1x16xf32>
    %147 = tpu.matmul %146, %0, %cst_49 {dimension_numbers = #tpu.dot_dimension_numbers<[2], [2], [1], [1], [0, 0, 0, 1, 1, 1], [0], [0]>} : vector<8x1x128xf32>, vector<8x16x128xf32>, vector<8x1x16xf32> -> vector<8x1x16xf32>
    "tpu.trace_stop"() : () -> ()
    %cst_50 = arith.constant dense<0xFF800000> : vector<8x1xf32>
    %148 = vector.multi_reduction <maximumf>, %147, %cst_50 [2] : vector<8x1x16xf32> to vector<8x1xf32>
    %149 = vector.shape_cast %148 : vector<8x1xf32> to vector<8x1x1xf32>
    %150 = vector.broadcast %149 : vector<8x1x1xf32> to vector<8x1x16xf32>
    %151 = arith.subf %147, %150 : vector<8x1x16xf32>
    %152 = math.exp %151 : vector<8x1x16xf32>
    %cst_51 = arith.constant dense<0.000000e+00> : vector<8x1xf32>
    %153 = vector.multi_reduction <add>, %152, %cst_51 [2] : vector<8x1x16xf32> to vector<8x1xf32>
    %154 = vector.shape_cast %153 : vector<8x1xf32> to vector<8x1x1xf32>
    %155 = tpu.reciprocal %154 {approx = true} : vector<8x1x1xf32> -> vector<8x1x1xf32>
    %156 = vector.broadcast %155 : vector<8x1x1xf32> to vector<8x1x16xf32>
    %157 = arith.mulf %152, %156 : vector<8x1x16xf32>
    "tpu.trace_start"() <{level = 10 : i32, message = "bqs,bsh->bqh"}> : () -> ()
    %cst_52 = arith.constant dense<0.000000e+00> : vector<8x1x128xf32>
    %158 = tpu.matmul %157, %0, %cst_52 {dimension_numbers = #tpu.dot_dimension_numbers<[2], [1], [1], [2], [0, 0, 0, 1, 1, 2], [0], [0]>} : vector<8x1x16xf32>, vector<8x16x128xf32>, vector<8x1x128xf32> -> vector<8x1x128xf32>
    "tpu.trace_stop"() : () -> ()
    %159 = vector.shape_cast %158 : vector<8x1x128xf32> to vector<8x128xf32>
    %cst_53 = arith.constant dense<0.000000e+00> : vector<8x128xf32>
    %160 = tpu.matmul %159, %5, %cst_53 {dimension_numbers = #tpu.dot_dimension_numbers<[1], [0], [0], [1], [0, 0, 1, 1], [], []>} : vector<8x128xf32>, vector<128x128xf32>, vector<8x128xf32> -> vector<8x128xf32>
    %cst_54 = arith.constant dense<0.000000e+00> : vector<8x128xf32>
    %161 = tpu.matmul %144, %6, %cst_54 {dimension_numbers = #tpu.dot_dimension_numbers<[1], [0], [0], [1], [0, 0, 1, 1], [], []>} : vector<8x128xf32>, vector<128x128xf32>, vector<8x128xf32> -> vector<8x128xf32>
    %162 = arith.addf %160, %161 : vector<8x128xf32>
    %163 = math.tanh %162 : vector<8x128xf32>
    %c3_i32 = arith.constant 3 : i32
    %164 = arith.index_cast %c3_i32 : i32 to index
    %c0_55 = arith.constant 0 : index
    %c0_56 = arith.constant 0 : index
    %165 = vector.load %arg0[%164, %c0_55, %c0_56] : memref<6x8x32xf32, #tpu.memory_space<vmem>>, vector<1x8x32xf32>
    %166 = vector.shape_cast %165 : vector<1x8x32xf32> to vector<8x32xf32>
    %cst_57 = arith.constant dense<0.000000e+00> : vector<8x512xf32>
    %167 = tpu.matmul %166, %1, %cst_57 {dimension_numbers = #tpu.dot_dimension_numbers<[1], [0], [0], [1], [0, 0, 1, 1], [], []>} : vector<8x32xf32>, vector<32x512xf32>, vector<8x512xf32> -> vector<8x512xf32>
    %cst_58 = arith.constant dense<0.000000e+00> : vector<8x512xf32>
    %168 = tpu.matmul %163, %2, %cst_58 {dimension_numbers = #tpu.dot_dimension_numbers<[1], [0], [0], [1], [0, 0, 1, 1], [], []>} : vector<8x128xf32>, vector<128x512xf32>, vector<8x512xf32> -> vector<8x512xf32>
    %169 = arith.addf %167, %168 : vector<8x512xf32>
    %170 = vector.broadcast %3 : vector<1x512xf32> to vector<8x512xf32>
    %171 = arith.addf %169, %170 : vector<8x512xf32>
    %172 = vector.extract_strided_slice %171 {offsets = [0, 0], sizes = [8, 128], strides = [1, 1]} : vector<8x512xf32> to vector<8x128xf32>
    %173 = arith.negf %172 : vector<8x128xf32>
    %174 = math.exp %173 : vector<8x128xf32>
    %cst_59 = arith.constant 1.000000e+00 : f32
    %175 = vector.broadcast %cst_59 : f32 to vector<8x128xf32>
    %176 = arith.addf %175, %174 : vector<8x128xf32>
    %177 = arith.divf %175, %176 : vector<8x128xf32>
    %178 = vector.extract_strided_slice %171 {offsets = [0, 128], sizes = [8, 128], strides = [1, 1]} : vector<8x512xf32> to vector<8x128xf32>
    %179 = arith.negf %178 : vector<8x128xf32>
    %180 = math.exp %179 : vector<8x128xf32>
    %cst_60 = arith.constant 1.000000e+00 : f32
    %181 = vector.broadcast %cst_60 : f32 to vector<8x128xf32>
    %182 = arith.addf %181, %180 : vector<8x128xf32>
    %183 = arith.divf %181, %182 : vector<8x128xf32>
    %184 = vector.extract_strided_slice %171 {offsets = [0, 256], sizes = [8, 128], strides = [1, 1]} : vector<8x512xf32> to vector<8x128xf32>
    %185 = math.tanh %184 : vector<8x128xf32>
    %186 = vector.extract_strided_slice %171 {offsets = [0, 384], sizes = [8, 128], strides = [1, 1]} : vector<8x512xf32> to vector<8x128xf32>
    %187 = arith.negf %186 : vector<8x128xf32>
    %188 = math.exp %187 : vector<8x128xf32>
    %cst_61 = arith.constant 1.000000e+00 : f32
    %189 = vector.broadcast %cst_61 : f32 to vector<8x128xf32>
    %190 = arith.addf %189, %188 : vector<8x128xf32>
    %191 = arith.divf %189, %190 : vector<8x128xf32>
    %192 = arith.mulf %183, %142 : vector<8x128xf32>
    %193 = arith.mulf %177, %185 : vector<8x128xf32>
    %194 = arith.addf %192, %193 : vector<8x128xf32>
    %195 = math.tanh %194 : vector<8x128xf32>
    %196 = arith.mulf %191, %195 : vector<8x128xf32>
    %cst_62 = arith.constant dense<0.000000e+00> : vector<8x128xf32>
    %197 = tpu.matmul %196, %4, %cst_62 {dimension_numbers = #tpu.dot_dimension_numbers<[1], [0], [0], [1], [0, 0, 1, 1], [], []>} : vector<8x128xf32>, vector<128x128xf32>, vector<8x128xf32> -> vector<8x128xf32>
    %198 = vector.shape_cast %197 : vector<8x128xf32> to vector<8x1x128xf32>
    "tpu.trace_start"() <{level = 10 : i32, message = "bqh,bsh->bqs"}> : () -> ()
    %cst_63 = arith.constant dense<0.000000e+00> : vector<8x1x16xf32>
    %199 = tpu.matmul %198, %0, %cst_63 {dimension_numbers = #tpu.dot_dimension_numbers<[2], [2], [1], [1], [0, 0, 0, 1, 1, 1], [0], [0]>} : vector<8x1x128xf32>, vector<8x16x128xf32>, vector<8x1x16xf32> -> vector<8x1x16xf32>
    "tpu.trace_stop"() : () -> ()
    %cst_64 = arith.constant dense<0xFF800000> : vector<8x1xf32>
    %200 = vector.multi_reduction <maximumf>, %199, %cst_64 [2] : vector<8x1x16xf32> to vector<8x1xf32>
    %201 = vector.shape_cast %200 : vector<8x1xf32> to vector<8x1x1xf32>
    %202 = vector.broadcast %201 : vector<8x1x1xf32> to vector<8x1x16xf32>
    %203 = arith.subf %199, %202 : vector<8x1x16xf32>
    %204 = math.exp %203 : vector<8x1x16xf32>
    %cst_65 = arith.constant dense<0.000000e+00> : vector<8x1xf32>
    %205 = vector.multi_reduction <add>, %204, %cst_65 [2] : vector<8x1x16xf32> to vector<8x1xf32>
    %206 = vector.shape_cast %205 : vector<8x1xf32> to vector<8x1x1xf32>
    %207 = tpu.reciprocal %206 {approx = true} : vector<8x1x1xf32> -> vector<8x1x1xf32>
    %208 = vector.broadcast %207 : vector<8x1x1xf32> to vector<8x1x16xf32>
    %209 = arith.mulf %204, %208 : vector<8x1x16xf32>
    "tpu.trace_start"() <{level = 10 : i32, message = "bqs,bsh->bqh"}> : () -> ()
    %cst_66 = arith.constant dense<0.000000e+00> : vector<8x1x128xf32>
    %210 = tpu.matmul %209, %0, %cst_66 {dimension_numbers = #tpu.dot_dimension_numbers<[2], [1], [1], [2], [0, 0, 0, 1, 1, 2], [0], [0]>} : vector<8x1x16xf32>, vector<8x16x128xf32>, vector<8x1x128xf32> -> vector<8x1x128xf32>
    "tpu.trace_stop"() : () -> ()
    %211 = vector.shape_cast %210 : vector<8x1x128xf32> to vector<8x128xf32>
    %cst_67 = arith.constant dense<0.000000e+00> : vector<8x128xf32>
    %212 = tpu.matmul %211, %5, %cst_67 {dimension_numbers = #tpu.dot_dimension_numbers<[1], [0], [0], [1], [0, 0, 1, 1], [], []>} : vector<8x128xf32>, vector<128x128xf32>, vector<8x128xf32> -> vector<8x128xf32>
    %cst_68 = arith.constant dense<0.000000e+00> : vector<8x128xf32>
    %213 = tpu.matmul %196, %6, %cst_68 {dimension_numbers = #tpu.dot_dimension_numbers<[1], [0], [0], [1], [0, 0, 1, 1], [], []>} : vector<8x128xf32>, vector<128x128xf32>, vector<8x128xf32> -> vector<8x128xf32>
    %214 = arith.addf %212, %213 : vector<8x128xf32>
    %215 = math.tanh %214 : vector<8x128xf32>
    %c4_i32 = arith.constant 4 : i32
    %216 = arith.index_cast %c4_i32 : i32 to index
    %c0_69 = arith.constant 0 : index
    %c0_70 = arith.constant 0 : index
    %217 = vector.load %arg0[%216, %c0_69, %c0_70] : memref<6x8x32xf32, #tpu.memory_space<vmem>>, vector<1x8x32xf32>
    %218 = vector.shape_cast %217 : vector<1x8x32xf32> to vector<8x32xf32>
    %cst_71 = arith.constant dense<0.000000e+00> : vector<8x512xf32>
    %219 = tpu.matmul %218, %1, %cst_71 {dimension_numbers = #tpu.dot_dimension_numbers<[1], [0], [0], [1], [0, 0, 1, 1], [], []>} : vector<8x32xf32>, vector<32x512xf32>, vector<8x512xf32> -> vector<8x512xf32>
    %cst_72 = arith.constant dense<0.000000e+00> : vector<8x512xf32>
    %220 = tpu.matmul %215, %2, %cst_72 {dimension_numbers = #tpu.dot_dimension_numbers<[1], [0], [0], [1], [0, 0, 1, 1], [], []>} : vector<8x128xf32>, vector<128x512xf32>, vector<8x512xf32> -> vector<8x512xf32>
    %221 = arith.addf %219, %220 : vector<8x512xf32>
    %222 = vector.broadcast %3 : vector<1x512xf32> to vector<8x512xf32>
    %223 = arith.addf %221, %222 : vector<8x512xf32>
    %224 = vector.extract_strided_slice %223 {offsets = [0, 0], sizes = [8, 128], strides = [1, 1]} : vector<8x512xf32> to vector<8x128xf32>
    %225 = arith.negf %224 : vector<8x128xf32>
    %226 = math.exp %225 : vector<8x128xf32>
    %cst_73 = arith.constant 1.000000e+00 : f32
    %227 = vector.broadcast %cst_73 : f32 to vector<8x128xf32>
    %228 = arith.addf %227, %226 : vector<8x128xf32>
    %229 = arith.divf %227, %228 : vector<8x128xf32>
    %230 = vector.extract_strided_slice %223 {offsets = [0, 128], sizes = [8, 128], strides = [1, 1]} : vector<8x512xf32> to vector<8x128xf32>
    %231 = arith.negf %230 : vector<8x128xf32>
    %232 = math.exp %231 : vector<8x128xf32>
    %cst_74 = arith.constant 1.000000e+00 : f32
    %233 = vector.broadcast %cst_74 : f32 to vector<8x128xf32>
    %234 = arith.addf %233, %232 : vector<8x128xf32>
    %235 = arith.divf %233, %234 : vector<8x128xf32>
    %236 = vector.extract_strided_slice %223 {offsets = [0, 256], sizes = [8, 128], strides = [1, 1]} : vector<8x512xf32> to vector<8x128xf32>
    %237 = math.tanh %236 : vector<8x128xf32>
    %238 = vector.extract_strided_slice %223 {offsets = [0, 384], sizes = [8, 128], strides = [1, 1]} : vector<8x512xf32> to vector<8x128xf32>
    %239 = arith.negf %238 : vector<8x128xf32>
    %240 = math.exp %239 : vector<8x128xf32>
    %cst_75 = arith.constant 1.000000e+00 : f32
    %241 = vector.broadcast %cst_75 : f32 to vector<8x128xf32>
    %242 = arith.addf %241, %240 : vector<8x128xf32>
    %243 = arith.divf %241, %242 : vector<8x128xf32>
    %244 = arith.mulf %235, %194 : vector<8x128xf32>
    %245 = arith.mulf %229, %237 : vector<8x128xf32>
    %246 = arith.addf %244, %245 : vector<8x128xf32>
    %247 = math.tanh %246 : vector<8x128xf32>
    %248 = arith.mulf %243, %247 : vector<8x128xf32>
    %cst_76 = arith.constant dense<0.000000e+00> : vector<8x128xf32>
    %249 = tpu.matmul %248, %4, %cst_76 {dimension_numbers = #tpu.dot_dimension_numbers<[1], [0], [0], [1], [0, 0, 1, 1], [], []>} : vector<8x128xf32>, vector<128x128xf32>, vector<8x128xf32> -> vector<8x128xf32>
    %250 = vector.shape_cast %249 : vector<8x128xf32> to vector<8x1x128xf32>
    "tpu.trace_start"() <{level = 10 : i32, message = "bqh,bsh->bqs"}> : () -> ()
    %cst_77 = arith.constant dense<0.000000e+00> : vector<8x1x16xf32>
    %251 = tpu.matmul %250, %0, %cst_77 {dimension_numbers = #tpu.dot_dimension_numbers<[2], [2], [1], [1], [0, 0, 0, 1, 1, 1], [0], [0]>} : vector<8x1x128xf32>, vector<8x16x128xf32>, vector<8x1x16xf32> -> vector<8x1x16xf32>
    "tpu.trace_stop"() : () -> ()
    %cst_78 = arith.constant dense<0xFF800000> : vector<8x1xf32>
    %252 = vector.multi_reduction <maximumf>, %251, %cst_78 [2] : vector<8x1x16xf32> to vector<8x1xf32>
    %253 = vector.shape_cast %252 : vector<8x1xf32> to vector<8x1x1xf32>
    %254 = vector.broadcast %253 : vector<8x1x1xf32> to vector<8x1x16xf32>
    %255 = arith.subf %251, %254 : vector<8x1x16xf32>
    %256 = math.exp %255 : vector<8x1x16xf32>
    %cst_79 = arith.constant dense<0.000000e+00> : vector<8x1xf32>
    %257 = vector.multi_reduction <add>, %256, %cst_79 [2] : vector<8x1x16xf32> to vector<8x1xf32>
    %258 = vector.shape_cast %257 : vector<8x1xf32> to vector<8x1x1xf32>
    %259 = tpu.reciprocal %258 {approx = true} : vector<8x1x1xf32> -> vector<8x1x1xf32>
    %260 = vector.broadcast %259 : vector<8x1x1xf32> to vector<8x1x16xf32>
    %261 = arith.mulf %256, %260 : vector<8x1x16xf32>
    "tpu.trace_start"() <{level = 10 : i32, message = "bqs,bsh->bqh"}> : () -> ()
    %cst_80 = arith.constant dense<0.000000e+00> : vector<8x1x128xf32>
    %262 = tpu.matmul %261, %0, %cst_80 {dimension_numbers = #tpu.dot_dimension_numbers<[2], [1], [1], [2], [0, 0, 0, 1, 1, 2], [0], [0]>} : vector<8x1x16xf32>, vector<8x16x128xf32>, vector<8x1x128xf32> -> vector<8x1x128xf32>
    "tpu.trace_stop"() : () -> ()
    %263 = vector.shape_cast %262 : vector<8x1x128xf32> to vector<8x128xf32>
    %cst_81 = arith.constant dense<0.000000e+00> : vector<8x128xf32>
    %264 = tpu.matmul %263, %5, %cst_81 {dimension_numbers = #tpu.dot_dimension_numbers<[1], [0], [0], [1], [0, 0, 1, 1], [], []>} : vector<8x128xf32>, vector<128x128xf32>, vector<8x128xf32> -> vector<8x128xf32>
    %cst_82 = arith.constant dense<0.000000e+00> : vector<8x128xf32>
    %265 = tpu.matmul %248, %6, %cst_82 {dimension_numbers = #tpu.dot_dimension_numbers<[1], [0], [0], [1], [0, 0, 1, 1], [], []>} : vector<8x128xf32>, vector<128x128xf32>, vector<8x128xf32> -> vector<8x128xf32>
    %266 = arith.addf %264, %265 : vector<8x128xf32>
    %267 = math.tanh %266 : vector<8x128xf32>
    %c5_i32 = arith.constant 5 : i32
    %268 = arith.index_cast %c5_i32 : i32 to index
    %c0_83 = arith.constant 0 : index
    %c0_84 = arith.constant 0 : index
    %269 = vector.load %arg0[%268, %c0_83, %c0_84] : memref<6x8x32xf32, #tpu.memory_space<vmem>>, vector<1x8x32xf32>
    %270 = vector.shape_cast %269 : vector<1x8x32xf32> to vector<8x32xf32>
    %cst_85 = arith.constant dense<0.000000e+00> : vector<8x512xf32>
    %271 = tpu.matmul %270, %1, %cst_85 {dimension_numbers = #tpu.dot_dimension_numbers<[1], [0], [0], [1], [0, 0, 1, 1], [], []>} : vector<8x32xf32>, vector<32x512xf32>, vector<8x512xf32> -> vector<8x512xf32>
    %cst_86 = arith.constant dense<0.000000e+00> : vector<8x512xf32>
    %272 = tpu.matmul %267, %2, %cst_86 {dimension_numbers = #tpu.dot_dimension_numbers<[1], [0], [0], [1], [0, 0, 1, 1], [], []>} : vector<8x128xf32>, vector<128x512xf32>, vector<8x512xf32> -> vector<8x512xf32>
    %273 = arith.addf %271, %272 : vector<8x512xf32>
    %274 = vector.broadcast %3 : vector<1x512xf32> to vector<8x512xf32>
    %275 = arith.addf %273, %274 : vector<8x512xf32>
    %276 = vector.extract_strided_slice %275 {offsets = [0, 0], sizes = [8, 128], strides = [1, 1]} : vector<8x512xf32> to vector<8x128xf32>
    %277 = arith.negf %276 : vector<8x128xf32>
    %278 = math.exp %277 : vector<8x128xf32>
    %cst_87 = arith.constant 1.000000e+00 : f32
    %279 = vector.broadcast %cst_87 : f32 to vector<8x128xf32>
    %280 = arith.addf %279, %278 : vector<8x128xf32>
    %281 = arith.divf %279, %280 : vector<8x128xf32>
    %282 = vector.extract_strided_slice %275 {offsets = [0, 128], sizes = [8, 128], strides = [1, 1]} : vector<8x512xf32> to vector<8x128xf32>
    %283 = arith.negf %282 : vector<8x128xf32>
    %284 = math.exp %283 : vector<8x128xf32>
    %cst_88 = arith.constant 1.000000e+00 : f32
    %285 = vector.broadcast %cst_88 : f32 to vector<8x128xf32>
    %286 = arith.addf %285, %284 : vector<8x128xf32>
    %287 = arith.divf %285, %286 : vector<8x128xf32>
    %288 = vector.extract_strided_slice %275 {offsets = [0, 256], sizes = [8, 128], strides = [1, 1]} : vector<8x512xf32> to vector<8x128xf32>
    %289 = math.tanh %288 : vector<8x128xf32>
    %290 = vector.extract_strided_slice %275 {offsets = [0, 384], sizes = [8, 128], strides = [1, 1]} : vector<8x512xf32> to vector<8x128xf32>
    %291 = arith.negf %290 : vector<8x128xf32>
    %292 = math.exp %291 : vector<8x128xf32>
    %cst_89 = arith.constant 1.000000e+00 : f32
    %293 = vector.broadcast %cst_89 : f32 to vector<8x128xf32>
    %294 = arith.addf %293, %292 : vector<8x128xf32>
    %295 = arith.divf %293, %294 : vector<8x128xf32>
    %296 = arith.mulf %287, %246 : vector<8x128xf32>
    %297 = arith.mulf %281, %289 : vector<8x128xf32>
    %298 = arith.addf %296, %297 : vector<8x128xf32>
    %299 = math.tanh %298 : vector<8x128xf32>
    %300 = arith.mulf %295, %299 : vector<8x128xf32>
    %cst_90 = arith.constant dense<0.000000e+00> : vector<8x128xf32>
    %301 = tpu.matmul %300, %4, %cst_90 {dimension_numbers = #tpu.dot_dimension_numbers<[1], [0], [0], [1], [0, 0, 1, 1], [], []>} : vector<8x128xf32>, vector<128x128xf32>, vector<8x128xf32> -> vector<8x128xf32>
    %302 = vector.shape_cast %301 : vector<8x128xf32> to vector<8x1x128xf32>
    "tpu.trace_start"() <{level = 10 : i32, message = "bqh,bsh->bqs"}> : () -> ()
    %cst_91 = arith.constant dense<0.000000e+00> : vector<8x1x16xf32>
    %303 = tpu.matmul %302, %0, %cst_91 {dimension_numbers = #tpu.dot_dimension_numbers<[2], [2], [1], [1], [0, 0, 0, 1, 1, 1], [0], [0]>} : vector<8x1x128xf32>, vector<8x16x128xf32>, vector<8x1x16xf32> -> vector<8x1x16xf32>
    "tpu.trace_stop"() : () -> ()
    %cst_92 = arith.constant dense<0xFF800000> : vector<8x1xf32>
    %304 = vector.multi_reduction <maximumf>, %303, %cst_92 [2] : vector<8x1x16xf32> to vector<8x1xf32>
    %305 = vector.shape_cast %304 : vector<8x1xf32> to vector<8x1x1xf32>
    %306 = vector.broadcast %305 : vector<8x1x1xf32> to vector<8x1x16xf32>
    %307 = arith.subf %303, %306 : vector<8x1x16xf32>
    %308 = math.exp %307 : vector<8x1x16xf32>
    %cst_93 = arith.constant dense<0.000000e+00> : vector<8x1xf32>
    %309 = vector.multi_reduction <add>, %308, %cst_93 [2] : vector<8x1x16xf32> to vector<8x1xf32>
    %310 = vector.shape_cast %309 : vector<8x1xf32> to vector<8x1x1xf32>
    %311 = tpu.reciprocal %310 {approx = true} : vector<8x1x1xf32> -> vector<8x1x1xf32>
    %312 = vector.broadcast %311 : vector<8x1x1xf32> to vector<8x1x16xf32>
    %313 = arith.mulf %308, %312 : vector<8x1x16xf32>
    "tpu.trace_start"() <{level = 10 : i32, message = "bqs,bsh->bqh"}> : () -> ()
    %cst_94 = arith.constant dense<0.000000e+00> : vector<8x1x128xf32>
    %314 = tpu.matmul %313, %0, %cst_94 {dimension_numbers = #tpu.dot_dimension_numbers<[2], [1], [1], [2], [0, 0, 0, 1, 1, 2], [0], [0]>} : vector<8x1x16xf32>, vector<8x16x128xf32>, vector<8x1x128xf32> -> vector<8x1x128xf32>
    "tpu.trace_stop"() : () -> ()
    %315 = vector.shape_cast %314 : vector<8x1x128xf32> to vector<8x128xf32>
    %cst_95 = arith.constant dense<0.000000e+00> : vector<8x128xf32>
    %316 = tpu.matmul %315, %5, %cst_95 {dimension_numbers = #tpu.dot_dimension_numbers<[1], [0], [0], [1], [0, 0, 1, 1], [], []>} : vector<8x128xf32>, vector<128x128xf32>, vector<8x128xf32> -> vector<8x128xf32>
    %cst_96 = arith.constant dense<0.000000e+00> : vector<8x128xf32>
    %317 = tpu.matmul %300, %6, %cst_96 {dimension_numbers = #tpu.dot_dimension_numbers<[1], [0], [0], [1], [0, 0, 1, 1], [], []>} : vector<8x128xf32>, vector<128x128xf32>, vector<8x128xf32> -> vector<8x128xf32>
    %318 = arith.addf %316, %317 : vector<8x128xf32>
    %319 = math.tanh %318 : vector<8x128xf32>
    %c6_i32 = arith.constant 6 : i32
    %c0_97 = arith.constant 0 : index
    %c0_98 = arith.constant 0 : index
    %320 = vector.load %arg7[%c0_97, %c0_98] : memref<128x1xf32, #tpu.memory_space<vmem>>, vector<128x1xf32>
    %cst_99 = arith.constant dense<0.000000e+00> : vector<8x1xf32>
    %321 = tpu.matmul %319, %320, %cst_99 {dimension_numbers = #tpu.dot_dimension_numbers<[1], [0], [0], [1], [0, 0, 1, 1], [], []>} : vector<8x128xf32>, vector<128x1xf32>, vector<8x1xf32> -> vector<8x1xf32>
    %c0_100 = arith.constant 0 : index
    %c0_101 = arith.constant 0 : index
    %322 = vector.load %arg8[%c0_100, %c0_101] : memref<1x1xf32, #tpu.memory_space<vmem>>, vector<1x1xf32>
    %323 = vector.broadcast %322 : vector<1x1xf32> to vector<8x1xf32>
    %324 = arith.addf %321, %323 : vector<8x1xf32>
    %325 = arith.negf %324 : vector<8x1xf32>
    %326 = math.exp %325 : vector<8x1xf32>
    %cst_102 = arith.constant 1.000000e+00 : f32
    %327 = vector.broadcast %cst_102 : f32 to vector<8x1xf32>
    %328 = arith.addf %327, %326 : vector<8x1xf32>
    %329 = arith.divf %327, %328 : vector<8x1xf32>
    %c0_103 = arith.constant 0 : index
    %c0_104 = arith.constant 0 : index
    %330 = vector.load %arg9[%c0_103, %c0_104] : memref<8x1xf32, #tpu.memory_space<vmem>>, vector<8x1xf32>
    tpu.vector_store %arg9[%c0_103, %c0_104], %329 {strides = array<i32>} : memref<8x1xf32, #tpu.memory_space<vmem>>, vector<8x1xf32>,
    return
  }
}

</mosaic_0001>

<bundles_post_ra>
// kernel: language_discriminator_forward.2
= control target key start
LH: loop header
LB: loop body
LE: loop exit
PB: predicated region body
PF: predicated region fallthrough
CT: control target
= control target key end

     0   :  { %v7311_v3 = vmov 0.0   ;;  %vm162_vm0 = vcmask 1040384   ;;  %vm158_vm1 = vcmask 269312   ;;  %vm83_vm2 = vcmask 523264   ;;  %s8742_s2 = inlined_call_operand.vmem [shape: f32[64,256], index: 2, kind: input, shape index: {}]   ;;  %s8743_s5 = inlined_call_operand.vmem [shape: f32[64,256], index: 5, kind: input, shape index: {}]   ;;  %s8744_s1 = inlined_call_operand.vmem [shape: f32[33,256], index: 1, kind: input, shape index: {}]   ;;  %s8745_s4 = inlined_call_operand.vmem [shape: f32[33,256], index: 4, kind: input, shape index: {}]   ;;  %s8746_s0 = inlined_call_operand.vmem [shape: f32[16,8,33], index: 0, kind: input, shape index: {}]   ;;  %s8747_s3 = inlined_call_operand.vmem [shape: f32[1,256], index: 3, kind: input, shape index: {}]   ;;  %s8748_s6 = inlined_call_operand.vmem [shape: f32[1,256], index: 6, kind: input, shape index: {}]   ;;  %s8749_s7 = inlined_call_operand.vmem [shape: f32[16,8,64], index: 7, kind: output, shape index: {0}]   ;;  %s8750_s8 = inlined_call_operand.vmem [shape: f32[16,8,64], index: 8, kind: output, shape index: {1}]  }
   0x1   :  { %v39_v0 = vld [vmem:[%s8742_s2 + $0x8] sm:$0xff]  ;;  %v41_v1 = vld [vmem:[%s8742_s2 + $0x18] sm:$0xff]  ;;  %151 = vmatprep.mubr.f32.mxu0 %v7311_v3  ;;  %346 = vmatprep.mubr.f32.mxu1 %v7311_v3  ;;  %v38_v6 = vld [vmem:[%s8742_s2] sm:$0xff] }
   0x2   :  { %v66_v2 = vld [vmem:[%s8743_s5 + $0x8] sm:$0xff]  ;;  %v7369_v4 = vpack.c.bf16 %v41_v1, %v39_v0  ;;  %v68_v5 = vld [vmem:[%s8743_s5 + $0x18] sm:$0xff]  ;;  %v40_v7 = vld [vmem:[%s8742_s2 + $0x10] sm:$0xff] }
   0x3   :  { %v7380_v8 = vpack.c.bf16 %v68_v5, %v66_v2  ;;  %v7382_v9 = vpack.c.bf16 %v40_v7, %v38_v6  ;;  %v65_v10 = vld [vmem:[%s8743_s5] sm:$0xff]  ;;  %v67_v11 = vld [vmem:[%s8743_s5 + $0x10] sm:$0xff]  ;;  %v43_v12 = vld [vmem:[%s8742_s2 + $0x28] sm:$0xff] }
   0x4   :  { %6086 = vmatprep.subr.bf16.mxu0 %v7369_v4  ;;  %v7394_v13 = vpack.c.bf16 %v67_v11, %v65_v10  ;;  %v45_v14 = vld [vmem:[%s8742_s2 + $0x38] sm:$0xff]  ;;  %v70_v15 = vld [vmem:[%s8743_s5 + $0x28] sm:$0xff]  ;;  %v42_v19 = vld [vmem:[%s8742_s2 + $0x20] sm:$0xff] }
   0x5   :  { %v72_v16 = vld [vmem:[%s8743_s5 + $0x38] sm:$0xff]  ;;  %6110 = vmatprep.subr.bf16.mxu1 %v7380_v8  ;;  %6088 = vmatpush1.bf16.msra.mxu0 %v7382_v9  ;;  %v7407_v17 = vpack.c.bf16 %v45_v14, %v43_v12  ;;  %v44_v20 = vld [vmem:[%s8742_s2 + $0x30] sm:$0xff]  ;;  %v69_v21 = vld [vmem:[%s8743_s5 + $0x20] sm:$0xff] }
   0x6   :  { %v7409_v18 = vpack.c.bf16 %v72_v16, %v70_v15  ;;  %6112 = vmatpush1.bf16.msra.mxu1 %v7394_v13  ;;  %v7421_v22 = vpack.c.bf16 %v44_v20, %v42_v19  ;;  %v71_v23 = vld [vmem:[%s8743_s5 + $0x30] sm:$0xff]  ;;  %v47_v24 = vld [vmem:[%s8742_s2 + $0x48] sm:$0xff]  ;;  %v49_v25 = vld [vmem:[%s8742_s2 + $0x58] sm:$0xff] }
   0x7   :  { %6090 = vmatprep.subr.bf16.mxu0 %v7407_v17  ;;  %v7434_v26 = vpack.c.bf16 %v71_v23, %v69_v21  ;;  %v7436_v27 = vpack.c.bf16 %v49_v25, %v47_v24  ;;  %v74_v28 = vld [vmem:[%s8743_s5 + $0x48] sm:$0xff]  ;;  %v76_v29 = vld [vmem:[%s8743_s5 + $0x58] sm:$0xff]  ;;  %v46_v30 = vld [vmem:[%s8742_s2 + $0x40] sm:$0xff]  ;;  %v241_v23 = vlaneseq }
   0x8   :  { %6114 = vmatprep.subr.bf16.mxu1 %v7409_v18  ;;  %v7447_v31 = vpack.c.bf16 %v76_v29, %v74_v28  ;;  %v48_v32 = vld [vmem:[%s8742_s2 + $0x50] sm:$0xff]  ;;  %v73_v33 = vld [vmem:[%s8743_s5 + $0x40] sm:$0xff]  ;;  %v51_v36 = vld [vmem:[%s8742_s2 + $0x68] sm:$0xff] }
   0x9   :  { %v75_v34 = vld [vmem:[%s8743_s5 + $0x50] sm:$0xff]  ;;  %6092 = vmatpush1.bf16.msra.mxu0 %v7421_v22  ;;  %v7459_v35 = vpack.c.bf16 %v48_v32, %v46_v30  ;;  %v53_v37 = vld [vmem:[%s8742_s2 + $0x78] sm:$0xff]  ;;  %v78_v38 = vld [vmem:[%s8743_s5 + $0x68] sm:$0xff]  ;;  %v242_v24 = vshrl.u32 %v241_v23, 7 }
   0xa   :  { %6116 = vmatpush1.bf16.msra.mxu1 %v7434_v26  ;;  %6094 = vmatprep.subr.bf16.mxu0 %v7436_v27  ;;  %v7472_v39 = vpack.c.bf16 %v75_v34, %v73_v33  ;;  %v7474_v40 = vpack.c.bf16 %v53_v37, %v51_v36  ;;  %v80_v41 = vld [vmem:[%s8743_s5 + $0x78] sm:$0xff]  ;;  %v50_v42 = vld [vmem:[%s8742_s2 + $0x60] sm:$0xff]  ;;  %v52_v43 = vld [vmem:[%s8742_s2 + $0x70] sm:$0xff] }
   0xb   :  { %6118 = vmatprep.subr.bf16.mxu1 %v7447_v31  ;;  %v7486_v44 = vpack.c.bf16 %v80_v41, %v78_v38  ;;  %v77_v45 = vld [vmem:[%s8743_s5 + $0x60] sm:$0xff]  ;;  %v79_v46 = vld [vmem:[%s8743_s5 + $0x70] sm:$0xff]  ;;  %v29_v47 = vld [vmem:[%s8744_s1 + $0x8] sm:$0xff]  ;;  %v7507_v51 = vpack.c.bf16 %v52_v43, %v50_v42  ;;  %v243_v25 = vsub.s32 0, %v242_v24 }
   0xc   :  { %v31_v48 = vld [vmem:[%s8744_s1 + $0x18] sm:$0xff]  ;;  %v56_v49 = vld [vmem:[%s8745_s4 + $0x8] sm:$0xff]  ;;  %v7511_v52 = vpack.c.bf16 %v79_v46, %v77_v45  ;;  %v28_v54 = vld [vmem:[%s8744_s1] sm:$0xff]  ;;  %v247_v45 = vsub.s32 1, %v242_v24 }
   0xd   :  { %v58_v50 = vld [vmem:[%s8745_s4 + $0x18] sm:$0xff]  ;;  %6096 = vmatpush1.bf16.msra.mxu0 %v7459_v35  ;;  %v7513_v53 = vpack.c.bf16 %v31_v48, %v29_v47  ;;  %v30_v55 = vld [vmem:[%s8744_s1 + $0x10] sm:$0xff]  ;;  %v55_v56 = vld [vmem:[%s8745_s4] sm:$0xff] }
   0xe   :  { %6120 = vmatpush1.bf16.msra.mxu1 %v7472_v39  ;;  %6098 = vmatprep.subr.bf16.mxu0 %v7474_v40  ;;  %v7525_v57 = vpack.c.bf16 %v58_v50, %v56_v49  ;;  %v57_v58 = vld [vmem:[%s8745_s4 + $0x10] sm:$0xff]  ;;  %v33_v59 = vld [vmem:[%s8744_s1 + $0x28] sm:$0xff]  ;;  %v35_v60 = vld [vmem:[%s8744_s1 + $0x38] sm:$0xff]  ;;  %v7543_v63 = vpack.c.bf16 %v30_v55, %v28_v54 }
   0xf   :  { %6122 = vmatprep.subr.bf16.mxu1 %v7486_v44  ;;  %v60_v61 = vld [vmem:[%s8745_s4 + $0x28] sm:$0xff]  ;;  %v62_v62 = vld [vmem:[%s8745_s4 + $0x38] sm:$0xff]  ;;  %v7547_v0 = vpack.c.bf16 %v57_v58, %v55_v56  ;;  %v7549_v1 = vpack.c.bf16 %v35_v60, %v33_v59  ;;  %v32_v2 = vld [vmem:[%s8744_s1 + $0x20] sm:$0xff] }
  0x10   :  { %v34_v5 = vld [vmem:[%s8744_s1 + $0x30] sm:$0xff]  ;;  %v7558_v6 = vpack.c.bf16 %v62_v62, %v60_v61  ;;  %v59_v7 = vld [vmem:[%s8745_s4 + $0x20] sm:$0xff]  ;;  %v7579_v14 = vld [vmem:[%s8744_s1 + $0x48] sm:$0x1] }
  0x11   :  { %6100 = vmatpush1.bf16.msra.mxu0 %v7507_v51  ;;  %v61_v10 = vld [vmem:[%s8745_s4 + $0x30] sm:$0xff]  ;;  %v7569_v11 = vpack.c.bf16 %v34_v5, %v32_v2  ;;  %v7585_v15 = vld [vmem:[%s8745_s4 + $0x48] sm:$0x1]  ;;  %v7595_v16 = vld [vmem:[%s8744_s1 + $0x40] sm:$0x1] }
  0x12   :  { %6124 = vmatpush1.bf16.msra.mxu1 %v7511_v52  ;;  %6102 = vmatprep.subr.bf16.mxu0 %v7513_v53  ;;  %v7573_v12 = vpack.c.bf16 %v61_v10, %v59_v7  ;;  %v7602_v19 = vld [vmem:[%s8745_s4 + $0x40] sm:$0x1]  ;;  %v5840_v21 = vld [vmem:[%s8746_s0 + $0x78] sm:$0xff] }
  0x13   :  { %6126 = vmatprep.subr.bf16.mxu1 %v7525_v57  ;;  %v82_v20 = vld [vmem:[%s8746_s0] sm:$0xff] }
  0x14   :  { %152 = vmatmul.mubr.f32.vlgmr.msra.gmra.mrb[0].mxu0 %v7311_v3  ;;  %v54_v28 = vld [vmem:[%s8747_s3] sm:$0x3]  ;;  %s7312_s3 = smov 64  }
  0x15   :  { %6104 = vmatpush1.bf16.msra.mxu0 %v7543_v63  ;;  %347 = vmatmul.mubr.f32.vlgmr.msra.gmra.mrb[0].mxu1 %v7311_v3  ;;  %v81_v29 = vld [vmem:[%s8748_s6] sm:$0x3]  ;;  %v7642_v30 = vrot.slane %v54_v28, %v243_v25  ;;  %v7648_v46 = vrot.slane %v54_v28, %v247_v45 }
  0x16   :  { %6128 = vmatpush1.bf16.msra.mxu1 %v7547_v0  ;;  %6106 = vmatprep.subr.bf16.mxu0 %v7549_v1  ;;  %v7644_v32 = vrot.slane %v81_v29, %v243_v25  ;;  %v7650_v47 = vrot.slane %v81_v29, %v247_v45 }
  0x17   :  { %6130 = vmatprep.subr.bf16.mxu1 %v7558_v6  ;;  %233 = vmatprep.mubr.f32.mxu0 %v7311_v3 }
  0x18   :  { %426 = vmatprep.mubr.f32.mxu1 %v7311_v3 }
  0x19   :  { %6108 = vmatpush1.bf16.msra.mxu0 %v7569_v11 }
  0x1a   :  { %6132 = vmatpush1.bf16.msra.mxu1 %v7573_v12  ;;  %5835 = vmatprep.subr.msk.mxu0 %vm162_vm0, %v7579_v14 }
  0x1b   :  { %5841 = vmatprep.subr.msk.mxu1 %vm162_vm0, %v7585_v15 }
  0x1d   :  { %5836 = vmatpush1.msk.msra.mxu0 %vm162_vm0, %v7595_v16 }
  0x1e   :  { %5842 = vmatpush1.msk.msra.mxu1 %vm162_vm0, %v7602_v19  ;;  %5837 = vmatmul.mubr.msk.f32.vlgmr.msra.gmra.mrb[0].mxu0 %vm158_vm1, %v82_v20 }
  0x1f   :  { %5843 = vmatmul.mubr.msk.f32.vlgmr.msra.gmra.mrb[0].mxu1 %vm158_vm1, %v5840_v21  ;;  %6134 = vmatprep.subr.bf16.mxu0 %v7369_v4 }
  0x20   :  { %6136 = vmatpush1.bf16.msra.mxu0 %v7382_v9  ;;  %6158 = vmatprep.subr.bf16.mxu1 %v7380_v8 }
  0x21   :  { %6138 = vmatprep.subr.bf16.mxu0 %v7407_v17  ;;  %6160 = vmatpush1.bf16.msra.mxu1 %v7394_v13 }
  0x22   :  { %6162 = vmatprep.subr.bf16.mxu1 %v7409_v18  ;;  %542 = vmatprep.mubr.f32.mxu0 %v7311_v3 }
  0x23   :  { %721 = vmatprep.mubr.f32.mxu1 %v7311_v3 }
  0x24   :  { %6140 = vmatpush1.bf16.msra.mxu0 %v7421_v22 }
  0x25   :  { %6142 = vmatprep.subr.bf16.mxu0 %v7436_v27  ;;  %6164 = vmatpush1.bf16.msra.mxu1 %v7434_v26 }
  0x26   :  { %6166 = vmatprep.subr.bf16.mxu1 %v7447_v31 }
  0x28   :  { %6144 = vmatpush1.bf16.msra.mxu0 %v7459_v35 }
  0x29   :  { %6146 = vmatprep.subr.bf16.mxu0 %v7474_v40  ;;  %6168 = vmatpush1.bf16.msra.mxu1 %v7472_v39 }
  0x2a   :  { %6170 = vmatprep.subr.bf16.mxu1 %v7486_v44 }
  0x2c   :  { %6148 = vmatpush1.bf16.msra.mxu0 %v7507_v51 }
  0x2d   :  { %6150 = vmatprep.subr.bf16.mxu0 %v7513_v53  ;;  %6172 = vmatpush1.bf16.msra.mxu1 %v7511_v52 }
  0x2e   :  { %6174 = vmatprep.subr.bf16.mxu1 %v7525_v57 }
  0xf1   :  { %v235_v33 = vpop.f32.mrb[0].mxu0 }
  0xf2   :  { %v251_v34 = vadd.f32 %v7642_v30, %v235_v33  ;;  %v428_v36 = vpop.f32.mrb[0].mxu1  ;;  %v237_v37 = vpop.f32.mrb[1].mxu0 }
  0xf3   :  { %v444_v38 = vadd.f32 %v7644_v32, %v428_v36  ;;  %v430_v41 = vpop.f32.mrb[1].mxu1  ;;  %v252_v48 = vadd.f32 %v7648_v46, %v237_v37 }
  0xf4   :  { %v5838_v42 = vmul.f32 -1.442695, %v251_v34  ;;  %v445_v49 = vadd.f32 %v7650_v47, %v430_v41 }
  0xf5   :  { %v5844_v43 = vmul.f32 -1.442695, %v444_v38  ;;  %v5839_v5 = vmul.f32 -1.442695, %v252_v48 }
  0xf6   :  { %6919 = vpow2.f32 %v5838_v42  ;;  %v5845_v7 = vmul.f32 -1.442695, %v445_v49 }
  0xf7   :  { %6921 = vpow2.f32 %v5844_v43 }
  0xf8   :  { %6923 = vtanh.f32 %v252_v48 }
  0xf9   :  { %6925 = vtanh.f32 %v445_v49  ;;  %v5847_v49 = vld [vmem:[%s8746_s0 + $0x8] sm:$0xff] }
 0x100   :  { %v6920_v50 = vpop.eup %6919 }
 0x101   :  { %v6922_v54 = vpop.eup %6921  ;;  %v256_v55 = vadd.f32 1.0, %v6920_v50  ;;  %v5855_v50 = vld [vmem:[%s8746_s0 + $0x70] sm:$0xff] }
 0x102   :  { %v449_v56 = vadd.f32 1.0, %v6922_v54  ;;  %v6924_v58 = vpop.eup %6923 }
 0x103   :  { %6927 = vrcp.f32 %v256_v55  ;;  %v6926_v59 = vpop.eup %6925 }
 0x104   :  { %6929 = vrcp.f32 %v449_v56 }
 0x105   :  { %6931 = vpow2.f32 %v5839_v5 }
 0x106   :  { %6933 = vpow2.f32 %v5845_v7 }
 0x10d   :  { %v6928_v60 = vpop.eup %6927 }
 0x10e   :  { %v6930_v61 = vpop.eup %6929  ;;  %v267_v62 = vmul.f32 %v6928_v60, %v6924_v58  ;;  %v266_v23 = vmul.f32 0.0, %v6928_v60 }
 0x10f   :  { %v460_v2 = vmul.f32 %v6930_v61, %v6926_v59  ;;  %v6932_v10 = vpop.eup %6931  ;;  %v459_v29 = vmul.f32 0.0, %v6930_v61 }
 0x110   :  { %269 = vrot.lane.b32.xlu0 %v267_v62, %s7312_s3  ;;  %v263_v20 = vadd.f32 1.0, %v6932_v10  ;;  %v6934_v21 = vpop.eup %6933 }
 0x111   :  { %v456_v28 = vadd.f32 1.0, %v6934_v21 }
 0x112   :  { %6935 = vrcp.f32 %v263_v20 }
 0x114   :  { %462 = vrot.lane.b32.xlu0 %v460_v2, %s7312_s3 }
 0x11c   :  { %v6936_v36 = vpop.eup %6935 }
 0x182   :  { %v270_v24 = vpop.permute.xlu0 %269 }
 0x183   :  { %v7656_v25 = vadd.f32 %v270_v24, %v266_v23 }
 0x185   :  { %6937 = vtanh.f32 %v7656_v25 }
 0x186   :  { %v463_v33 = vpop.permute.xlu0 %462  ;;  %6939 = vrcp.f32 %v456_v28 }
 0x187   :  { %v7659_v34 = vadd.f32 %v463_v33, %v459_v29 }
 0x189   :  { %6941 = vtanh.f32 %v7659_v34 }
 0x18f   :  { %v6938_v37 = vpop.eup %6937 }
 0x190   :  { %v274_v38 = vmul.f32 %v6938_v37, %v6936_v36  ;;  %v6940_v41 = vpop.eup %6939 }
 0x192   :  { %276 = vrot.lane.b32.xlu1 %v274_v38, %s7312_s3 }
 0x193   :  { %v6942_v42 = vpop.eup %6941 }
 0x194   :  { %v467_v43 = vmul.f32 %v6942_v42, %v6940_v41 }
 0x196   :  { %469 = vrot.lane.b32.xlu1 %v467_v43, %s7312_s3 }
 0x204   :  { %v277_v45 = vpop.permute.xlu1 %276 }
 0x205   :  { %279 = vst.msk [vmem:[%s8749_s7] sm:$0xff] %vm83_vm2, %v277_v45  ;;  %5848 = vmatmul.mubr.msk.f32.vlgmr.msra.gmra.mrb[2].mxu0 %vm83_vm2, %v277_v45 }
 0x206   :  { %6152 = vmatpush1.bf16.msra.mxu0 %v7543_v63  ;;  %616 = vmatprep.mubr.f32.mxu0 %v7311_v3 }
 0x207   :  { %6154 = vmatprep.subr.bf16.mxu0 %v7549_v1 }
 0x208   :  { %v470_v48 = vpop.permute.xlu1 %469 }
 0x209   :  { %5846 = vst.msk [vmem:[%s8750_s8 + $0x78] sm:$0xff] %vm83_vm2, %v470_v48  ;;  %5856 = vmatmul.mubr.msk.f32.vlgmr.msra.gmra.mrb[2].mxu1 %vm83_vm2, %v470_v48 }
 0x20a   :  { %6156 = vmatpush1.bf16.msra.mxu0 %v7569_v11  ;;  %6176 = vmatpush1.bf16.msra.mxu1 %v7547_v0 }
 0x20b   :  { %5849 = vmatprep.subr.msk.mxu0 %vm162_vm0, %v7579_v14  ;;  %6178 = vmatprep.subr.bf16.mxu1 %v7558_v6 }
 0x20c   :  { %795 = vmatprep.mubr.f32.mxu1 %v7311_v3 }
 0x20e   :  { %5850 = vmatpush1.msk.msra.mxu0 %vm162_vm0, %v7595_v16  ;;  %6180 = vmatpush1.bf16.msra.mxu1 %v7573_v12 }
 0x20f   :  { %5851 = vmatmul.mubr.msk.f32.vlgmr.msra.gmra.mrb[2].mxu0 %vm158_vm1, %v5847_v49  ;;  %5857 = vmatprep.subr.msk.mxu1 %vm162_vm0, %v7585_v15 }
 0x210   :  { %6182 = vmatprep.subr.bf16.mxu0 %v7369_v4  ;;  %900 = vmatprep.mubr.f32.mxu0 %v7311_v3 }
 0x211   :  { %6184 = vmatpush1.bf16.msra.mxu0 %v7382_v9 }
 0x212   :  { %5858 = vmatpush1.msk.msra.mxu1 %vm162_vm0, %v7602_v19  ;;  %6186 = vmatprep.subr.bf16.mxu0 %v7407_v17 }
 0x213   :  { %5859 = vmatmul.mubr.msk.f32.vlgmr.msra.gmra.mrb[2].mxu1 %vm158_vm1, %v5855_v50  ;;  %6206 = vmatprep.subr.bf16.mxu1 %v7380_v8 }
 0x214   :  { %6208 = vmatpush1.bf16.msra.mxu1 %v7394_v13  ;;  %1079 = vmatprep.mubr.f32.mxu1 %v7311_v3 }
 0x215   :  { %6188 = vmatpush1.bf16.msra.mxu0 %v7421_v22  ;;  %6210 = vmatprep.subr.bf16.mxu1 %v7409_v18 }
 0x216   :  { %6190 = vmatprep.subr.bf16.mxu0 %v7436_v27 }
 0x218   :  { %6212 = vmatpush1.bf16.msra.mxu1 %v7434_v26 }
 0x219   :  { %6192 = vmatpush1.bf16.msra.mxu0 %v7459_v35  ;;  %6214 = vmatprep.subr.bf16.mxu1 %v7447_v31 }
 0x21a   :  { %6194 = vmatprep.subr.bf16.mxu0 %v7474_v40 }
 0x21c   :  { %6216 = vmatpush1.bf16.msra.mxu1 %v7472_v39 }
 0x21d   :  { %6196 = vmatpush1.bf16.msra.mxu0 %v7507_v51  ;;  %6218 = vmatprep.subr.bf16.mxu1 %v7486_v44 }
 0x21e   :  { %6198 = vmatprep.subr.bf16.mxu0 %v7513_v53 }
 0x220   :  { %6220 = vmatpush1.bf16.msra.mxu1 %v7511_v52 }
 0x221   :  { %6222 = vmatprep.subr.bf16.mxu1 %v7525_v57 }
 0x2e2   :  { %v618_v54 = vpop.f32.mrb[2].mxu0 }
 0x2e3   :  { %v623_v55 = vadd.f32 %v618_v54, %v7642_v30  ;;  %v620_v56 = vpop.f32.mrb[3].mxu0 }
 0x2e4   :  { %v624_v2 = vadd.f32 %v620_v56, %v7648_v46 }
 0x2e5   :  { %v5852_v58 = vmul.f32 -1.442695, %v623_v55 }
 0x2e6   :  { %v797_v59 = vpop.f32.mrb[2].mxu1  ;;  %v5853_v37 = vmul.f32 -1.442695, %v624_v2 }
 0x2e7   :  { %6943 = vpow2.f32 %v5852_v58  ;;  %v802_v60 = vadd.f32 %v797_v59, %v7644_v32  ;;  %v799_v61 = vpop.f32.mrb[3].mxu1 }
 0x2e8   :  { %v803_v10 = vadd.f32 %v799_v61, %v7650_v47 }
 0x2e9   :  { %v5860_v62 = vmul.f32 -1.442695, %v802_v60 }
 0x2ea   :  { %v5861_v38 = vmul.f32 -1.442695, %v803_v10 }
 0x2eb   :  { %6945 = vpow2.f32 %v5860_v62 }
 0x2ec   :  { %6947 = vtanh.f32 %v624_v2 }
 0x2f1   :  { %v6944_v5 = vpop.eup %6943 }
 0x2f2   :  { %v628_v7 = vadd.f32 1.0, %v6944_v5  ;;  %v5863_v5 = vld [vmem:[%s8746_s0 + $0x10] sm:$0xff] }
 0x2f4   :  { %6949 = vrcp.f32 %v628_v7  ;;  %v5871_v7 = vld [vmem:[%s8746_s0 + $0x68] sm:$0xff] }
 0x2f5   :  { %v6946_v20 = vpop.eup %6945  ;;  %6951 = vtanh.f32 %v803_v10 }
 0x2f6   :  { %v807_v21 = vadd.f32 1.0, %v6946_v20  ;;  %v6948_v23 = vpop.eup %6947 }
 0x2f8   :  { %6953 = vrcp.f32 %v807_v21 }
 0x2f9   :  { %6955 = vpow2.f32 %v5853_v37 }
 0x2fa   :  { %6957 = vpow2.f32 %v5861_v38 }
 0x2fe   :  { %v6950_v24 = vpop.eup %6949 }
 0x2ff   :  { %v639_v28 = vmul.f32 %v6950_v24, %v6948_v23  ;;  %v6952_v29 = vpop.eup %6951  ;;  %v638_v45 = vmul.f32 %v6950_v24, %v7656_v25 }
 0x301   :  { %641 = vrot.lane.b32.xlu0 %v639_v28, %s7312_s3 }
 0x302   :  { %v6954_v33 = vpop.eup %6953 }
 0x303   :  { %v818_v36 = vmul.f32 %v6954_v33, %v6952_v29  ;;  %v6956_v41 = vpop.eup %6955  ;;  %v817_v54 = vmul.f32 %v6954_v33, %v7659_v34 }
 0x304   :  { %v635_v42 = vadd.f32 1.0, %v6956_v41  ;;  %v6958_v43 = vpop.eup %6957 }
 0x305   :  { %820 = vrot.lane.b32.xlu1 %v818_v36, %s7312_s3  ;;  %v814_v50 = vadd.f32 1.0, %v6958_v43 }
 0x306   :  { %6959 = vrcp.f32 %v635_v42 }
 0x310   :  { %v6960_v58 = vpop.eup %6959 }
 0x373   :  { %v642_v48 = vpop.permute.xlu0 %641 }
 0x374   :  { %v7725_v49 = vadd.f32 %v642_v48, %v638_v45 }
 0x376   :  { %6961 = vtanh.f32 %v7725_v49 }
 0x377   :  { %v821_v55 = vpop.permute.xlu1 %820  ;;  %6963 = vrcp.f32 %v814_v50 }
 0x378   :  { %v7729_v56 = vadd.f32 %v821_v55, %v817_v54 }
 0x37a   :  { %6965 = vtanh.f32 %v7729_v56 }
 0x380   :  { %v6962_v59 = vpop.eup %6961 }
 0x381   :  { %v646_v60 = vmul.f32 %v6962_v59, %v6960_v58  ;;  %v6964_v61 = vpop.eup %6963 }
 0x383   :  { %648 = vrot.lane.b32.xlu0 %v646_v60, %s7312_s3 }
 0x384   :  { %v6966_v25 = vpop.eup %6965 }
 0x385   :  { %v825_v62 = vmul.f32 %v6966_v25, %v6964_v61 }
 0x387   :  { %827 = vrot.lane.b32.xlu1 %v825_v62, %s7312_s3 }
 0x3f5   :  { %v649_v2 = vpop.permute.xlu0 %648 }
 0x3f6   :  { %5854 = vst.msk [vmem:[%s8749_s7 + $0x8] sm:$0xff] %vm83_vm2, %v649_v2  ;;  %5864 = vmatmul.mubr.msk.f32.vlgmr.msra.gmra.mrb[4].mxu0 %vm83_vm2, %v649_v2 }
 0x3f7   :  { %6200 = vmatpush1.bf16.msra.mxu0 %v7543_v63  ;;  %974 = vmatprep.mubr.f32.mxu0 %v7311_v3 }
 0x3f8   :  { %6202 = vmatprep.subr.bf16.mxu0 %v7549_v1 }
 0x3f9   :  { %v828_v34 = vpop.permute.xlu1 %827 }
 0x3fa   :  { %5862 = vst.msk [vmem:[%s8750_s8 + $0x70] sm:$0xff] %vm83_vm2, %v828_v34  ;;  %5872 = vmatmul.mubr.msk.f32.vlgmr.msra.gmra.mrb[4].mxu1 %vm83_vm2, %v828_v34 }
 0x3fb   :  { %6204 = vmatpush1.bf16.msra.mxu0 %v7569_v11  ;;  %6224 = vmatpush1.bf16.msra.mxu1 %v7547_v0 }
 0x3fc   :  { %5865 = vmatprep.subr.msk.mxu0 %vm162_vm0, %v7579_v14  ;;  %6226 = vmatprep.subr.bf16.mxu1 %v7558_v6 }
 0x3fd   :  { %1153 = vmatprep.mubr.f32.mxu1 %v7311_v3 }
 0x3ff   :  { %5866 = vmatpush1.msk.msra.mxu0 %vm162_vm0, %v7595_v16  ;;  %6228 = vmatpush1.bf16.msra.mxu1 %v7573_v12 }
 0x400   :  { %5867 = vmatmul.mubr.msk.f32.vlgmr.msra.gmra.mrb[4].mxu0 %vm158_vm1, %v5863_v5  ;;  %5873 = vmatprep.subr.msk.mxu1 %vm162_vm0, %v7585_v15 }
 0x401   :  { %6230 = vmatprep.subr.bf16.mxu0 %v7369_v4  ;;  %1258 = vmatprep.mubr.f32.mxu0 %v7311_v3 }
 0x402   :  { %6232 = vmatpush1.bf16.msra.mxu0 %v7382_v9 }
 0x403   :  { %5874 = vmatpush1.msk.msra.mxu1 %vm162_vm0, %v7602_v19  ;;  %6234 = vmatprep.subr.bf16.mxu0 %v7407_v17 }
 0x404   :  { %5875 = vmatmul.mubr.msk.f32.vlgmr.msra.gmra.mrb[4].mxu1 %vm158_vm1, %v5871_v7  ;;  %6254 = vmatprep.subr.bf16.mxu1 %v7380_v8 }
 0x405   :  { %6256 = vmatpush1.bf16.msra.mxu1 %v7394_v13  ;;  %1437 = vmatprep.mubr.f32.mxu1 %v7311_v3 }
 0x406   :  { %6236 = vmatpush1.bf16.msra.mxu0 %v7421_v22  ;;  %6258 = vmatprep.subr.bf16.mxu1 %v7409_v18 }
 0x407   :  { %6238 = vmatprep.subr.bf16.mxu0 %v7436_v27 }
 0x409   :  { %6260 = vmatpush1.bf16.msra.mxu1 %v7434_v26 }
 0x40a   :  { %6240 = vmatpush1.bf16.msra.mxu0 %v7459_v35  ;;  %6262 = vmatprep.subr.bf16.mxu1 %v7447_v31 }
 0x40b   :  { %6242 = vmatprep.subr.bf16.mxu0 %v7474_v40 }
 0x40d   :  { %6264 = vmatpush1.bf16.msra.mxu1 %v7472_v39 }
 0x40e   :  { %6244 = vmatpush1.bf16.msra.mxu0 %v7507_v51  ;;  %6266 = vmatprep.subr.bf16.mxu1 %v7486_v44 }
 0x40f   :  { %6246 = vmatprep.subr.bf16.mxu0 %v7513_v53 }
 0x411   :  { %6268 = vmatpush1.bf16.msra.mxu1 %v7511_v52 }
 0x412   :  { %6270 = vmatprep.subr.bf16.mxu1 %v7525_v57 }
 0x4d3   :  { %v976_v10 = vpop.f32.mrb[4].mxu0 }
 0x4d4   :  { %v981_v20 = vadd.f32 %v976_v10, %v7642_v30  ;;  %v978_v21 = vpop.f32.mrb[5].mxu0 }
 0x4d5   :  { %v982_v36 = vadd.f32 %v978_v21, %v7648_v46 }
 0x4d6   :  { %v5868_v23 = vmul.f32 -1.442695, %v981_v20 }
 0x4d7   :  { %v1155_v24 = vpop.f32.mrb[4].mxu1  ;;  %v5869_v59 = vmul.f32 -1.442695, %v982_v36 }
 0x4d8   :  { %6967 = vpow2.f32 %v5868_v23  ;;  %v1160_v28 = vadd.f32 %v1155_v24, %v7644_v32  ;;  %v1157_v29 = vpop.f32.mrb[5].mxu1 }
 0x4d9   :  { %v1161_v41 = vadd.f32 %v1157_v29, %v7650_v47 }
 0x4da   :  { %v5876_v33 = vmul.f32 -1.442695, %v1160_v28 }
 0x4db   :  { %v5877_v60 = vmul.f32 -1.442695, %v1161_v41 }
 0x4dc   :  { %6969 = vpow2.f32 %v5876_v33 }
 0x4dd   :  { %6971 = vtanh.f32 %v982_v36 }
 0x4e2   :  { %v6968_v37 = vpop.eup %6967 }
 0x4e3   :  { %v986_v38 = vadd.f32 1.0, %v6968_v37  ;;  %v5879_v37 = vld [vmem:[%s8746_s0 + $0x18] sm:$0xff] }
 0x4e5   :  { %6973 = vrcp.f32 %v986_v38  ;;  %v5887_v38 = vld [vmem:[%s8746_s0 + $0x60] sm:$0xff] }
 0x4e6   :  { %v6970_v42 = vpop.eup %6969  ;;  %6975 = vtanh.f32 %v1161_v41 }
 0x4e7   :  { %v1165_v43 = vadd.f32 1.0, %v6970_v42  ;;  %v6972_v45 = vpop.eup %6971 }
 0x4e9   :  { %6977 = vrcp.f32 %v1165_v43 }
 0x4ea   :  { %6979 = vpow2.f32 %v5869_v59 }
 0x4eb   :  { %6981 = vpow2.f32 %v5877_v60 }
 0x4ef   :  { %v6974_v48 = vpop.eup %6973 }
 0x4f0   :  { %v997_v50 = vmul.f32 %v6974_v48, %v6972_v45  ;;  %v6976_v54 = vpop.eup %6975  ;;  %v996_v2 = vmul.f32 %v6974_v48, %v7725_v49 }
 0x4f2   :  { %999 = vrot.lane.b32.xlu0 %v997_v50, %s7312_s3 }
 0x4f3   :  { %v6978_v55 = vpop.eup %6977 }
 0x4f4   :  { %v1176_v58 = vmul.f32 %v6978_v55, %v6976_v54  ;;  %v6980_v61 = vpop.eup %6979  ;;  %v1175_v10 = vmul.f32 %v6978_v55, %v7729_v56 }
 0x4f5   :  { %v993_v25 = vadd.f32 1.0, %v6980_v61  ;;  %v6982_v62 = vpop.eup %6981 }
 0x4f6   :  { %1178 = vrot.lane.b32.xlu1 %v1176_v58, %s7312_s3  ;;  %v1172_v7 = vadd.f32 1.0, %v6982_v62 }
 0x4f7   :  { %6983 = vrcp.f32 %v993_v25 }
 0x501   :  { %v6984_v23 = vpop.eup %6983 }
 0x564   :  { %v1000_v34 = vpop.permute.xlu0 %999 }
 0x565   :  { %v7795_v5 = vadd.f32 %v1000_v34, %v996_v2 }
 0x567   :  { %6985 = vtanh.f32 %v7795_v5 }
 0x568   :  { %v1179_v20 = vpop.permute.xlu1 %1178  ;;  %6987 = vrcp.f32 %v1172_v7 }
 0x569   :  { %v7799_v21 = vadd.f32 %v1179_v20, %v1175_v10 }
 0x56b   :  { %6989 = vtanh.f32 %v7799_v21 }
 0x571   :  { %v6986_v24 = vpop.eup %6985 }
 0x572   :  { %v1004_v28 = vmul.f32 %v6986_v24, %v6984_v23  ;;  %v6988_v29 = vpop.eup %6987 }
 0x574   :  { %1006 = vrot.lane.b32.xlu0 %v1004_v28, %s7312_s3 }
 0x575   :  { %v6990_v49 = vpop.eup %6989 }
 0x576   :  { %v1183_v33 = vmul.f32 %v6990_v49, %v6988_v29 }
 0x578   :  { %1185 = vrot.lane.b32.xlu1 %v1183_v33, %s7312_s3 }
 0x5e6   :  { %v1007_v36 = vpop.permute.xlu0 %1006 }
 0x5e7   :  { %5870 = vst.msk [vmem:[%s8749_s7 + $0x10] sm:$0xff] %vm83_vm2, %v1007_v36  ;;  %5880 = vmatmul.mubr.msk.f32.vlgmr.msra.gmra.mrb[6].mxu0 %vm83_vm2, %v1007_v36 }
 0x5e8   :  { %6248 = vmatpush1.bf16.msra.mxu0 %v7543_v63  ;;  %1332 = vmatprep.mubr.f32.mxu0 %v7311_v3 }
 0x5e9   :  { %6250 = vmatprep.subr.bf16.mxu0 %v7549_v1 }
 0x5ea   :  { %v1186_v56 = vpop.permute.xlu1 %1185 }
 0x5eb   :  { %5878 = vst.msk [vmem:[%s8750_s8 + $0x68] sm:$0xff] %vm83_vm2, %v1186_v56  ;;  %5888 = vmatmul.mubr.msk.f32.vlgmr.msra.gmra.mrb[6].mxu1 %vm83_vm2, %v1186_v56 }
 0x5ec   :  { %6252 = vmatpush1.bf16.msra.mxu0 %v7569_v11  ;;  %6272 = vmatpush1.bf16.msra.mxu1 %v7547_v0 }
 0x5ed   :  { %5881 = vmatprep.subr.msk.mxu0 %vm162_vm0, %v7579_v14  ;;  %6274 = vmatprep.subr.bf16.mxu1 %v7558_v6 }
 0x5ee   :  { %1511 = vmatprep.mubr.f32.mxu1 %v7311_v3 }
 0x5f0   :  { %5882 = vmatpush1.msk.msra.mxu0 %vm162_vm0, %v7595_v16  ;;  %6276 = vmatpush1.bf16.msra.mxu1 %v7573_v12 }
 0x5f1   :  { %5883 = vmatmul.mubr.msk.f32.vlgmr.msra.gmra.mrb[6].mxu0 %vm158_vm1, %v5879_v37  ;;  %5889 = vmatprep.subr.msk.mxu1 %vm162_vm0, %v7585_v15 }
 0x5f2   :  { %6278 = vmatprep.subr.bf16.mxu0 %v7369_v4  ;;  %1616 = vmatprep.mubr.f32.mxu0 %v7311_v3 }
 0x5f3   :  { %6280 = vmatpush1.bf16.msra.mxu0 %v7382_v9 }
 0x5f4   :  { %5890 = vmatpush1.msk.msra.mxu1 %vm162_vm0, %v7602_v19  ;;  %6282 = vmatprep.subr.bf16.mxu0 %v7407_v17 }
 0x5f5   :  { %5891 = vmatmul.mubr.msk.f32.vlgmr.msra.gmra.mrb[6].mxu1 %vm158_vm1, %v5887_v38  ;;  %6302 = vmatprep.subr.bf16.mxu1 %v7380_v8 }
 0x5f6   :  { %6304 = vmatpush1.bf16.msra.mxu1 %v7394_v13  ;;  %1795 = vmatprep.mubr.f32.mxu1 %v7311_v3 }
 0x5f7   :  { %6284 = vmatpush1.bf16.msra.mxu0 %v7421_v22  ;;  %6306 = vmatprep.subr.bf16.mxu1 %v7409_v18 }
 0x5f8   :  { %6286 = vmatprep.subr.bf16.mxu0 %v7436_v27 }
 0x5fa   :  { %6308 = vmatpush1.bf16.msra.mxu1 %v7434_v26 }
 0x5fb   :  { %6288 = vmatpush1.bf16.msra.mxu0 %v7459_v35  ;;  %6310 = vmatprep.subr.bf16.mxu1 %v7447_v31 }
 0x5fc   :  { %6290 = vmatprep.subr.bf16.mxu0 %v7474_v40 }
 0x5fe   :  { %6312 = vmatpush1.bf16.msra.mxu1 %v7472_v39 }
 0x5ff   :  { %6292 = vmatpush1.bf16.msra.mxu0 %v7507_v51  ;;  %6314 = vmatprep.subr.bf16.mxu1 %v7486_v44 }
 0x600   :  { %6294 = vmatprep.subr.bf16.mxu0 %v7513_v53 }
 0x602   :  { %6316 = vmatpush1.bf16.msra.mxu1 %v7511_v52 }
 0x603   :  { %6318 = vmatprep.subr.bf16.mxu1 %v7525_v57 }
 0x6c4   :  { %v1334_v41 = vpop.f32.mrb[6].mxu0 }
 0x6c5   :  { %v1339_v42 = vadd.f32 %v1334_v41, %v7642_v30  ;;  %v1336_v43 = vpop.f32.mrb[7].mxu0 }
 0x6c6   :  { %v1340_v58 = vadd.f32 %v1336_v43, %v7648_v46 }
 0x6c7   :  { %v5884_v45 = vmul.f32 -1.442695, %v1339_v42 }
 0x6c8   :  { %v1513_v48 = vpop.f32.mrb[6].mxu1  ;;  %v5885_v24 = vmul.f32 -1.442695, %v1340_v58 }
 0x6c9   :  { %6991 = vpow2.f32 %v5884_v45  ;;  %v1518_v50 = vadd.f32 %v1513_v48, %v7644_v32  ;;  %v1515_v54 = vpop.f32.mrb[7].mxu1 }
 0x6ca   :  { %v1519_v61 = vadd.f32 %v1515_v54, %v7650_v47 }
 0x6cb   :  { %v5892_v55 = vmul.f32 -1.442695, %v1518_v50 }
 0x6cc   :  { %v5893_v28 = vmul.f32 -1.442695, %v1519_v61 }
 0x6cd   :  { %6993 = vpow2.f32 %v5892_v55 }
 0x6ce   :  { %6995 = vtanh.f32 %v1340_v58 }
 0x6d3   :  { %v6992_v59 = vpop.eup %6991 }
 0x6d4   :  { %v1344_v60 = vadd.f32 1.0, %v6992_v59  ;;  %v5895_v59 = vld [vmem:[%s8746_s0 + $0x20] sm:$0xff] }
 0x6d6   :  { %6997 = vrcp.f32 %v1344_v60  ;;  %v5903_v60 = vld [vmem:[%s8746_s0 + $0x58] sm:$0xff] }
 0x6d7   :  { %v6994_v25 = vpop.eup %6993  ;;  %6999 = vtanh.f32 %v1519_v61 }
 0x6d8   :  { %v1523_v62 = vadd.f32 1.0, %v6994_v25  ;;  %v6996_v2 = vpop.eup %6995 }
 0x6da   :  { %7001 = vrcp.f32 %v1523_v62 }
 0x6db   :  { %7003 = vpow2.f32 %v5885_v24 }
 0x6dc   :  { %7005 = vpow2.f32 %v5893_v28 }
 0x6e0   :  { %v6998_v34 = vpop.eup %6997 }
 0x6e1   :  { %v1355_v7 = vmul.f32 %v6998_v34, %v6996_v2  ;;  %v7000_v10 = vpop.eup %6999  ;;  %v1354_v36 = vmul.f32 %v6998_v34, %v7795_v5 }
 0x6e3   :  { %1357 = vrot.lane.b32.xlu0 %v1355_v7, %s7312_s3 }
 0x6e4   :  { %v7002_v20 = vpop.eup %7001 }
 0x6e5   :  { %v1534_v23 = vmul.f32 %v7002_v20, %v7000_v10  ;;  %v7004_v29 = vpop.eup %7003  ;;  %v1533_v41 = vmul.f32 %v7002_v20, %v7799_v21 }
 0x6e6   :  { %v1351_v49 = vadd.f32 1.0, %v7004_v29  ;;  %v7006_v33 = vpop.eup %7005 }
 0x6e7   :  { %1536 = vrot.lane.b32.xlu1 %v1534_v23, %s7312_s3  ;;  %v1530_v38 = vadd.f32 1.0, %v7006_v33 }
 0x6e8   :  { %7007 = vrcp.f32 %v1351_v49 }
 0x6f2   :  { %v7008_v45 = vpop.eup %7007 }
 0x755   :  { %v1358_v56 = vpop.permute.xlu0 %1357 }
 0x756   :  { %v7865_v37 = vadd.f32 %v1358_v56, %v1354_v36 }
 0x758   :  { %7009 = vtanh.f32 %v7865_v37 }
 0x759   :  { %v1537_v42 = vpop.permute.xlu1 %1536  ;;  %7011 = vrcp.f32 %v1530_v38 }
 0x75a   :  { %v7869_v43 = vadd.f32 %v1537_v42, %v1533_v41 }
 0x75c   :  { %7013 = vtanh.f32 %v7869_v43 }
 0x762   :  { %v7010_v48 = vpop.eup %7009 }
 0x763   :  { %v1362_v50 = vmul.f32 %v7010_v48, %v7008_v45  ;;  %v7012_v54 = vpop.eup %7011 }
 0x765   :  { %1364 = vrot.lane.b32.xlu0 %v1362_v50, %s7312_s3 }
 0x766   :  { %v7014_v5 = vpop.eup %7013 }
 0x767   :  { %v1541_v55 = vmul.f32 %v7014_v5, %v7012_v54 }
 0x769   :  { %1543 = vrot.lane.b32.xlu1 %v1541_v55, %s7312_s3 }
 0x7d7   :  { %v1365_v58 = vpop.permute.xlu0 %1364 }
 0x7d8   :  { %5886 = vst.msk [vmem:[%s8749_s7 + $0x18] sm:$0xff] %vm83_vm2, %v1365_v58  ;;  %5896 = vmatmul.mubr.msk.f32.vlgmr.msra.gmra.mrb[8].mxu0 %vm83_vm2, %v1365_v58 }
 0x7d9   :  { %6296 = vmatpush1.bf16.msra.mxu0 %v7543_v63  ;;  %1690 = vmatprep.mubr.f32.mxu0 %v7311_v3 }
 0x7da   :  { %6298 = vmatprep.subr.bf16.mxu0 %v7549_v1 }
 0x7db   :  { %v1544_v21 = vpop.permute.xlu1 %1543 }
 0x7dc   :  { %5894 = vst.msk [vmem:[%s8750_s8 + $0x60] sm:$0xff] %vm83_vm2, %v1544_v21  ;;  %5904 = vmatmul.mubr.msk.f32.vlgmr.msra.gmra.mrb[8].mxu1 %vm83_vm2, %v1544_v21 }
 0x7dd   :  { %6300 = vmatpush1.bf16.msra.mxu0 %v7569_v11  ;;  %6320 = vmatpush1.bf16.msra.mxu1 %v7547_v0 }
 0x7de   :  { %5897 = vmatprep.subr.msk.mxu0 %vm162_vm0, %v7579_v14  ;;  %6322 = vmatprep.subr.bf16.mxu1 %v7558_v6 }
 0x7df   :  { %1869 = vmatprep.mubr.f32.mxu1 %v7311_v3 }
 0x7e1   :  { %5898 = vmatpush1.msk.msra.mxu0 %vm162_vm0, %v7595_v16  ;;  %6324 = vmatpush1.bf16.msra.mxu1 %v7573_v12 }
 0x7e2   :  { %5899 = vmatmul.mubr.msk.f32.vlgmr.msra.gmra.mrb[8].mxu0 %vm158_vm1, %v5895_v59  ;;  %5905 = vmatprep.subr.msk.mxu1 %vm162_vm0, %v7585_v15 }
 0x7e3   :  { %6326 = vmatprep.subr.bf16.mxu0 %v7369_v4  ;;  %1974 = vmatprep.mubr.f32.mxu0 %v7311_v3 }
 0x7e4   :  { %6328 = vmatpush1.bf16.msra.mxu0 %v7382_v9 }
 0x7e5   :  { %5906 = vmatpush1.msk.msra.mxu1 %vm162_vm0, %v7602_v19  ;;  %6330 = vmatprep.subr.bf16.mxu0 %v7407_v17 }
 0x7e6   :  { %5907 = vmatmul.mubr.msk.f32.vlgmr.msra.gmra.mrb[8].mxu1 %vm158_vm1, %v5903_v60  ;;  %6350 = vmatprep.subr.bf16.mxu1 %v7380_v8 }
 0x7e7   :  { %6352 = vmatpush1.bf16.msra.mxu1 %v7394_v13  ;;  %2153 = vmatprep.mubr.f32.mxu1 %v7311_v3 }
 0x7e8   :  { %6332 = vmatpush1.bf16.msra.mxu0 %v7421_v22  ;;  %6354 = vmatprep.subr.bf16.mxu1 %v7409_v18 }
 0x7e9   :  { %6334 = vmatprep.subr.bf16.mxu0 %v7436_v27 }
 0x7eb   :  { %6356 = vmatpush1.bf16.msra.mxu1 %v7434_v26 }
 0x7ec   :  { %6336 = vmatpush1.bf16.msra.mxu0 %v7459_v35  ;;  %6358 = vmatprep.subr.bf16.mxu1 %v7447_v31 }
 0x7ed   :  { %6338 = vmatprep.subr.bf16.mxu0 %v7474_v40 }
 0x7ef   :  { %6360 = vmatpush1.bf16.msra.mxu1 %v7472_v39 }
 0x7f0   :  { %6340 = vmatpush1.bf16.msra.mxu0 %v7507_v51  ;;  %6362 = vmatprep.subr.bf16.mxu1 %v7486_v44 }
 0x7f1   :  { %6342 = vmatprep.subr.bf16.mxu0 %v7513_v53 }
 0x7f3   :  { %6364 = vmatpush1.bf16.msra.mxu1 %v7511_v52 }
 0x7f4   :  { %6366 = vmatprep.subr.bf16.mxu1 %v7525_v57 }
 0x8b5   :  { %v1692_v61 = vpop.f32.mrb[8].mxu0 }
 0x8b6   :  { %v1697_v25 = vadd.f32 %v1692_v61, %v7642_v30  ;;  %v1694_v62 = vpop.f32.mrb[9].mxu0 }
 0x8b7   :  { %v1698_v23 = vadd.f32 %v1694_v62, %v7648_v46 }
 0x8b8   :  { %v5900_v2 = vmul.f32 -1.442695, %v1697_v25 }
 0x8b9   :  { %v1871_v34 = vpop.f32.mrb[8].mxu1  ;;  %v5901_v48 = vmul.f32 -1.442695, %v1698_v23 }
 0x8ba   :  { %7015 = vpow2.f32 %v5900_v2  ;;  %v1876_v7 = vadd.f32 %v1871_v34, %v7644_v32  ;;  %v1873_v10 = vpop.f32.mrb[9].mxu1 }
 0x8bb   :  { %v1877_v29 = vadd.f32 %v1873_v10, %v7650_v47 }
 0x8bc   :  { %v5908_v20 = vmul.f32 -1.442695, %v1876_v7 }
 0x8bd   :  { %v5909_v50 = vmul.f32 -1.442695, %v1877_v29 }
 0x8be   :  { %7017 = vpow2.f32 %v5908_v20 }
 0x8bf   :  { %7019 = vtanh.f32 %v1698_v23 }
 0x8c4   :  { %v7016_v24 = vpop.eup %7015 }
 0x8c5   :  { %v1702_v28 = vadd.f32 1.0, %v7016_v24  ;;  %v7965_v24 = vld [vmem:[%s8746_s0 + $0x28] sm:$0xff] }
 0x8c7   :  { %7021 = vrcp.f32 %v1702_v28 }
 0x8c8   :  { %v7018_v49 = vpop.eup %7017  ;;  %7023 = vtanh.f32 %v1877_v29 }
 0x8c9   :  { %v1881_v33 = vadd.f32 1.0, %v7018_v49  ;;  %v7020_v36 = vpop.eup %7019 }
 0x8cb   :  { %7025 = vrcp.f32 %v1881_v33 }
 0x8cc   :  { %7027 = vpow2.f32 %v5901_v48 }
 0x8cd   :  { %7029 = vpow2.f32 %v5909_v50 }
 0x8d1   :  { %v7022_v56 = vpop.eup %7021 }
 0x8d2   :  { %v1713_v38 = vmul.f32 %v7022_v56, %v7020_v36  ;;  %v7024_v41 = vpop.eup %7023  ;;  %v1712_v58 = vmul.f32 %v7022_v56, %v7865_v37 }
 0x8d4   :  { %1715 = vrot.lane.b32.xlu0 %v1713_v38, %s7312_s3 }
 0x8d5   :  { %v7026_v42 = vpop.eup %7025 }
 0x8d6   :  { %v1892_v45 = vmul.f32 %v7026_v42, %v7024_v41  ;;  %v7028_v54 = vpop.eup %7027  ;;  %v1891_v61 = vmul.f32 %v7026_v42, %v7869_v43 }
 0x8d7   :  { %v1709_v5 = vadd.f32 1.0, %v7028_v54  ;;  %v7030_v55 = vpop.eup %7029 }
 0x8d8   :  { %1894 = vrot.lane.b32.xlu1 %v1892_v45, %s7312_s3  ;;  %v1888_v60 = vadd.f32 1.0, %v7030_v55 }
 0x8d9   :  { %7031 = vrcp.f32 %v1709_v5 }
 0x8e3   :  { %v7032_v2 = vpop.eup %7031 }
 0x946   :  { %v1716_v21 = vpop.permute.xlu0 %1715 }
 0x947   :  { %v7935_v59 = vadd.f32 %v1716_v21, %v1712_v58 }
 0x949   :  { %7033 = vtanh.f32 %v7935_v59 }
 0x94a   :  { %v1895_v25 = vpop.permute.xlu1 %1894  ;;  %7035 = vrcp.f32 %v1888_v60 }
 0x94b   :  { %v7939_v62 = vadd.f32 %v1895_v25, %v1891_v61 }
 0x94d   :  { %7037 = vtanh.f32 %v7939_v62 }
 0x953   :  { %v7034_v34 = vpop.eup %7033 }
 0x954   :  { %v1720_v7 = vmul.f32 %v7034_v34, %v7032_v2  ;;  %v7036_v10 = vpop.eup %7035 }
 0x956   :  { %1722 = vrot.lane.b32.xlu0 %v1720_v7, %s7312_s3 }
 0x957   :  { %v7038_v37 = vpop.eup %7037 }
 0x958   :  { %v1899_v20 = vmul.f32 %v7038_v37, %v7036_v10 }
 0x95a   :  { %1901 = vrot.lane.b32.xlu1 %v1899_v20, %s7312_s3 }
 0x9c8   :  { %v1723_v23 = vpop.permute.xlu0 %1722 }
 0x9c9   :  { %5902 = vst.msk [vmem:[%s8749_s7 + $0x20] sm:$0xff] %vm83_vm2, %v1723_v23  ;;  %5912 = vmatmul.mubr.msk.f32.vlgmr.msra.gmra.mrb[10].mxu0 %vm83_vm2, %v1723_v23 }
 0x9ca   :  { %6344 = vmatpush1.bf16.msra.mxu0 %v7543_v63  ;;  %2048 = vmatprep.mubr.f32.mxu0 %v7311_v3 }
 0x9cb   :  { %6346 = vmatprep.subr.bf16.mxu0 %v7549_v1 }
 0x9cc   :  { %v1902_v43 = vpop.permute.xlu1 %1901 }
 0x9cd   :  { %5910 = vst.msk [vmem:[%s8750_s8 + $0x58] sm:$0xff] %vm83_vm2, %v1902_v43  ;;  %5920 = vmatmul.mubr.msk.f32.vlgmr.msra.gmra.mrb[10].mxu1 %vm83_vm2, %v1902_v43 }
 0x9ce   :  { %6348 = vmatpush1.bf16.msra.mxu0 %v7569_v11  ;;  %6368 = vmatpush1.bf16.msra.mxu1 %v7547_v0 }
 0x9cf   :  { %5913 = vmatprep.subr.msk.mxu0 %vm162_vm0, %v7579_v14  ;;  %6370 = vmatprep.subr.bf16.mxu1 %v7558_v6  ;;  %v7978_v14 = vld [vmem:[%s8746_s0 + $0x50] sm:$0xff] }
 0x9d0   :  { %2227 = vmatprep.mubr.f32.mxu1 %v7311_v3 }
 0x9d2   :  { %5914 = vmatpush1.msk.msra.mxu0 %vm162_vm0, %v7595_v16  ;;  %6372 = vmatpush1.bf16.msra.mxu1 %v7573_v12 }
 0x9d3   :  { %5915 = vmatmul.mubr.msk.f32.vlgmr.msra.gmra.mrb[10].mxu0 %vm158_vm1, %v7965_v24  ;;  %5921 = vmatprep.subr.msk.mxu1 %vm162_vm0, %v7585_v15 }
 0x9d4   :  { %6374 = vmatprep.subr.bf16.mxu0 %v7369_v4  ;;  %2332 = vmatprep.mubr.f32.mxu0 %v7311_v3 }
 0x9d5   :  { %6376 = vmatpush1.bf16.msra.mxu0 %v7382_v9 }
 0x9d6   :  { %5922 = vmatpush1.msk.msra.mxu1 %vm162_vm0, %v7602_v19  ;;  %6378 = vmatprep.subr.bf16.mxu0 %v7407_v17 }
 0x9d7   :  { %5923 = vmatmul.mubr.msk.f32.vlgmr.msra.gmra.mrb[10].mxu1 %vm158_vm1, %v7978_v14  ;;  %6398 = vmatprep.subr.bf16.mxu1 %v7380_v8 }
 0x9d8   :  { %6400 = vmatpush1.bf16.msra.mxu1 %v7394_v13  ;;  %2511 = vmatprep.mubr.f32.mxu1 %v7311_v3 }
 0x9d9   :  { %6380 = vmatpush1.bf16.msra.mxu0 %v7421_v22  ;;  %6402 = vmatprep.subr.bf16.mxu1 %v7409_v18 }
 0x9da   :  { %6382 = vmatprep.subr.bf16.mxu0 %v7436_v27 }
 0x9dc   :  { %6404 = vmatpush1.bf16.msra.mxu1 %v7434_v26 }
 0x9dd   :  { %6384 = vmatpush1.bf16.msra.mxu0 %v7459_v35  ;;  %6406 = vmatprep.subr.bf16.mxu1 %v7447_v31 }
 0x9de   :  { %6386 = vmatprep.subr.bf16.mxu0 %v7474_v40 }
 0x9e0   :  { %6408 = vmatpush1.bf16.msra.mxu1 %v7472_v39 }
 0x9e1   :  { %6388 = vmatpush1.bf16.msra.mxu0 %v7507_v51  ;;  %6410 = vmatprep.subr.bf16.mxu1 %v7486_v44 }
 0x9e2   :  { %6390 = vmatprep.subr.bf16.mxu0 %v7513_v53 }
 0x9e4   :  { %6412 = vmatpush1.bf16.msra.mxu1 %v7511_v52 }
 0x9e5   :  { %6414 = vmatprep.subr.bf16.mxu1 %v7525_v57 }
 0xaa6   :  { %v2050_v15 = vpop.f32.mrb[10].mxu0 }
 0xaa7   :  { %v2055_v16 = vadd.f32 %v2050_v15, %v7642_v30  ;;  %v2052_v19 = vpop.f32.mrb[11].mxu0 }
 0xaa8   :  { %v2056_v56 = vadd.f32 %v2052_v19, %v7648_v46 }
 0xaa9   :  { %v5916_v28 = vmul.f32 -1.442695, %v2055_v16 }
 0xaaa   :  { %v2229_v29 = vpop.f32.mrb[10].mxu1  ;;  %v5917_v60 = vmul.f32 -1.442695, %v2056_v56 }
 0xaab   :  { %7039 = vpow2.f32 %v5916_v28  ;;  %v2234_v49 = vadd.f32 %v2229_v29, %v7644_v32  ;;  %v2231_v33 = vpop.f32.mrb[11].mxu1 }
 0xaac   :  { %v2235_v42 = vadd.f32 %v2231_v33, %v7650_v47 }
 0xaad   :  { %v5924_v36 = vmul.f32 -1.442695, %v2234_v49 }
 0xaae   :  { %v5925_v61 = vmul.f32 -1.442695, %v2235_v42 }
 0xaaf   :  { %7041 = vpow2.f32 %v5924_v36  ;;  %v8038_v36 = vld [vmem:[%s8744_s1 + $0x48] sm:$0x1] }
 0xab0   :  { %7043 = vtanh.f32 %v2056_v56  ;;  %v8046_v56 = vld [vmem:[%s8746_s0 + $0x30] sm:$0xff] }
 0xab5   :  { %v7040_v38 = vpop.eup %7039 }
 0xab6   :  { %v2060_v41 = vadd.f32 1.0, %v7040_v38  ;;  %v8052_v38 = vld [vmem:[%s8744_s1 + $0x40] sm:$0x1] }
 0xab8   :  { %7045 = vrcp.f32 %v2060_v41  ;;  %v8062_v41 = vld [vmem:[%s8745_s4 + $0x48] sm:$0x1] }
 0xab9   :  { %v7042_v45 = vpop.eup %7041  ;;  %7047 = vtanh.f32 %v2235_v42  ;;  %v8069_v42 = vld [vmem:[%s8746_s0 + $0x48] sm:$0xff] }
 0xaba   :  { %v2239_v48 = vadd.f32 1.0, %v7042_v45  ;;  %v7044_v50 = vpop.eup %7043  ;;  %v8077_v45 = vld [vmem:[%s8745_s4 + $0x40] sm:$0x1] }
 0xabc   :  { %7049 = vrcp.f32 %v2239_v48 }
 0xabd   :  { %7051 = vpow2.f32 %v5917_v60 }
 0xabe   :  { %7053 = vpow2.f32 %v5925_v61 }
 0xac2   :  { %v7046_v54 = vpop.eup %7045 }
 0xac3   :  { %v2071_v5 = vmul.f32 %v7046_v54, %v7044_v50  ;;  %v7048_v55 = vpop.eup %7047  ;;  %v2070_v7 = vmul.f32 %v7046_v54, %v7935_v59 }
 0xac5   :  { %2073 = vrot.lane.b32.xlu0 %v2071_v5, %s7312_s3 }
 0xac6   :  { %v7050_v58 = vpop.eup %7049 }
 0xac7   :  { %v2250_v21 = vmul.f32 %v7050_v58, %v7048_v55  ;;  %v7052_v25 = vpop.eup %7051  ;;  %v2249_v23 = vmul.f32 %v7050_v58, %v7939_v62 }
 0xac8   :  { %v2067_v2 = vadd.f32 1.0, %v7052_v25  ;;  %v7054_v34 = vpop.eup %7053 }
 0xac9   :  { %2252 = vrot.lane.b32.xlu1 %v2250_v21, %s7312_s3  ;;  %v2246_v20 = vadd.f32 1.0, %v7054_v34 }
 0xaca   :  { %7055 = vrcp.f32 %v2067_v2 }
 0xad4   :  { %v7056_v16 = vpop.eup %7055 }
 0xb37   :  { %v2074_v10 = vpop.permute.xlu0 %2073 }
 0xb38   :  { %v8011_v37 = vadd.f32 %v2074_v10, %v2070_v7 }
 0xb3a   :  { %7057 = vtanh.f32 %v8011_v37 }
 0xb3b   :  { %v2253_v43 = vpop.permute.xlu1 %2252  ;;  %7059 = vrcp.f32 %v2246_v20 }
 0xb3c   :  { %v8015_v15 = vadd.f32 %v2253_v43, %v2249_v23 }
 0xb3e   :  { %7061 = vtanh.f32 %v8015_v15 }
 0xb44   :  { %v7058_v19 = vpop.eup %7057 }
 0xb45   :  { %v2078_v28 = vmul.f32 %v7058_v19, %v7056_v16  ;;  %v7060_v29 = vpop.eup %7059 }
 0xb47   :  { %2080 = vrot.lane.b32.xlu0 %v2078_v28, %s7312_s3 }
 0xb48   :  { %v7062_v59 = vpop.eup %7061 }
 0xb49   :  { %v2257_v49 = vmul.f32 %v7062_v59, %v7060_v29 }
 0xb4b   :  { %2259 = vrot.lane.b32.xlu1 %v2257_v49, %s7312_s3 }
 0xbb9   :  { %v2081_v33 = vpop.permute.xlu0 %2080 }
 0xbba   :  { %5918 = vst.msk [vmem:[%s8749_s7 + $0x28] sm:$0xff] %vm83_vm2, %v2081_v33  ;;  %5928 = vmatmul.mubr.msk.f32.vlgmr.msra.gmra.mrb[12].mxu0 %vm83_vm2, %v2081_v33 }
 0xbbb   :  { %6392 = vmatpush1.bf16.msra.mxu0 %v7543_v63  ;;  %2406 = vmatprep.mubr.f32.mxu0 %v7311_v3 }
 0xbbc   :  { %6394 = vmatprep.subr.bf16.mxu0 %v7549_v1 }
 0xbbd   :  { %v2260_v62 = vpop.permute.xlu1 %2259 }
 0xbbe   :  { %5926 = vst.msk [vmem:[%s8750_s8 + $0x50] sm:$0xff] %vm83_vm2, %v2260_v62  ;;  %5936 = vmatmul.mubr.msk.f32.vlgmr.msra.gmra.mrb[12].mxu1 %vm83_vm2, %v2260_v62 }
 0xbbf   :  { %6396 = vmatpush1.bf16.msra.mxu0 %v7569_v11  ;;  %6416 = vmatpush1.bf16.msra.mxu1 %v7547_v0 }
 0xbc0   :  { %5929 = vmatprep.subr.msk.mxu0 %vm162_vm0, %v8038_v36  ;;  %6418 = vmatprep.subr.bf16.mxu1 %v7558_v6 }
 0xbc1   :  { %2585 = vmatprep.mubr.f32.mxu1 %v7311_v3 }
 0xbc3   :  { %5930 = vmatpush1.msk.msra.mxu0 %vm162_vm0, %v8052_v38  ;;  %6420 = vmatpush1.bf16.msra.mxu1 %v7573_v12 }
 0xbc4   :  { %5931 = vmatmul.mubr.msk.f32.vlgmr.msra.gmra.mrb[12].mxu0 %vm158_vm1, %v8046_v56  ;;  %5937 = vmatprep.subr.msk.mxu1 %vm162_vm0, %v8062_v41 }
 0xbc5   :  { %6422 = vmatprep.subr.bf16.mxu0 %v7369_v4  ;;  %2690 = vmatprep.mubr.f32.mxu0 %v7311_v3 }
 0xbc6   :  { %6424 = vmatpush1.bf16.msra.mxu0 %v7382_v9 }
 0xbc7   :  { %5938 = vmatpush1.msk.msra.mxu1 %vm162_vm0, %v8077_v45  ;;  %6426 = vmatprep.subr.bf16.mxu0 %v7407_v17 }
 0xbc8   :  { %5939 = vmatmul.mubr.msk.f32.vlgmr.msra.gmra.mrb[12].mxu1 %vm158_vm1, %v8069_v42  ;;  %6446 = vmatprep.subr.bf16.mxu1 %v7380_v8 }
 0xbc9   :  { %6448 = vmatpush1.bf16.msra.mxu1 %v7394_v13  ;;  %2869 = vmatprep.mubr.f32.mxu1 %v7311_v3 }
 0xbca   :  { %6428 = vmatpush1.bf16.msra.mxu0 %v7421_v22  ;;  %6450 = vmatprep.subr.bf16.mxu1 %v7409_v18 }
 0xbcb   :  { %6430 = vmatprep.subr.bf16.mxu0 %v7436_v27 }
 0xbcd   :  { %6452 = vmatpush1.bf16.msra.mxu1 %v7434_v26 }
 0xbce   :  { %6432 = vmatpush1.bf16.msra.mxu0 %v7459_v35  ;;  %6454 = vmatprep.subr.bf16.mxu1 %v7447_v31 }
 0xbcf   :  { %6434 = vmatprep.subr.bf16.mxu0 %v7474_v40 }
 0xbd1   :  { %6456 = vmatpush1.bf16.msra.mxu1 %v7472_v39 }
 0xbd2   :  { %6436 = vmatpush1.bf16.msra.mxu0 %v7507_v51  ;;  %6458 = vmatprep.subr.bf16.mxu1 %v7486_v44 }
 0xbd3   :  { %6438 = vmatprep.subr.bf16.mxu0 %v7513_v53 }
 0xbd5   :  { %6460 = vmatpush1.bf16.msra.mxu1 %v7511_v52 }
 0xbd6   :  { %6462 = vmatprep.subr.bf16.mxu1 %v7525_v57 }
 0xc97   :  { %v2408_v48 = vpop.f32.mrb[12].mxu0 }
 0xc98   :  { %v2413_v50 = vadd.f32 %v2408_v48, %v7642_v30  ;;  %v2410_v54 = vpop.f32.mrb[13].mxu0 }
 0xc99   :  { %v2414_v61 = vadd.f32 %v2410_v54, %v7648_v46 }
 0xc9a   :  { %v5932_v5 = vmul.f32 -1.442695, %v2413_v50 }
 0xc9b   :  { %v2587_v55 = vpop.f32.mrb[12].mxu1  ;;  %v5933_v29 = vmul.f32 -1.442695, %v2414_v61 }
 0xc9c   :  { %7063 = vpow2.f32 %v5932_v5  ;;  %v2592_v58 = vadd.f32 %v2587_v55, %v7644_v32  ;;  %v2589_v21 = vpop.f32.mrb[13].mxu1 }
 0xc9d   :  { %v2593_v34 = vadd.f32 %v2589_v21, %v7650_v47 }
 0xc9e   :  { %v5940_v60 = vmul.f32 -1.442695, %v2592_v58 }
 0xc9f   :  { %v5941_v59 = vmul.f32 -1.442695, %v2593_v34 }
 0xca0   :  { %7065 = vpow2.f32 %v5940_v60 }
 0xca1   :  { %7067 = vtanh.f32 %v2414_v61 }
 0xca6   :  { %v7064_v25 = vpop.eup %7063 }
 0xca7   :  { %v2418_v2 = vadd.f32 1.0, %v7064_v25 }
 0xca9   :  { %7069 = vrcp.f32 %v2418_v2 }
 0xcaa   :  { %v7066_v7 = vpop.eup %7065  ;;  %7071 = vtanh.f32 %v2593_v34 }
 0xcab   :  { %v2597_v10 = vadd.f32 1.0, %v7066_v7  ;;  %v7068_v20 = vpop.eup %7067 }
 0xcad   :  { %7073 = vrcp.f32 %v2597_v10  ;;  %v8137_v10 = vld [vmem:[%s8746_s0 + $0x38] sm:$0xff] }
 0xcae   :  { %7075 = vpow2.f32 %v5933_v29 }
 0xcaf   :  { %7077 = vpow2.f32 %v5941_v59 }
 0xcb3   :  { %v7070_v23 = vpop.eup %7069 }
 0xcb4   :  { %v2429_v43 = vmul.f32 %v7070_v23, %v7068_v20  ;;  %v7072_v16 = vpop.eup %7071  ;;  %v2428_v48 = vmul.f32 %v7070_v23, %v8011_v37  ;;  %v8150_v20 = vld [vmem:[%s8746_s0 + $0x40] sm:$0xff] }
 0xcb6   :  { %2431 = vrot.lane.b32.xlu0 %v2429_v43, %s7312_s3 }
 0xcb7   :  { %v7074_v19 = vpop.eup %7073 }
 0xcb8   :  { %v2608_v28 = vmul.f32 %v7074_v19, %v7072_v16  ;;  %v7076_v49 = vpop.eup %7075  ;;  %v2607_v55 = vmul.f32 %v7074_v19, %v8015_v15 }
 0xcb9   :  { %v2425_v33 = vadd.f32 1.0, %v7076_v49  ;;  %v7078_v62 = vpop.eup %7077 }
 0xcba   :  { %2610 = vrot.lane.b32.xlu1 %v2608_v28, %s7312_s3  ;;  %v2604_v5 = vadd.f32 1.0, %v7078_v62 }
 0xcbb   :  { %7079 = vrcp.f32 %v2425_v33 }
 0xcc5   :  { %v7080_v60 = vpop.eup %7079 }
 0xd28   :  { %v2432_v50 = vpop.permute.xlu0 %2431 }
 0xd29   :  { %v8107_v54 = vadd.f32 %v2432_v50, %v2428_v48 }
 0xd2b   :  { %7081 = vtanh.f32 %v8107_v54 }
 0xd2c   :  { %v2611_v58 = vpop.permute.xlu1 %2610  ;;  %7083 = vrcp.f32 %v2604_v5 }
 0xd2d   :  { %v8111_v21 = vadd.f32 %v2611_v58, %v2607_v55 }
 0xd2f   :  { %7085 = vtanh.f32 %v8111_v21 }
 0xd35   :  { %v7082_v61 = vpop.eup %7081 }
 0xd36   :  { %v2436_v25 = vmul.f32 %v7082_v61, %v7080_v60  ;;  %v7084_v2 = vpop.eup %7083 }
 0xd38   :  { %2438 = vrot.lane.b32.xlu0 %v2436_v25, %s7312_s3 }
 0xd39   :  { %v7086_v37 = vpop.eup %7085 }
 0xd3a   :  { %v2615_v34 = vmul.f32 %v7086_v37, %v7084_v2 }
 0xd3c   :  { %2617 = vrot.lane.b32.xlu1 %v2615_v34, %s7312_s3 }
 0xdaa   :  { %v2439_v7 = vpop.permute.xlu0 %2438 }
 0xdab   :  { %5934 = vst.msk [vmem:[%s8749_s7 + $0x30] sm:$0xff] %vm83_vm2, %v2439_v7  ;;  %5944 = vmatmul.mubr.msk.f32.vlgmr.msra.gmra.mrb[14].mxu0 %vm83_vm2, %v2439_v7 }
 0xdac   :  { %6440 = vmatpush1.bf16.msra.mxu0 %v7543_v63  ;;  %2764 = vmatprep.mubr.f32.mxu0 %v7311_v3 }
 0xdad   :  { %6442 = vmatprep.subr.bf16.mxu0 %v7549_v1 }
 0xdae   :  { %v2618_v15 = vpop.permute.xlu1 %2617 }
 0xdaf   :  { %5942 = vst.msk [vmem:[%s8750_s8 + $0x48] sm:$0xff] %vm83_vm2, %v2618_v15  ;;  %5952 = vmatmul.mubr.msk.f32.vlgmr.msra.gmra.mrb[14].mxu1 %vm83_vm2, %v2618_v15 }
 0xdb0   :  { %6444 = vmatpush1.bf16.msra.mxu0 %v7569_v11  ;;  %6464 = vmatpush1.bf16.msra.mxu1 %v7547_v0 }
 0xdb1   :  { %5945 = vmatprep.subr.msk.mxu0 %vm162_vm0, %v8038_v36  ;;  %6466 = vmatprep.subr.bf16.mxu1 %v7558_v6 }
 0xdb2   :  { %2943 = vmatprep.mubr.f32.mxu1 %v7311_v3 }
 0xdb4   :  { %5946 = vmatpush1.msk.msra.mxu0 %vm162_vm0, %v8052_v38  ;;  %6468 = vmatpush1.bf16.msra.mxu1 %v7573_v12 }
 0xdb5   :  { %5947 = vmatmul.mubr.msk.f32.vlgmr.msra.gmra.mrb[14].mxu0 %vm158_vm1, %v8137_v10  ;;  %5953 = vmatprep.subr.msk.mxu1 %vm162_vm0, %v8062_v41 }
 0xdb6   :  { %6470 = vmatprep.subr.bf16.mxu0 %v7369_v4  ;;  %3047 = vmatprep.mubr.f32.mxu0 %v7311_v3 }
 0xdb7   :  { %6472 = vmatpush1.bf16.msra.mxu0 %v7382_v9 }
 0xdb8   :  { %5954 = vmatpush1.msk.msra.mxu1 %vm162_vm0, %v8077_v45  ;;  %6474 = vmatprep.subr.bf16.mxu0 %v7407_v17 }
 0xdb9   :  { %5955 = vmatmul.mubr.msk.f32.vlgmr.msra.gmra.mrb[14].mxu1 %vm158_vm1, %v8150_v20  ;;  %6494 = vmatprep.subr.bf16.mxu1 %v7380_v8 }
 0xdba   :  { %6496 = vmatpush1.bf16.msra.mxu1 %v7394_v13  ;;  %3225 = vmatprep.mubr.f32.mxu1 %v7311_v3 }
 0xdbb   :  { %6476 = vmatpush1.bf16.msra.mxu0 %v7421_v22  ;;  %6498 = vmatprep.subr.bf16.mxu1 %v7409_v18 }
 0xdbc   :  { %6478 = vmatprep.subr.bf16.mxu0 %v7436_v27 }
 0xdbe   :  { %6500 = vmatpush1.bf16.msra.mxu1 %v7434_v26 }
 0xdbf   :  { %6480 = vmatpush1.bf16.msra.mxu0 %v7459_v35  ;;  %6502 = vmatprep.subr.bf16.mxu1 %v7447_v31 }
 0xdc0   :  { %6482 = vmatprep.subr.bf16.mxu0 %v7474_v40 }
 0xdc2   :  { %6504 = vmatpush1.bf16.msra.mxu1 %v7472_v39 }
 0xdc3   :  { %6484 = vmatpush1.bf16.msra.mxu0 %v7507_v51  ;;  %6506 = vmatprep.subr.bf16.mxu1 %v7486_v44 }
 0xdc4   :  { %6486 = vmatprep.subr.bf16.mxu0 %v7513_v53 }
 0xdc6   :  { %6508 = vmatpush1.bf16.msra.mxu1 %v7511_v52 }
 0xdc7   :  { %6510 = vmatprep.subr.bf16.mxu1 %v7525_v57 }
 0xe88   :  { %v2766_v23 = vpop.f32.mrb[14].mxu0 }
 0xe89   :  { %v2771_v43 = vadd.f32 %v2766_v23, %v7642_v30  ;;  %v2768_v16 = vpop.f32.mrb[15].mxu0 }
 0xe8a   :  { %v2772_v33 = vadd.f32 %v2768_v16, %v7648_v46 }
 0xe8b   :  { %v5948_v19 = vmul.f32 -1.442695, %v2771_v43 }
 0xe8c   :  { %v2945_v28 = vpop.f32.mrb[14].mxu1  ;;  %v5949_v34 = vmul.f32 -1.442695, %v2772_v33 }
 0xe8d   :  { %7087 = vpow2.f32 %v5948_v19  ;;  %v2950_v29 = vadd.f32 %v2945_v28, %v7644_v32  ;;  %v2947_v59 = vpop.f32.mrb[15].mxu1 }
 0xe8e   :  { %v2951_v50 = vadd.f32 %v2947_v59, %v7650_v47 }
 0xe8f   :  { %v5956_v49 = vmul.f32 -1.442695, %v2950_v29 }
 0xe90   :  { %v5957_v7 = vmul.f32 -1.442695, %v2951_v50 }
 0xe91   :  { %7089 = vpow2.f32 %v5956_v49 }
 0xe92   :  { %7091 = vtanh.f32 %v2772_v33 }
 0xe97   :  { %v7088_v62 = vpop.eup %7087 }
 0xe98   :  { %v2776_v48 = vadd.f32 1.0, %v7088_v62 }
 0xe9a   :  { %7093 = vrcp.f32 %v2776_v48 }
 0xe9b   :  { %v7090_v5 = vpop.eup %7089  ;;  %7095 = vtanh.f32 %v2951_v50 }
 0xe9c   :  { %v2955_v55 = vadd.f32 1.0, %v7090_v5  ;;  %v7092_v58 = vpop.eup %7091 }
 0xe9e   :  { %7097 = vrcp.f32 %v2955_v55 }
 0xe9f   :  { %7099 = vpow2.f32 %v5949_v34 }
 0xea0   :  { %7101 = vpow2.f32 %v5957_v7 }
 0xea4   :  { %v7094_v60 = vpop.eup %7093 }
 0xea5   :  { %v2787_v61 = vmul.f32 %v7094_v60, %v7092_v58  ;;  %v7096_v25 = vpop.eup %7095  ;;  %v2786_v16 = vmul.f32 %v7094_v60, %v8107_v54 }
 0xea7   :  { %2789 = vrot.lane.b32.xlu0 %v2787_v61, %s7312_s3 }
 0xea8   :  { %v7098_v2 = vpop.eup %7097 }
 0xea9   :  { %v2966_v37 = vmul.f32 %v7098_v2, %v7096_v25  ;;  %v7100_v15 = vpop.eup %7099  ;;  %v2965_v59 = vmul.f32 %v7098_v2, %v8111_v21 }
 0xeaa   :  { %v2783_v23 = vadd.f32 1.0, %v7100_v15  ;;  %v7102_v43 = vpop.eup %7101 }
 0xeab   :  { %2968 = vrot.lane.b32.xlu1 %v2966_v37, %s7312_s3  ;;  %v2962_v29 = vadd.f32 1.0, %v7102_v43 }
 0xeac   :  { %7103 = vrcp.f32 %v2783_v23 }
 0xeb6   :  { %v7104_v33 = vpop.eup %7103 }
 0xf19   :  { %v2790_v19 = vpop.permute.xlu0 %2789 }
 0xf1a   :  { %v8183_v28 = vadd.f32 %v2790_v19, %v2786_v16 }
 0xf1c   :  { %7105 = vtanh.f32 %v8183_v28 }
 0xf1d   :  { %v2969_v49 = vpop.permute.xlu1 %2968  ;;  %7107 = vrcp.f32 %v2962_v29 }
 0xf1e   :  { %v8187_v62 = vadd.f32 %v2969_v49, %v2965_v59 }
 0xf20   :  { %7109 = vtanh.f32 %v8187_v62 }
 0xf26   :  { %v7106_v48 = vpop.eup %7105 }
 0xf27   :  { %v2794_v50 = vmul.f32 %v7106_v48, %v7104_v33  ;;  %v7108_v5 = vpop.eup %7107 }
 0xf29   :  { %2796 = vrot.lane.b32.xlu0 %v2794_v50, %s7312_s3 }
 0xf2a   :  { %v7110_v54 = vpop.eup %7109 }
 0xf2b   :  { %v2973_v55 = vmul.f32 %v7110_v54, %v7108_v5 }
 0xf2d   :  { %2975 = vrot.lane.b32.xlu1 %v2973_v55, %s7312_s3 }
 0xf9b   :  { %v2797_v58 = vpop.permute.xlu0 %2796 }
 0xf9c   :  { %5950 = vst.msk [vmem:[%s8749_s7 + $0x38] sm:$0xff] %vm83_vm2, %v2797_v58  ;;  %5960 = vmatmul.mubr.msk.f32.vlgmr.msra.gmra.mrb[16].mxu0 %vm83_vm2, %v2797_v58 }
 0xf9d   :  { %6488 = vmatpush1.bf16.msra.mxu0 %v7543_v63  ;;  %3121 = vmatprep.mubr.f32.mxu0 %v7311_v3 }
 0xf9e   :  { %6490 = vmatprep.subr.bf16.mxu0 %v7549_v1 }
 0xf9f   :  { %v2976_v21 = vpop.permute.xlu1 %2975 }
 0xfa0   :  { %5958 = vst.msk [vmem:[%s8750_s8 + $0x40] sm:$0xff] %vm83_vm2, %v2976_v21  ;;  %5968 = vmatmul.mubr.msk.f32.vlgmr.msra.gmra.mrb[16].mxu1 %vm83_vm2, %v2976_v21 }
 0xfa1   :  { %6492 = vmatpush1.bf16.msra.mxu0 %v7569_v11  ;;  %6512 = vmatpush1.bf16.msra.mxu1 %v7547_v0 }
 0xfa2   :  { %5961 = vmatprep.subr.msk.mxu0 %vm162_vm0, %v8038_v36  ;;  %6514 = vmatprep.subr.bf16.mxu1 %v7558_v6 }
 0xfa3   :  { %3299 = vmatprep.mubr.f32.mxu1 %v7311_v3 }
 0xfa5   :  { %5962 = vmatpush1.msk.msra.mxu0 %vm162_vm0, %v8052_v38  ;;  %6516 = vmatpush1.bf16.msra.mxu1 %v7573_v12 }
 0xfa6   :  { %5963 = vmatmul.mubr.msk.f32.vlgmr.msra.gmra.mrb[16].mxu0 %vm158_vm1, %v8150_v20  ;;  %5969 = vmatprep.subr.msk.mxu1 %vm162_vm0, %v8062_v41 }
 0xfa7   :  { %6518 = vmatprep.subr.bf16.mxu0 %v7369_v4  ;;  %3403 = vmatprep.mubr.f32.mxu0 %v7311_v3 }
 0xfa8   :  { %6520 = vmatpush1.bf16.msra.mxu0 %v7382_v9 }
 0xfa9   :  { %5970 = vmatpush1.msk.msra.mxu1 %vm162_vm0, %v8077_v45  ;;  %6522 = vmatprep.subr.bf16.mxu0 %v7407_v17 }
 0xfaa   :  { %5971 = vmatmul.mubr.msk.f32.vlgmr.msra.gmra.mrb[16].mxu1 %vm158_vm1, %v8137_v10  ;;  %6542 = vmatprep.subr.bf16.mxu1 %v7380_v8 }
 0xfab   :  { %6544 = vmatpush1.bf16.msra.mxu1 %v7394_v13  ;;  %3581 = vmatprep.mubr.f32.mxu1 %v7311_v3 }
 0xfac   :  { %6524 = vmatpush1.bf16.msra.mxu0 %v7421_v22  ;;  %6546 = vmatprep.subr.bf16.mxu1 %v7409_v18 }
 0xfad   :  { %6526 = vmatprep.subr.bf16.mxu0 %v7436_v27 }
 0xfaf   :  { %6548 = vmatpush1.bf16.msra.mxu1 %v7434_v26 }
 0xfb0   :  { %6528 = vmatpush1.bf16.msra.mxu0 %v7459_v35  ;;  %6550 = vmatprep.subr.bf16.mxu1 %v7447_v31 }
 0xfb1   :  { %6530 = vmatprep.subr.bf16.mxu0 %v7474_v40 }
 0xfb3   :  { %6552 = vmatpush1.bf16.msra.mxu1 %v7472_v39 }
 0xfb4   :  { %6532 = vmatpush1.bf16.msra.mxu0 %v7507_v51  ;;  %6554 = vmatprep.subr.bf16.mxu1 %v7486_v44 }
 0xfb5   :  { %6534 = vmatprep.subr.bf16.mxu0 %v7513_v53 }
 0xfb7   :  { %6556 = vmatpush1.bf16.msra.mxu1 %v7511_v52 }
 0xfb8   :  { %6558 = vmatprep.subr.bf16.mxu1 %v7525_v57 }
0x1079   :  { %v3123_v10 = vpop.f32.mrb[16].mxu0 }
0x107a   :  { %v3128_v20 = vadd.f32 %v3123_v10, %v7642_v30  ;;  %v3125_v60 = vpop.f32.mrb[17].mxu0 }
0x107b   :  { %v3129_v7 = vadd.f32 %v3125_v60, %v7648_v46 }
0x107c   :  { %v5964_v61 = vmul.f32 -1.442695, %v3128_v20 }
0x107d   :  { %v3301_v25 = vpop.f32.mrb[16].mxu1  ;;  %v5965_v5 = vmul.f32 -1.442695, %v3129_v7 }
0x107e   :  { %7111 = vpow2.f32 %v5964_v61  ;;  %v3306_v2 = vadd.f32 %v3301_v25, %v7644_v32  ;;  %v3303_v37 = vpop.f32.mrb[17].mxu1 }
0x107f   :  { %v3307_v43 = vadd.f32 %v3303_v37, %v7650_v47 }
0x1080   :  { %v5972_v34 = vmul.f32 -1.442695, %v3306_v2 }
0x1081   :  { %v5973_v54 = vmul.f32 -1.442695, %v3307_v43 }
0x1082   :  { %7113 = vpow2.f32 %v5972_v34 }
0x1083   :  { %7115 = vtanh.f32 %v3129_v7 }
0x1088   :  { %v7112_v15 = vpop.eup %7111 }
0x1089   :  { %v3133_v23 = vadd.f32 1.0, %v7112_v15 }
0x108b   :  { %7117 = vrcp.f32 %v3133_v23 }
0x108c   :  { %v7114_v16 = vpop.eup %7113  ;;  %7119 = vtanh.f32 %v3307_v43 }
0x108d   :  { %v3311_v19 = vadd.f32 1.0, %v7114_v16  ;;  %v7116_v29 = vpop.eup %7115 }
0x108f   :  { %7121 = vrcp.f32 %v3311_v19 }
0x1090   :  { %7123 = vpow2.f32 %v5965_v5 }
0x1091   :  { %7125 = vpow2.f32 %v5973_v54 }
0x1095   :  { %v7118_v59 = vpop.eup %7117 }
0x1096   :  { %v3144_v49 = vmul.f32 %v7118_v59, %v7116_v29  ;;  %v7120_v33 = vpop.eup %7119  ;;  %v3143_v10 = vmul.f32 %v7118_v59, %v8183_v28 }
0x1098   :  { %3146 = vrot.lane.b32.xlu0 %v3144_v49, %s7312_s3 }
0x1099   :  { %v7122_v48 = vpop.eup %7121 }
0x109a   :  { %v3322_v50 = vmul.f32 %v7122_v48, %v7120_v33  ;;  %v7124_v55 = vpop.eup %7123  ;;  %v3321_v25 = vmul.f32 %v7122_v48, %v8187_v62 }
0x109b   :  { %v3140_v58 = vadd.f32 1.0, %v7124_v55  ;;  %v7126_v21 = vpop.eup %7125 }
0x109c   :  { %3324 = vrot.lane.b32.xlu1 %v3322_v50, %s7312_s3  ;;  %v3318_v61 = vadd.f32 1.0, %v7126_v21 }
0x109d   :  { %7127 = vrcp.f32 %v3140_v58 }
0x10a7   :  { %v7128_v34 = vpop.eup %7127 }
0x110a   :  { %v3147_v20 = vpop.permute.xlu0 %3146 }
0x110b   :  { %v8249_v60 = vadd.f32 %v3147_v20, %v3143_v10 }
0x110d   :  { %7129 = vtanh.f32 %v8249_v60 }
0x110e   :  { %v3325_v2 = vpop.permute.xlu1 %3324  ;;  %7131 = vrcp.f32 %v3318_v61 }
0x110f   :  { %v8253_v37 = vadd.f32 %v3325_v2, %v3321_v25 }
0x1111   :  { %7133 = vtanh.f32 %v8253_v37 }
0x1117   :  { %v7130_v7 = vpop.eup %7129 }
0x1118   :  { %v3151_v15 = vmul.f32 %v7130_v7, %v7128_v34  ;;  %v7132_v23 = vpop.eup %7131 }
0x111a   :  { %3153 = vrot.lane.b32.xlu0 %v3151_v15, %s7312_s3 }
0x111b   :  { %v7134_v28 = vpop.eup %7133 }
0x111c   :  { %v3329_v43 = vmul.f32 %v7134_v28, %v7132_v23 }
0x111e   :  { %3331 = vrot.lane.b32.xlu1 %v3329_v43, %s7312_s3 }
0x118c   :  { %v3154_v16 = vpop.permute.xlu0 %3153 }
0x118d   :  { %5966 = vst.msk [vmem:[%s8749_s7 + $0x40] sm:$0xff] %vm83_vm2, %v3154_v16  ;;  %5976 = vmatmul.mubr.msk.f32.vlgmr.msra.gmra.mrb[18].mxu0 %vm83_vm2, %v3154_v16 }
0x118e   :  { %6536 = vmatpush1.bf16.msra.mxu0 %v7543_v63  ;;  %3477 = vmatprep.mubr.f32.mxu0 %v7311_v3 }
0x118f   :  { %6538 = vmatprep.subr.bf16.mxu0 %v7549_v1 }
0x1190   :  { %v3332_v62 = vpop.permute.xlu1 %3331 }
0x1191   :  { %5974 = vst.msk [vmem:[%s8750_s8 + $0x38] sm:$0xff] %vm83_vm2, %v3332_v62  ;;  %5984 = vmatmul.mubr.msk.f32.vlgmr.msra.gmra.mrb[18].mxu1 %vm83_vm2, %v3332_v62 }
0x1192   :  { %6540 = vmatpush1.bf16.msra.mxu0 %v7569_v11  ;;  %6560 = vmatpush1.bf16.msra.mxu1 %v7547_v0 }
0x1193   :  { %5977 = vmatprep.subr.msk.mxu0 %vm162_vm0, %v8038_v36  ;;  %6562 = vmatprep.subr.bf16.mxu1 %v7558_v6 }
0x1194   :  { %3655 = vmatprep.mubr.f32.mxu1 %v7311_v3 }
0x1196   :  { %5978 = vmatpush1.msk.msra.mxu0 %vm162_vm0, %v8052_v38  ;;  %6564 = vmatpush1.bf16.msra.mxu1 %v7573_v12 }
0x1197   :  { %5979 = vmatmul.mubr.msk.f32.vlgmr.msra.gmra.mrb[18].mxu0 %vm158_vm1, %v8069_v42  ;;  %5985 = vmatprep.subr.msk.mxu1 %vm162_vm0, %v8062_v41 }
0x1198   :  { %6566 = vmatprep.subr.bf16.mxu0 %v7369_v4  ;;  %3759 = vmatprep.mubr.f32.mxu0 %v7311_v3 }
0x1199   :  { %6568 = vmatpush1.bf16.msra.mxu0 %v7382_v9 }
0x119a   :  { %5986 = vmatpush1.msk.msra.mxu1 %vm162_vm0, %v8077_v45  ;;  %6570 = vmatprep.subr.bf16.mxu0 %v7407_v17 }
0x119b   :  { %5987 = vmatmul.mubr.msk.f32.vlgmr.msra.gmra.mrb[18].mxu1 %vm158_vm1, %v8046_v56  ;;  %6590 = vmatprep.subr.bf16.mxu1 %v7380_v8 }
0x119c   :  { %6592 = vmatpush1.bf16.msra.mxu1 %v7394_v13  ;;  %3937 = vmatprep.mubr.f32.mxu1 %v7311_v3 }
0x119d   :  { %6572 = vmatpush1.bf16.msra.mxu0 %v7421_v22  ;;  %6594 = vmatprep.subr.bf16.mxu1 %v7409_v18 }
0x119e   :  { %6574 = vmatprep.subr.bf16.mxu0 %v7436_v27 }
0x11a0   :  { %6596 = vmatpush1.bf16.msra.mxu1 %v7434_v26 }
0x11a1   :  { %6576 = vmatpush1.bf16.msra.mxu0 %v7459_v35  ;;  %6598 = vmatprep.subr.bf16.mxu1 %v7447_v31 }
0x11a2   :  { %6578 = vmatprep.subr.bf16.mxu0 %v7474_v40 }
0x11a4   :  { %6600 = vmatpush1.bf16.msra.mxu1 %v7472_v39 }
0x11a5   :  { %6580 = vmatpush1.bf16.msra.mxu0 %v7507_v51  ;;  %6602 = vmatprep.subr.bf16.mxu1 %v7486_v44 }
0x11a6   :  { %6582 = vmatprep.subr.bf16.mxu0 %v7513_v53 }
0x11a8   :  { %6604 = vmatpush1.bf16.msra.mxu1 %v7511_v52 }
0x11a9   :  { %6606 = vmatprep.subr.bf16.mxu1 %v7525_v57 }
0x126a   :  { %v3479_v56 = vpop.f32.mrb[18].mxu0 }
0x126b   :  { %v3484_v42 = vadd.f32 %v3479_v56, %v7642_v30  ;;  %v3481_v19 = vpop.f32.mrb[19].mxu0 }
0x126c   :  { %v3485_v50 = vadd.f32 %v3481_v19, %v7648_v46 }
0x126d   :  { %v5980_v29 = vmul.f32 -1.442695, %v3484_v42 }
0x126e   :  { %v3657_v59 = vpop.f32.mrb[18].mxu1  ;;  %v5981_v7 = vmul.f32 -1.442695, %v3485_v50 }
0x126f   :  { %7135 = vpow2.f32 %v5980_v29  ;;  %v3662_v49 = vadd.f32 %v3657_v59, %v7644_v32  ;;  %v3659_v33 = vpop.f32.mrb[19].mxu1 }
0x1270   :  { %v3663_v55 = vadd.f32 %v3659_v33, %v7650_v47 }
0x1271   :  { %v5988_v48 = vmul.f32 -1.442695, %v3662_v49 }
0x1272   :  { %v5989_v15 = vmul.f32 -1.442695, %v3663_v55 }
0x1273   :  { %7137 = vpow2.f32 %v5988_v48 }
0x1274   :  { %7139 = vtanh.f32 %v3485_v50 }
0x1279   :  { %v7136_v5 = vpop.eup %7135 }
0x127a   :  { %v3489_v54 = vadd.f32 1.0, %v7136_v5 }
0x127c   :  { %7141 = vrcp.f32 %v3489_v54 }
0x127d   :  { %v7138_v58 = vpop.eup %7137  ;;  %7143 = vtanh.f32 %v3663_v55 }
0x127e   :  { %v3667_v21 = vadd.f32 1.0, %v7138_v58  ;;  %v7140_v10 = vpop.eup %7139 }
0x1280   :  { %7145 = vrcp.f32 %v3667_v21 }
0x1281   :  { %7147 = vpow2.f32 %v5981_v7 }
0x1282   :  { %7149 = vpow2.f32 %v5989_v15 }
0x1286   :  { %v7142_v20 = vpop.eup %7141 }
0x1287   :  { %v3500_v61 = vmul.f32 %v7142_v20, %v7140_v10  ;;  %v7144_v25 = vpop.eup %7143  ;;  %v3499_v16 = vmul.f32 %v7142_v20, %v8249_v60 }
0x1289   :  { %3502 = vrot.lane.b32.xlu0 %v3500_v61, %s7312_s3 }
0x128a   :  { %v7146_v2 = vpop.eup %7145 }
0x128b   :  { %v3678_v34 = vmul.f32 %v7146_v2, %v7144_v25  ;;  %v7148_v23 = vpop.eup %7147  ;;  %v3677_v19 = vmul.f32 %v7146_v2, %v8253_v37 }
0x128c   :  { %v3496_v28 = vadd.f32 1.0, %v7148_v23  ;;  %v7150_v43 = vpop.eup %7149 }
0x128d   :  { %3680 = vrot.lane.b32.xlu1 %v3678_v34, %s7312_s3  ;;  %v3674_v42 = vadd.f32 1.0, %v7150_v43 }
0x128e   :  { %7151 = vrcp.f32 %v3496_v28 }
0x1298   :  { %v7152_v49 = vpop.eup %7151 }
0x12fb   :  { %v3503_v62 = vpop.permute.xlu0 %3502 }
0x12fc   :  { %v8315_v56 = vadd.f32 %v3503_v62, %v3499_v16 }
0x12fe   :  { %7153 = vtanh.f32 %v8315_v56 }
0x12ff   :  { %v3681_v29 = vpop.permute.xlu1 %3680  ;;  %7155 = vrcp.f32 %v3674_v42 }
0x1300   :  { %v8319_v59 = vadd.f32 %v3681_v29, %v3677_v19 }
0x1302   :  { %7157 = vtanh.f32 %v8319_v59 }
0x1308   :  { %v7154_v33 = vpop.eup %7153 }
0x1309   :  { %v3507_v48 = vmul.f32 %v7154_v33, %v7152_v49  ;;  %v7156_v50 = vpop.eup %7155 }
0x130b   :  { %3509 = vrot.lane.b32.xlu0 %v3507_v48, %s7312_s3 }
0x130c   :  { %v7158_v60 = vpop.eup %7157 }
0x130d   :  { %v3685_v5 = vmul.f32 %v7158_v60, %v7156_v50 }
0x130f   :  { %3687 = vrot.lane.b32.xlu1 %v3685_v5, %s7312_s3 }
0x137d   :  { %v3510_v54 = vpop.permute.xlu0 %3509 }
0x137e   :  { %5982 = vst.msk [vmem:[%s8749_s7 + $0x48] sm:$0xff] %vm83_vm2, %v3510_v54  ;;  %5992 = vmatmul.mubr.msk.f32.vlgmr.msra.gmra.mrb[20].mxu0 %vm83_vm2, %v3510_v54 }
0x137f   :  { %6584 = vmatpush1.bf16.msra.mxu0 %v7543_v63  ;;  %3833 = vmatprep.mubr.f32.mxu0 %v7311_v3 }
0x1380   :  { %6586 = vmatprep.subr.bf16.mxu0 %v7549_v1 }
0x1381   :  { %v3688_v37 = vpop.permute.xlu1 %3687 }
0x1382   :  { %5990 = vst.msk [vmem:[%s8750_s8 + $0x30] sm:$0xff] %vm83_vm2, %v3688_v37  ;;  %6000 = vmatmul.mubr.msk.f32.vlgmr.msra.gmra.mrb[20].mxu1 %vm83_vm2, %v3688_v37 }
0x1383   :  { %6588 = vmatpush1.bf16.msra.mxu0 %v7569_v11  ;;  %6608 = vmatpush1.bf16.msra.mxu1 %v7547_v0 }
0x1384   :  { %5993 = vmatprep.subr.msk.mxu0 %vm162_vm0, %v8038_v36  ;;  %6610 = vmatprep.subr.bf16.mxu1 %v7558_v6 }
0x1385   :  { %4011 = vmatprep.mubr.f32.mxu1 %v7311_v3 }
0x1387   :  { %5994 = vmatpush1.msk.msra.mxu0 %vm162_vm0, %v8052_v38  ;;  %6612 = vmatpush1.bf16.msra.mxu1 %v7573_v12 }
0x1388   :  { %5995 = vmatmul.mubr.msk.f32.vlgmr.msra.gmra.mrb[20].mxu0 %vm158_vm1, %v7978_v14  ;;  %6001 = vmatprep.subr.msk.mxu1 %vm162_vm0, %v8062_v41 }
0x1389   :  { %6614 = vmatprep.subr.bf16.mxu0 %v7369_v4  ;;  %4115 = vmatprep.mubr.f32.mxu0 %v7311_v3 }
0x138a   :  { %6616 = vmatpush1.bf16.msra.mxu0 %v7382_v9 }
0x138b   :  { %6002 = vmatpush1.msk.msra.mxu1 %vm162_vm0, %v8077_v45  ;;  %6618 = vmatprep.subr.bf16.mxu0 %v7407_v17 }
0x138c   :  { %6003 = vmatmul.mubr.msk.f32.vlgmr.msra.gmra.mrb[20].mxu1 %vm158_vm1, %v7965_v24  ;;  %6638 = vmatprep.subr.bf16.mxu1 %v7380_v8 }
0x138d   :  { %6640 = vmatpush1.bf16.msra.mxu1 %v7394_v13  ;;  %4293 = vmatprep.mubr.f32.mxu1 %v7311_v3 }
0x138e   :  { %6620 = vmatpush1.bf16.msra.mxu0 %v7421_v22  ;;  %6642 = vmatprep.subr.bf16.mxu1 %v7409_v18 }
0x138f   :  { %6622 = vmatprep.subr.bf16.mxu0 %v7436_v27 }
0x1391   :  { %6644 = vmatpush1.bf16.msra.mxu1 %v7434_v26 }
0x1392   :  { %6624 = vmatpush1.bf16.msra.mxu0 %v7459_v35  ;;  %6646 = vmatprep.subr.bf16.mxu1 %v7447_v31 }
0x1393   :  { %6626 = vmatprep.subr.bf16.mxu0 %v7474_v40 }
0x1395   :  { %6648 = vmatpush1.bf16.msra.mxu1 %v7472_v39 }
0x1396   :  { %6628 = vmatpush1.bf16.msra.mxu0 %v7507_v51  ;;  %6650 = vmatprep.subr.bf16.mxu1 %v7486_v44 }
0x1397   :  { %6630 = vmatprep.subr.bf16.mxu0 %v7513_v53 }
0x1399   :  { %6652 = vmatpush1.bf16.msra.mxu1 %v7511_v52 }
0x139a   :  { %6654 = vmatprep.subr.bf16.mxu1 %v7525_v57 }
0x145b   :  { %v3835_v24 = vpop.f32.mrb[20].mxu0 }
0x145c   :  { %v3840_v14 = vadd.f32 %v3835_v24, %v7642_v30  ;;  %v3837_v55 = vpop.f32.mrb[21].mxu0 }
0x145d   :  { %v3841_v25 = vadd.f32 %v3837_v55, %v7648_v46 }
0x145e   :  { %v5996_v58 = vmul.f32 -1.442695, %v3840_v14 }
0x145f   :  { %v4013_v21 = vpop.f32.mrb[20].mxu1  ;;  %v5997_v29 = vmul.f32 -1.442695, %v3841_v25 }
0x1460   :  { %7159 = vpow2.f32 %v5996_v58  ;;  %v4018_v10 = vadd.f32 %v4013_v21, %v7644_v32  ;;  %v4015_v20 = vpop.f32.mrb[21].mxu1 }
0x1461   :  { %v4019_v7 = vadd.f32 %v4015_v20, %v7650_v47 }
0x1462   :  { %v6004_v61 = vmul.f32 -1.442695, %v4018_v10 }
0x1463   :  { %v6005_v49 = vmul.f32 -1.442695, %v4019_v7 }
0x1464   :  { %7161 = vpow2.f32 %v6004_v61 }
0x1465   :  { %7163 = vtanh.f32 %v3841_v25 }
0x146a   :  { %v7160_v2 = vpop.eup %7159 }
0x146b   :  { %v3845_v34 = vadd.f32 1.0, %v7160_v2  ;;  %v6007_v2 = vld [vmem:[%s8746_s0 + $0x58] sm:$0xff] }
0x146d   :  { %7165 = vrcp.f32 %v3845_v34 }
0x146e   :  { %v7162_v15 = vpop.eup %7161  ;;  %7167 = vtanh.f32 %v4019_v7 }
0x146f   :  { %v4023_v23 = vadd.f32 1.0, %v7162_v15  ;;  %v7164_v28 = vpop.eup %7163 }
0x1471   :  { %7169 = vrcp.f32 %v4023_v23 }
0x1472   :  { %7171 = vpow2.f32 %v5997_v29 }
0x1473   :  { %7173 = vpow2.f32 %v6005_v49 }
0x1477   :  { %v7166_v43 = vpop.eup %7165 }
0x1478   :  { %v3856_v16 = vmul.f32 %v7166_v43, %v7164_v28  ;;  %v7168_v62 = vpop.eup %7167  ;;  %v3855_v60 = vmul.f32 %v7166_v43, %v8315_v56 }
0x147a   :  { %3858 = vrot.lane.b32.xlu0 %v3856_v16, %s7312_s3 }
0x147b   :  { %v7170_v42 = vpop.eup %7169 }
0x147c   :  { %v4034_v19 = vmul.f32 %v7170_v42, %v7168_v62  ;;  %v7172_v33 = vpop.eup %7171  ;;  %v4033_v24 = vmul.f32 %v7170_v42, %v8319_v59 }
0x147d   :  { %v3852_v48 = vadd.f32 1.0, %v7172_v33  ;;  %v7174_v50 = vpop.eup %7173 }
0x147e   :  { %4036 = vrot.lane.b32.xlu1 %v4034_v19, %s7312_s3  ;;  %v4030_v37 = vadd.f32 1.0, %v7174_v50 }
0x147f   :  { %7175 = vrcp.f32 %v3852_v48 }
0x1489   :  { %v7176_v58 = vpop.eup %7175 }
0x14ec   :  { %v3859_v5 = vpop.permute.xlu0 %3858 }
0x14ed   :  { %v8381_v54 = vadd.f32 %v3859_v5, %v3855_v60 }
0x14ef   :  { %7177 = vtanh.f32 %v8381_v54 }
0x14f0   :  { %v4037_v14 = vpop.permute.xlu1 %4036  ;;  %7179 = vrcp.f32 %v4030_v37 }
0x14f1   :  { %v8385_v55 = vadd.f32 %v4037_v14, %v4033_v24 }
0x14f3   :  { %7181 = vtanh.f32 %v8385_v55 }
0x14f9   :  { %v7178_v21 = vpop.eup %7177 }
0x14fa   :  { %v3863_v10 = vmul.f32 %v7178_v21, %v7176_v58  ;;  %v7180_v20 = vpop.eup %7179 }
0x14fc   :  { %3865 = vrot.lane.b32.xlu0 %v3863_v10, %s7312_s3 }
0x14fd   :  { %v7182_v56 = vpop.eup %7181 }
0x14fe   :  { %v4041_v61 = vmul.f32 %v7182_v56, %v7180_v20 }
0x1500   :  { %4043 = vrot.lane.b32.xlu1 %v4041_v61, %s7312_s3 }
0x156e   :  { %v3866_v25 = vpop.permute.xlu0 %3865 }
0x156f   :  { %5998 = vst.msk [vmem:[%s8749_s7 + $0x50] sm:$0xff] %vm83_vm2, %v3866_v25  ;;  %6008 = vmatmul.mubr.msk.f32.vlgmr.msra.gmra.mrb[22].mxu0 %vm83_vm2, %v3866_v25 }
0x1570   :  { %6632 = vmatpush1.bf16.msra.mxu0 %v7543_v63  ;;  %4189 = vmatprep.mubr.f32.mxu0 %v7311_v3 }
0x1571   :  { %6634 = vmatprep.subr.bf16.mxu0 %v7549_v1 }
0x1572   :  { %v4044_v59 = vpop.permute.xlu1 %4043 }
0x1573   :  { %6006 = vst.msk [vmem:[%s8750_s8 + $0x28] sm:$0xff] %vm83_vm2, %v4044_v59  ;;  %6016 = vmatmul.mubr.msk.f32.vlgmr.msra.gmra.mrb[22].mxu1 %vm83_vm2, %v4044_v59 }
0x1574   :  { %6636 = vmatpush1.bf16.msra.mxu0 %v7569_v11  ;;  %6656 = vmatpush1.bf16.msra.mxu1 %v7547_v0 }
0x1575   :  { %6009 = vmatprep.subr.msk.mxu0 %vm162_vm0, %v8038_v36  ;;  %6658 = vmatprep.subr.bf16.mxu1 %v7558_v6  ;;  %v6015_v36 = vld [vmem:[%s8746_s0 + $0x20] sm:$0xff] }
0x1576   :  { %4367 = vmatprep.mubr.f32.mxu1 %v7311_v3 }
0x1578   :  { %6010 = vmatpush1.msk.msra.mxu0 %vm162_vm0, %v8052_v38  ;;  %6660 = vmatpush1.bf16.msra.mxu1 %v7573_v12 }
0x1579   :  { %6011 = vmatmul.mubr.msk.f32.vlgmr.msra.gmra.mrb[22].mxu0 %vm158_vm1, %v6007_v2  ;;  %6017 = vmatprep.subr.msk.mxu1 %vm162_vm0, %v8062_v41 }
0x157a   :  { %6662 = vmatprep.subr.bf16.mxu0 %v7369_v4  ;;  %4471 = vmatprep.mubr.f32.mxu0 %v7311_v3 }
0x157b   :  { %6664 = vmatpush1.bf16.msra.mxu0 %v7382_v9 }
0x157c   :  { %6018 = vmatpush1.msk.msra.mxu1 %vm162_vm0, %v8077_v45  ;;  %6666 = vmatprep.subr.bf16.mxu0 %v7407_v17 }
0x157d   :  { %6019 = vmatmul.mubr.msk.f32.vlgmr.msra.gmra.mrb[22].mxu1 %vm158_vm1, %v6015_v36  ;;  %6686 = vmatprep.subr.bf16.mxu1 %v7380_v8 }
0x157e   :  { %6688 = vmatpush1.bf16.msra.mxu1 %v7394_v13  ;;  %4649 = vmatprep.mubr.f32.mxu1 %v7311_v3 }
0x157f   :  { %6668 = vmatpush1.bf16.msra.mxu0 %v7421_v22  ;;  %6690 = vmatprep.subr.bf16.mxu1 %v7409_v18 }
0x1580   :  { %6670 = vmatprep.subr.bf16.mxu0 %v7436_v27 }
0x1582   :  { %6692 = vmatpush1.bf16.msra.mxu1 %v7434_v26 }
0x1583   :  { %6672 = vmatpush1.bf16.msra.mxu0 %v7459_v35  ;;  %6694 = vmatprep.subr.bf16.mxu1 %v7447_v31 }
0x1584   :  { %6674 = vmatprep.subr.bf16.mxu0 %v7474_v40 }
0x1586   :  { %6696 = vmatpush1.bf16.msra.mxu1 %v7472_v39 }
0x1587   :  { %6676 = vmatpush1.bf16.msra.mxu0 %v7507_v51  ;;  %6698 = vmatprep.subr.bf16.mxu1 %v7486_v44 }
0x1588   :  { %6678 = vmatprep.subr.bf16.mxu0 %v7513_v53 }
0x158a   :  { %6700 = vmatpush1.bf16.msra.mxu1 %v7511_v52 }
0x158b   :  { %6702 = vmatprep.subr.bf16.mxu1 %v7525_v57 }
0x164c   :  { %v4191_v38 = vpop.f32.mrb[22].mxu0 }
0x164d   :  { %v4196_v41 = vadd.f32 %v4191_v38, %v7642_v30  ;;  %v4193_v45 = vpop.f32.mrb[23].mxu0 }
0x164e   :  { %v4197_v43 = vadd.f32 %v4193_v45, %v7648_v46 }
0x164f   :  { %v6012_v34 = vmul.f32 -1.442695, %v4196_v41 }
0x1650   :  { %v4369_v7 = vpop.f32.mrb[22].mxu1  ;;  %v6013_v37 = vmul.f32 -1.442695, %v4197_v43 }
0x1651   :  { %7183 = vpow2.f32 %v6012_v34  ;;  %v4374_v15 = vadd.f32 %v4369_v7, %v7644_v32  ;;  %v4371_v23 = vpop.f32.mrb[23].mxu1 }
0x1652   :  { %v4375_v42 = vadd.f32 %v4371_v23, %v7650_v47  ;;  %v6023_v23 = vld [vmem:[%s8746_s0 + $0x60] sm:$0xff] }
0x1653   :  { %v6020_v28 = vmul.f32 -1.442695, %v4374_v15  ;;  %v8478_v15 = vld [vmem:[%s8744_s1 + $0x48] sm:$0x1] }
0x1654   :  { %v6021_v24 = vmul.f32 -1.442695, %v4375_v42 }
0x1655   :  { %7185 = vpow2.f32 %v6020_v28  ;;  %v8490_v28 = vld [vmem:[%s8744_s1 + $0x40] sm:$0x1] }
0x1656   :  { %7187 = vtanh.f32 %v4197_v43  ;;  %v8499_v43 = vld [vmem:[%s8745_s4 + $0x48] sm:$0x1] }
0x165b   :  { %v7184_v16 = vpop.eup %7183 }
0x165c   :  { %v4201_v62 = vadd.f32 1.0, %v7184_v16  ;;  %v6031_v16 = vld [vmem:[%s8746_s0 + $0x18] sm:$0xff] }
0x165e   :  { %7189 = vrcp.f32 %v4201_v62  ;;  %v8512_v62 = vld [vmem:[%s8745_s4 + $0x40] sm:$0x1] }
0x165f   :  { %v7186_v19 = vpop.eup %7185  ;;  %7191 = vtanh.f32 %v4375_v42 }
0x1660   :  { %v4379_v29 = vadd.f32 1.0, %v7186_v19  ;;  %v7188_v49 = vpop.eup %7187 }
0x1662   :  { %7193 = vrcp.f32 %v4379_v29 }
0x1663   :  { %7195 = vpow2.f32 %v6013_v37 }
0x1664   :  { %7197 = vpow2.f32 %v6021_v24 }
0x1668   :  { %v7190_v33 = vpop.eup %7189 }
0x1669   :  { %v4212_v48 = vmul.f32 %v7190_v33, %v7188_v49  ;;  %v7192_v50 = vpop.eup %7191  ;;  %v4211_v10 = vmul.f32 %v7190_v33, %v8381_v54 }
0x166b   :  { %4214 = vrot.lane.b32.xlu0 %v4212_v48, %s7312_s3 }
0x166c   :  { %v7194_v60 = vpop.eup %7193 }
0x166d   :  { %v4390_v5 = vmul.f32 %v7194_v60, %v7192_v50  ;;  %v7196_v14 = vpop.eup %7195  ;;  %v4389_v25 = vmul.f32 %v7194_v60, %v8385_v55 }
0x166e   :  { %v4208_v58 = vadd.f32 1.0, %v7196_v14  ;;  %v7198_v21 = vpop.eup %7197 }
0x166f   :  { %4392 = vrot.lane.b32.xlu1 %v4390_v5, %s7312_s3  ;;  %v4386_v61 = vadd.f32 1.0, %v7198_v21 }
0x1670   :  { %7199 = vrcp.f32 %v4208_v58 }
0x167a   :  { %v7200_v36 = vpop.eup %7199 }
0x16dd   :  { %v4215_v20 = vpop.permute.xlu0 %4214 }
0x16de   :  { %v8451_v56 = vadd.f32 %v4215_v20, %v4211_v10 }
0x16e0   :  { %7201 = vtanh.f32 %v8451_v56 }
0x16e1   :  { %v4393_v59 = vpop.permute.xlu1 %4392  ;;  %7203 = vrcp.f32 %v4386_v61 }
0x16e2   :  { %v8455_v2 = vadd.f32 %v4393_v59, %v4389_v25 }
0x16e4   :  { %7205 = vtanh.f32 %v8455_v2 }
0x16ea   :  { %v7202_v38 = vpop.eup %7201 }
0x16eb   :  { %v4219_v41 = vmul.f32 %v7202_v38, %v7200_v36  ;;  %v7204_v45 = vpop.eup %7203 }
0x16ed   :  { %4221 = vrot.lane.b32.xlu0 %v4219_v41, %s7312_s3 }
0x16ee   :  { %v7206_v54 = vpop.eup %7205 }
0x16ef   :  { %v4397_v34 = vmul.f32 %v7206_v54, %v7204_v45 }
0x16f1   :  { %4399 = vrot.lane.b32.xlu1 %v4397_v34, %s7312_s3 }
0x175f   :  { %v4222_v7 = vpop.permute.xlu0 %4221 }
0x1760   :  { %6014 = vst.msk [vmem:[%s8749_s7 + $0x58] sm:$0xff] %vm83_vm2, %v4222_v7  ;;  %6024 = vmatmul.mubr.msk.f32.vlgmr.msra.gmra.mrb[24].mxu0 %vm83_vm2, %v4222_v7 }
0x1761   :  { %6680 = vmatpush1.bf16.msra.mxu0 %v7543_v63  ;;  %4545 = vmatprep.mubr.f32.mxu0 %v7311_v3 }
0x1762   :  { %6682 = vmatprep.subr.bf16.mxu0 %v7549_v1 }
0x1763   :  { %v4400_v55 = vpop.permute.xlu1 %4399 }
0x1764   :  { %6022 = vst.msk [vmem:[%s8750_s8 + $0x20] sm:$0xff] %vm83_vm2, %v4400_v55  ;;  %6032 = vmatmul.mubr.msk.f32.vlgmr.msra.gmra.mrb[24].mxu1 %vm83_vm2, %v4400_v55 }
0x1765   :  { %6684 = vmatpush1.bf16.msra.mxu0 %v7569_v11  ;;  %6704 = vmatpush1.bf16.msra.mxu1 %v7547_v0 }
0x1766   :  { %6025 = vmatprep.subr.msk.mxu0 %vm162_vm0, %v8478_v15  ;;  %6706 = vmatprep.subr.bf16.mxu1 %v7558_v6 }
0x1767   :  { %4723 = vmatprep.mubr.f32.mxu1 %v7311_v3 }
0x1769   :  { %6026 = vmatpush1.msk.msra.mxu0 %vm162_vm0, %v8490_v28  ;;  %6708 = vmatpush1.bf16.msra.mxu1 %v7573_v12 }
0x176a   :  { %6027 = vmatmul.mubr.msk.f32.vlgmr.msra.gmra.mrb[24].mxu0 %vm158_vm1, %v6023_v23  ;;  %6033 = vmatprep.subr.msk.mxu1 %vm162_vm0, %v8499_v43 }
0x176b   :  { %6710 = vmatprep.subr.bf16.mxu0 %v7369_v4  ;;  %4827 = vmatprep.mubr.f32.mxu0 %v7311_v3 }
0x176c   :  { %6712 = vmatpush1.bf16.msra.mxu0 %v7382_v9 }
0x176d   :  { %6034 = vmatpush1.msk.msra.mxu1 %vm162_vm0, %v8512_v62  ;;  %6714 = vmatprep.subr.bf16.mxu0 %v7407_v17 }
0x176e   :  { %6035 = vmatmul.mubr.msk.f32.vlgmr.msra.gmra.mrb[24].mxu1 %vm158_vm1, %v6031_v16  ;;  %6734 = vmatprep.subr.bf16.mxu1 %v7380_v8 }
0x176f   :  { %6736 = vmatpush1.bf16.msra.mxu1 %v7394_v13  ;;  %5005 = vmatprep.mubr.f32.mxu1 %v7311_v3 }
0x1770   :  { %6716 = vmatpush1.bf16.msra.mxu0 %v7421_v22  ;;  %6738 = vmatprep.subr.bf16.mxu1 %v7409_v18 }
0x1771   :  { %6718 = vmatprep.subr.bf16.mxu0 %v7436_v27 }
0x1773   :  { %6740 = vmatpush1.bf16.msra.mxu1 %v7434_v26 }
0x1774   :  { %6720 = vmatpush1.bf16.msra.mxu0 %v7459_v35  ;;  %6742 = vmatprep.subr.bf16.mxu1 %v7447_v31 }
0x1775   :  { %6722 = vmatprep.subr.bf16.mxu0 %v7474_v40 }
0x1777   :  { %6744 = vmatpush1.bf16.msra.mxu1 %v7472_v39 }
0x1778   :  { %6724 = vmatpush1.bf16.msra.mxu0 %v7507_v51  ;;  %6746 = vmatprep.subr.bf16.mxu1 %v7486_v44 }
0x1779   :  { %6726 = vmatprep.subr.bf16.mxu0 %v7513_v53 }
0x177b   :  { %6748 = vmatpush1.bf16.msra.mxu1 %v7511_v52 }
0x177c   :  { %6750 = vmatprep.subr.bf16.mxu1 %v7525_v57 }
0x183d   :  { %v4547_v42 = vpop.f32.mrb[24].mxu0 }
0x183e   :  { %v4552_v19 = vadd.f32 %v4547_v42, %v7642_v30  ;;  %v4549_v29 = vpop.f32.mrb[25].mxu0 }
0x183f   :  { %v4553_v5 = vadd.f32 %v4549_v29, %v7648_v46 }
0x1840   :  { %v6028_v49 = vmul.f32 -1.442695, %v4552_v19 }
0x1841   :  { %v4725_v33 = vpop.f32.mrb[24].mxu1  ;;  %v6029_v38 = vmul.f32 -1.442695, %v4553_v5 }
0x1842   :  { %7207 = vpow2.f32 %v6028_v49  ;;  %v4730_v48 = vadd.f32 %v4725_v33, %v7644_v32  ;;  %v4727_v50 = vpop.f32.mrb[25].mxu1 }
0x1843   :  { %v4731_v14 = vadd.f32 %v4727_v50, %v7650_v47 }
0x1844   :  { %v6036_v60 = vmul.f32 -1.442695, %v4730_v48 }
0x1845   :  { %v6037_v41 = vmul.f32 -1.442695, %v4731_v14 }
0x1846   :  { %7209 = vpow2.f32 %v6036_v60 }
0x1847   :  { %7211 = vtanh.f32 %v4553_v5 }
0x184c   :  { %v7208_v37 = vpop.eup %7207 }
0x184d   :  { %v4557_v24 = vadd.f32 1.0, %v7208_v37  ;;  %v6039_v37 = vld [vmem:[%s8746_s0 + $0x68] sm:$0xff] }
0x184f   :  { %7213 = vrcp.f32 %v4557_v24  ;;  %v6047_v24 = vld [vmem:[%s8746_s0 + $0x10] sm:$0xff] }
0x1850   :  { %v7210_v58 = vpop.eup %7209  ;;  %7215 = vtanh.f32 %v4731_v14 }
0x1851   :  { %v4735_v21 = vadd.f32 1.0, %v7210_v58  ;;  %v7212_v10 = vpop.eup %7211 }
0x1853   :  { %7217 = vrcp.f32 %v4735_v21 }
0x1854   :  { %7219 = vpow2.f32 %v6029_v38 }
0x1855   :  { %7221 = vpow2.f32 %v6037_v41 }
0x1859   :  { %v7214_v20 = vpop.eup %7213 }
0x185a   :  { %v4568_v61 = vmul.f32 %v7214_v20, %v7212_v10  ;;  %v7216_v25 = vpop.eup %7215  ;;  %v4567_v7 = vmul.f32 %v7214_v20, %v8451_v56 }
0x185c   :  { %4570 = vrot.lane.b32.xlu0 %v4568_v61, %s7312_s3 }
0x185d   :  { %v7218_v59 = vpop.eup %7217 }
0x185e   :  { %v4746_v36 = vmul.f32 %v7218_v59, %v7216_v25  ;;  %v7220_v45 = vpop.eup %7219  ;;  %v4745_v42 = vmul.f32 %v7218_v59, %v8455_v2 }
0x185f   :  { %v4564_v54 = vadd.f32 1.0, %v7220_v45  ;;  %v7222_v34 = vpop.eup %7221 }
0x1860   :  { %4748 = vrot.lane.b32.xlu1 %v4746_v36, %s7312_s3  ;;  %v4742_v16 = vadd.f32 1.0, %v7222_v34 }
0x1861   :  { %7223 = vrcp.f32 %v4564_v54 }
0x186b   :  { %v7224_v49 = vpop.eup %7223 }
0x18ce   :  { %v4571_v55 = vpop.permute.xlu0 %4570 }
0x18cf   :  { %v8541_v23 = vadd.f32 %v4571_v55, %v4567_v7 }
0x18d1   :  { %7225 = vtanh.f32 %v8541_v23 }
0x18d2   :  { %v4749_v19 = vpop.permute.xlu1 %4748  ;;  %7227 = vrcp.f32 %v4742_v16 }
0x18d3   :  { %v8545_v29 = vadd.f32 %v4749_v19, %v4745_v42 }
0x18d5   :  { %7229 = vtanh.f32 %v8545_v29 }
0x18db   :  { %v7226_v33 = vpop.eup %7225 }
0x18dc   :  { %v4575_v48 = vmul.f32 %v7226_v33, %v7224_v49  ;;  %v7228_v50 = vpop.eup %7227 }
0x18de   :  { %4577 = vrot.lane.b32.xlu0 %v4575_v48, %s7312_s3 }
0x18df   :  { %v7230_v56 = vpop.eup %7229 }
0x18e0   :  { %v4753_v60 = vmul.f32 %v7230_v56, %v7228_v50 }
0x18e2   :  { %4755 = vrot.lane.b32.xlu1 %v4753_v60, %s7312_s3 }
0x1950   :  { %v4578_v5 = vpop.permute.xlu0 %4577 }
0x1951   :  { %6030 = vst.msk [vmem:[%s8749_s7 + $0x60] sm:$0xff] %vm83_vm2, %v4578_v5  ;;  %6040 = vmatmul.mubr.msk.f32.vlgmr.msra.gmra.mrb[26].mxu0 %vm83_vm2, %v4578_v5 }
0x1952   :  { %6728 = vmatpush1.bf16.msra.mxu0 %v7543_v63  ;;  %4901 = vmatprep.mubr.f32.mxu0 %v7311_v3 }
0x1953   :  { %6730 = vmatprep.subr.bf16.mxu0 %v7549_v1 }
0x1954   :  { %v4756_v2 = vpop.permute.xlu1 %4755 }
0x1955   :  { %6038 = vst.msk [vmem:[%s8750_s8 + $0x18] sm:$0xff] %vm83_vm2, %v4756_v2  ;;  %6048 = vmatmul.mubr.msk.f32.vlgmr.msra.gmra.mrb[26].mxu1 %vm83_vm2, %v4756_v2 }
0x1956   :  { %6732 = vmatpush1.bf16.msra.mxu0 %v7569_v11  ;;  %6752 = vmatpush1.bf16.msra.mxu1 %v7547_v0 }
0x1957   :  { %6041 = vmatprep.subr.msk.mxu0 %vm162_vm0, %v8478_v15  ;;  %6754 = vmatprep.subr.bf16.mxu1 %v7558_v6 }
0x1958   :  { %5079 = vmatprep.mubr.f32.mxu1 %v7311_v3 }
0x195a   :  { %6042 = vmatpush1.msk.msra.mxu0 %vm162_vm0, %v8490_v28  ;;  %6756 = vmatpush1.bf16.msra.mxu1 %v7573_v12 }
0x195b   :  { %6043 = vmatmul.mubr.msk.f32.vlgmr.msra.gmra.mrb[26].mxu0 %vm158_vm1, %v6039_v37  ;;  %6049 = vmatprep.subr.msk.mxu1 %vm162_vm0, %v8499_v43 }
0x195c   :  { %6758 = vmatprep.subr.bf16.mxu0 %v7369_v4  ;;  %5183 = vmatprep.mubr.f32.mxu0 %v7311_v3 }
0x195d   :  { %6760 = vmatpush1.bf16.msra.mxu0 %v7382_v9 }
0x195e   :  { %6050 = vmatpush1.msk.msra.mxu1 %vm162_vm0, %v8512_v62  ;;  %6762 = vmatprep.subr.bf16.mxu0 %v7407_v17 }
0x195f   :  { %6051 = vmatmul.mubr.msk.f32.vlgmr.msra.gmra.mrb[26].mxu1 %vm158_vm1, %v6047_v24  ;;  %6782 = vmatprep.subr.bf16.mxu1 %v7380_v8 }
0x1960   :  { %6784 = vmatpush1.bf16.msra.mxu1 %v7394_v13  ;;  %5361 = vmatprep.mubr.f32.mxu1 %v7311_v3 }
0x1961   :  { %6764 = vmatpush1.bf16.msra.mxu0 %v7421_v22  ;;  %6786 = vmatprep.subr.bf16.mxu1 %v7409_v18 }
0x1962   :  { %6766 = vmatprep.subr.bf16.mxu0 %v7436_v27 }
0x1964   :  { %6788 = vmatpush1.bf16.msra.mxu1 %v7434_v26 }
0x1965   :  { %6768 = vmatpush1.bf16.msra.mxu0 %v7459_v35  ;;  %6790 = vmatprep.subr.bf16.mxu1 %v7447_v31 }
0x1966   :  { %6770 = vmatprep.subr.bf16.mxu0 %v7474_v40 }
0x1968   :  { %6792 = vmatpush1.bf16.msra.mxu1 %v7472_v39 }
0x1969   :  { %6772 = vmatpush1.bf16.msra.mxu0 %v7507_v51  ;;  %6794 = vmatprep.subr.bf16.mxu1 %v7486_v44 }
0x196a   :  { %6774 = vmatprep.subr.bf16.mxu0 %v7513_v53 }
0x196c   :  { %6796 = vmatpush1.bf16.msra.mxu1 %v7511_v52 }
0x196d   :  { %6798 = vmatprep.subr.bf16.mxu1 %v7525_v57 }
0x1a2e   :  { %v4903_v14 = vpop.f32.mrb[26].mxu0 }
0x1a2f   :  { %v4908_v58 = vadd.f32 %v4903_v14, %v7642_v30  ;;  %v4905_v21 = vpop.f32.mrb[27].mxu0 }
0x1a30   :  { %v4909_v36 = vadd.f32 %v4905_v21, %v7648_v46 }
0x1a31   :  { %v6044_v10 = vmul.f32 -1.442695, %v4908_v58 }
0x1a32   :  { %v5081_v20 = vpop.f32.mrb[26].mxu1  ;;  %v6045_v33 = vmul.f32 -1.442695, %v4909_v36 }
0x1a33   :  { %7231 = vpow2.f32 %v6044_v10  ;;  %v5086_v61 = vadd.f32 %v5081_v20, %v7644_v32  ;;  %v5083_v25 = vpop.f32.mrb[27].mxu1 }
0x1a34   :  { %v5087_v45 = vadd.f32 %v5083_v25, %v7650_v47 }
0x1a35   :  { %v6052_v59 = vmul.f32 -1.442695, %v5086_v61 }
0x1a36   :  { %v6053_v48 = vmul.f32 -1.442695, %v5087_v45 }
0x1a37   :  { %7233 = vpow2.f32 %v6052_v59 }
0x1a38   :  { %7235 = vtanh.f32 %v4909_v36 }
0x1a3d   :  { %v7232_v38 = vpop.eup %7231 }
0x1a3e   :  { %v4913_v41 = vadd.f32 1.0, %v7232_v38  ;;  %v6055_v38 = vld [vmem:[%s8746_s0 + $0x70] sm:$0xff] }
0x1a40   :  { %7237 = vrcp.f32 %v4913_v41  ;;  %v6063_v41 = vld [vmem:[%s8746_s0 + $0x8] sm:$0xff] }
0x1a41   :  { %v7234_v54 = vpop.eup %7233  ;;  %7239 = vtanh.f32 %v5087_v45 }
0x1a42   :  { %v5091_v34 = vadd.f32 1.0, %v7234_v54  ;;  %v7236_v7 = vpop.eup %7235 }
0x1a44   :  { %7241 = vrcp.f32 %v5091_v34 }
0x1a45   :  { %7243 = vpow2.f32 %v6045_v33 }
0x1a46   :  { %7245 = vpow2.f32 %v6053_v48 }
0x1a4a   :  { %v7238_v55 = vpop.eup %7237 }
0x1a4b   :  { %v4924_v16 = vmul.f32 %v7238_v55, %v7236_v7  ;;  %v7240_v42 = vpop.eup %7239  ;;  %v4923_v5 = vmul.f32 %v7238_v55, %v8541_v23 }
0x1a4d   :  { %4926 = vrot.lane.b32.xlu0 %v4924_v16, %s7312_s3 }
0x1a4e   :  { %v7242_v19 = vpop.eup %7241 }
0x1a4f   :  { %v5102_v49 = vmul.f32 %v7242_v19, %v7240_v42  ;;  %v7244_v50 = vpop.eup %7243  ;;  %v5101_v14 = vmul.f32 %v7242_v19, %v8545_v29 }
0x1a50   :  { %v4920_v56 = vadd.f32 1.0, %v7244_v50  ;;  %v7246_v60 = vpop.eup %7245 }
0x1a51   :  { %5104 = vrot.lane.b32.xlu1 %v5102_v49, %s7312_s3  ;;  %v5098_v24 = vadd.f32 1.0, %v7246_v60 }
0x1a52   :  { %7247 = vrcp.f32 %v4920_v56 }
0x1a5c   :  { %v7248_v10 = vpop.eup %7247 }
0x1abf   :  { %v4927_v2 = vpop.permute.xlu0 %4926 }
0x1ac0   :  { %v8611_v37 = vadd.f32 %v4927_v2, %v4923_v5 }
0x1ac2   :  { %7249 = vtanh.f32 %v8611_v37 }
0x1ac3   :  { %v5105_v58 = vpop.permute.xlu1 %5104  ;;  %7251 = vrcp.f32 %v5098_v24 }
0x1ac4   :  { %v8615_v21 = vadd.f32 %v5105_v58, %v5101_v14 }
0x1ac6   :  { %7253 = vtanh.f32 %v8615_v21 }
0x1acc   :  { %v7250_v20 = vpop.eup %7249 }
0x1acd   :  { %v4931_v61 = vmul.f32 %v7250_v20, %v7248_v10  ;;  %v7252_v25 = vpop.eup %7251 }
0x1acf   :  { %4933 = vrot.lane.b32.xlu0 %v4931_v61, %s7312_s3 }
0x1ad0   :  { %v7254_v23 = vpop.eup %7253 }
0x1ad1   :  { %v5109_v59 = vmul.f32 %v7254_v23, %v7252_v25 }
0x1ad3   :  { %5111 = vrot.lane.b32.xlu1 %v5109_v59, %s7312_s3 }
0x1b41   :  { %v4934_v36 = vpop.permute.xlu0 %4933 }
0x1b42   :  { %6046 = vst.msk [vmem:[%s8749_s7 + $0x68] sm:$0xff] %vm83_vm2, %v4934_v36  ;;  %6056 = vmatmul.mubr.msk.f32.vlgmr.msra.gmra.mrb[28].mxu0 %vm83_vm2, %v4934_v36 }
0x1b43   :  { %6776 = vmatpush1.bf16.msra.mxu0 %v7543_v63  ;;  %5257 = vmatprep.mubr.f32.mxu0 %v7311_v3 }
0x1b44   :  { %6778 = vmatprep.subr.bf16.mxu0 %v7549_v1 }
0x1b45   :  { %v5112_v29 = vpop.permute.xlu1 %5111 }
0x1b46   :  { %6054 = vst.msk [vmem:[%s8750_s8 + $0x10] sm:$0xff] %vm83_vm2, %v5112_v29  ;;  %6064 = vmatmul.mubr.msk.f32.vlgmr.msra.gmra.mrb[28].mxu1 %vm83_vm2, %v5112_v29 }
0x1b47   :  { %6780 = vmatpush1.bf16.msra.mxu0 %v7569_v11  ;;  %6800 = vmatpush1.bf16.msra.mxu1 %v7547_v0 }
0x1b48   :  { %6057 = vmatprep.subr.msk.mxu0 %vm162_vm0, %v8478_v15  ;;  %6802 = vmatprep.subr.bf16.mxu1 %v7558_v6 }
0x1b49   :  { %5435 = vmatprep.mubr.f32.mxu1 %v7311_v3 }
0x1b4b   :  { %6058 = vmatpush1.msk.msra.mxu0 %vm162_vm0, %v8490_v28  ;;  %6804 = vmatpush1.bf16.msra.mxu1 %v7573_v12 }
0x1b4c   :  { %6059 = vmatmul.mubr.msk.f32.vlgmr.msra.gmra.mrb[28].mxu0 %vm158_vm1, %v6055_v38  ;;  %6065 = vmatprep.subr.msk.mxu1 %vm162_vm0, %v8499_v43 }
0x1b4d   :  { %6806 = vmatprep.subr.bf16.mxu0 %v7369_v4  ;;  %5539 = vmatprep.mubr.f32.mxu0 %v7311_v3 }
0x1b4e   :  { %6808 = vmatpush1.bf16.msra.mxu0 %v7382_v9 }
0x1b4f   :  { %6066 = vmatpush1.msk.msra.mxu1 %vm162_vm0, %v8512_v62  ;;  %6810 = vmatprep.subr.bf16.mxu0 %v7407_v17 }
0x1b50   :  { %6067 = vmatmul.mubr.msk.f32.vlgmr.msra.gmra.mrb[28].mxu1 %vm158_vm1, %v6063_v41  ;;  %6830 = vmatprep.subr.bf16.mxu1 %v7380_v8 }
0x1b51   :  { %6832 = vmatpush1.bf16.msra.mxu1 %v7394_v13  ;;  %5717 = vmatprep.mubr.f32.mxu1 %v7311_v3 }
0x1b52   :  { %6812 = vmatpush1.bf16.msra.mxu0 %v7421_v22  ;;  %6834 = vmatprep.subr.bf16.mxu1 %v7409_v18 }
0x1b53   :  { %6814 = vmatprep.subr.bf16.mxu0 %v7436_v27 }
0x1b55   :  { %6836 = vmatpush1.bf16.msra.mxu1 %v7434_v26 }
0x1b56   :  { %6816 = vmatpush1.bf16.msra.mxu0 %v7459_v35  ;;  %6838 = vmatprep.subr.bf16.mxu1 %v7447_v31 }
0x1b57   :  { %6818 = vmatprep.subr.bf16.mxu0 %v7474_v40 }
0x1b59   :  { %6840 = vmatpush1.bf16.msra.mxu1 %v7472_v39 }
0x1b5a   :  { %6820 = vmatpush1.bf16.msra.mxu0 %v7507_v51  ;;  %6842 = vmatprep.subr.bf16.mxu1 %v7486_v44 }
0x1b5b   :  { %6822 = vmatprep.subr.bf16.mxu0 %v7513_v53 }
0x1b5d   :  { %6844 = vmatpush1.bf16.msra.mxu1 %v7511_v52 }
0x1b5e   :  { %6846 = vmatprep.subr.bf16.mxu1 %v7525_v57 }
0x1c1f   :  { %v5259_v4 = vpop.f32.mrb[28].mxu0 }
0x1c20   :  { %v5264_v8 = vadd.f32 %v5259_v4, %v7642_v30  ;;  %v5261_v9 = vpop.f32.mrb[29].mxu0 }
0x1c21   :  { %v5265_v27 = vadd.f32 %v5261_v9, %v7648_v46 }
0x1c22   :  { %v6060_v13 = vmul.f32 -1.442695, %v5264_v8 }
0x1c23   :  { %v5437_v17 = vpop.f32.mrb[28].mxu1  ;;  %v6061_v34 = vmul.f32 -1.442695, %v5265_v27 }
0x1c24   :  { %7255 = vpow2.f32 %v6060_v13  ;;  %v5442_v18 = vadd.f32 %v5437_v17, %v7644_v32  ;;  %v5439_v22 = vpop.f32.mrb[29].mxu1 }
0x1c25   :  { %v5443_v39 = vadd.f32 %v5439_v22, %v7650_v47 }
0x1c26   :  { %v6068_v26 = vmul.f32 -1.442695, %v5442_v18 }
0x1c27   :  { %v6069_v7 = vmul.f32 -1.442695, %v5443_v39 }
0x1c28   :  { %7257 = vpow2.f32 %v6068_v26 }
0x1c29   :  { %7259 = vtanh.f32 %v5265_v27 }
0x1c2e   :  { %v7256_v31 = vpop.eup %7255 }
0x1c2f   :  { %v5269_v35 = vadd.f32 1.0, %v7256_v31 }
0x1c31   :  { %7261 = vrcp.f32 %v5269_v35 }
0x1c32   :  { %v7258_v40 = vpop.eup %7257  ;;  %7263 = vtanh.f32 %v5443_v39 }
0x1c33   :  { %v5447_v44 = vadd.f32 1.0, %v7258_v40  ;;  %v7260_v51 = vpop.eup %7259 }
0x1c35   :  { %7265 = vrcp.f32 %v5447_v44 }
0x1c36   :  { %7267 = vpow2.f32 %v6061_v34 }
0x1c37   :  { %7269 = vpow2.f32 %v6069_v7 }
0x1c3b   :  { %v7262_v52 = vpop.eup %7261 }
0x1c3c   :  { %v5280_v53 = vmul.f32 %v7262_v52, %v7260_v51  ;;  %v7264_v57 = vpop.eup %7263  ;;  %v5279_v19 = vmul.f32 %v7262_v52, %v8611_v37 }
0x1c3e   :  { %5282 = vrot.lane.b32.xlu0 %v5280_v53, %s7312_s3 }
0x1c3f   :  { %v7266_v45 = vpop.eup %7265 }
0x1c40   :  { %v5458_v54 = vmul.f32 %v7266_v45, %v7264_v57  ;;  %v7268_v55 = vpop.eup %7267  ;;  %v5457_v50 = vmul.f32 %v7266_v45, %v8615_v21 }
0x1c41   :  { %v5276_v16 = vadd.f32 1.0, %v7268_v55  ;;  %v7270_v42 = vpop.eup %7269 }
0x1c42   :  { %5460 = vrot.lane.b32.xlu1 %v5458_v54, %s7312_s3  ;;  %v5454_v48 = vadd.f32 1.0, %v7270_v42 }
0x1c43   :  { %7271 = vrcp.f32 %v5276_v16 }
0x1c4d   :  { %v7272_v5 = vpop.eup %7271 }
0x1cb0   :  { %v5283_v49 = vpop.permute.xlu0 %5282 }
0x1cb1   :  { %v8681_v33 = vadd.f32 %v5283_v49, %v5279_v19 }
0x1cb3   :  { %7273 = vtanh.f32 %v8681_v33 }
0x1cb4   :  { %v5461_v56 = vpop.permute.xlu1 %5460  ;;  %7275 = vrcp.f32 %v5454_v48 }
0x1cb5   :  { %v8685_v60 = vadd.f32 %v5461_v56, %v5457_v50 }
0x1cb7   :  { %7277 = vtanh.f32 %v8685_v60 }
0x1cbd   :  { %v7274_v2 = vpop.eup %7273 }
0x1cbe   :  { %v5287_v24 = vmul.f32 %v7274_v2, %v7272_v5  ;;  %v7276_v14 = vpop.eup %7275 }
0x1cc0   :  { %5289 = vrot.lane.b32.xlu0 %v5287_v24, %s7312_s3 }
0x1cc1   :  { %v7278_v37 = vpop.eup %7277 }
0x1cc2   :  { %v5465_v58 = vmul.f32 %v7278_v37, %v7276_v14 }
0x1cc4   :  { %5467 = vrot.lane.b32.xlu1 %v5465_v58, %s7312_s3 }
0x1d32   :  { %v5290_v10 = vpop.permute.xlu0 %5289 }
0x1d33   :  { %6062 = vst.msk [vmem:[%s8749_s7 + $0x70] sm:$0xff] %vm83_vm2, %v5290_v10  ;;  %6072 = vmatmul.mubr.msk.f32.vlgmr.msra.gmra.mrb[30].mxu0 %vm83_vm2, %v5290_v10 }
0x1d34   :  { %6824 = vmatpush1.bf16.msra.mxu0 %v7543_v63  ;;  %5613 = vmatprep.mubr.f32.mxu0 %v7311_v3  ;;  %v6071_v63 = vld [vmem:[%s8746_s0 + $0x78] sm:$0xff] }
0x1d35   :  { %6826 = vmatprep.subr.bf16.mxu0 %v7549_v1 }
0x1d36   :  { %v5468_v21 = vpop.permute.xlu1 %5467 }
0x1d37   :  { %6070 = vst.msk [vmem:[%s8750_s8 + $0x8] sm:$0xff] %vm83_vm2, %v5468_v21  ;;  %6079 = vmatmul.mubr.msk.f32.vlgmr.msra.gmra.mrb[30].mxu1 %vm83_vm2, %v5468_v21 }
0x1d38   :  { %6828 = vmatpush1.bf16.msra.mxu0 %v7569_v11  ;;  %6848 = vmatpush1.bf16.msra.mxu1 %v7547_v0  ;;  %v5650_v0 = vld [vmem:[%s8746_s0] sm:$0xff] }
0x1d39   :  { %6073 = vmatprep.subr.msk.mxu0 %vm162_vm0, %v8478_v15  ;;  %6850 = vmatprep.subr.bf16.mxu1 %v7558_v6 }
0x1d3a   :  { %5791 = vmatprep.mubr.f32.mxu1 %v7311_v3 }
0x1d3c   :  { %6074 = vmatpush1.msk.msra.mxu0 %vm162_vm0, %v8490_v28  ;;  %6852 = vmatpush1.bf16.msra.mxu1 %v7573_v12 }
0x1d3d   :  { %6075 = vmatmul.mubr.msk.f32.vlgmr.msra.gmra.mrb[30].mxu0 %vm158_vm1, %v6071_v63  ;;  %6080 = vmatprep.subr.msk.mxu1 %vm162_vm0, %v8499_v43 }
0x1d40   :  { %6081 = vmatpush1.msk.msra.mxu1 %vm162_vm0, %v8512_v62 }
0x1d41   :  { %6082 = vmatmul.mubr.msk.f32.vlgmr.msra.gmra.mrb[30].mxu1 %vm158_vm1, %v5650_v0 }
0x1e10   :  { %v5615_v3 = vpop.f32.mrb[30].mxu0 }
0x1e11   :  { %v5620_v1 = vadd.f32 %v5615_v3, %v7642_v30  ;;  %v5617_v6 = vpop.f32.mrb[31].mxu0 }
0x1e12   :  { %v5621_v20 = vadd.f32 %v5617_v6, %v7648_v46 }
0x1e13   :  { %v6076_v11 = vmul.f32 -1.442695, %v5620_v1 }
0x1e14   :  { %v5793_v12 = vpop.f32.mrb[30].mxu1  ;;  %v6077_v46 = vmul.f32 -1.442695, %v5621_v20 }
0x1e15   :  { %7279 = vpow2.f32 %v6076_v11  ;;  %v5798_v15 = vadd.f32 %v5793_v12, %v7644_v32  ;;  %v5795_v28 = vpop.f32.mrb[31].mxu1 }
0x1e16   :  { %v5799_v62 = vadd.f32 %v5795_v28, %v7650_v47 }
0x1e17   :  { %v6083_v43 = vmul.f32 -1.442695, %v5798_v15 }
0x1e18   :  { %v6084_v4 = vmul.f32 -1.442695, %v5799_v62 }
0x1e19   :  { %7281 = vpow2.f32 %v6083_v43 }
0x1e1a   :  { %7283 = vtanh.f32 %v5621_v20 }
0x1e1f   :  { %v7280_v61 = vpop.eup %7279 }
0x1e20   :  { %v5625_v25 = vadd.f32 1.0, %v7280_v61 }
0x1e22   :  { %7285 = vrcp.f32 %v5625_v25 }
0x1e23   :  { %v7282_v23 = vpop.eup %7281  ;;  %7287 = vtanh.f32 %v5799_v62 }
0x1e24   :  { %v5803_v59 = vadd.f32 1.0, %v7282_v23  ;;  %v7284_v30 = vpop.eup %7283 }
0x1e26   :  { %7289 = vrcp.f32 %v5803_v59 }
0x1e27   :  { %7291 = vpow2.f32 %v6077_v46 }
0x1e28   :  { %7293 = vpow2.f32 %v6084_v4 }
0x1e2c   :  { %v7286_v36 = vpop.eup %7285 }
0x1e2d   :  { %v5636_v29 = vmul.f32 %v7286_v36, %v7284_v30  ;;  %v7288_v38 = vpop.eup %7287  ;;  %v5635_v13 = vmul.f32 %v7286_v36, %v8681_v33 }
0x1e2f   :  { %5638 = vrot.lane.b32.xlu0 %v5636_v29, %s7312_s3 }
0x1e30   :  { %v7290_v32 = vpop.eup %7289 }
0x1e31   :  { %v5814_v41 = vmul.f32 %v7290_v32, %v7288_v38  ;;  %v7292_v47 = vpop.eup %7291  ;;  %v5813_v26 = vmul.f32 %v7290_v32, %v8685_v60 }
0x1e32   :  { %v5632_v8 = vadd.f32 1.0, %v7292_v47  ;;  %v7294_v9 = vpop.eup %7293 }
0x1e33   :  { %5816 = vrot.lane.b32.xlu1 %v5814_v41, %s7312_s3  ;;  %v5810_v22 = vadd.f32 1.0, %v7294_v9 }
0x1e34   :  { %7295 = vrcp.f32 %v5632_v8 }
0x1e3e   :  { %v7296_v35 = vpop.eup %7295 }
0x1ea1   :  { %v5639_v17 = vpop.permute.xlu0 %5638 }
0x1ea2   :  { %v5641_v18 = vadd.f32 %v5639_v17, %v5635_v13 }
0x1ea4   :  { %7297 = vtanh.f32 %v5641_v18 }
0x1ea5   :  { %v5817_v27 = vpop.permute.xlu1 %5816  ;;  %7299 = vrcp.f32 %v5810_v22 }
0x1ea6   :  { %v5819_v31 = vadd.f32 %v5817_v27, %v5813_v26 }
0x1ea8   :  { %7301 = vtanh.f32 %v5819_v31 }
0x1eae   :  { %v7298_v39 = vpop.eup %7297 }
0x1eaf   :  { %v5643_v40 = vmul.f32 %v7298_v39, %v7296_v35  ;;  %v7300_v44 = vpop.eup %7299 }
0x1eb1   :  { %5645 = vrot.lane.b32.xlu0 %v5643_v40, %s7312_s3 }
0x1eb2   :  { %v7302_v51 = vpop.eup %7301 }
0x1eb3   :  { %v5821_v52 = vmul.f32 %v7302_v51, %v7300_v44 }
0x1eb5   :  { %5823 = vrot.lane.b32.xlu1 %v5821_v52, %s7312_s3 }
0x1f23   :  { %v5646_v53 = vpop.permute.xlu0 %5645 }
0x1f24   :  { %6078 = vst.msk [vmem:[%s8749_s7 + $0x78] sm:$0xff] %vm83_vm2, %v5646_v53 }
0x1f27   :  { %v5824_v57 = vpop.permute.xlu1 %5823 }
0x1f28   :  { %5826 = vst.msk [vmem:[%s8750_s8] sm:$0xff] %vm83_vm2, %v5824_v57 }

// kernel: language_discriminator_forward.3
= control target key start
LH: loop header
LB: loop body
LE: loop exit
PB: predicated region body
PF: predicated region fallthrough
CT: control target
= control target key end

     0   :  { %v17000_v3 = vmov 0.0   ;;  %vm322_vm0 = vcmask 261120   ;;  %vm14963_vm1 = vmmov 0   ;;  %vm1205_vm2 = vcmask 122880   ;;  %s16990_s3 = inlined_call_operand.vmem [shape: f32[128,512], index: 3, kind: input, shape index: {}]   ;;  %s16991_s2 = inlined_call_operand.vmem [shape: f32[32,512], index: 2, kind: input, shape index: {}]   ;;  %s16992_s0 = inlined_call_operand.vmem [shape: f32[6,8,32], index: 0, kind: input, shape index: {}]   ;;  %s16993_s5 = inlined_call_operand.vmem [shape: f32[128,128], index: 5, kind: input, shape index: {}]   ;;  %s16994_s1 = inlined_call_operand.vmem [shape: f32[8,16,128], index: 1, kind: input, shape index: {}]   ;;  %s16995_s4 = inlined_call_operand.vmem [shape: f32[1,512], index: 4, kind: input, shape index: {}]   ;;  %s16996_s6 = inlined_call_operand.vmem [shape: f32[256,128], index: 6, kind: input, shape index: {}]   ;;  %s16997_s7 = inlined_call_operand.vmem [shape: f32[128,1], index: 7, kind: input, shape index: {}]   ;;  %s16998_s8 = inlined_call_operand.<no memory space> [shape: f32[1,1], index: 8, kind: input, shape index: {}]   ;;  %s16999_s9 = inlined_call_operand.vmem [shape: f32[8,1], index: 9, kind: output, shape index: {}]  }
   0x1   :  { %v69_v0 = vld [vmem:[%s16990_s3 + $0x18] sm:$0xff]  ;;  %v68_v2 = vld [vmem:[%s16990_s3 + $0x10] sm:$0xff]  ;;  %315 = vmatprep.mubr.f32.mxu1 %v17000_v3  ;;  %244 = vmatprep.mubr.f32.mxu0 %v17000_v3  ;;  %v67_v12 = vld [vmem:[%s16990_s3 + $0x8] sm:$0xff]  ;;  %vm1294_vm3 = vcmask 130048   ;;  %vm1958_vm4 = vcmask 1041409   ;;  %vm1961_vm5 = vcmask 1042434  }
   0x2   :  { %v73_v1 = vld [vmem:[%s16990_s3 + $0x38] sm:$0xff]  ;;  %v72_v5 = vld [vmem:[%s16990_s3 + $0x30] sm:$0xff]  ;;  %v71_v13 = vld [vmem:[%s16990_s3 + $0x28] sm:$0xff]  ;;  %vm1964_vm6 = vcmask 1043459   ;;  %vm1967_vm7 = vcmask 1044484   ;;  %vm1970_vm8 = vcmask 1045509  }
   0x3   :  { %v15026_v4 = vpack.c.bf16 %v73_v1, %v69_v0  ;;  %v77_v6 = vld [vmem:[%s16990_s3 + $0x58] sm:$0xff]  ;;  %v15037_v8 = vpack.c.bf16 %v72_v5, %v68_v2  ;;  %v76_v10 = vld [vmem:[%s16990_s3 + $0x50] sm:$0xff]  ;;  %v66_v14 = vld [vmem:[%s16990_s3] sm:$0xff]  ;;  %v15063_v17 = vpack.c.bf16 %v71_v13, %v67_v12  ;;  %vm1973_vm9 = vcmask 1046534  }
   0x4   :  { %v81_v7 = vld [vmem:[%s16990_s3 + $0x78] sm:$0xff]  ;;  %v80_v11 = vld [vmem:[%s16990_s3 + $0x70] sm:$0xff]  ;;  %v70_v15 = vld [vmem:[%s16990_s3 + $0x20] sm:$0xff]  ;;  %vm1976_vm10 = vcmask 1047559   ;;  %vm11354_vm11 = vcmask 7168  }
   0x5   :  { %17113 = vst [vmem:[#allocation3_spill] sm:$0xff] %v15026_v4  ;;  %17114 = vst [vmem:[#allocation4_spill] sm:$0xff] %v15037_v8  ;;  %v15039_v9 = vpack.c.bf16 %v81_v7, %v77_v6  ;;  %13426 = vmatprep.subr.bf16.mxu1 %v15026_v4  ;;  %v15061_v16 = vpack.c.bf16 %v80_v11, %v76_v10  ;;  %v15065_v18 = vpack.c.bf16 %v70_v15, %v66_v14  ;;  %v85_v19 = vld [vmem:[%s16990_s3 + $0x98] sm:$0xff]  ;;  %v84_v21 = vld [vmem:[%s16990_s3 + $0x90] sm:$0xff] }
   0x6   :  { %13428 = vmatpush1.bf16.msra.mxu1 %v15037_v8  ;;  %v89_v20 = vld [vmem:[%s16990_s3 + $0xb8] sm:$0xff]  ;;  %v88_v23 = vld [vmem:[%s16990_s3 + $0xb0] sm:$0xff]  ;;  %v75_v24 = vld [vmem:[%s16990_s3 + $0x48] sm:$0xff]  ;;  %13394 = vmatprep.subr.bf16.mxu0 %v15063_v17 }
   0x7   :  { %17115 = vst [vmem:[#allocation5_spill] sm:$0xff] %v15039_v9  ;;  %17116 = vst [vmem:[#allocation6_spill] sm:$0xff] %v15061_v16  ;;  %13430 = vmatprep.subr.bf16.mxu1 %v15039_v9  ;;  %v15077_v22 = vpack.c.bf16 %v89_v20, %v85_v19  ;;  %v79_v25 = vld [vmem:[%s16990_s3 + $0x68] sm:$0xff]  ;;  %v74_v27 = vld [vmem:[%s16990_s3 + $0x40] sm:$0xff]  ;;  %13396 = vmatpush1.bf16.msra.mxu0 %v15065_v18  ;;  %v15107_v32 = vpack.c.bf16 %v88_v23, %v84_v21 }
   0x8   :  { %v15089_v26 = vpack.c.bf16 %v79_v25, %v75_v24  ;;  %v78_v28 = vld [vmem:[%s16990_s3 + $0x60] sm:$0xff]  ;;  %v93_v29 = vld [vmem:[%s16990_s3 + $0xd8] sm:$0xff]  ;;  %v83_v33 = vld [vmem:[%s16990_s3 + $0x88] sm:$0xff] }
   0x9   :  { %17117 = vst [vmem:[#allocation7_spill] sm:$0xff] %v15077_v22  ;;  %v15101_v30 = vpack.c.bf16 %v78_v28, %v74_v27  ;;  %v97_v31 = vld [vmem:[%s16990_s3 + $0xf8] sm:$0xff]  ;;  %17118 = vst [vmem:[#allocation8_spill] sm:$0xff] %v15107_v32  ;;  %v87_v34 = vld [vmem:[%s16990_s3 + $0xa8] sm:$0xff] }
   0xa   :  { %13432 = vmatpush1.bf16.msra.mxu1 %v15061_v16  ;;  %13398 = vmatprep.subr.bf16.mxu0 %v15089_v26  ;;  %v82_v35 = vld [vmem:[%s16990_s3 + $0x80] sm:$0xff]  ;;  %v15120_v36 = vpack.c.bf16 %v97_v31, %v93_v29  ;;  %v92_v37 = vld [vmem:[%s16990_s3 + $0xd0] sm:$0xff]  ;;  %v15128_v39 = vpack.c.bf16 %v87_v34, %v83_v33  ;;  %v101_v41 = vld [vmem:[%s16990_s3 + $0x118] sm:$0xff] }
   0xb   :  { %13434 = vmatprep.subr.bf16.mxu1 %v15077_v22  ;;  %v96_v38 = vld [vmem:[%s16990_s3 + $0xf0] sm:$0xff]  ;;  %v86_v40 = vld [vmem:[%s16990_s3 + $0xa0] sm:$0xff]  ;;  %v105_v42 = vld [vmem:[%s16990_s3 + $0x138] sm:$0xff]  ;;  %13400 = vmatpush1.bf16.msra.mxu0 %v15101_v30 }
   0xc   :  { %17119 = vst [vmem:[#allocation9_spill] sm:$0xff] %v15120_v36  ;;  %v91_v43 = vld [vmem:[%s16990_s3 + $0xc8] sm:$0xff]  ;;  %v15143_v44 = vpack.c.bf16 %v86_v40, %v82_v35  ;;  %v15149_v46 = vpack.c.bf16 %v96_v38, %v92_v37  ;;  %13402 = vmatprep.subr.bf16.mxu0 %v15128_v39  ;;  %v100_v47 = vld [vmem:[%s16990_s3 + $0x110] sm:$0xff]  ;;  %v90_v49 = vld [vmem:[%s16990_s3 + $0xc0] sm:$0xff]  ;;  %v15164_v51 = vpack.c.bf16 %v105_v42, %v101_v41 }
   0xd   :  { %v95_v45 = vld [vmem:[%s16990_s3 + $0xe8] sm:$0xff]  ;;  %v94_v50 = vld [vmem:[%s16990_s3 + $0xe0] sm:$0xff]  ;;  %v104_v52 = vld [vmem:[%s16990_s3 + $0x130] sm:$0xff] }
   0xe   :  { %13436 = vmatpush1.bf16.msra.mxu1 %v15107_v32  ;;  %17120 = vst [vmem:[#allocation10_spill] sm:$0xff] %v15149_v46  ;;  %v15155_v48 = vpack.c.bf16 %v95_v45, %v91_v43  ;;  %17121 = vst [vmem:[#allocation11_spill] sm:$0xff] %v15164_v51  ;;  %v99_v53 = vld [vmem:[%s16990_s3 + $0x108] sm:$0xff]  ;;  %v109_v55 = vld [vmem:[%s16990_s3 + $0x158] sm:$0xff]  ;;  %v15182_v57 = vpack.c.bf16 %v94_v50, %v90_v49  ;;  %v15185_v58 = vpack.c.bf16 %v104_v52, %v100_v47 }
   0xf   :  { %13438 = vmatprep.subr.bf16.mxu1 %v15120_v36  ;;  %v103_v54 = vld [vmem:[%s16990_s3 + $0x128] sm:$0xff]  ;;  %v113_v56 = vld [vmem:[%s16990_s3 + $0x178] sm:$0xff]  ;;  %13404 = vmatpush1.bf16.msra.mxu0 %v15143_v44  ;;  %v108_v59 = vld [vmem:[%s16990_s3 + $0x150] sm:$0xff] }
  0x10   :  { %17122 = vst [vmem:[#allocation12_spill] sm:$0xff] %v15185_v58  ;;  %13406 = vmatprep.subr.bf16.mxu0 %v15155_v48  ;;  %v15191_v60 = vpack.c.bf16 %v103_v54, %v99_v53  ;;  %v98_v61 = vld [vmem:[%s16990_s3 + $0x100] sm:$0xff]  ;;  %v15200_v63 = vpack.c.bf16 %v113_v56, %v109_v55  ;;  %v112_v0 = vld [vmem:[%s16990_s3 + $0x170] sm:$0xff]  ;;  %v107_v1 = vld [vmem:[%s16990_s3 + $0x148] sm:$0xff] }
  0x11   :  { %v102_v62 = vld [vmem:[%s16990_s3 + $0x120] sm:$0xff]  ;;  %v111_v2 = vld [vmem:[%s16990_s3 + $0x168] sm:$0xff]  ;;  %v117_v5 = vld [vmem:[%s16990_s3 + $0x198] sm:$0xff]  ;;  %v15221_v10 = vpack.c.bf16 %v112_v0, %v108_v59 }
  0x12   :  { %13440 = vmatpush1.bf16.msra.mxu1 %v15149_v46  ;;  %17123 = vst [vmem:[#allocation13_spill] sm:$0xff] %v15200_v63  ;;  %v121_v6 = vld [vmem:[%s16990_s3 + $0x1b8] sm:$0xff]  ;;  %v15218_v7 = vpack.c.bf16 %v102_v62, %v98_v61  ;;  %v116_v11 = vld [vmem:[%s16990_s3 + $0x190] sm:$0xff]  ;;  %v15227_v12 = vpack.c.bf16 %v111_v2, %v107_v1  ;;  %v106_v13 = vld [vmem:[%s16990_s3 + $0x140] sm:$0xff] }
  0x13   :  { %13442 = vmatprep.subr.bf16.mxu1 %v15164_v51  ;;  %13408 = vmatpush1.bf16.msra.mxu0 %v15182_v57  ;;  %17124 = vst [vmem:[#allocation14_spill] sm:$0xff] %v15221_v10  ;;  %v110_v14 = vld [vmem:[%s16990_s3 + $0x160] sm:$0xff]  ;;  %v15236_v15 = vpack.c.bf16 %v121_v6, %v117_v5  ;;  %v120_v19 = vld [vmem:[%s16990_s3 + $0x1b0] sm:$0xff]  ;;  %v115_v20 = vld [vmem:[%s16990_s3 + $0x188] sm:$0xff] }
  0x14   :  { %13410 = vmatprep.subr.bf16.mxu0 %v15191_v60  ;;  %v119_v21 = vld [vmem:[%s16990_s3 + $0x1a8] sm:$0xff]  ;;  %v125_v23 = vld [vmem:[%s16990_s3 + $0x1d8] sm:$0xff]  ;;  %v15254_v25 = vpack.c.bf16 %v110_v14, %v106_v13  ;;  %v15257_v27 = vpack.c.bf16 %v120_v19, %v116_v11  ;;  %v124_v28 = vld [vmem:[%s16990_s3 + $0x1d0] sm:$0xff] }
  0x15   :  { %17125 = vst [vmem:[#allocation15_spill] sm:$0xff] %v15236_v15  ;;  %v129_v24 = vld [vmem:[%s16990_s3 + $0x1f8] sm:$0xff]  ;;  %v15263_v29 = vpack.c.bf16 %v119_v21, %v115_v20  ;;  %v114_v31 = vld [vmem:[%s16990_s3 + $0x180] sm:$0xff]  ;;  %v128_v35 = vld [vmem:[%s16990_s3 + $0x1f0] sm:$0xff] }
  0x16   :  { %13444 = vmatpush1.bf16.msra.mxu1 %v15185_v58  ;;  %17126 = vst [vmem:[#allocation16_spill] sm:$0xff] %v15257_v27  ;;  %v118_v33 = vld [vmem:[%s16990_s3 + $0x1a0] sm:$0xff]  ;;  %v15272_v34 = vpack.c.bf16 %v129_v24, %v125_v23  ;;  %v123_v37 = vld [vmem:[%s16990_s3 + $0x1c8] sm:$0xff]  ;;  %v15293_v43 = vpack.c.bf16 %v128_v35, %v124_v28  ;;  %v53_v1 = vld [vmem:[%s16991_s2 + $0x18] sm:$0xff] }
  0x17   :  { %13446 = vmatprep.subr.bf16.mxu1 %v15200_v63  ;;  %13412 = vmatpush1.bf16.msra.mxu0 %v15218_v7  ;;  %v127_v38 = vld [vmem:[%s16990_s3 + $0x1e8] sm:$0xff]  ;;  %v15290_v42 = vpack.c.bf16 %v118_v33, %v114_v31  ;;  %v122_v47 = vld [vmem:[%s16990_s3 + $0x1c0] sm:$0xff]  ;;  %v57_v2 = vld [vmem:[%s16991_s2 + $0x38] sm:$0xff] }
  0x18   :  { %13414 = vmatprep.subr.bf16.mxu0 %v15227_v12  ;;  %17127 = vst [vmem:[#allocation17_spill] sm:$0xff] %v15272_v34  ;;  %v51_v40 = vld [vmem:[%s16991_s2 + $0x8] sm:$0xff]  ;;  %17128 = vst [vmem:[#allocation18_spill] sm:$0xff] %v15293_v43  ;;  %v15296_v45 = vpack.c.bf16 %v127_v38, %v123_v37  ;;  %v126_v49 = vld [vmem:[%s16990_s3 + $0x1e0] sm:$0xff]  ;;  %v15348_v6 = vpack.c.bf16 %v57_v2, %v53_v1  ;;  %v17002_v38 = vmov 0.0|0.0  }
  0x19   :  { %v55_v41 = vld [vmem:[%s16991_s2 + $0x28] sm:$0xff]  ;;  %v50_v52 = vld [vmem:[%s16991_s2] sm:$0xff]  ;;  %v15320_v56 = vpack.c.bf16 %v126_v49, %v122_v47  ;;  %v52_v11 = vld [vmem:[%s16991_s2 + $0x10] sm:$0xff] }
  0x1a   :  { %13448 = vmatpush1.bf16.msra.mxu1 %v15221_v10  ;;  %v15305_v50 = vpack.c.bf16 %v55_v41, %v51_v40  ;;  %v54_v53 = vld [vmem:[%s16991_s2 + $0x20] sm:$0xff]  ;;  %v59_v54 = vld [vmem:[%s16991_s2 + $0x48] sm:$0xff]  ;;  %17134 = vst [vmem:[#allocation24_spill] sm:$0xff] %v15348_v6  ;;  %v56_v13 = vld [vmem:[%s16991_s2 + $0x30] sm:$0xff] }
  0x1b   :  { %13450 = vmatprep.subr.bf16.mxu1 %v15236_v15  ;;  %13416 = vmatpush1.bf16.msra.mxu0 %v15254_v25  ;;  %v63_v55 = vld [vmem:[%s16991_s2 + $0x68] sm:$0xff]  ;;  %17130 = vst [vmem:[#allocation20_spill] sm:$0xff] %v15320_v56  ;;  %v15323_v59 = vpack.c.bf16 %v54_v53, %v50_v52  ;;  %v58_v62 = vld [vmem:[%s16991_s2 + $0x40] sm:$0xff]  ;;  %v61_v14 = vld [vmem:[%s16991_s2 + $0x58] sm:$0xff]  ;;  %v15367_v21 = vpack.c.bf16 %v56_v13, %v52_v11 }
  0x1c   :  { %13418 = vmatprep.subr.bf16.mxu0 %v15263_v29  ;;  %17129 = vst [vmem:[#allocation19_spill] sm:$0xff] %v15305_v50  ;;  %v15327_v61 = vpack.c.bf16 %v63_v55, %v59_v54  ;;  %v62_v0 = vld [vmem:[%s16991_s2 + $0x60] sm:$0xff]  ;;  %v65_v19 = vld [vmem:[%s16991_s2 + $0x78] sm:$0xff]  ;;  %v60_v24 = vld [vmem:[%s16991_s2 + $0x50] sm:$0xff] }
  0x1d   :  { %17131 = vst [vmem:[#allocation21_spill] sm:$0xff] %v15323_v59  ;;  %v15344_v5 = vpack.c.bf16 %v62_v0, %v58_v62  ;;  %v179_v20 = vld [vmem:[%s16992_s0] sm:$0xff]  ;;  %17135 = vst [vmem:[#allocation25_spill] sm:$0xff] %v15367_v21  ;;  %v15370_v23 = vpack.c.bf16 %v65_v19, %v61_v14  ;;  %v64_v28 = vld [vmem:[%s16991_s2 + $0x70] sm:$0xff] }
  0x1e   :  { %13452 = vmatpush1.bf16.msra.mxu1 %v15257_v27  ;;  %17132 = vst [vmem:[#allocation22_spill] sm:$0xff] %v15327_v61  ;;  %v15380_v31 = vpack.c.bf16 %v64_v28, %v60_v24  ;;  %v131_v33 = vld [vmem:[%s16993_s5] sm:$0xff]  ;;  %v132_v35 = vld [vmem:[%s16993_s5 + $0x8] sm:$0xff]  ;;  %v133_v40 = vld [vmem:[%s16993_s5 + $0x10] sm:$0xff] }
  0x1f   :  { %13454 = vmatprep.subr.bf16.mxu1 %v15272_v34  ;;  %13420 = vmatpush1.bf16.msra.mxu0 %v15290_v42  ;;  %17133 = vst [vmem:[#allocation23_spill] sm:$0xff] %v15344_v5  ;;  %17136 = vst [vmem:[#allocation26_spill] sm:$0xff] %v15370_v23  ;;  %v15392_v37 = vpack.c.bf16 %v132_v35, %v131_v33  ;;  %v134_v41 = vld [vmem:[%s16993_s5 + $0x18] sm:$0xff]  ;;  %v135_v49 = vld [vmem:[%s16993_s5 + $0x20] sm:$0xff] }
  0x20   :  { %13422 = vmatprep.subr.bf16.mxu0 %v15296_v45  ;;  %17137 = vst [vmem:[#allocation27_spill] sm:$0xff] %v15380_v31  ;;  %v15404_v47 = vpack.c.bf16 %v134_v41, %v133_v40  ;;  %v136_v52 = vld [vmem:[%s16993_s5 + $0x28] sm:$0xff]  ;;  %v137_v54 = vld [vmem:[%s16993_s5 + $0x30] sm:$0xff]  ;;  %v138_v55 = vld [vmem:[%s16993_s5 + $0x38] sm:$0xff] }
  0x21   :  { %17138 = vst [vmem:[#allocation28_spill] sm:$0xff] %v15392_v37  ;;  %v15414_v53 = vpack.c.bf16 %v136_v52, %v135_v49  ;;  %v15424_v62 = vpack.c.bf16 %v138_v55, %v137_v54  ;;  %v139_v0 = vld [vmem:[%s16993_s5 + $0x40] sm:$0xff]  ;;  %v140_v1 = vld [vmem:[%s16993_s5 + $0x48] sm:$0xff]  ;;  %v141_v11 = vld [vmem:[%s16993_s5 + $0x50] sm:$0xff]  ;;  %v469_v52 = vlaneseq }
  0x22   :  { %13456 = vmatpush1.bf16.msra.mxu1 %v15293_v43  ;;  %17139 = vst [vmem:[#allocation29_spill] sm:$0xff] %v15404_v47  ;;  %v15434_v2 = vpack.c.bf16 %v140_v1, %v139_v0  ;;  %v142_v13 = vld [vmem:[%s16993_s5 + $0x58] sm:$0xff]  ;;  %v143_v19 = vld [vmem:[%s16993_s5 + $0x60] sm:$0xff]  ;;  %v145_v28 = vld [vmem:[%s16993_s5 + $0x70] sm:$0xff] }
  0x23   :  { %13458 = vmatprep.subr.bf16.mxu1 %v15305_v50  ;;  %13424 = vmatpush1.bf16.msra.mxu0 %v15320_v56  ;;  %17140 = vst [vmem:[#allocation30_spill] sm:$0xff] %v15414_v53  ;;  %17141 = vst [vmem:[#allocation31_spill] sm:$0xff] %v15424_v62  ;;  %v15444_v14 = vpack.c.bf16 %v142_v13, %v141_v11  ;;  %v146_v33 = vld [vmem:[%s16993_s5 + $0x78] sm:$0xff]  ;;  %v34_v40 = vld [vmem:[%s16994_s1] sm:$0xff]  ;;  %v470_v54 = vshrl.u32 %v469_v52, 7 }
  0x24   :  { %13473 = vmatprep.subr.bf16.mxu0 %v17002_v38  ;;  %17142 = vst [vmem:[#allocation32_spill] sm:$0xff] %v15434_v2  ;;  %v15467_v35 = vpack.c.bf16 %v146_v33, %v145_v28  ;;  %v35_v41 = vld [vmem:[%s16994_s1 + $0x8] sm:$0xff]  ;;  %v130_v11 = vld [vmem:[%s16995_s4] sm:$0xf] }
  0x25   :  { %316 = vmatmul.mubr.f32.vlgmr.msra.gmra.mrb[0].mxu1 %v17000_v3  ;;  %17143 = vst [vmem:[#allocation33_spill] sm:$0xff] %v15444_v14  ;;  %v15478_v49 = vpack.c.bf16 %v35_v41, %v34_v40  ;;  %v471_v0 = vsub.s32 0, %v470_v54  ;;  %v475_v13 = vsub.s32 1, %v470_v54 }
  0x26   :  { %13460 = vmatpush1.bf16.msra.mxu1 %v15323_v59  ;;  %390 = vmatprep.mubr.f32.mxu1 %v17000_v3  ;;  %17145 = vst [vmem:[#allocation35_spill] sm:$0xff] %v15467_v35 }
  0x27   :  { %13462 = vmatprep.subr.bf16.mxu1 %v15327_v61  ;;  %245 = vmatmul.mubr.f32.vlgmr.msra.gmra.mrb[0].mxu0 %v17000_v3  ;;  %17146 = vst [vmem:[#allocation36_spill] sm:$0xff] %v15478_v49  ;;  %v15487_v28 = vrot.slane %v130_v11, %v475_v13 }
  0x28   :  { %13475 = vmatpush3.bf16.msra.mxu0 %v15392_v37  ;;  %12088 = vmatprep.mubr.msk.f32.mxu0 %vm14963_vm1, %v17000_v3 }
  0x29   :  { %13476 = vmatprep.subr.bf16.mxu0 %v17002_v38  ;;  %17148 = vst [vmem:[#allocation38_spill] sm:$0xff] %v15487_v28 }
  0x2a   :  { %13464 = vmatpush1.bf16.msra.mxu1 %v15344_v5 }
  0x2b   :  { %13466 = vmatprep.subr.bf16.mxu1 %v15348_v6  ;;  %v479_v6 = vsub.s32 2, %v470_v54 }
  0x2c   :  { %13478 = vmatpush3.bf16.msra.mxu0 %v15404_v47 }
  0x2d   :  { %11360 = vmatmul.mubr.msk.f32.vlgmr.msra.gmra.mrb[2].mxu1 %vm322_vm0, %v179_v20  ;;  %13479 = vmatprep.subr.bf16.mxu0 %v17002_v38  ;;  %v15494_v61 = vrot.slane %v130_v11, %v479_v6 }
  0x2e   :  { %13468 = vmatpush1.bf16.msra.mxu1 %v15367_v21  ;;  %461 = vmatprep.mubr.f32.mxu1 %v17000_v3 }
  0x2f   :  { %13470 = vmatprep.subr.bf16.mxu1 %v15370_v23  ;;  %17150 = vst [vmem:[#allocation40_spill] sm:$0xff] %v15494_v61 }
  0x30   :  { %13481 = vmatpush3.bf16.msra.mxu0 %v15414_v53 }
  0x31   :  { %13482 = vmatprep.subr.bf16.mxu0 %v17002_v38 }
  0x32   :  { %13472 = vmatpush1.bf16.msra.mxu1 %v15380_v31 }
  0x33   :  { %13497 = vmatprep.subr.bf16.mxu1 %v17002_v38 }
  0x34   :  { %13484 = vmatpush3.bf16.msra.mxu0 %v15424_v62 }
  0x35   :  { %11361 = vmatmul.mubr.msk.f32.vlgmr.msra.gmra.mrb[0].mxu1 %vm322_vm0, %v179_v20  ;;  %13485 = vmatprep.subr.bf16.mxu0 %v17002_v38  ;;  %v144_v20 = vld [vmem:[%s16993_s5 + $0x68] sm:$0xff] }
  0x36   :  { %12095 = vmatprep.mubr.msk.f32.mxu1 %vm14963_vm1, %v17000_v3  ;;  %v15457_v24 = vpack.c.bf16 %v144_v20, %v143_v19  ;;  %v15485_v19 = vrot.slane %v130_v11, %v471_v0  ;;  %v483_v3 = vsub.s32 3, %v470_v54 }
  0x38   :  { %13487 = vmatpush3.bf16.msra.mxu0 %v15434_v2  ;;  %17144 = vst [vmem:[#allocation34_spill] sm:$0xff] %v15457_v24  ;;  %17147 = vst [vmem:[#allocation37_spill] sm:$0xff] %v15485_v19  ;;  %v15491_v21 = vrot.slane %v130_v11, %v483_v3 }
  0x39   :  { %13488 = vmatprep.subr.bf16.mxu0 %v17002_v38 }
  0x3a   :  { %17149 = vst [vmem:[#allocation39_spill] sm:$0xff] %v15491_v21 }
  0x3b   :  { %13499 = vmatpush3.bf16.xpose.msra.mxu1 %v15478_v49 }
  0x3c   :  { %13490 = vmatpush3.bf16.msra.mxu0 %v15444_v14  ;;  %13500 = vmatprep.subr.bf16.mxu1 %v17002_v38 }
  0x3d   :  { %13491 = vmatprep.subr.bf16.mxu0 %v17002_v38 }
  0x40   :  { %13493 = vmatpush3.bf16.msra.mxu0 %v15457_v24 }
  0x41   :  { %13494 = vmatprep.subr.bf16.mxu0 %v17002_v38 }
  0x44   :  { %13496 = vmatpush3.bf16.msra.mxu0 %v15467_v35 }
  0x45   :  { %13515 = vmatprep.subr.bf16.mxu0 %v17002_v38 }
  0xfa   :  { %v246_v55 = vpop.f32.mrb[0].mxu0 }
  0xfb   :  { %v248_v1 = vpop.f32.mrb[1].mxu0 }
 0x100   :  { %v392_v20 = vpop.f32.mrb[2].mxu1 }
 0x101   :  { %v393_v33 = vadd.f32 %v392_v20, %v246_v55  ;;  %v394_v40 = vpop.f32.mrb[3].mxu1 }
 0x102   :  { %v395_v41 = vadd.f32 %v394_v40, %v248_v1 }
 0x103   :  { %v489_v38 = vadd.f32 %v15485_v19, %v393_v33 }
 0x104   :  { %v490_v52 = vadd.f32 %v15487_v28, %v395_v41 }
 0x105   :  { %v11362_v31 = vmul.f32 -1.442695, %v489_v38 }
 0x106   :  { %v11363_v23 = vmul.f32 -1.442695, %v490_v52 }
 0x107   :  { %14657 = vpow2.f32 %v11362_v31 }
 0x108   :  { %14659 = vpow2.f32 %v11363_v23  ;;  %v463_v0 = vpop.f32.mrb[0].mxu1 }
 0x109   :  { %v465_v5 = vpop.f32.mrb[1].mxu1  ;;  %v491_v1 = vadd.f32 %v15494_v61, %v463_v0 }
 0x10a   :  { %v492_v13 = vadd.f32 %v15491_v21, %v465_v5 }
 0x10c   :  { %v11364_v55 = vmul.f32 -1.442695, %v492_v13 }
 0x10e   :  { %14661 = vpow2.f32 %v11364_v55  ;;  %v17152_v55 = vmov 0.0  }
 0x10f   :  { %14663 = vtanh.f32 %v491_v1  ;;  %v46_v1 = vld [vmem:[%s16994_s1 + $0x60] sm:$0xff] }
 0x111   :  { %v14658_v20 = vpop.eup %14657 }
 0x112   :  { %v14660_v33 = vpop.eup %14659  ;;  %v496_v40 = vadd.f32 1.0, %v14658_v20  ;;  %v47_v20 = vld [vmem:[%s16994_s1 + $0x68] sm:$0xff] }
 0x113   :  { %v502_v38 = vadd.f32 1.0, %v14660_v33  ;;  %v17153_v33 = vmov 0.0|0.0  }
 0x114   :  { %14665 = vrcp.f32 %v496_v40  ;;  %v14964_v40 = vmov 1966171168  }
 0x115   :  { %14667 = vrcp.f32 %v502_v38  ;;  %v590_v38 = vunpack.c.l.s4 %v14964_v40 }
 0x118   :  { %v14662_v3 = vpop.eup %14661 }
 0x119   :  { %v14664_v31 = vpop.eup %14663  ;;  %v509_v28 = vadd.f32 1.0, %v14662_v3  ;;  %v591_v3 = vunpack.c.0.s8 %v590_v38 }
 0x11b   :  { %14669 = vrcp.f32 %v509_v28  ;;  %v15511_v28 = vpack.c.bf16 %v47_v20, %v46_v1 }
 0x11e   :  { %v14666_v23 = vpop.eup %14665 }
 0x11f   :  { %v14668_v41 = vpop.eup %14667  ;;  %v513_v52 = vmul.f32 %v14666_v23, %v14664_v31  ;;  %v15515_v31 = vsub.s32 %v591_v3, %v470_v54  ;;  %v36_v23 = vld [vmem:[%s16994_s1 + $0x10] sm:$0xff] }
 0x120   :  { %v512_v5 = vmul.f32 0.0, %v14668_v41  ;;  %v37_v41 = vld [vmem:[%s16994_s1 + $0x18] sm:$0xff] }
 0x121   :  { %17154 = vst [vmem:[#allocation42_spill] sm:$0xff] %v15515_v31  ;;  %v15524_v1 = vpack.c.bf16 %v37_v41, %v36_v23  ;;  %v38_v23 = vld [vmem:[%s16994_s1 + $0x20] sm:$0xff]  ;;  %v39_v41 = vld [vmem:[%s16994_s1 + $0x28] sm:$0xff] }
 0x122   :  { %v15497_v6 = vadd.f32 %v513_v52, %v512_v5 }
 0x123   :  { %17155 = vst [vmem:[#allocation43_spill] sm:$0xff] %v15524_v1 }
 0x124   :  { %17151 = vst [vmem:[#allocation41_spill] sm:$0xff] %v15497_v6  ;;  %14671 = vtanh.f32 %v15497_v6 }
 0x125   :  { %v14670_v11 = vpop.eup %14669 }
 0x12e   :  { %v14672_v0 = vpop.eup %14671 }
 0x12f   :  { %v15500_v13 = vmul.f32 %v14672_v0, %v14670_v11 }
 0x131   :  { %12089 = vmatmul.mubr.f32.vlgmr.msra.gmra.mrb[2].mxu0 %v15500_v13 }
 0x132   :  { %12137 = vmatprep.mubr.msk.f32.mxu0 %vm14963_vm1, %v17152_v55  ;;  %13517 = vmatpush3.bf16.xpose.msra.mxu0 %v15511_v28 }
 0x133   :  { %13521 = vmatprep.subr.bf16.mxu0 %v17153_v33 }
 0x204   :  { %v583_v52 = vpop.f32.mrb[2].mxu0 }
 0x205   :  { %v588_v5 = vcombine.high %v583_v52, %v583_v52  ;;  %v595_v11 = vrot.slane %v583_v52, %v15515_v31  ;;  %v12090_v0 = vpop.f32.mrb[3].mxu0  ;;  %v15539_v52 = vpack.c.bf16 %v39_v41, %v38_v23  ;;  %v42_v23 = vld [vmem:[%s16994_s1 + $0x40] sm:$0xff]  ;;  %v43_v41 = vld [vmem:[%s16994_s1 + $0x48] sm:$0xff] }
 0x206   :  { %v41_v0 = vld [vmem:[%s16994_s1 + $0x38] sm:$0xff]  ;;  %v15568_v6 = vpack.c.bf16 %v43_v41, %v42_v23  ;;  %v48_v23 = vld [vmem:[%s16994_s1 + $0x70] sm:$0xff] }
 0x207   :  { %v602_v20 = vrot.slane %v588_v5, %v15515_v31  ;;  %v611_v54 = vrot.slane %v595_v11, %v15515_v31  ;;  %v603_v38 = vcombine.high %v595_v11, %v595_v11  ;;  %v40_v11 = vld [vmem:[%s16994_s1 + $0x30] sm:$0xff]  ;;  %v49_v41 = vld [vmem:[%s16994_s1 + $0x78] sm:$0xff] }
 0x209   :  { %v618_v40 = vrot.slane %v602_v20, %v15515_v31  ;;  %12096 = vmatmul.mubr.f32.vlgmr.msra.gmra.mrb[4].mxu1 %v611_v54  ;;  %v625_v5 = vrot.slane %v603_v38, %v15515_v31  ;;  %v633_v38 = vcombine.high %v611_v54, %v611_v54  ;;  %v44_v54 = vld [vmem:[%s16994_s1 + $0x50] sm:$0xff] }
 0x20a   :  { %13502 = vmatpush3.bf16.xpose.msra.mxu1 %v15524_v1  ;;  %12102 = vmatprep.mubr.msk.f32.mxu1 %vm14963_vm1, %v17152_v55 }
 0x20b   :  { %v634_v3 = vcombine.high %v618_v40, %v618_v40  ;;  %13503 = vmatprep.subr.bf16.mxu1 %v17153_v33 }
 0x20d   :  { %12138 = vmatmul.mubr.f32.vlgmr.msra.gmra.mrb[4].mxu0 %v634_v3  ;;  %v15556_v3 = vpack.c.bf16 %v41_v0, %v40_v11  ;;  %v635_v11 = vcombine.high %v625_v5, %v625_v5  ;;  %v45_v0 = vld [vmem:[%s16994_s1 + $0x58] sm:$0xff] }
 0x20e   :  { %13523 = vmatpush3.bf16.msra.mxu0 %v15478_v49  ;;  %12151 = vmatprep.mubr.msk.f32.mxu0 %vm14963_vm1, %v17152_v55 }
 0x20f   :  { %13527 = vmatprep.subr.bf16.mxu0 %v17153_v33 }
 0x211   :  { %12103 = vmatmul.mubr.f32.vlgmr.msra.gmra.mrb[6].mxu1 %v625_v5  ;;  %v604_v5 = vcombine.high %v602_v20, %v602_v20 }
 0x212   :  { %13505 = vmatpush3.bf16.xpose.msra.mxu1 %v15539_v52  ;;  %12109 = vmatprep.mubr.msk.f32.mxu1 %vm14963_vm1, %v17152_v55 }
 0x213   :  { %13506 = vmatprep.subr.bf16.mxu1 %v17153_v33 }
 0x219   :  { %12110 = vmatmul.mubr.f32.vlgmr.msra.gmra.mrb[8].mxu1 %v633_v38  ;;  %v15580_v38 = vpack.c.bf16 %v45_v0, %v44_v54 }
 0x21a   :  { %13508 = vmatpush3.bf16.xpose.msra.mxu1 %v15556_v3  ;;  %12116 = vmatprep.mubr.msk.f32.mxu1 %vm14963_vm1, %v17152_v55 }
 0x21b   :  { %13509 = vmatprep.subr.bf16.mxu1 %v17153_v33 }
 0x221   :  { %12117 = vmatmul.mubr.f32.vlgmr.msra.gmra.mrb[10].mxu1 %v635_v11  ;;  %v15592_v11 = vpack.c.bf16 %v49_v41, %v48_v23 }
 0x222   :  { %13511 = vmatpush3.bf16.xpose.msra.mxu1 %v15568_v6  ;;  %12123 = vmatprep.mubr.msk.f32.mxu1 %vm14963_vm1, %v17152_v55 }
 0x223   :  { %13512 = vmatprep.subr.bf16.mxu1 %v17153_v33 }
 0x229   :  { %12124 = vmatmul.mubr.f32.vlgmr.msra.gmra.mrb[12].mxu1 %v618_v40  ;;  %v632_v40 = vrot.slane %v604_v5, %v15515_v31 }
 0x22a   :  { %13514 = vmatpush3.bf16.xpose.msra.mxu1 %v15580_v38  ;;  %12130 = vmatprep.mubr.msk.f32.mxu1 %vm14963_vm1, %v17152_v55 }
 0x22b   :  { %13518 = vmatprep.subr.bf16.mxu1 %v17153_v33  ;;  %v636_v20 = vcombine.high %v632_v40, %v632_v40 }
 0x231   :  { %12131 = vmatmul.mubr.f32.vlgmr.msra.gmra.mrb[14].mxu1 %v632_v40 }
 0x232   :  { %13520 = vmatpush3.bf16.xpose.msra.mxu1 %v15592_v11  ;;  %12144 = vmatprep.mubr.msk.f32.mxu1 %vm14963_vm1, %v17152_v55 }
 0x233   :  { %13524 = vmatprep.subr.bf16.mxu1 %v17153_v33 }
 0x239   :  { %12145 = vmatmul.mubr.f32.vlgmr.msra.gmra.mrb[16].mxu1 %v636_v20 }
 0x23a   :  { %13526 = vmatpush3.bf16.msra.mxu1 %v15524_v1  ;;  %12158 = vmatprep.mubr.msk.f32.mxu1 %vm14963_vm1, %v17152_v55 }
 0x23b   :  { %13530 = vmatprep.subr.bf16.mxu1 %v17153_v33 }
 0x2dc   :  { %v711_v54 = vpop.f32.mrb[4].mxu1 }
 0x2dd   :  { %v12097_v0 = vpop.f32.mrb[5].mxu1  ;;  %v1206_v5 = vsel %vm1205_vm2, %v711_v54, -inf }
 0x2de   :  { %1207 = vmax.xlane.f32.xlu0 %v1206_v5 }
 0x2e0   :  { %v1131_v23 = vpop.f32.mrb[4].mxu0 }
 0x2e1   :  { %v12139_v41 = vpop.f32.mrb[5].mxu0 }
 0x2e4   :  { %v781_v31 = vpop.f32.mrb[6].mxu1 }
 0x2e5   :  { %v12104_v61 = vpop.f32.mrb[7].mxu1  ;;  %v1209_v40 = vsel %vm1205_vm2, %v781_v31, -inf }
 0x2e6   :  { %1210 = vmax.xlane.f32.xlu0 %v1209_v40  ;;  %v1224_v61 = vsel %vm1205_vm2, %v1131_v23, -inf }
 0x2ec   :  { %v851_v20 = vpop.f32.mrb[8].mxu1 }
 0x2ed   :  { %v12111_v1 = vpop.f32.mrb[9].mxu1  ;;  %v1212_v21 = vsel %vm1205_vm2, %v851_v20, -inf }
 0x2ee   :  { %1213 = vmax.xlane.f32.xlu1 %v1212_v21 }
 0x2f4   :  { %v921_v19 = vpop.f32.mrb[10].mxu1 }
 0x2f5   :  { %v12118_v49 = vpop.f32.mrb[11].mxu1  ;;  %v1215_v59 = vsel %vm1205_vm2, %v921_v19, -inf }
 0x2f6   :  { %1216 = vmax.xlane.f32.xlu1 %v1215_v59 }
 0x2fc   :  { %v991_v0 = vpop.f32.mrb[12].mxu1 }
 0x2fd   :  { %v12125_v50 = vpop.f32.mrb[13].mxu1  ;;  %v1218_v5 = vsel %vm1205_vm2, %v991_v0, -inf }
 0x2fe   :  { %1219 = vmax.xlane.f32.xlu0 %v1218_v5 }
 0x302   :  { %1225 = vmax.xlane.f32.xlu0 %v1224_v61 }
 0x304   :  { %v1061_v41 = vpop.f32.mrb[14].mxu1 }
 0x305   :  { %v12132_v40 = vpop.f32.mrb[15].mxu1  ;;  %v1221_v1 = vsel %vm1205_vm2, %v1061_v41, -inf }
 0x306   :  { %1222 = vmax.xlane.f32.xlu1 %v1221_v1 }
 0x30c   :  { %v1201_v43 = vpop.f32.mrb[16].mxu1 }
 0x30d   :  { %v12146_v21 = vpop.f32.mrb[17].mxu1  ;;  %v1227_v49 = vsel %vm1205_vm2, %v1201_v43, -inf }
 0x30e   :  { %1228 = vmax.xlane.f32.xlu1 %v1227_v49 }
 0x36b   :  { %v1208_v34 = vpop.xlane.xlu0 %1207 }
 0x36c   :  { %v1230_v59 = vsub.f32 %v711_v54, %v1208_v34 }
 0x36e   :  { %v1238_v27 = vmul.f32 1.442695, %v1230_v59 }
 0x370   :  { %14673 = vpow2.f32 %v1238_v27 }
 0x373   :  { %v1211_v50 = vpop.xlane.xlu0 %1210 }
 0x374   :  { %v1231_v15 = vsub.f32 %v781_v31, %v1211_v50 }
 0x376   :  { %v1240_v5 = vmul.f32 1.442695, %v1231_v15 }
 0x378   :  { %14675 = vpow2.f32 %v1240_v5 }
 0x37a   :  { %v14674_v10 = vpop.eup %14673 }
 0x37b   :  { %v1214_v61 = vpop.xlane.xlu1 %1213  ;;  %v1254_v40 = vsel %vm1205_vm2, %v14674_v10, 0.0 }
 0x37c   :  { %v1232_v63 = vsub.f32 %v851_v20, %v1214_v61  ;;  %1255 = vadd.xlane.f32.xlu0 %v1254_v40 }
 0x37e   :  { %v1242_v1 = vmul.f32 1.442695, %v1232_v63 }
 0x380   :  { %14677 = vpow2.f32 %v1242_v1 }
 0x382   :  { %v14676_v21 = vpop.eup %14675 }
 0x383   :  { %v1217_v58 = vpop.xlane.xlu1 %1216  ;;  %v1257_v49 = vsel %vm1205_vm2, %v14676_v21, 0.0 }
 0x384   :  { %v1233_v51 = vsub.f32 %v921_v19, %v1217_v58  ;;  %1258 = vadd.xlane.f32.xlu1 %v1257_v49 }
 0x386   :  { %v1244_v34 = vmul.f32 1.442695, %v1233_v51 }
 0x388   :  { %14679 = vpow2.f32 %v1244_v34 }
 0x38a   :  { %v14678_v27 = vpop.eup %14677 }
 0x38b   :  { %v1220_v31 = vpop.xlane.xlu0 %1219  ;;  %v1260_v15 = vsel %vm1205_vm2, %v14678_v27, 0.0 }
 0x38c   :  { %v1234_v54 = vsub.f32 %v991_v0, %v1220_v31  ;;  %1261 = vadd.xlane.f32.xlu0 %v1260_v15 }
 0x38e   :  { %v1246_v59 = vmul.f32 1.442695, %v1234_v54 }
 0x38f   :  { %v1226_v50 = vpop.xlane.xlu0 %1225 }
 0x390   :  { %14681 = vpow2.f32 %v1246_v59  ;;  %v1236_v20 = vsub.f32 %v1131_v23, %v1226_v50 }
 0x392   :  { %v14680_v63 = vpop.eup %14679  ;;  %v1250_v5 = vmul.f32 1.442695, %v1236_v20 }
 0x393   :  { %v1223_v61 = vpop.xlane.xlu1 %1222  ;;  %v1263_v40 = vsel %vm1205_vm2, %v14680_v63, 0.0 }
 0x394   :  { %14683 = vpow2.f32 %v1250_v5  ;;  %v1235_v58 = vsub.f32 %v1061_v41, %v1223_v61  ;;  %1264 = vadd.xlane.f32.xlu1 %v1263_v40 }
 0x396   :  { %v1248_v51 = vmul.f32 1.442695, %v1235_v58 }
 0x398   :  { %14685 = vpow2.f32 %v1248_v51 }
 0x39a   :  { %v14682_v19 = vpop.eup %14681 }
 0x39b   :  { %v1229_v1 = vpop.xlane.xlu1 %1228  ;;  %v1266_v49 = vsel %vm1205_vm2, %v14682_v19, 0.0 }
 0x39c   :  { %v1237_v0 = vsub.f32 %v1201_v43, %v1229_v1  ;;  %1267 = vadd.xlane.f32.xlu0 %v1266_v49 }
 0x39e   :  { %v14684_v34 = vpop.eup %14683  ;;  %v1252_v31 = vmul.f32 1.442695, %v1237_v0 }
 0x39f   :  { %v1272_v23 = vsel %vm1205_vm2, %v14684_v34, 0.0 }
 0x3a0   :  { %14687 = vpow2.f32 %v1252_v31  ;;  %1273 = vadd.xlane.f32.xlu0 %v1272_v23 }
 0x3a2   :  { %v15617_v15 = vpop.eup %14685 }
 0x3a3   :  { %v1269_v41 = vsel %vm1205_vm2, %v15617_v15, 0.0 }
 0x3a4   :  { %1270 = vadd.xlane.f32.xlu1 %v1269_v41 }
 0x3aa   :  { %v15621_v54 = vpop.eup %14687 }
 0x3ab   :  { %v1275_v59 = vsel %vm1205_vm2, %v15621_v54, 0.0 }
 0x3ac   :  { %1276 = vadd.xlane.f32.xlu1 %v1275_v59  ;;  %v163_v59 = vld [vmem:[%s16996_s6 + $0x80] sm:$0xff] }
 0x409   :  { %v1256_v43 = vpop.xlane.xlu0 %1255 }
 0x40a   :  { %14689 = vrcp.f32 %v1256_v43 }
 0x411   :  { %v1259_v50 = vpop.xlane.xlu1 %1258 }
 0x412   :  { %14691 = vrcp.f32 %v1259_v50 }
 0x414   :  { %v14690_v20 = vpop.eup %14689 }
 0x415   :  { %v1286_v5 = vmul.f32 %v14690_v20, %v14674_v10 }
 0x417   :  { %12152 = vmatmul.mubr.msk.f32.vlgmr.msra.gmra.mrb[6].mxu0 %vm1294_vm3, %v1286_v5  ;;  %v165_v5 = vld [vmem:[%s16996_s6 + $0x90] sm:$0xff] }
 0x418   :  { %13529 = vmatpush3.bf16.msra.mxu0 %v15539_v52  ;;  %12165 = vmatprep.mubr.msk.f32.mxu0 %vm14963_vm1, %v17152_v55 }
 0x419   :  { %v1262_v61 = vpop.xlane.xlu0 %1261  ;;  %13533 = vmatprep.subr.bf16.mxu0 %v17153_v33 }
 0x41a   :  { %14693 = vrcp.f32 %v1262_v61  ;;  %v166_v61 = vld [vmem:[%s16996_s6 + $0x98] sm:$0xff] }
 0x41c   :  { %v14692_v40 = vpop.eup %14691 }
 0x41d   :  { %v1287_v58 = vmul.f32 %v14692_v40, %v14676_v21 }
 0x41f   :  { %12159 = vmatmul.mubr.msk.f32.vlgmr.msra.gmra.mrb[18].mxu1 %vm1294_vm3, %v1287_v58  ;;  %v15666_v58 = vpack.c.bf16 %v166_v61, %v165_v5  ;;  %v177_v5 = vld [vmem:[%s16996_s6 + $0xf0] sm:$0xff]  ;;  %v178_v61 = vld [vmem:[%s16996_s6 + $0xf8] sm:$0xff] }
 0x420   :  { %13532 = vmatpush3.bf16.msra.mxu1 %v15556_v3  ;;  %12172 = vmatprep.mubr.msk.f32.mxu1 %vm14963_vm1, %v17152_v55 }
 0x421   :  { %v1265_v10 = vpop.xlane.xlu1 %1264  ;;  %13536 = vmatprep.subr.bf16.mxu1 %v17153_v33 }
 0x422   :  { %14695 = vrcp.f32 %v1265_v10  ;;  %v167_v10 = vld [vmem:[%s16996_s6 + $0xa0] sm:$0xff] }
 0x424   :  { %v14694_v51 = vpop.eup %14693 }
 0x425   :  { %v1288_v1 = vmul.f32 %v14694_v51, %v14678_v27  ;;  %v168_v51 = vld [vmem:[%s16996_s6 + $0xa8] sm:$0xff] }
 0x427   :  { %12166 = vmatmul.mubr.msk.f32.vlgmr.msra.gmra.mrb[8].mxu0 %vm1294_vm3, %v1288_v1  ;;  %v15681_v1 = vpack.c.bf16 %v168_v51, %v167_v10  ;;  %v149_v51 = vld [vmem:[%s16996_s6 + $0x10] sm:$0xff] }
 0x428   :  { %13535 = vmatpush3.bf16.msra.mxu0 %v15568_v6  ;;  %12179 = vmatprep.mubr.msk.f32.mxu0 %vm14963_vm1, %v17152_v55 }
 0x429   :  { %v1268_v21 = vpop.xlane.xlu0 %1267  ;;  %13539 = vmatprep.subr.bf16.mxu0 %v17153_v33 }
 0x42a   :  { %14697 = vrcp.f32 %v1268_v21  ;;  %v170_v21 = vld [vmem:[%s16996_s6 + $0xb8] sm:$0xff] }
 0x42c   :  { %v14696_v49 = vpop.eup %14695 }
 0x42d   :  { %v1289_v0 = vmul.f32 %v14696_v49, %v14680_v63  ;;  %v1274_v31 = vpop.xlane.xlu0 %1273  ;;  %v164_v63 = vld [vmem:[%s16996_s6 + $0x88] sm:$0xff] }
 0x42e   :  { %14699 = vrcp.f32 %v1274_v31  ;;  %v15655_v50 = vpack.c.bf16 %v164_v63, %v163_v59  ;;  %v174_v59 = vld [vmem:[%s16996_s6 + $0xd8] sm:$0xff] }
 0x42f   :  { %12173 = vmatmul.mubr.msk.f32.vlgmr.msra.gmra.mrb[20].mxu1 %vm1294_vm3, %v1289_v0 }
 0x430   :  { %13538 = vmatpush3.bf16.msra.mxu1 %v15580_v38  ;;  %12186 = vmatprep.mubr.msk.f32.mxu1 %vm14963_vm1, %v17152_v55 }
 0x431   :  { %v1271_v27 = vpop.xlane.xlu1 %1270  ;;  %13542 = vmatprep.subr.bf16.mxu1 %v17153_v33 }
 0x432   :  { %14701 = vrcp.f32 %v1271_v27  ;;  %v171_v27 = vld [vmem:[%s16996_s6 + $0xc0] sm:$0xff] }
 0x434   :  { %v14698_v23 = vpop.eup %14697 }
 0x435   :  { %v1290_v41 = vmul.f32 %v14698_v23, %v14682_v19  ;;  %v172_v23 = vld [vmem:[%s16996_s6 + $0xc8] sm:$0xff] }
 0x437   :  { %12180 = vmatmul.mubr.msk.f32.vlgmr.msra.gmra.mrb[10].mxu0 %vm1294_vm3, %v1290_v41  ;;  %v15706_v41 = vpack.c.bf16 %v172_v23, %v171_v27  ;;  %v153_v23 = vld [vmem:[%s16996_s6 + $0x30] sm:$0xff] }
 0x438   :  { %v14700_v43 = vpop.eup %14699  ;;  %13541 = vmatpush3.bf16.msra.mxu0 %v15511_v28  ;;  %12193 = vmatprep.mubr.msk.f32.mxu0 %vm14963_vm1, %v17152_v55 }
 0x439   :  { %v1292_v20 = vmul.f32 %v14700_v43, %v14684_v34  ;;  %v1277_v19 = vpop.xlane.xlu1 %1276  ;;  %13545 = vmatprep.subr.bf16.mxu0 %v17153_v33  ;;  %v175_v43 = vld [vmem:[%s16996_s6 + $0xe0] sm:$0xff] }
 0x43a   :  { %14703 = vrcp.f32 %v1277_v19 }
 0x43b   :  { %12194 = vmatmul.mubr.msk.f32.vlgmr.msra.gmra.mrb[12].mxu0 %vm1294_vm3, %v1292_v20  ;;  %v176_v20 = vld [vmem:[%s16996_s6 + $0xe8] sm:$0xff] }
 0x43c   :  { %v14702_v40 = vpop.eup %14701  ;;  %13547 = vmatpush3.bf16.msra.mxu0 %v15655_v50  ;;  %12235 = vmatprep.mubr.msk.f32.mxu0 %vm14963_vm1, %v17152_v55  ;;  %v15731_v19 = vpack.c.bf16 %v176_v20, %v175_v43  ;;  %v155_v43 = vld [vmem:[%s16996_s6 + $0x40] sm:$0xff]  ;;  %v156_v20 = vld [vmem:[%s16996_s6 + $0x48] sm:$0xff] }
 0x43d   :  { %v1291_v34 = vmul.f32 %v14702_v40, %v15617_v15  ;;  %13548 = vmatprep.subr.bf16.mxu0 %v17153_v33  ;;  %v169_v15 = vld [vmem:[%s16996_s6 + $0xb0] sm:$0xff]  ;;  %v15743_v40 = vpack.c.bf16 %v178_v61, %v177_v5  ;;  %v15807_v5 = vpack.c.bf16 %v156_v20, %v155_v43 }
 0x43e   :  { %v15694_v0 = vpack.c.bf16 %v170_v21, %v169_v15  ;;  %v150_v15 = vld [vmem:[%s16996_s6 + $0x18] sm:$0xff]  ;;  %v157_v61 = vld [vmem:[%s16996_s6 + $0x50] sm:$0xff] }
 0x43f   :  { %12187 = vmatmul.mubr.msk.f32.vlgmr.msra.gmra.mrb[22].mxu1 %vm1294_vm3, %v1291_v34  ;;  %v147_v34 = vld [vmem:[%s16996_s6] sm:$0xff]  ;;  %v15777_v21 = vpack.c.bf16 %v150_v15, %v149_v51  ;;  %17158 = vst [vmem:[#allocation46_spill] sm:$0xff] %v15807_v5  ;;  %v160_v15 = vld [vmem:[%s16996_s6 + $0x68] sm:$0xff] }
 0x440   :  { %13550 = vmatpush3.bf16.msra.mxu0 %v15666_v58  ;;  %13544 = vmatpush3.bf16.msra.mxu1 %v15592_v11  ;;  %v159_v51 = vld [vmem:[%s16996_s6 + $0x60] sm:$0xff] }
 0x441   :  { %13551 = vmatprep.subr.bf16.mxu0 %v17153_v33  ;;  %12200 = vmatprep.mubr.msk.f32.mxu1 %vm14963_vm1, %v17152_v55 }
 0x442   :  { %13594 = vmatprep.subr.bf16.mxu1 %v15063_v17 }
 0x444   :  { %v14704_v49 = vpop.eup %14703  ;;  %13553 = vmatpush3.bf16.msra.mxu0 %v15681_v1 }
 0x445   :  { %v1293_v31 = vmul.f32 %v14704_v49, %v15621_v54  ;;  %13554 = vmatprep.subr.bf16.mxu0 %v17153_v33  ;;  %v173_v54 = vld [vmem:[%s16996_s6 + $0xd0] sm:$0xff]  ;;  %v151_v49 = vld [vmem:[%s16996_s6 + $0x20] sm:$0xff] }
 0x446   :  { %v15719_v63 = vpack.c.bf16 %v174_v59, %v173_v54  ;;  %v154_v54 = vld [vmem:[%s16996_s6 + $0x38] sm:$0xff] }
 0x447   :  { %12201 = vmatmul.mubr.msk.f32.vlgmr.msra.gmra.mrb[24].mxu1 %vm1294_vm3, %v1293_v31  ;;  %v152_v31 = vld [vmem:[%s16996_s6 + $0x28] sm:$0xff]  ;;  %v15797_v59 = vpack.c.bf16 %v154_v54, %v153_v23  ;;  %v162_v23 = vld [vmem:[%s16996_s6 + $0x78] sm:$0xff] }
 0x448   :  { %13556 = vmatpush3.bf16.msra.mxu0 %v15694_v0  ;;  %13596 = vmatpush1.bf16.msra.mxu1 %v15065_v18  ;;  %v15787_v27 = vpack.c.bf16 %v152_v31, %v151_v49  ;;  %v15827_v49 = vpack.c.bf16 %v160_v15, %v159_v51  ;;  %v161_v31 = vld [vmem:[%s16996_s6 + $0x70] sm:$0xff] }
 0x449   :  { %13557 = vmatprep.subr.bf16.mxu0 %v17153_v33  ;;  %13598 = vmatprep.subr.bf16.mxu1 %v15089_v26  ;;  %17157 = vst [vmem:[#allocation45_spill] sm:$0xff] %v15797_v59  ;;  %v15837_v54 = vpack.c.bf16 %v162_v23, %v161_v31 }
 0x44a   :  { %2116 = vmatprep.mubr.f32.mxu1 %v17152_v55  ;;  %17156 = vst [vmem:[#allocation44_spill] sm:$0xff] %v15787_v27  ;;  %17160 = vst [vmem:[#allocation48_spill] sm:$0xff] %v15827_v49 }
 0x44b   :  { %17161 = vst [vmem:[#allocation49_spill] sm:$0xff] %v15837_v54 }
 0x44c   :  { %13559 = vmatpush3.bf16.msra.mxu0 %v15706_v41  ;;  %13600 = vmatpush1.bf16.msra.mxu1 %v15101_v30 }
 0x44d   :  { %13560 = vmatprep.subr.bf16.mxu0 %v17153_v33  ;;  %13602 = vmatprep.subr.bf16.mxu1 %v15128_v39 }
 0x450   :  { %13562 = vmatpush3.bf16.msra.mxu0 %v15719_v63  ;;  %13604 = vmatpush1.bf16.msra.mxu1 %v15143_v44 }
 0x451   :  { %13563 = vmatprep.subr.bf16.mxu0 %v17153_v33  ;;  %13606 = vmatprep.subr.bf16.mxu1 %v15155_v48 }
 0x454   :  { %13565 = vmatpush3.bf16.msra.mxu0 %v15731_v19  ;;  %13608 = vmatpush1.bf16.msra.mxu1 %v15182_v57 }
 0x455   :  { %13566 = vmatprep.subr.bf16.mxu0 %v17153_v33  ;;  %13610 = vmatprep.subr.bf16.mxu1 %v15191_v60 }
 0x458   :  { %13568 = vmatpush3.bf16.msra.mxu0 %v15743_v40  ;;  %13612 = vmatpush1.bf16.msra.mxu1 %v15218_v7 }
 0x459   :  { %13569 = vmatprep.subr.bf16.mxu0 %v17153_v33  ;;  %13614 = vmatprep.subr.bf16.mxu1 %v15227_v12 }
 0x45b   :  { %12236 = vmatmul.mubr.f32.vlgmr.msra.gmra.mrb[14].mxu0 %v15500_v13  ;;  %v148_v13 = vld [vmem:[%s16996_s6 + $0x8] sm:$0xff] }
 0x45c   :  { %12270 = vmatprep.mubr.msk.f32.mxu0 %vm14963_vm1, %v17152_v55  ;;  %13616 = vmatpush1.bf16.msra.mxu1 %v15254_v25  ;;  %v15767_v10 = vpack.c.bf16 %v148_v13, %v147_v34  ;;  %v158_v34 = vld [vmem:[%s16996_s6 + $0x58] sm:$0xff] }
 0x45d   :  { %13618 = vmatprep.subr.bf16.mxu1 %v15263_v29  ;;  %v15817_v13 = vpack.c.bf16 %v158_v34, %v157_v61 }
 0x45e   :  { %13571 = vmatpush3.bf16.msra.mxu0 %v15767_v10 }
 0x45f   :  { %13572 = vmatprep.subr.bf16.mxu0 %v17153_v33  ;;  %17159 = vst [vmem:[#allocation47_spill] sm:$0xff] %v15817_v13 }
 0x460   :  { %13620 = vmatpush1.bf16.msra.mxu1 %v15290_v42 }
 0x461   :  { %13622 = vmatprep.subr.bf16.mxu1 %v15296_v45 }
 0x462   :  { %13574 = vmatpush3.bf16.msra.mxu0 %v15777_v21 }
 0x463   :  { %13575 = vmatprep.subr.bf16.mxu0 %v17153_v33 }
 0x464   :  { %13624 = vmatpush1.bf16.msra.mxu1 %v15320_v56 }
 0x465   :  { %13626 = vmatprep.subr.bf16.mxu1 %v15026_v4 }
 0x466   :  { %13577 = vmatpush3.bf16.msra.mxu0 %v15787_v27 }
 0x467   :  { %13578 = vmatprep.subr.bf16.mxu0 %v17153_v33 }
 0x46a   :  { %13580 = vmatpush3.bf16.msra.mxu0 %v15797_v59 }
 0x46b   :  { %13581 = vmatprep.subr.bf16.mxu0 %v17153_v33 }
 0x46e   :  { %13583 = vmatpush3.bf16.msra.mxu0 %v15807_v5 }
 0x46f   :  { %13584 = vmatprep.subr.bf16.mxu0 %v17153_v33 }
 0x472   :  { %13586 = vmatpush3.bf16.msra.mxu0 %v15817_v13 }
 0x473   :  { %13587 = vmatprep.subr.bf16.mxu0 %v17153_v33 }
 0x476   :  { %13589 = vmatpush3.bf16.msra.mxu0 %v15827_v49 }
 0x477   :  { %13590 = vmatprep.subr.bf16.mxu0 %v17153_v33 }
 0x47a   :  { %13592 = vmatpush3.bf16.msra.mxu0 %v15837_v54 }
 0x47b   :  { %13673 = vmatprep.subr.bf16.mxu0 %v17153_v33 }
 0x4ea   :  { %v1364_v43 = vpop.f32.mrb[6].mxu0 }
 0x4eb   :  { %v12153_v20 = vpop.f32.mrb[7].mxu0 }
 0x4f2   :  { %v1437_v61 = vpop.f32.mrb[18].mxu1 }
 0x4f3   :  { %v1957_v34 = vrot.slane %v1437_v61, 7  ;;  %v12160_v51 = vpop.f32.mrb[19].mxu1 }
 0x4f5   :  { %v1959_v15 = vsel %vm1958_vm4, %v1957_v34, %v1364_v43 }
 0x4fa   :  { %v1510_v49 = vpop.f32.mrb[8].mxu0 }
 0x4fb   :  { %v1960_v13 = vrot.slane %v1510_v49, 6  ;;  %v12167_v5 = vpop.f32.mrb[9].mxu0 }
 0x4fd   :  { %v1962_v59 = vsel %vm1961_vm5, %v1960_v13, %v1959_v15 }
 0x502   :  { %v1583_v31 = vpop.f32.mrb[20].mxu1 }
 0x503   :  { %v1963_v23 = vrot.slane %v1583_v31, 5  ;;  %v12174_v54 = vpop.f32.mrb[21].mxu1 }
 0x505   :  { %v1965_v4 = vsel %vm1964_vm6, %v1963_v23, %v1962_v59 }
 0x50a   :  { %v1656_v56 = vpop.f32.mrb[10].mxu0 }
 0x50b   :  { %v1966_v20 = vrot.slane %v1656_v56, 4  ;;  %v12181_v27 = vpop.f32.mrb[11].mxu0 }
 0x50d   :  { %v1968_v61 = vsel %vm1967_vm7, %v1966_v20, %v1965_v4 }
 0x50e   :  { %v1802_v51 = vpop.f32.mrb[12].mxu0 }
 0x50f   :  { %v12195_v43 = vpop.f32.mrb[13].mxu0  ;;  %v1972_v13 = vrot.slane %v1802_v51, 2  ;;  %v17163_v51 = vld [vmem:[#allocation12_spill] sm:$0xff] }
 0x510   :  { %v17164_v43 = vld [vmem:[#allocation13_spill] sm:$0xff] }
 0x512   :  { %v1729_v34 = vpop.f32.mrb[22].mxu1 }
 0x513   :  { %v1969_v49 = vrot.slane %v1729_v34, 3  ;;  %v12188_v5 = vpop.f32.mrb[23].mxu1  ;;  %v17165_v34 = vld [vmem:[#allocation14_spill] sm:$0xff] }
 0x514   :  { %v17167_v5 = vld [vmem:[#allocation16_spill] sm:$0xff] }
 0x515   :  { %v1971_v15 = vsel %vm1970_vm8, %v1969_v49, %v1968_v61  ;;  %v17162_v61 = vld [vmem:[#allocation11_spill] sm:$0xff] }
 0x516   :  { %v1974_v54 = vsel %vm1973_vm9, %v1972_v13, %v1971_v15  ;;  %v17166_v49 = vld [vmem:[#allocation15_spill] sm:$0xff]  ;;  %v17168_v13 = vld [vmem:[#allocation17_spill] sm:$0xff]  ;;  %v17169_v15 = vld [vmem:[#allocation18_spill] sm:$0xff] }
 0x51a   :  { %v1875_v31 = vpop.f32.mrb[24].mxu1 }
 0x51b   :  { %v1975_v59 = vrot.slane %v1875_v31, 1  ;;  %v12202_v23 = vpop.f32.mrb[25].mxu1  ;;  %v17171_v31 = vld [vmem:[#allocation21_spill] sm:$0xff] }
 0x51c   :  { %v17173_v23 = vld [vmem:[#allocation23_spill] sm:$0xff] }
 0x51d   :  { %v1977_v56 = vsel %vm1976_vm10, %v1975_v59, %v1974_v54  ;;  %v17170_v54 = vld [vmem:[#allocation19_spill] sm:$0xff]  ;;  %v17172_v59 = vld [vmem:[#allocation22_spill] sm:$0xff] }
 0x51e   :  { %12271 = vmatmul.mubr.f32.vlgmr.msra.gmra.mrb[14].mxu0 %v1977_v56  ;;  %v11373_v56 = vld [vmem:[%s16992_s0 + $0x8] sm:$0xff] }
 0x51f   :  { %13675 = vmatpush3.bf16.msra.mxu0 %v15392_v37  ;;  %12305 = vmatprep.mubr.msk.f32.mxu0 %vm14963_vm1, %v17152_v55 }
 0x520   :  { %13676 = vmatprep.subr.bf16.mxu0 %v17153_v33 }
 0x523   :  { %13678 = vmatpush3.bf16.msra.mxu0 %v15404_v47 }
 0x524   :  { %13679 = vmatprep.subr.bf16.mxu0 %v17153_v33 }
 0x527   :  { %13681 = vmatpush3.bf16.msra.mxu0 %v15414_v53 }
 0x528   :  { %13682 = vmatprep.subr.bf16.mxu0 %v17153_v33 }
 0x52b   :  { %13684 = vmatpush3.bf16.msra.mxu0 %v15424_v62 }
 0x52c   :  { %13685 = vmatprep.subr.bf16.mxu0 %v17153_v33 }
 0x52f   :  { %13687 = vmatpush3.bf16.msra.mxu0 %v15434_v2 }
 0x530   :  { %13688 = vmatprep.subr.bf16.mxu0 %v17153_v33 }
 0x533   :  { %13690 = vmatpush3.bf16.msra.mxu0 %v15444_v14 }
 0x534   :  { %13691 = vmatprep.subr.bf16.mxu0 %v17153_v33 }
 0x537   :  { %13693 = vmatpush3.bf16.msra.mxu0 %v15457_v24 }
 0x538   :  { %13694 = vmatprep.subr.bf16.mxu0 %v17153_v33 }
 0x53b   :  { %13696 = vmatpush3.bf16.msra.mxu0 %v15467_v35 }
 0x53c   :  { %13703 = vmatprep.subr.bf16.mxu0 %v17153_v33 }
 0x5f1   :  { %v2045_v4 = vpop.f32.mrb[14].mxu0 }
 0x5f2   :  { %14705 = vtanh.f32 %v2045_v4  ;;  %v12272_v27 = vpop.f32.mrb[15].mxu0  ;;  %v17174_v4 = vld [vmem:[#allocation24_spill] sm:$0xff] }
 0x5f3   :  { %v17175_v27 = vld [vmem:[#allocation25_spill] sm:$0xff] }
 0x5fc   :  { %v14706_v20 = vpop.eup %14705 }
 0x5fd   :  { %2117 = vmatmul.mubr.f32.vlgmr.msra.gmra.mrb[26].mxu1 %v14706_v20 }
 0x5fe   :  { %13628 = vmatpush1.bf16.msra.mxu1 %v15037_v8  ;;  %2187 = vmatprep.mubr.f32.mxu1 %v17152_v55 }
 0x5ff   :  { %13630 = vmatprep.subr.bf16.mxu1 %v15039_v9 }
 0x602   :  { %13632 = vmatpush1.bf16.msra.mxu1 %v15061_v16 }
 0x603   :  { %13634 = vmatprep.subr.bf16.mxu1 %v15077_v22 }
 0x606   :  { %13636 = vmatpush1.bf16.msra.mxu1 %v15107_v32 }
 0x607   :  { %13638 = vmatprep.subr.bf16.mxu1 %v15120_v36 }
 0x60a   :  { %13640 = vmatpush1.bf16.msra.mxu1 %v15149_v46 }
 0x60b   :  { %13642 = vmatprep.subr.bf16.mxu1 %v17162_v61 }
 0x60e   :  { %13644 = vmatpush1.bf16.msra.mxu1 %v17163_v51  ;;  %v17182_v51 = vld [vmem:[#allocation40_spill] sm:$0xff] }
 0x60f   :  { %13646 = vmatprep.subr.bf16.mxu1 %v17164_v43 }
 0x612   :  { %13648 = vmatpush1.bf16.msra.mxu1 %v17165_v34 }
 0x613   :  { %13650 = vmatprep.subr.bf16.mxu1 %v17166_v49 }
 0x616   :  { %13652 = vmatpush1.bf16.msra.mxu1 %v17167_v5 }
 0x617   :  { %13654 = vmatprep.subr.bf16.mxu1 %v17168_v13 }
 0x61a   :  { %13656 = vmatpush1.bf16.msra.mxu1 %v17169_v15  ;;  %v17180_v15 = vld [vmem:[#allocation38_spill] sm:$0xff] }
 0x61b   :  { %13658 = vmatprep.subr.bf16.mxu1 %v17170_v54 }
 0x61d   :  { %2188 = vmatmul.mubr.f32.vlgmr.msra.gmra.mrb[28].mxu1 %v14706_v20  ;;  %v17176_v20 = vld [vmem:[#allocation26_spill] sm:$0xff] }
 0x61e   :  { %13660 = vmatpush1.bf16.msra.mxu1 %v17171_v31  ;;  %2261 = vmatprep.mubr.f32.mxu1 %v17152_v55  ;;  %v17177_v31 = vld [vmem:[#allocation27_spill] sm:$0xff] }
 0x61f   :  { %13662 = vmatprep.subr.bf16.mxu1 %v17172_v59  ;;  %v17179_v59 = vld [vmem:[#allocation37_spill] sm:$0xff] }
 0x622   :  { %13664 = vmatpush1.bf16.msra.mxu1 %v17173_v23  ;;  %v17178_v23 = vld [vmem:[#allocation36_spill] sm:$0xff] }
 0x623   :  { %13666 = vmatprep.subr.bf16.mxu1 %v17174_v4 }
 0x625   :  { %11374 = vmatmul.mubr.msk.f32.vlgmr.msra.gmra.mrb[26].mxu1 %vm322_vm0, %v11373_v56 }
 0x626   :  { %13668 = vmatpush1.bf16.msra.mxu1 %v17175_v27  ;;  %2332 = vmatprep.mubr.f32.mxu1 %v17152_v55 }
 0x627   :  { %13670 = vmatprep.subr.bf16.mxu1 %v17176_v20 }
 0x62a   :  { %13672 = vmatpush1.bf16.msra.mxu1 %v17177_v31 }
 0x62b   :  { %13697 = vmatprep.subr.bf16.mxu1 %v17153_v33 }
 0x62d   :  { %11375 = vmatmul.mubr.msk.f32.vlgmr.msra.gmra.mrb[28].mxu1 %vm322_vm0, %v11373_v56  ;;  %v17181_v56 = vld [vmem:[#allocation39_spill] sm:$0xff] }
 0x62e   :  { %12312 = vmatprep.mubr.msk.f32.mxu1 %vm14963_vm1, %v17152_v55 }
 0x633   :  { %13699 = vmatpush3.bf16.xpose.msra.mxu1 %v17178_v23 }
 0x634   :  { %13700 = vmatprep.subr.bf16.mxu1 %v17153_v33 }
 0x6f8   :  { %v2263_v4 = vpop.f32.mrb[26].mxu1 }
 0x6f9   :  { %v2339_v27 = vadd.f32 %v2263_v4, %v17179_v59  ;;  %v2265_v54 = vpop.f32.mrb[27].mxu1 }
 0x6fa   :  { %v2340_v13 = vadd.f32 %v2265_v54, %v17180_v15  ;;  %v17183_v15 = vld [vmem:[#allocation41_spill] sm:$0xff] }
 0x6fb   :  { %v11376_v20 = vmul.f32 -1.442695, %v2339_v27 }
 0x6fc   :  { %v11377_v5 = vmul.f32 -1.442695, %v2340_v13 }
 0x6fd   :  { %14707 = vpow2.f32 %v11376_v20 }
 0x6fe   :  { %14709 = vpow2.f32 %v11377_v5 }
 0x700   :  { %v2334_v31 = vpop.f32.mrb[28].mxu1 }
 0x701   :  { %v2336_v49 = vpop.f32.mrb[29].mxu1  ;;  %v2341_v61 = vadd.f32 %v2334_v31, %v17182_v51 }
 0x702   :  { %v2342_v34 = vadd.f32 %v2336_v49, %v17181_v56 }
 0x704   :  { %v11378_v43 = vmul.f32 -1.442695, %v2342_v34 }
 0x706   :  { %14711 = vpow2.f32 %v11378_v43 }
 0x707   :  { %v14708_v46 = vpop.eup %14707  ;;  %14713 = vtanh.f32 %v2341_v61 }
 0x708   :  { %v14710_v36 = vpop.eup %14709  ;;  %v2346_v32 = vadd.f32 1.0, %v14708_v46 }
 0x709   :  { %v2352_v22 = vadd.f32 1.0, %v14710_v36 }
 0x70a   :  { %14715 = vrcp.f32 %v2346_v32  ;;  %v17185_v32 = vld [vmem:[#allocation42_spill] sm:$0xff] }
 0x70b   :  { %14717 = vrcp.f32 %v2352_v22 }
 0x710   :  { %v14712_v54 = vpop.eup %14711 }
 0x711   :  { %v14714_v4 = vpop.eup %14713  ;;  %v2359_v20 = vadd.f32 1.0, %v14712_v54  ;;  %v17186_v54 = vld [vmem:[#allocation43_spill] sm:$0xff] }
 0x713   :  { %14719 = vrcp.f32 %v2359_v20 }
 0x714   :  { %v14716_v13 = vpop.eup %14715 }
 0x715   :  { %v14718_v27 = vpop.eup %14717  ;;  %v2363_v5 = vmul.f32 %v14716_v13, %v14714_v4 }
 0x716   :  { %v2362_v59 = vmul.f32 %v14718_v27, %v17183_v15 }
 0x718   :  { %v15907_v49 = vadd.f32 %v2363_v5, %v2362_v59 }
 0x71a   :  { %17184 = vst [vmem:[#allocation41_spill] sm:$0xff] %v15907_v49  ;;  %14721 = vtanh.f32 %v15907_v49 }
 0x71d   :  { %v14720_v34 = vpop.eup %14719 }
 0x724   :  { %v14722_v46 = vpop.eup %14721 }
 0x725   :  { %v15910_v43 = vmul.f32 %v14722_v46, %v14720_v34 }
 0x727   :  { %12306 = vmatmul.mubr.f32.vlgmr.msra.gmra.mrb[16].mxu0 %v15910_v43 }
 0x728   :  { %13705 = vmatpush3.bf16.xpose.msra.mxu0 %v15539_v52  ;;  %12326 = vmatprep.mubr.msk.f32.mxu0 %vm14963_vm1, %v17152_v55 }
 0x729   :  { %13709 = vmatprep.subr.bf16.mxu0 %v17153_v33 }
 0x7fa   :  { %v2433_v22 = vpop.f32.mrb[16].mxu0 }
 0x7fb   :  { %v2445_v36 = vrot.slane %v2433_v22, %v17185_v32  ;;  %v12307_v61 = vpop.f32.mrb[17].mxu0  ;;  %v2438_v31 = vcombine.high %v2433_v22, %v2433_v22 }
 0x7fd   :  { %v2461_v15 = vrot.slane %v2445_v36, %v17185_v32  ;;  %v2453_v4 = vcombine.high %v2445_v36, %v2445_v36  ;;  %v2452_v13 = vrot.slane %v2438_v31, %v17185_v32 }
 0x7ff   :  { %v2483_v59 = vcombine.high %v2461_v15, %v2461_v15  ;;  %12313 = vmatmul.mubr.f32.vlgmr.msra.gmra.mrb[30].mxu1 %v2461_v15  ;;  %v2475_v27 = vrot.slane %v2453_v4, %v17185_v32  ;;  %v2468_v5 = vrot.slane %v2452_v13, %v17185_v32  ;;  %v2454_v46 = vcombine.high %v2452_v13, %v2452_v13 }
 0x800   :  { %13702 = vmatpush3.bf16.xpose.msra.mxu1 %v17186_v54  ;;  %12319 = vmatprep.mubr.msk.f32.mxu1 %vm14963_vm1, %v17152_v55 }
 0x801   :  { %12327 = vmatmul.mubr.f32.vlgmr.msra.gmra.mrb[18].mxu0 %v2483_v59  ;;  %13706 = vmatprep.subr.bf16.mxu1 %v17153_v33  ;;  %v2485_v20 = vcombine.high %v2475_v27, %v2475_v27  ;;  %v2484_v34 = vcombine.high %v2468_v5, %v2468_v5  ;;  %v2482_v22 = vrot.slane %v2454_v46, %v17185_v32 }
 0x802   :  { %13711 = vmatpush3.bf16.xpose.msra.mxu0 %v15568_v6  ;;  %12340 = vmatprep.mubr.msk.f32.mxu0 %vm14963_vm1, %v17152_v55 }
 0x803   :  { %13715 = vmatprep.subr.bf16.mxu0 %v17153_v33  ;;  %v2486_v36 = vcombine.high %v2482_v22, %v2482_v22 }
 0x807   :  { %12320 = vmatmul.mubr.f32.vlgmr.msra.gmra.mrb[32].mxu1 %v2475_v27 }
 0x808   :  { %13708 = vmatpush3.bf16.xpose.msra.mxu1 %v15556_v3  ;;  %12333 = vmatprep.mubr.msk.f32.mxu1 %vm14963_vm1, %v17152_v55 }
 0x809   :  { %12341 = vmatmul.mubr.f32.vlgmr.msra.gmra.mrb[20].mxu0 %v2468_v5  ;;  %13712 = vmatprep.subr.bf16.mxu1 %v17153_v33 }
 0x80a   :  { %13717 = vmatpush3.bf16.xpose.msra.mxu0 %v15511_v28  ;;  %12354 = vmatprep.mubr.msk.f32.mxu0 %vm14963_vm1, %v17152_v55 }
 0x80b   :  { %13721 = vmatprep.subr.bf16.mxu0 %v17153_v33 }
 0x80f   :  { %12334 = vmatmul.mubr.f32.vlgmr.msra.gmra.mrb[34].mxu1 %v2485_v20 }
 0x810   :  { %13714 = vmatpush3.bf16.xpose.msra.mxu1 %v15580_v38  ;;  %12347 = vmatprep.mubr.msk.f32.mxu1 %vm14963_vm1, %v17152_v55 }
 0x811   :  { %12355 = vmatmul.mubr.f32.vlgmr.msra.gmra.mrb[22].mxu0 %v2484_v34  ;;  %13718 = vmatprep.subr.bf16.mxu1 %v17153_v33 }
 0x812   :  { %13723 = vmatpush3.bf16.msra.mxu0 %v17178_v23  ;;  %12368 = vmatprep.mubr.msk.f32.mxu0 %vm14963_vm1, %v17152_v55 }
 0x813   :  { %13727 = vmatprep.subr.bf16.mxu0 %v17153_v33 }
 0x817   :  { %12348 = vmatmul.mubr.f32.vlgmr.msra.gmra.mrb[36].mxu1 %v2482_v22 }
 0x818   :  { %13720 = vmatpush3.bf16.xpose.msra.mxu1 %v15592_v11  ;;  %12361 = vmatprep.mubr.msk.f32.mxu1 %vm14963_vm1, %v17152_v55 }
 0x819   :  { %13724 = vmatprep.subr.bf16.mxu1 %v17153_v33 }
 0x81f   :  { %12362 = vmatmul.mubr.f32.vlgmr.msra.gmra.mrb[38].mxu1 %v2486_v36 }
 0x820   :  { %13726 = vmatpush3.bf16.msra.mxu1 %v17186_v54  ;;  %12375 = vmatprep.mubr.msk.f32.mxu1 %vm14963_vm1, %v17152_v55 }
 0x821   :  { %13730 = vmatprep.subr.bf16.mxu1 %v17153_v33 }
 0x8d2   :  { %v2561_v61 = vpop.f32.mrb[30].mxu1 }
 0x8d3   :  { %v12314_v15 = vpop.f32.mrb[31].mxu1  ;;  %v3055_v31 = vsel %vm1205_vm2, %v2561_v61, -inf }
 0x8d4   :  { %3056 = vmax.xlane.f32.xlu0 %v3055_v31  ;;  %v2701_v59 = vpop.f32.mrb[18].mxu0 }
 0x8d5   :  { %v12328_v4 = vpop.f32.mrb[19].mxu0  ;;  %v3061_v13 = vsel %vm1205_vm2, %v2701_v59, -inf }
 0x8d8   :  { %3062 = vmax.xlane.f32.xlu0 %v3061_v13 }
 0x8da   :  { %v2631_v27 = vpop.f32.mrb[32].mxu1 }
 0x8db   :  { %v12321_v5 = vpop.f32.mrb[33].mxu1  ;;  %v3058_v20 = vsel %vm1205_vm2, %v2631_v27, -inf }
 0x8dc   :  { %3059 = vmax.xlane.f32.xlu1 %v3058_v20  ;;  %v2841_v34 = vpop.f32.mrb[20].mxu0 }
 0x8dd   :  { %v12342_v46 = vpop.f32.mrb[21].mxu0  ;;  %v3067_v22 = vsel %vm1205_vm2, %v2841_v34, -inf }
 0x8de   :  { %3068 = vmax.xlane.f32.xlu0 %v3067_v22 }
 0x8e2   :  { %v2771_v36 = vpop.f32.mrb[34].mxu1 }
 0x8e3   :  { %v12335_v15 = vpop.f32.mrb[35].mxu1  ;;  %v3064_v54 = vsel %vm1205_vm2, %v2771_v36, -inf }
 0x8e4   :  { %3065 = vmax.xlane.f32.xlu1 %v3064_v54  ;;  %v2981_v31 = vpop.f32.mrb[22].mxu0 }
 0x8e5   :  { %v12356_v4 = vpop.f32.mrb[23].mxu0  ;;  %v3073_v32 = vsel %vm1205_vm2, %v2981_v31, -inf }
 0x8e6   :  { %3074 = vmax.xlane.f32.xlu0 %v3073_v32 }
 0x8ea   :  { %v2911_v13 = vpop.f32.mrb[36].mxu1 }
 0x8eb   :  { %v12349_v5 = vpop.f32.mrb[37].mxu1  ;;  %v3070_v49 = vsel %vm1205_vm2, %v2911_v13, -inf }
 0x8ec   :  { %3071 = vmax.xlane.f32.xlu1 %v3070_v49 }
 0x8f2   :  { %v3051_v20 = vpop.f32.mrb[38].mxu1 }
 0x8f3   :  { %v12363_v46 = vpop.f32.mrb[39].mxu1  ;;  %v3076_v51 = vsel %vm1205_vm2, %v3051_v20, -inf }
 0x8f4   :  { %3077 = vmax.xlane.f32.xlu1 %v3076_v51 }
 0x961   :  { %v3057_v22 = vpop.xlane.xlu0 %3056 }
 0x962   :  { %v3079_v15 = vsub.f32 %v2561_v61, %v3057_v22 }
 0x964   :  { %v3087_v56 = vmul.f32 1.442695, %v3079_v15 }
 0x965   :  { %v3063_v23 = vpop.xlane.xlu0 %3062 }
 0x966   :  { %14723 = vpow2.f32 %v3087_v56  ;;  %v3081_v54 = vsub.f32 %v2701_v59, %v3063_v23 }
 0x968   :  { %v3091_v4 = vmul.f32 1.442695, %v3081_v54 }
 0x969   :  { %v3060_v16 = vpop.xlane.xlu1 %3059 }
 0x96a   :  { %14725 = vpow2.f32 %v3091_v4  ;;  %v3080_v32 = vsub.f32 %v2631_v27, %v3060_v16 }
 0x96b   :  { %v3069_v9 = vpop.xlane.xlu0 %3068 }
 0x96c   :  { %v3089_v5 = vmul.f32 1.442695, %v3080_v32  ;;  %v3083_v8 = vsub.f32 %v2841_v34, %v3069_v9 }
 0x96e   :  { %14727 = vpow2.f32 %v3089_v5  ;;  %v3095_v49 = vmul.f32 1.442695, %v3083_v8 }
 0x970   :  { %v14724_v35 = vpop.eup %14723  ;;  %14729 = vpow2.f32 %v3095_v49 }
 0x971   :  { %v3066_v46 = vpop.xlane.xlu1 %3065  ;;  %v3103_v51 = vsel %vm1205_vm2, %v14724_v35, 0.0 }
 0x972   :  { %v3082_v24 = vsub.f32 %v2771_v36, %v3066_v46  ;;  %3104 = vadd.xlane.f32.xlu0 %v3103_v51 }
 0x973   :  { %v3075_v61 = vpop.xlane.xlu0 %3074 }
 0x974   :  { %v14726_v22 = vpop.eup %14725  ;;  %v3093_v56 = vmul.f32 1.442695, %v3082_v24  ;;  %v3085_v23 = vsub.f32 %v2981_v31, %v3075_v61 }
 0x975   :  { %v3109_v59 = vsel %vm1205_vm2, %v14726_v22, 0.0 }
 0x976   :  { %14731 = vpow2.f32 %v3093_v56  ;;  %v3099_v16 = vmul.f32 1.442695, %v3085_v23  ;;  %3110 = vadd.xlane.f32.xlu0 %v3109_v59 }
 0x978   :  { %v14728_v27 = vpop.eup %14727  ;;  %14733 = vpow2.f32 %v3099_v16 }
 0x979   :  { %v3072_v9 = vpop.xlane.xlu1 %3071  ;;  %v3106_v8 = vsel %vm1205_vm2, %v14728_v27, 0.0 }
 0x97a   :  { %v14730_v34 = vpop.eup %14729  ;;  %v3084_v15 = vsub.f32 %v2911_v13, %v3072_v9  ;;  %3107 = vadd.xlane.f32.xlu1 %v3106_v8 }
 0x97b   :  { %v3115_v36 = vsel %vm1205_vm2, %v14730_v34, 0.0 }
 0x97c   :  { %v3097_v54 = vmul.f32 1.442695, %v3084_v15  ;;  %3116 = vadd.xlane.f32.xlu0 %v3115_v36 }
 0x97e   :  { %14735 = vpow2.f32 %v3097_v54 }
 0x980   :  { %v14732_v24 = vpop.eup %14731 }
 0x981   :  { %v3078_v31 = vpop.xlane.xlu1 %3077  ;;  %v3112_v4 = vsel %vm1205_vm2, %v14732_v24, 0.0 }
 0x982   :  { %v14734_v32 = vpop.eup %14733  ;;  %v3086_v5 = vsub.f32 %v3051_v20, %v3078_v31  ;;  %3113 = vadd.xlane.f32.xlu1 %v3112_v4 }
 0x983   :  { %v3121_v49 = vsel %vm1205_vm2, %v14734_v32, 0.0 }
 0x984   :  { %v3101_v46 = vmul.f32 1.442695, %v3086_v5  ;;  %3122 = vadd.xlane.f32.xlu0 %v3121_v49 }
 0x986   :  { %14737 = vpow2.f32 %v3101_v46 }
 0x988   :  { %v14736_v51 = vpop.eup %14735 }
 0x989   :  { %v3118_v13 = vsel %vm1205_vm2, %v14736_v51, 0.0 }
 0x98a   :  { %3119 = vadd.xlane.f32.xlu1 %v3118_v13 }
 0x990   :  { %v15970_v61 = vpop.eup %14737 }
 0x991   :  { %v3124_v56 = vsel %vm1205_vm2, %v15970_v61, 0.0 }
 0x992   :  { %3125 = vadd.xlane.f32.xlu1 %v3124_v56 }
 0x9ff   :  { %v3105_v23 = vpop.xlane.xlu0 %3104 }
 0xa00   :  { %14739 = vrcp.f32 %v3105_v23 }
 0xa03   :  { %v3111_v59 = vpop.xlane.xlu0 %3110 }
 0xa04   :  { %14741 = vrcp.f32 %v3111_v59  ;;  %v17189_v59 = vld [vmem:[#allocation3_spill] sm:$0xff] }
 0xa07   :  { %v3108_v20 = vpop.xlane.xlu1 %3107 }
 0xa08   :  { %14743 = vrcp.f32 %v3108_v20  ;;  %v17190_v20 = vld [vmem:[#allocation45_spill] sm:$0xff] }
 0xa09   :  { %v3117_v16 = vpop.xlane.xlu0 %3116 }
 0xa0a   :  { %v14740_v9 = vpop.eup %14739  ;;  %14745 = vrcp.f32 %v3117_v16  ;;  %v17191_v16 = vld [vmem:[#allocation46_spill] sm:$0xff] }
 0xa0b   :  { %v3135_v8 = vmul.f32 %v14740_v9, %v14724_v35  ;;  %v17192_v9 = vld [vmem:[#allocation47_spill] sm:$0xff] }
 0xa0d   :  { %12369 = vmatmul.mubr.msk.f32.vlgmr.msra.gmra.mrb[24].mxu0 %vm1294_vm3, %v3135_v8  ;;  %v17193_v8 = vld [vmem:[#allocation48_spill] sm:$0xff] }
 0xa0e   :  { %v14742_v15 = vpop.eup %14741  ;;  %13729 = vmatpush3.bf16.msra.mxu0 %v15539_v52  ;;  %12382 = vmatprep.mubr.msk.f32.mxu0 %vm14963_vm1, %v17152_v55 }
 0xa0f   :  { %v3137_v36 = vmul.f32 %v14742_v15, %v14726_v22  ;;  %v3114_v54 = vpop.xlane.xlu1 %3113  ;;  %13733 = vmatprep.subr.bf16.mxu0 %v17153_v33  ;;  %v17194_v15 = vld [vmem:[#allocation49_spill] sm:$0xff] }
 0xa10   :  { %14747 = vrcp.f32 %v3114_v54 }
 0xa11   :  { %v3123_v31 = vpop.xlane.xlu0 %3122  ;;  %12383 = vmatmul.mubr.msk.f32.vlgmr.msra.gmra.mrb[26].mxu0 %vm1294_vm3, %v3137_v36 }
 0xa12   :  { %v14744_v4 = vpop.eup %14743  ;;  %14749 = vrcp.f32 %v3123_v31  ;;  %13735 = vmatpush3.bf16.msra.mxu0 %v15568_v6  ;;  %12396 = vmatprep.mubr.msk.f32.mxu0 %vm14963_vm1, %v17152_v55 }
 0xa13   :  { %v3136_v35 = vmul.f32 %v14744_v4, %v14728_v27  ;;  %13739 = vmatprep.subr.bf16.mxu0 %v17153_v33 }
 0xa14   :  { %v14746_v5 = vpop.eup %14745 }
 0xa15   :  { %v3139_v49 = vmul.f32 %v14746_v5, %v14730_v34  ;;  %12376 = vmatmul.mubr.msk.f32.vlgmr.msra.gmra.mrb[40].mxu1 %vm1294_vm3, %v3136_v35 }
 0xa16   :  { %13732 = vmatpush3.bf16.msra.mxu1 %v15556_v3  ;;  %12389 = vmatprep.mubr.msk.f32.mxu1 %vm14963_vm1, %v17152_v55 }
 0xa17   :  { %v3120_v22 = vpop.xlane.xlu1 %3119  ;;  %12397 = vmatmul.mubr.msk.f32.vlgmr.msra.gmra.mrb[28].mxu0 %vm1294_vm3, %v3139_v49  ;;  %13736 = vmatprep.subr.bf16.mxu1 %v17153_v33 }
 0xa18   :  { %14751 = vrcp.f32 %v3120_v22  ;;  %13741 = vmatpush3.bf16.msra.mxu0 %v15511_v28  ;;  %12410 = vmatprep.mubr.msk.f32.mxu0 %vm14963_vm1, %v17152_v55 }
 0xa19   :  { %13745 = vmatprep.subr.bf16.mxu0 %v17153_v33 }
 0xa1a   :  { %v14748_v27 = vpop.eup %14747 }
 0xa1b   :  { %v3138_v34 = vmul.f32 %v14748_v27, %v14732_v24 }
 0xa1c   :  { %v14750_v46 = vpop.eup %14749 }
 0xa1d   :  { %v3141_v13 = vmul.f32 %v14750_v46, %v14734_v32  ;;  %12390 = vmatmul.mubr.msk.f32.vlgmr.msra.gmra.mrb[42].mxu1 %vm1294_vm3, %v3138_v34 }
 0xa1e   :  { %13738 = vmatpush3.bf16.msra.mxu1 %v15580_v38  ;;  %12403 = vmatprep.mubr.msk.f32.mxu1 %vm14963_vm1, %v17152_v55 }
 0xa1f   :  { %v3126_v56 = vpop.xlane.xlu1 %3125  ;;  %12411 = vmatmul.mubr.msk.f32.vlgmr.msra.gmra.mrb[30].mxu0 %vm1294_vm3, %v3141_v13  ;;  %13742 = vmatprep.subr.bf16.mxu1 %v17153_v33 }
 0xa20   :  { %14753 = vrcp.f32 %v3126_v56  ;;  %13747 = vmatpush3.bf16.msra.mxu0 %v15655_v50  ;;  %12452 = vmatprep.mubr.msk.f32.mxu0 %vm14963_vm1, %v17152_v55 }
 0xa21   :  { %13748 = vmatprep.subr.bf16.mxu0 %v17153_v33 }
 0xa22   :  { %v14752_v24 = vpop.eup %14751 }
 0xa23   :  { %v3140_v32 = vmul.f32 %v14752_v24, %v14736_v51 }
 0xa24   :  { %13750 = vmatpush3.bf16.msra.mxu0 %v15666_v58 }
 0xa25   :  { %12404 = vmatmul.mubr.msk.f32.vlgmr.msra.gmra.mrb[44].mxu1 %vm1294_vm3, %v3140_v32  ;;  %13751 = vmatprep.subr.bf16.mxu0 %v17153_v33 }
 0xa26   :  { %13744 = vmatpush3.bf16.msra.mxu1 %v15592_v11  ;;  %12417 = vmatprep.mubr.msk.f32.mxu1 %vm14963_vm1, %v17152_v55 }
 0xa27   :  { %13794 = vmatprep.subr.bf16.mxu1 %v15063_v17 }
 0xa28   :  { %13753 = vmatpush3.bf16.msra.mxu0 %v15681_v1 }
 0xa29   :  { %13754 = vmatprep.subr.bf16.mxu0 %v17153_v33 }
 0xa2a   :  { %v14754_v23 = vpop.eup %14753 }
 0xa2b   :  { %v3142_v51 = vmul.f32 %v14754_v23, %v15970_v61  ;;  %v17188_v61 = vld [vmem:[#allocation20_spill] sm:$0xff] }
 0xa2c   :  { %13756 = vmatpush3.bf16.msra.mxu0 %v15694_v0 }
 0xa2d   :  { %12418 = vmatmul.mubr.msk.f32.vlgmr.msra.gmra.mrb[46].mxu1 %vm1294_vm3, %v3142_v51  ;;  %13757 = vmatprep.subr.bf16.mxu0 %v17153_v33 }
 0xa2e   :  { %13796 = vmatpush1.bf16.msra.mxu1 %v15065_v18  ;;  %3957 = vmatprep.mubr.f32.mxu1 %v17152_v55 }
 0xa2f   :  { %13798 = vmatprep.subr.bf16.mxu1 %v15089_v26 }
 0xa30   :  { %13759 = vmatpush3.bf16.msra.mxu0 %v15706_v41 }
 0xa31   :  { %13760 = vmatprep.subr.bf16.mxu0 %v17153_v33 }
 0xa32   :  { %13800 = vmatpush1.bf16.msra.mxu1 %v15101_v30 }
 0xa33   :  { %13802 = vmatprep.subr.bf16.mxu1 %v15128_v39 }
 0xa34   :  { %13762 = vmatpush3.bf16.msra.mxu0 %v15719_v63 }
 0xa35   :  { %13763 = vmatprep.subr.bf16.mxu0 %v17153_v33 }
 0xa36   :  { %13804 = vmatpush1.bf16.msra.mxu1 %v15143_v44 }
 0xa37   :  { %13806 = vmatprep.subr.bf16.mxu1 %v15155_v48 }
 0xa38   :  { %13765 = vmatpush3.bf16.msra.mxu0 %v15731_v19 }
 0xa39   :  { %13766 = vmatprep.subr.bf16.mxu0 %v17153_v33 }
 0xa3a   :  { %13808 = vmatpush1.bf16.msra.mxu1 %v15182_v57 }
 0xa3b   :  { %13810 = vmatprep.subr.bf16.mxu1 %v15191_v60 }
 0xa3c   :  { %13768 = vmatpush3.bf16.msra.mxu0 %v15743_v40 }
 0xa3d   :  { %13769 = vmatprep.subr.bf16.mxu0 %v17153_v33 }
 0xa3e   :  { %13812 = vmatpush1.bf16.msra.mxu1 %v15218_v7 }
 0xa3f   :  { %12453 = vmatmul.mubr.f32.vlgmr.msra.gmra.mrb[32].mxu0 %v15910_v43  ;;  %13814 = vmatprep.subr.bf16.mxu1 %v15227_v12  ;;  %v17187_v43 = vld [vmem:[#allocation44_spill] sm:$0xff] }
 0xa40   :  { %13771 = vmatpush3.bf16.msra.mxu0 %v15767_v10  ;;  %12487 = vmatprep.mubr.msk.f32.mxu0 %vm14963_vm1, %v17152_v55 }
 0xa41   :  { %13772 = vmatprep.subr.bf16.mxu0 %v17153_v33 }
 0xa42   :  { %13816 = vmatpush1.bf16.msra.mxu1 %v15254_v25 }
 0xa43   :  { %13818 = vmatprep.subr.bf16.mxu1 %v15263_v29 }
 0xa44   :  { %13774 = vmatpush3.bf16.msra.mxu0 %v15777_v21 }
 0xa45   :  { %13775 = vmatprep.subr.bf16.mxu0 %v17153_v33 }
 0xa46   :  { %13820 = vmatpush1.bf16.msra.mxu1 %v15290_v42 }
 0xa47   :  { %13822 = vmatprep.subr.bf16.mxu1 %v15296_v45 }
 0xa48   :  { %13777 = vmatpush3.bf16.msra.mxu0 %v17187_v43 }
 0xa49   :  { %13778 = vmatprep.subr.bf16.mxu0 %v17153_v33 }
 0xa4a   :  { %13824 = vmatpush1.bf16.msra.mxu1 %v17188_v61 }
 0xa4b   :  { %13826 = vmatprep.subr.bf16.mxu1 %v17189_v59 }
 0xa4c   :  { %13780 = vmatpush3.bf16.msra.mxu0 %v17190_v20 }
 0xa4d   :  { %13781 = vmatprep.subr.bf16.mxu0 %v17153_v33 }
 0xa50   :  { %13783 = vmatpush3.bf16.msra.mxu0 %v17191_v16 }
 0xa51   :  { %13784 = vmatprep.subr.bf16.mxu0 %v17153_v33 }
 0xa54   :  { %13786 = vmatpush3.bf16.msra.mxu0 %v17192_v9 }
 0xa55   :  { %13787 = vmatprep.subr.bf16.mxu0 %v17153_v33 }
 0xa58   :  { %13789 = vmatpush3.bf16.msra.mxu0 %v17193_v8 }
 0xa59   :  { %13790 = vmatprep.subr.bf16.mxu0 %v17153_v33 }
 0xa5c   :  { %13792 = vmatpush3.bf16.msra.mxu0 %v17194_v15 }
 0xa5d   :  { %13873 = vmatprep.subr.bf16.mxu0 %v17153_v33 }
 0xae0   :  { %v3212_v36 = vpop.f32.mrb[24].mxu0 }
 0xae1   :  { %v12370_v54 = vpop.f32.mrb[25].mxu0 }
 0xae4   :  { %v3358_v31 = vpop.f32.mrb[26].mxu0 }
 0xae5   :  { %v12384_v4 = vpop.f32.mrb[27].mxu0  ;;  %v3807_v22 = vrot.slane %v3358_v31, 6 }
 0xae8   :  { %v3285_v35 = vpop.f32.mrb[40].mxu1 }
 0xae9   :  { %v3805_v5 = vrot.slane %v3285_v35, 7  ;;  %v12377_v49 = vpop.f32.mrb[41].mxu1 }
 0xaea   :  { %v3504_v27 = vpop.f32.mrb[28].mxu0 }
 0xaeb   :  { %v3806_v34 = vsel %vm1958_vm4, %v3805_v5, %v3212_v36  ;;  %v12398_v46 = vpop.f32.mrb[29].mxu0  ;;  %v3811_v23 = vrot.slane %v3504_v27, 4 }
 0xaec   :  { %v3808_v13 = vsel %vm1961_vm5, %v3807_v22, %v3806_v34 }
 0xaf0   :  { %v3431_v56 = vpop.f32.mrb[42].mxu1 }
 0xaf1   :  { %v3809_v24 = vrot.slane %v3431_v56, 5  ;;  %v12391_v32 = vpop.f32.mrb[43].mxu1  ;;  %v17197_v56 = vld [vmem:[#allocation4_spill] sm:$0xff] }
 0xaf2   :  { %v3650_v51 = vpop.f32.mrb[30].mxu0  ;;  %v17199_v32 = vld [vmem:[#allocation6_spill] sm:$0xff] }
 0xaf3   :  { %v3810_v15 = vsel %vm1964_vm6, %v3809_v24, %v3808_v13  ;;  %v12412_v54 = vpop.f32.mrb[31].mxu0  ;;  %v3815_v31 = vrot.slane %v3650_v51, 2  ;;  %v17198_v24 = vld [vmem:[#allocation5_spill] sm:$0xff]  ;;  %v17201_v51 = vld [vmem:[#allocation8_spill] sm:$0xff] }
 0xaf4   :  { %v3812_v4 = vsel %vm1967_vm7, %v3811_v23, %v3810_v15  ;;  %v17200_v23 = vld [vmem:[#allocation7_spill] sm:$0xff]  ;;  %v17202_v54 = vld [vmem:[#allocation9_spill] sm:$0xff] }
 0xaf8   :  { %v3577_v8 = vpop.f32.mrb[44].mxu1 }
 0xaf9   :  { %v3813_v35 = vrot.slane %v3577_v8, 3  ;;  %v12405_v49 = vpop.f32.mrb[45].mxu1  ;;  %v17196_v8 = vld [vmem:[#allocation35_spill] sm:$0xff] }
 0xafa   :  { %v17205_v49 = vld [vmem:[#allocation12_spill] sm:$0xff] }
 0xafb   :  { %v3814_v9 = vsel %vm1970_vm8, %v3813_v35, %v3812_v4  ;;  %v17203_v4 = vld [vmem:[#allocation10_spill] sm:$0xff]  ;;  %v17204_v35 = vld [vmem:[#allocation11_spill] sm:$0xff] }
 0xafc   :  { %v3816_v36 = vsel %vm1973_vm9, %v3815_v31, %v3814_v9  ;;  %v17195_v9 = vld [vmem:[#allocation34_spill] sm:$0xff]  ;;  %v17206_v31 = vld [vmem:[#allocation13_spill] sm:$0xff] }
 0xb00   :  { %v3723_v5 = vpop.f32.mrb[46].mxu1 }
 0xb01   :  { %v3817_v22 = vrot.slane %v3723_v5, 1  ;;  %v12419_v34 = vpop.f32.mrb[47].mxu1  ;;  %v17208_v5 = vld [vmem:[#allocation15_spill] sm:$0xff] }
 0xb02   :  { %v17210_v34 = vld [vmem:[#allocation17_spill] sm:$0xff] }
 0xb03   :  { %v3818_v46 = vsel %vm1976_vm10, %v3817_v22, %v3816_v36  ;;  %v17207_v36 = vld [vmem:[#allocation14_spill] sm:$0xff]  ;;  %v17209_v22 = vld [vmem:[#allocation16_spill] sm:$0xff] }
 0xb04   :  { %12488 = vmatmul.mubr.f32.vlgmr.msra.gmra.mrb[32].mxu0 %v3818_v46  ;;  %v17211_v46 = vld [vmem:[#allocation18_spill] sm:$0xff] }
 0xb05   :  { %13875 = vmatpush3.bf16.msra.mxu0 %v15392_v37  ;;  %12522 = vmatprep.mubr.msk.f32.mxu0 %vm14963_vm1, %v17152_v55 }
 0xb06   :  { %13876 = vmatprep.subr.bf16.mxu0 %v17153_v33 }
 0xb09   :  { %13878 = vmatpush3.bf16.msra.mxu0 %v15404_v47 }
 0xb0a   :  { %13879 = vmatprep.subr.bf16.mxu0 %v17153_v33 }
 0xb0d   :  { %13881 = vmatpush3.bf16.msra.mxu0 %v15414_v53 }
 0xb0e   :  { %13882 = vmatprep.subr.bf16.mxu0 %v17153_v33 }
 0xb11   :  { %13884 = vmatpush3.bf16.msra.mxu0 %v15424_v62 }
 0xb12   :  { %13885 = vmatprep.subr.bf16.mxu0 %v17153_v33 }
 0xb15   :  { %13887 = vmatpush3.bf16.msra.mxu0 %v15434_v2 }
 0xb16   :  { %13888 = vmatprep.subr.bf16.mxu0 %v17153_v33 }
 0xb19   :  { %13890 = vmatpush3.bf16.msra.mxu0 %v15444_v14 }
 0xb1a   :  { %13891 = vmatprep.subr.bf16.mxu0 %v17153_v33 }
 0xb1d   :  { %13893 = vmatpush3.bf16.msra.mxu0 %v17195_v9 }
 0xb1e   :  { %13894 = vmatprep.subr.bf16.mxu0 %v17153_v33 }
 0xb21   :  { %13896 = vmatpush3.bf16.msra.mxu0 %v17196_v8 }
 0xb22   :  { %13903 = vmatprep.subr.bf16.mxu0 %v17153_v33 }
 0xbd7   :  { %v3886_v15 = vpop.f32.mrb[32].mxu0 }
 0xbd8   :  { %14755 = vtanh.f32 %v3886_v15  ;;  %v12489_v27 = vpop.f32.mrb[33].mxu0  ;;  %v17212_v15 = vld [vmem:[#allocation19_spill] sm:$0xff] }
 0xbd9   :  { %v17213_v27 = vld [vmem:[#allocation21_spill] sm:$0xff] }
 0xbe2   :  { %v14756_v13 = vpop.eup %14755 }
 0xbe3   :  { %3958 = vmatmul.mubr.f32.vlgmr.msra.gmra.mrb[48].mxu1 %v14756_v13 }
 0xbe4   :  { %13828 = vmatpush1.bf16.msra.mxu1 %v17197_v56  ;;  %4028 = vmatprep.mubr.f32.mxu1 %v17152_v55 }
 0xbe5   :  { %13830 = vmatprep.subr.bf16.mxu1 %v17198_v24 }
 0xbe8   :  { %13832 = vmatpush1.bf16.msra.mxu1 %v17199_v32 }
 0xbe9   :  { %13834 = vmatprep.subr.bf16.mxu1 %v17200_v23  ;;  %v17224_v23 = vld [vmem:[#allocation40_spill] sm:$0xff] }
 0xbec   :  { %13836 = vmatpush1.bf16.msra.mxu1 %v17201_v51 }
 0xbed   :  { %13838 = vmatprep.subr.bf16.mxu1 %v17202_v54 }
 0xbf0   :  { %13840 = vmatpush1.bf16.msra.mxu1 %v17203_v4 }
 0xbf1   :  { %13842 = vmatprep.subr.bf16.mxu1 %v17204_v35 }
 0xbf4   :  { %13844 = vmatpush1.bf16.msra.mxu1 %v17205_v49  ;;  %v17214_v49 = vld [vmem:[#allocation22_spill] sm:$0xff] }
 0xbf5   :  { %13846 = vmatprep.subr.bf16.mxu1 %v17206_v31  ;;  %v17215_v31 = vld [vmem:[#allocation23_spill] sm:$0xff] }
 0xbf8   :  { %13848 = vmatpush1.bf16.msra.mxu1 %v17207_v36 }
 0xbf9   :  { %13850 = vmatprep.subr.bf16.mxu1 %v17208_v5  ;;  %v11387_v5 = vld [vmem:[%s16992_s0 + $0x10] sm:$0xff] }
 0xbfc   :  { %13852 = vmatpush1.bf16.msra.mxu1 %v17209_v22  ;;  %v17216_v22 = vld [vmem:[#allocation24_spill] sm:$0xff] }
 0xbfd   :  { %13854 = vmatprep.subr.bf16.mxu1 %v17210_v34  ;;  %v17222_v34 = vld [vmem:[#allocation38_spill] sm:$0xff] }
 0xc00   :  { %13856 = vmatpush1.bf16.msra.mxu1 %v17211_v46  ;;  %v17217_v46 = vld [vmem:[#allocation25_spill] sm:$0xff] }
 0xc01   :  { %13858 = vmatprep.subr.bf16.mxu1 %v17212_v15 }
 0xc03   :  { %4029 = vmatmul.mubr.f32.vlgmr.msra.gmra.mrb[50].mxu1 %v14756_v13  ;;  %v17218_v13 = vld [vmem:[#allocation26_spill] sm:$0xff] }
 0xc04   :  { %13860 = vmatpush1.bf16.msra.mxu1 %v17213_v27  ;;  %4102 = vmatprep.mubr.f32.mxu1 %v17152_v55  ;;  %v17219_v27 = vld [vmem:[#allocation27_spill] sm:$0xff] }
 0xc05   :  { %13862 = vmatprep.subr.bf16.mxu1 %v17214_v49  ;;  %v17221_v49 = vld [vmem:[#allocation37_spill] sm:$0xff] }
 0xc08   :  { %13864 = vmatpush1.bf16.msra.mxu1 %v17215_v31  ;;  %v17220_v31 = vld [vmem:[#allocation36_spill] sm:$0xff] }
 0xc09   :  { %13866 = vmatprep.subr.bf16.mxu1 %v17216_v22 }
 0xc0b   :  { %11388 = vmatmul.mubr.msk.f32.vlgmr.msra.gmra.mrb[48].mxu1 %vm322_vm0, %v11387_v5 }
 0xc0c   :  { %13868 = vmatpush1.bf16.msra.mxu1 %v17217_v46  ;;  %4173 = vmatprep.mubr.f32.mxu1 %v17152_v55 }
 0xc0d   :  { %13870 = vmatprep.subr.bf16.mxu1 %v17218_v13 }
 0xc10   :  { %13872 = vmatpush1.bf16.msra.mxu1 %v17219_v27 }
 0xc11   :  { %13897 = vmatprep.subr.bf16.mxu1 %v17153_v33 }
 0xc13   :  { %11389 = vmatmul.mubr.msk.f32.vlgmr.msra.gmra.mrb[50].mxu1 %vm322_vm0, %v11387_v5  ;;  %v17223_v5 = vld [vmem:[#allocation39_spill] sm:$0xff] }
 0xc14   :  { %12529 = vmatprep.mubr.msk.f32.mxu1 %vm14963_vm1, %v17152_v55 }
 0xc19   :  { %13899 = vmatpush3.bf16.xpose.msra.mxu1 %v17220_v31 }
 0xc1a   :  { %13900 = vmatprep.subr.bf16.mxu1 %v17153_v33 }
 0xcde   :  { %v4104_v22 = vpop.f32.mrb[48].mxu1 }
 0xcdf   :  { %v4180_v46 = vadd.f32 %v4104_v22, %v17221_v49  ;;  %v4106_v15 = vpop.f32.mrb[49].mxu1 }
 0xce0   :  { %v4181_v36 = vadd.f32 %v4106_v15, %v17222_v34  ;;  %v17225_v34 = vld [vmem:[#allocation41_spill] sm:$0xff] }
 0xce1   :  { %v11390_v13 = vmul.f32 -1.442695, %v4180_v46 }
 0xce2   :  { %v11391_v35 = vmul.f32 -1.442695, %v4181_v36 }
 0xce3   :  { %14757 = vpow2.f32 %v11390_v13 }
 0xce4   :  { %14759 = vpow2.f32 %v11391_v35 }
 0xce6   :  { %v4175_v27 = vpop.f32.mrb[50].mxu1 }
 0xce7   :  { %v4177_v4 = vpop.f32.mrb[51].mxu1  ;;  %v4182_v32 = vadd.f32 %v4175_v27, %v17224_v23 }
 0xce8   :  { %v4183_v54 = vadd.f32 %v4177_v4, %v17223_v5 }
 0xcea   :  { %v11392_v51 = vmul.f32 -1.442695, %v4183_v54 }
 0xcec   :  { %14761 = vpow2.f32 %v11392_v51 }
 0xced   :  { %v14758_v24 = vpop.eup %14757  ;;  %14763 = vtanh.f32 %v4182_v32 }
 0xcee   :  { %v14760_v56 = vpop.eup %14759  ;;  %v4187_v8 = vadd.f32 1.0, %v14758_v24 }
 0xcef   :  { %v4193_v9 = vadd.f32 1.0, %v14760_v56 }
 0xcf0   :  { %14765 = vrcp.f32 %v4187_v8  ;;  %v17227_v8 = vld [vmem:[#allocation42_spill] sm:$0xff] }
 0xcf1   :  { %14767 = vrcp.f32 %v4193_v9 }
 0xcf6   :  { %v14762_v22 = vpop.eup %14761 }
 0xcf7   :  { %v14764_v46 = vpop.eup %14763  ;;  %v4200_v13 = vadd.f32 1.0, %v14762_v22  ;;  %v17228_v22 = vld [vmem:[#allocation43_spill] sm:$0xff] }
 0xcf9   :  { %14769 = vrcp.f32 %v4200_v13 }
 0xcfa   :  { %v14766_v36 = vpop.eup %14765 }
 0xcfb   :  { %v14768_v15 = vpop.eup %14767  ;;  %v4204_v35 = vmul.f32 %v14766_v36, %v14764_v46 }
 0xcfc   :  { %v4203_v49 = vmul.f32 %v14768_v15, %v17225_v34 }
 0xcfe   :  { %v16127_v4 = vadd.f32 %v4204_v35, %v4203_v49 }
 0xd00   :  { %17226 = vst [vmem:[#allocation44_spill] sm:$0xff] %v16127_v4  ;;  %14771 = vtanh.f32 %v16127_v4 }
 0xd03   :  { %v14770_v54 = vpop.eup %14769 }
 0xd0a   :  { %v14772_v24 = vpop.eup %14771 }
 0xd0b   :  { %v16130_v51 = vmul.f32 %v14772_v24, %v14770_v54 }
 0xd0d   :  { %12523 = vmatmul.mubr.f32.vlgmr.msra.gmra.mrb[34].mxu0 %v16130_v51 }
 0xd0e   :  { %13905 = vmatpush3.bf16.xpose.msra.mxu0 %v15539_v52  ;;  %12543 = vmatprep.mubr.msk.f32.mxu0 %vm14963_vm1, %v17152_v55 }
 0xd0f   :  { %13909 = vmatprep.subr.bf16.mxu0 %v17153_v33 }
 0xde0   :  { %v4274_v9 = vpop.f32.mrb[34].mxu0 }
 0xde1   :  { %v4286_v56 = vrot.slane %v4274_v9, %v17227_v8  ;;  %v12524_v32 = vpop.f32.mrb[35].mxu0  ;;  %v4279_v34 = vcombine.high %v4274_v9, %v4274_v9 }
 0xde3   :  { %v4302_v49 = vrot.slane %v4286_v56, %v17227_v8  ;;  %v4294_v46 = vcombine.high %v4286_v56, %v4286_v56  ;;  %v4293_v36 = vrot.slane %v4279_v34, %v17227_v8 }
 0xde5   :  { %v4324_v27 = vcombine.high %v4302_v49, %v4302_v49  ;;  %12530 = vmatmul.mubr.f32.vlgmr.msra.gmra.mrb[52].mxu1 %v4302_v49  ;;  %v4316_v15 = vrot.slane %v4294_v46, %v17227_v8  ;;  %v4309_v35 = vrot.slane %v4293_v36, %v17227_v8  ;;  %v4295_v24 = vcombine.high %v4293_v36, %v4293_v36 }
 0xde6   :  { %13902 = vmatpush3.bf16.xpose.msra.mxu1 %v17228_v22  ;;  %12536 = vmatprep.mubr.msk.f32.mxu1 %vm14963_vm1, %v17152_v55 }
 0xde7   :  { %12544 = vmatmul.mubr.f32.vlgmr.msra.gmra.mrb[36].mxu0 %v4324_v27  ;;  %13906 = vmatprep.subr.bf16.mxu1 %v17153_v33  ;;  %v4326_v13 = vcombine.high %v4316_v15, %v4316_v15  ;;  %v4325_v54 = vcombine.high %v4309_v35, %v4309_v35  ;;  %v4323_v9 = vrot.slane %v4295_v24, %v17227_v8 }
 0xde8   :  { %13911 = vmatpush3.bf16.xpose.msra.mxu0 %v15568_v6  ;;  %12557 = vmatprep.mubr.msk.f32.mxu0 %vm14963_vm1, %v17152_v55 }
 0xde9   :  { %13915 = vmatprep.subr.bf16.mxu0 %v17153_v33  ;;  %v4327_v56 = vcombine.high %v4323_v9, %v4323_v9 }
 0xded   :  { %12537 = vmatmul.mubr.f32.vlgmr.msra.gmra.mrb[54].mxu1 %v4316_v15 }
 0xdee   :  { %13908 = vmatpush3.bf16.xpose.msra.mxu1 %v15556_v3  ;;  %12550 = vmatprep.mubr.msk.f32.mxu1 %vm14963_vm1, %v17152_v55 }
 0xdef   :  { %12558 = vmatmul.mubr.f32.vlgmr.msra.gmra.mrb[38].mxu0 %v4309_v35  ;;  %13912 = vmatprep.subr.bf16.mxu1 %v17153_v33 }
 0xdf0   :  { %13917 = vmatpush3.bf16.xpose.msra.mxu0 %v15511_v28  ;;  %12571 = vmatprep.mubr.msk.f32.mxu0 %vm14963_vm1, %v17152_v55 }
 0xdf1   :  { %13921 = vmatprep.subr.bf16.mxu0 %v17153_v33 }
 0xdf5   :  { %12551 = vmatmul.mubr.f32.vlgmr.msra.gmra.mrb[56].mxu1 %v4326_v13 }
 0xdf6   :  { %13914 = vmatpush3.bf16.xpose.msra.mxu1 %v15580_v38  ;;  %12564 = vmatprep.mubr.msk.f32.mxu1 %vm14963_vm1, %v17152_v55 }
 0xdf7   :  { %12572 = vmatmul.mubr.f32.vlgmr.msra.gmra.mrb[40].mxu0 %v4325_v54  ;;  %13918 = vmatprep.subr.bf16.mxu1 %v17153_v33 }
 0xdf8   :  { %13923 = vmatpush3.bf16.msra.mxu0 %v17220_v31  ;;  %12585 = vmatprep.mubr.msk.f32.mxu0 %vm14963_vm1, %v17152_v55 }
 0xdf9   :  { %13927 = vmatprep.subr.bf16.mxu0 %v17153_v33 }
 0xdfd   :  { %12565 = vmatmul.mubr.f32.vlgmr.msra.gmra.mrb[58].mxu1 %v4323_v9 }
 0xdfe   :  { %13920 = vmatpush3.bf16.xpose.msra.mxu1 %v15592_v11  ;;  %12578 = vmatprep.mubr.msk.f32.mxu1 %vm14963_vm1, %v17152_v55 }
 0xdff   :  { %13924 = vmatprep.subr.bf16.mxu1 %v17153_v33 }
 0xe05   :  { %12579 = vmatmul.mubr.f32.vlgmr.msra.gmra.mrb[60].mxu1 %v4327_v56 }
 0xe06   :  { %13926 = vmatpush3.bf16.msra.mxu1 %v17228_v22  ;;  %12592 = vmatprep.mubr.msk.f32.mxu1 %vm14963_vm1, %v17152_v55 }
 0xe07   :  { %13930 = vmatprep.subr.bf16.mxu1 %v17153_v33 }
 0xeb8   :  { %v4402_v32 = vpop.f32.mrb[52].mxu1 }
 0xeb9   :  { %v12531_v49 = vpop.f32.mrb[53].mxu1  ;;  %v4896_v34 = vsel %vm1205_vm2, %v4402_v32, -inf }
 0xeba   :  { %4897 = vmax.xlane.f32.xlu0 %v4896_v34  ;;  %v4542_v27 = vpop.f32.mrb[36].mxu0 }
 0xebb   :  { %v12545_v46 = vpop.f32.mrb[37].mxu0  ;;  %v4902_v36 = vsel %vm1205_vm2, %v4542_v27, -inf }
 0xebe   :  { %4903 = vmax.xlane.f32.xlu0 %v4902_v36 }
 0xec0   :  { %v4472_v15 = vpop.f32.mrb[54].mxu1 }
 0xec1   :  { %v12538_v35 = vpop.f32.mrb[55].mxu1  ;;  %v4899_v13 = vsel %vm1205_vm2, %v4472_v15, -inf }
 0xec2   :  { %4900 = vmax.xlane.f32.xlu1 %v4899_v13  ;;  %v4682_v54 = vpop.f32.mrb[38].mxu0 }
 0xec3   :  { %v12559_v24 = vpop.f32.mrb[39].mxu0  ;;  %v4908_v9 = vsel %vm1205_vm2, %v4682_v54, -inf }
 0xec4   :  { %4909 = vmax.xlane.f32.xlu0 %v4908_v9 }
 0xec8   :  { %v4612_v56 = vpop.f32.mrb[56].mxu1 }
 0xec9   :  { %v12552_v49 = vpop.f32.mrb[57].mxu1  ;;  %v4905_v22 = vsel %vm1205_vm2, %v4612_v56, -inf }
 0xeca   :  { %4906 = vmax.xlane.f32.xlu1 %v4905_v22  ;;  %v4822_v34 = vpop.f32.mrb[40].mxu0 }
 0xecb   :  { %v12573_v46 = vpop.f32.mrb[41].mxu0  ;;  %v4914_v8 = vsel %vm1205_vm2, %v4822_v34, -inf }
 0xecc   :  { %4915 = vmax.xlane.f32.xlu0 %v4914_v8 }
 0xed0   :  { %v4752_v36 = vpop.f32.mrb[58].mxu1 }
 0xed1   :  { %v12566_v35 = vpop.f32.mrb[59].mxu1  ;;  %v4911_v4 = vsel %vm1205_vm2, %v4752_v36, -inf }
 0xed2   :  { %4912 = vmax.xlane.f32.xlu1 %v4911_v4 }
 0xed8   :  { %v4892_v13 = vpop.f32.mrb[60].mxu1 }
 0xed9   :  { %v12580_v24 = vpop.f32.mrb[61].mxu1  ;;  %v4917_v23 = vsel %vm1205_vm2, %v4892_v13, -inf }
 0xeda   :  { %4918 = vmax.xlane.f32.xlu1 %v4917_v23 }
 0xf47   :  { %v4898_v9 = vpop.xlane.xlu0 %4897 }
 0xf48   :  { %v4920_v49 = vsub.f32 %v4402_v32, %v4898_v9 }
 0xf4a   :  { %v4928_v5 = vmul.f32 1.442695, %v4920_v49 }
 0xf4b   :  { %v4904_v31 = vpop.xlane.xlu0 %4903 }
 0xf4c   :  { %14773 = vpow2.f32 %v4928_v5  ;;  %v4922_v22 = vsub.f32 %v4542_v27, %v4904_v31 }
 0xf4e   :  { %v4932_v46 = vmul.f32 1.442695, %v4922_v22 }
 0xf4f   :  { %v4901_v14 = vpop.xlane.xlu1 %4900 }
 0xf50   :  { %14775 = vpow2.f32 %v4932_v46  ;;  %v4921_v8 = vsub.f32 %v4472_v15, %v4901_v14 }
 0xf51   :  { %v4910_v2 = vpop.xlane.xlu0 %4909 }
 0xf52   :  { %v4930_v35 = vmul.f32 1.442695, %v4921_v8  ;;  %v4924_v62 = vsub.f32 %v4682_v54, %v4910_v2 }
 0xf54   :  { %14777 = vpow2.f32 %v4930_v35  ;;  %v4936_v4 = vmul.f32 1.442695, %v4924_v62 }
 0xf56   :  { %v14774_v53 = vpop.eup %14773  ;;  %14779 = vpow2.f32 %v4936_v4 }
 0xf57   :  { %v4907_v24 = vpop.xlane.xlu1 %4906  ;;  %v4944_v23 = vsel %vm1205_vm2, %v14774_v53, 0.0 }
 0xf58   :  { %v4923_v47 = vsub.f32 %v4612_v56, %v4907_v24  ;;  %4945 = vadd.xlane.f32.xlu0 %v4944_v23 }
 0xf59   :  { %v4916_v32 = vpop.xlane.xlu0 %4915 }
 0xf5a   :  { %v14776_v9 = vpop.eup %14775  ;;  %v4934_v5 = vmul.f32 1.442695, %v4923_v47  ;;  %v4926_v31 = vsub.f32 %v4822_v34, %v4916_v32 }
 0xf5b   :  { %v4950_v27 = vsel %vm1205_vm2, %v14776_v9, 0.0 }
 0xf5c   :  { %14781 = vpow2.f32 %v4934_v5  ;;  %v4940_v14 = vmul.f32 1.442695, %v4926_v31  ;;  %4951 = vadd.xlane.f32.xlu0 %v4950_v27 }
 0xf5e   :  { %v14778_v15 = vpop.eup %14777  ;;  %14783 = vpow2.f32 %v4940_v14 }
 0xf5f   :  { %v4913_v2 = vpop.xlane.xlu1 %4912  ;;  %v4947_v62 = vsel %vm1205_vm2, %v14778_v15, 0.0 }
 0xf60   :  { %v14780_v54 = vpop.eup %14779  ;;  %v4925_v49 = vsub.f32 %v4752_v36, %v4913_v2  ;;  %4948 = vadd.xlane.f32.xlu1 %v4947_v62 }
 0xf61   :  { %v4956_v56 = vsel %vm1205_vm2, %v14780_v54, 0.0 }
 0xf62   :  { %v4938_v22 = vmul.f32 1.442695, %v4925_v49  ;;  %4957 = vadd.xlane.f32.xlu0 %v4956_v56 }
 0xf64   :  { %14785 = vpow2.f32 %v4938_v22 }
 0xf66   :  { %v14782_v47 = vpop.eup %14781 }
 0xf67   :  { %v4919_v34 = vpop.xlane.xlu1 %4918  ;;  %v4953_v46 = vsel %vm1205_vm2, %v14782_v47, 0.0 }
 0xf68   :  { %v14784_v8 = vpop.eup %14783  ;;  %v4927_v35 = vsub.f32 %v4892_v13, %v4919_v34  ;;  %4954 = vadd.xlane.f32.xlu1 %v4953_v46 }
 0xf69   :  { %v4962_v4 = vsel %vm1205_vm2, %v14784_v8, 0.0 }
 0xf6a   :  { %v4942_v24 = vmul.f32 1.442695, %v4927_v35  ;;  %4963 = vadd.xlane.f32.xlu0 %v4962_v4 }
 0xf6c   :  { %14787 = vpow2.f32 %v4942_v24 }
 0xf6e   :  { %v14786_v23 = vpop.eup %14785 }
 0xf6f   :  { %v4959_v36 = vsel %vm1205_vm2, %v14786_v23, 0.0 }
 0xf70   :  { %4960 = vadd.xlane.f32.xlu1 %v4959_v36 }
 0xf76   :  { %v16190_v32 = vpop.eup %14787 }
 0xf77   :  { %v4965_v5 = vsel %vm1205_vm2, %v16190_v32, 0.0 }
 0xf78   :  { %4966 = vadd.xlane.f32.xlu1 %v4965_v5 }
 0xfe5   :  { %v4946_v31 = vpop.xlane.xlu0 %4945 }
 0xfe6   :  { %14789 = vrcp.f32 %v4946_v31 }
 0xfe9   :  { %v4952_v27 = vpop.xlane.xlu0 %4951 }
 0xfea   :  { %14791 = vrcp.f32 %v4952_v27  ;;  %v17231_v27 = vld [vmem:[#allocation49_spill] sm:$0xff] }
 0xfed   :  { %v4949_v13 = vpop.xlane.xlu1 %4948 }
 0xfee   :  { %14793 = vrcp.f32 %v4949_v13 }
 0xfef   :  { %v4958_v14 = vpop.xlane.xlu0 %4957 }
 0xff0   :  { %v14790_v2 = vpop.eup %14789  ;;  %14795 = vrcp.f32 %v4958_v14 }
 0xff1   :  { %v4976_v62 = vmul.f32 %v14790_v2, %v14774_v53 }
 0xff3   :  { %12586 = vmatmul.mubr.msk.f32.vlgmr.msra.gmra.mrb[42].mxu0 %vm1294_vm3, %v4976_v62 }
 0xff4   :  { %v14792_v49 = vpop.eup %14791  ;;  %13929 = vmatpush3.bf16.msra.mxu0 %v15539_v52  ;;  %12599 = vmatprep.mubr.msk.f32.mxu0 %vm14963_vm1, %v17152_v55 }
 0xff5   :  { %v4978_v56 = vmul.f32 %v14792_v49, %v14776_v9  ;;  %v4955_v22 = vpop.xlane.xlu1 %4954  ;;  %13933 = vmatprep.subr.bf16.mxu0 %v17153_v33 }
 0xff6   :  { %14797 = vrcp.f32 %v4955_v22 }
 0xff7   :  { %v4964_v34 = vpop.xlane.xlu0 %4963  ;;  %12600 = vmatmul.mubr.msk.f32.vlgmr.msra.gmra.mrb[44].mxu0 %vm1294_vm3, %v4978_v56 }
 0xff8   :  { %v14794_v46 = vpop.eup %14793  ;;  %14799 = vrcp.f32 %v4964_v34  ;;  %13935 = vmatpush3.bf16.msra.mxu0 %v15568_v6  ;;  %12613 = vmatprep.mubr.msk.f32.mxu0 %vm14963_vm1, %v17152_v55 }
 0xff9   :  { %v4977_v53 = vmul.f32 %v14794_v46, %v14778_v15  ;;  %13939 = vmatprep.subr.bf16.mxu0 %v17153_v33 }
 0xffa   :  { %v14796_v35 = vpop.eup %14795 }
 0xffb   :  { %v4980_v4 = vmul.f32 %v14796_v35, %v14780_v54  ;;  %12593 = vmatmul.mubr.msk.f32.vlgmr.msra.gmra.mrb[62].mxu1 %vm1294_vm3, %v4977_v53 }
 0xffc   :  { %13932 = vmatpush3.bf16.msra.mxu1 %v15556_v3  ;;  %12606 = vmatprep.mubr.msk.f32.mxu1 %vm14963_vm1, %v17152_v55 }
 0xffd   :  { %v4961_v9 = vpop.xlane.xlu1 %4960  ;;  %12614 = vmatmul.mubr.msk.f32.vlgmr.msra.gmra.mrb[46].mxu0 %vm1294_vm3, %v4980_v4  ;;  %13936 = vmatprep.subr.bf16.mxu1 %v17153_v33 }
 0xffe   :  { %14801 = vrcp.f32 %v4961_v9  ;;  %13941 = vmatpush3.bf16.msra.mxu0 %v15511_v28  ;;  %12627 = vmatprep.mubr.msk.f32.mxu0 %vm14963_vm1, %v17152_v55 }
 0xfff   :  { %13945 = vmatprep.subr.bf16.mxu0 %v17153_v33 }
0x1000   :  { %v14798_v15 = vpop.eup %14797 }
0x1001   :  { %v4979_v54 = vmul.f32 %v14798_v15, %v14782_v47 }
0x1002   :  { %v14800_v24 = vpop.eup %14799 }
0x1003   :  { %v4982_v36 = vmul.f32 %v14800_v24, %v14784_v8  ;;  %12607 = vmatmul.mubr.msk.f32.vlgmr.msra.gmra.mrb[64].mxu1 %vm1294_vm3, %v4979_v54 }
0x1004   :  { %13938 = vmatpush3.bf16.msra.mxu1 %v15580_v38  ;;  %12620 = vmatprep.mubr.msk.f32.mxu1 %vm14963_vm1, %v17152_v55 }
0x1005   :  { %v4967_v5 = vpop.xlane.xlu1 %4966  ;;  %12628 = vmatmul.mubr.msk.f32.vlgmr.msra.gmra.mrb[48].mxu0 %vm1294_vm3, %v4982_v36  ;;  %13942 = vmatprep.subr.bf16.mxu1 %v17153_v33 }
0x1006   :  { %14803 = vrcp.f32 %v4967_v5  ;;  %13947 = vmatpush3.bf16.msra.mxu0 %v15655_v50  ;;  %12669 = vmatprep.mubr.msk.f32.mxu0 %vm14963_vm1, %v17152_v55 }
0x1007   :  { %13948 = vmatprep.subr.bf16.mxu0 %v17153_v33 }
0x1008   :  { %v14802_v47 = vpop.eup %14801 }
0x1009   :  { %v4981_v8 = vmul.f32 %v14802_v47, %v14786_v23 }
0x100a   :  { %13950 = vmatpush3.bf16.msra.mxu0 %v15666_v58 }
0x100b   :  { %12621 = vmatmul.mubr.msk.f32.vlgmr.msra.gmra.mrb[66].mxu1 %vm1294_vm3, %v4981_v8  ;;  %13951 = vmatprep.subr.bf16.mxu0 %v17153_v33 }
0x100c   :  { %13944 = vmatpush3.bf16.msra.mxu1 %v15592_v11  ;;  %12634 = vmatprep.mubr.msk.f32.mxu1 %vm14963_vm1, %v17152_v55 }
0x100d   :  { %13994 = vmatprep.subr.bf16.mxu1 %v15063_v17 }
0x100e   :  { %13953 = vmatpush3.bf16.msra.mxu0 %v15681_v1 }
0x100f   :  { %13954 = vmatprep.subr.bf16.mxu0 %v17153_v33 }
0x1010   :  { %v14804_v31 = vpop.eup %14803 }
0x1011   :  { %v4983_v23 = vmul.f32 %v14804_v31, %v16190_v32  ;;  %v17230_v32 = vld [vmem:[#allocation48_spill] sm:$0xff] }
0x1012   :  { %13956 = vmatpush3.bf16.msra.mxu0 %v15694_v0 }
0x1013   :  { %12635 = vmatmul.mubr.msk.f32.vlgmr.msra.gmra.mrb[68].mxu1 %vm1294_vm3, %v4983_v23  ;;  %13957 = vmatprep.subr.bf16.mxu0 %v17153_v33 }
0x1014   :  { %13996 = vmatpush1.bf16.msra.mxu1 %v15065_v18  ;;  %5798 = vmatprep.mubr.f32.mxu1 %v17152_v55 }
0x1015   :  { %13998 = vmatprep.subr.bf16.mxu1 %v15089_v26 }
0x1016   :  { %13959 = vmatpush3.bf16.msra.mxu0 %v15706_v41 }
0x1017   :  { %13960 = vmatprep.subr.bf16.mxu0 %v17153_v33 }
0x1018   :  { %14000 = vmatpush1.bf16.msra.mxu1 %v15101_v30 }
0x1019   :  { %14002 = vmatprep.subr.bf16.mxu1 %v15128_v39 }
0x101a   :  { %13962 = vmatpush3.bf16.msra.mxu0 %v15719_v63 }
0x101b   :  { %13963 = vmatprep.subr.bf16.mxu0 %v17153_v33 }
0x101c   :  { %14004 = vmatpush1.bf16.msra.mxu1 %v15143_v44 }
0x101d   :  { %14006 = vmatprep.subr.bf16.mxu1 %v15155_v48 }
0x101e   :  { %13965 = vmatpush3.bf16.msra.mxu0 %v15731_v19 }
0x101f   :  { %13966 = vmatprep.subr.bf16.mxu0 %v17153_v33 }
0x1020   :  { %14008 = vmatpush1.bf16.msra.mxu1 %v15182_v57 }
0x1021   :  { %14010 = vmatprep.subr.bf16.mxu1 %v15191_v60 }
0x1022   :  { %13968 = vmatpush3.bf16.msra.mxu0 %v15743_v40 }
0x1023   :  { %13969 = vmatprep.subr.bf16.mxu0 %v17153_v33 }
0x1024   :  { %14012 = vmatpush1.bf16.msra.mxu1 %v15218_v7 }
0x1025   :  { %12670 = vmatmul.mubr.f32.vlgmr.msra.gmra.mrb[50].mxu0 %v16130_v51  ;;  %14014 = vmatprep.subr.bf16.mxu1 %v15227_v12  ;;  %v17229_v51 = vld [vmem:[#allocation47_spill] sm:$0xff] }
0x1026   :  { %13971 = vmatpush3.bf16.msra.mxu0 %v15767_v10  ;;  %12704 = vmatprep.mubr.msk.f32.mxu0 %vm14963_vm1, %v17152_v55 }
0x1027   :  { %13972 = vmatprep.subr.bf16.mxu0 %v17153_v33 }
0x1028   :  { %14016 = vmatpush1.bf16.msra.mxu1 %v15254_v25 }
0x1029   :  { %14018 = vmatprep.subr.bf16.mxu1 %v15263_v29 }
0x102a   :  { %13974 = vmatpush3.bf16.msra.mxu0 %v15777_v21 }
0x102b   :  { %13975 = vmatprep.subr.bf16.mxu0 %v17153_v33 }
0x102c   :  { %14020 = vmatpush1.bf16.msra.mxu1 %v15290_v42 }
0x102d   :  { %14022 = vmatprep.subr.bf16.mxu1 %v15296_v45 }
0x102e   :  { %13977 = vmatpush3.bf16.msra.mxu0 %v17187_v43 }
0x102f   :  { %13978 = vmatprep.subr.bf16.mxu0 %v17153_v33 }
0x1030   :  { %14024 = vmatpush1.bf16.msra.mxu1 %v17188_v61 }
0x1031   :  { %14026 = vmatprep.subr.bf16.mxu1 %v17189_v59 }
0x1032   :  { %13980 = vmatpush3.bf16.msra.mxu0 %v17190_v20 }
0x1033   :  { %13981 = vmatprep.subr.bf16.mxu0 %v17153_v33 }
0x1036   :  { %13983 = vmatpush3.bf16.msra.mxu0 %v17191_v16 }
0x1037   :  { %13984 = vmatprep.subr.bf16.mxu0 %v17153_v33 }
0x103a   :  { %13986 = vmatpush3.bf16.msra.mxu0 %v17229_v51 }
0x103b   :  { %13987 = vmatprep.subr.bf16.mxu0 %v17153_v33 }
0x103e   :  { %13989 = vmatpush3.bf16.msra.mxu0 %v17230_v32 }
0x103f   :  { %13990 = vmatprep.subr.bf16.mxu0 %v17153_v33 }
0x1042   :  { %13992 = vmatpush3.bf16.msra.mxu0 %v17231_v27 }
0x1043   :  { %14073 = vmatprep.subr.bf16.mxu0 %v17153_v33 }
0x10c6   :  { %v5053_v13 = vpop.f32.mrb[42].mxu0 }
0x10c7   :  { %v12587_v14 = vpop.f32.mrb[43].mxu0 }
0x10ca   :  { %v5199_v2 = vpop.f32.mrb[44].mxu0 }
0x10cb   :  { %v12601_v62 = vpop.f32.mrb[45].mxu0  ;;  %v5648_v34 = vrot.slane %v5199_v2, 6 }
0x10ce   :  { %v5126_v49 = vpop.f32.mrb[62].mxu1 }
0x10cf   :  { %v5646_v56 = vrot.slane %v5126_v49, 7  ;;  %v12594_v22 = vpop.f32.mrb[63].mxu1 }
0x10d0   :  { %v5345_v46 = vpop.f32.mrb[46].mxu0 }
0x10d1   :  { %v5647_v53 = vsel %vm1958_vm4, %v5646_v56, %v5053_v13  ;;  %v12615_v35 = vpop.f32.mrb[47].mxu0  ;;  %v5652_v24 = vrot.slane %v5345_v46, 4  ;;  %v17232_v46 = vld [vmem:[#allocation29_spill] sm:$0xff] }
0x10d2   :  { %v5649_v4 = vsel %vm1961_vm5, %v5648_v34, %v5647_v53  ;;  %v17233_v53 = vld [vmem:[#allocation30_spill] sm:$0xff]  ;;  %v17234_v35 = vld [vmem:[#allocation31_spill] sm:$0xff] }
0x10d6   :  { %v5272_v9 = vpop.f32.mrb[64].mxu1 }
0x10d7   :  { %v5650_v15 = vrot.slane %v5272_v9, 5  ;;  %v12608_v54 = vpop.f32.mrb[65].mxu1  ;;  %v17236_v9 = vld [vmem:[#allocation33_spill] sm:$0xff] }
0x10d8   :  { %v5491_v36 = vpop.f32.mrb[48].mxu0  ;;  %v17238_v54 = vld [vmem:[#allocation35_spill] sm:$0xff] }
0x10d9   :  { %v5651_v5 = vsel %vm1964_vm6, %v5650_v15, %v5649_v4  ;;  %v12629_v47 = vpop.f32.mrb[49].mxu0  ;;  %v5656_v2 = vrot.slane %v5491_v36, 2  ;;  %v17235_v4 = vld [vmem:[#allocation32_spill] sm:$0xff]  ;;  %v17237_v15 = vld [vmem:[#allocation34_spill] sm:$0xff] }
0x10da   :  { %v5653_v8 = vsel %vm1967_vm7, %v5652_v24, %v5651_v5  ;;  %v17239_v47 = vld [vmem:[#allocation4_spill] sm:$0xff] }
0x10de   :  { %v5418_v31 = vpop.f32.mrb[66].mxu1 }
0x10df   :  { %v5654_v23 = vrot.slane %v5418_v31, 3  ;;  %v12622_v14 = vpop.f32.mrb[67].mxu1  ;;  %v17241_v31 = vld [vmem:[#allocation6_spill] sm:$0xff] }
0x10e0   :  { %v17243_v14 = vld [vmem:[#allocation8_spill] sm:$0xff] }
0x10e1   :  { %v5655_v62 = vsel %vm1970_vm8, %v5654_v23, %v5653_v8  ;;  %v17240_v8 = vld [vmem:[#allocation5_spill] sm:$0xff]  ;;  %v17242_v23 = vld [vmem:[#allocation7_spill] sm:$0xff] }
0x10e2   :  { %v5657_v13 = vsel %vm1973_vm9, %v5656_v2, %v5655_v62  ;;  %v17244_v2 = vld [vmem:[#allocation9_spill] sm:$0xff]  ;;  %v17245_v62 = vld [vmem:[#allocation10_spill] sm:$0xff] }
0x10e6   :  { %v5564_v49 = vpop.f32.mrb[68].mxu1 }
0x10e7   :  { %v5658_v56 = vrot.slane %v5564_v49, 1  ;;  %v12636_v22 = vpop.f32.mrb[69].mxu1  ;;  %v17247_v49 = vld [vmem:[#allocation12_spill] sm:$0xff] }
0x10e8   :  { %v17249_v22 = vld [vmem:[#allocation14_spill] sm:$0xff] }
0x10e9   :  { %v5659_v34 = vsel %vm1976_vm10, %v5658_v56, %v5657_v13  ;;  %v17246_v13 = vld [vmem:[#allocation11_spill] sm:$0xff]  ;;  %v17248_v56 = vld [vmem:[#allocation13_spill] sm:$0xff] }
0x10ea   :  { %12705 = vmatmul.mubr.f32.vlgmr.msra.gmra.mrb[50].mxu0 %v5659_v34  ;;  %v17250_v34 = vld [vmem:[#allocation15_spill] sm:$0xff] }
0x10eb   :  { %14075 = vmatpush3.bf16.msra.mxu0 %v15392_v37  ;;  %12739 = vmatprep.mubr.msk.f32.mxu0 %vm14963_vm1, %v17152_v55 }
0x10ec   :  { %14076 = vmatprep.subr.bf16.mxu0 %v17153_v33 }
0x10ef   :  { %14078 = vmatpush3.bf16.msra.mxu0 %v17232_v46 }
0x10f0   :  { %14079 = vmatprep.subr.bf16.mxu0 %v17153_v33 }
0x10f3   :  { %14081 = vmatpush3.bf16.msra.mxu0 %v17233_v53 }
0x10f4   :  { %14082 = vmatprep.subr.bf16.mxu0 %v17153_v33 }
0x10f7   :  { %14084 = vmatpush3.bf16.msra.mxu0 %v17234_v35 }
0x10f8   :  { %14085 = vmatprep.subr.bf16.mxu0 %v17153_v33 }
0x10fb   :  { %14087 = vmatpush3.bf16.msra.mxu0 %v17235_v4 }
0x10fc   :  { %14088 = vmatprep.subr.bf16.mxu0 %v17153_v33 }
0x10ff   :  { %14090 = vmatpush3.bf16.msra.mxu0 %v17236_v9 }
0x1100   :  { %14091 = vmatprep.subr.bf16.mxu0 %v17153_v33 }
0x1103   :  { %14093 = vmatpush3.bf16.msra.mxu0 %v17237_v15 }
0x1104   :  { %14094 = vmatprep.subr.bf16.mxu0 %v17153_v33 }
0x1107   :  { %14096 = vmatpush3.bf16.msra.mxu0 %v17238_v54 }
0x1108   :  { %14103 = vmatprep.subr.bf16.mxu0 %v17153_v33 }
0x11bd   :  { %v5727_v24 = vpop.f32.mrb[50].mxu0 }
0x11be   :  { %14805 = vtanh.f32 %v5727_v24  ;;  %v12706_v36 = vpop.f32.mrb[51].mxu0  ;;  %v17251_v24 = vld [vmem:[#allocation16_spill] sm:$0xff] }
0x11bf   :  { %v17252_v36 = vld [vmem:[#allocation17_spill] sm:$0xff] }
0x11c8   :  { %v14806_v5 = vpop.eup %14805 }
0x11c9   :  { %5799 = vmatmul.mubr.f32.vlgmr.msra.gmra.mrb[70].mxu1 %v14806_v5 }
0x11ca   :  { %14028 = vmatpush1.bf16.msra.mxu1 %v17239_v47  ;;  %5869 = vmatprep.mubr.f32.mxu1 %v17152_v55  ;;  %v17266_v47 = vld [vmem:[#allocation40_spill] sm:$0xff] }
0x11cb   :  { %14030 = vmatprep.subr.bf16.mxu1 %v17240_v8 }
0x11ce   :  { %14032 = vmatpush1.bf16.msra.mxu1 %v17241_v31 }
0x11cf   :  { %14034 = vmatprep.subr.bf16.mxu1 %v17242_v23  ;;  %v17253_v23 = vld [vmem:[#allocation18_spill] sm:$0xff] }
0x11d2   :  { %14036 = vmatpush1.bf16.msra.mxu1 %v17243_v14  ;;  %v17254_v14 = vld [vmem:[#allocation19_spill] sm:$0xff] }
0x11d3   :  { %14038 = vmatprep.subr.bf16.mxu1 %v17244_v2 }
0x11d6   :  { %14040 = vmatpush1.bf16.msra.mxu1 %v17245_v62  ;;  %v17255_v62 = vld [vmem:[#allocation21_spill] sm:$0xff] }
0x11d7   :  { %14042 = vmatprep.subr.bf16.mxu1 %v17246_v13 }
0x11da   :  { %14044 = vmatpush1.bf16.msra.mxu1 %v17247_v49  ;;  %v17256_v49 = vld [vmem:[#allocation22_spill] sm:$0xff] }
0x11db   :  { %14046 = vmatprep.subr.bf16.mxu1 %v17248_v56  ;;  %v17257_v56 = vld [vmem:[#allocation23_spill] sm:$0xff] }
0x11de   :  { %14048 = vmatpush1.bf16.msra.mxu1 %v17249_v22 }
0x11df   :  { %14050 = vmatprep.subr.bf16.mxu1 %v17250_v34  ;;  %v11401_v34 = vld [vmem:[%s16992_s0 + $0x18] sm:$0xff] }
0x11e2   :  { %14052 = vmatpush1.bf16.msra.mxu1 %v17251_v24  ;;  %v17258_v24 = vld [vmem:[#allocation24_spill] sm:$0xff] }
0x11e3   :  { %14054 = vmatprep.subr.bf16.mxu1 %v17252_v36  ;;  %v17264_v36 = vld [vmem:[#allocation38_spill] sm:$0xff] }
0x11e6   :  { %14056 = vmatpush1.bf16.msra.mxu1 %v17253_v23  ;;  %v17259_v23 = vld [vmem:[#allocation25_spill] sm:$0xff] }
0x11e7   :  { %14058 = vmatprep.subr.bf16.mxu1 %v17254_v14 }
0x11e9   :  { %5870 = vmatmul.mubr.f32.vlgmr.msra.gmra.mrb[72].mxu1 %v14806_v5  ;;  %v17260_v5 = vld [vmem:[#allocation26_spill] sm:$0xff] }
0x11ea   :  { %14060 = vmatpush1.bf16.msra.mxu1 %v17255_v62  ;;  %5943 = vmatprep.mubr.f32.mxu1 %v17152_v55  ;;  %v17261_v62 = vld [vmem:[#allocation27_spill] sm:$0xff] }
0x11eb   :  { %14062 = vmatprep.subr.bf16.mxu1 %v17256_v49  ;;  %v17263_v49 = vld [vmem:[#allocation37_spill] sm:$0xff] }
0x11ee   :  { %14064 = vmatpush1.bf16.msra.mxu1 %v17257_v56  ;;  %v17262_v56 = vld [vmem:[#allocation36_spill] sm:$0xff] }
0x11ef   :  { %14066 = vmatprep.subr.bf16.mxu1 %v17258_v24 }
0x11f1   :  { %11402 = vmatmul.mubr.msk.f32.vlgmr.msra.gmra.mrb[70].mxu1 %vm322_vm0, %v11401_v34 }
0x11f2   :  { %14068 = vmatpush1.bf16.msra.mxu1 %v17259_v23  ;;  %6014 = vmatprep.mubr.f32.mxu1 %v17152_v55 }
0x11f3   :  { %14070 = vmatprep.subr.bf16.mxu1 %v17260_v5 }
0x11f6   :  { %14072 = vmatpush1.bf16.msra.mxu1 %v17261_v62 }
0x11f7   :  { %14097 = vmatprep.subr.bf16.mxu1 %v17153_v33 }
0x11f9   :  { %11403 = vmatmul.mubr.msk.f32.vlgmr.msra.gmra.mrb[72].mxu1 %vm322_vm0, %v11401_v34  ;;  %v17265_v34 = vld [vmem:[#allocation39_spill] sm:$0xff] }
0x11fa   :  { %12746 = vmatprep.mubr.msk.f32.mxu1 %vm14963_vm1, %v17152_v55 }
0x11ff   :  { %14099 = vmatpush3.bf16.xpose.msra.mxu1 %v17262_v56 }
0x1200   :  { %14100 = vmatprep.subr.bf16.mxu1 %v17153_v33 }
0x12c4   :  { %v5945_v24 = vpop.f32.mrb[70].mxu1 }
0x12c5   :  { %v6021_v23 = vadd.f32 %v5945_v24, %v17263_v49  ;;  %v5947_v14 = vpop.f32.mrb[71].mxu1 }
0x12c6   :  { %v6022_v22 = vadd.f32 %v5947_v14, %v17264_v36  ;;  %v17267_v36 = vld [vmem:[#allocation44_spill] sm:$0xff] }
0x12c7   :  { %v11404_v5 = vmul.f32 -1.442695, %v6021_v23 }
0x12c8   :  { %v11405_v13 = vmul.f32 -1.442695, %v6022_v22 }
0x12c9   :  { %14807 = vpow2.f32 %v11404_v5 }
0x12ca   :  { %14809 = vpow2.f32 %v11405_v13 }
0x12cc   :  { %v6016_v62 = vpop.f32.mrb[72].mxu1 }
0x12cd   :  { %v6018_v2 = vpop.f32.mrb[73].mxu1  ;;  %v6023_v54 = vadd.f32 %v6016_v62, %v17266_v47 }
0x12ce   :  { %v6024_v31 = vadd.f32 %v6018_v2, %v17265_v34 }
0x12d0   :  { %v11406_v8 = vmul.f32 -1.442695, %v6024_v31 }
0x12d2   :  { %14811 = vpow2.f32 %v11406_v8 }
0x12d3   :  { %v14808_v15 = vpop.eup %14807  ;;  %14813 = vtanh.f32 %v6023_v54 }
0x12d4   :  { %v14810_v9 = vpop.eup %14809  ;;  %v6028_v4 = vadd.f32 1.0, %v14808_v15 }
0x12d5   :  { %v6034_v35 = vadd.f32 1.0, %v14810_v9 }
0x12d6   :  { %14815 = vrcp.f32 %v6028_v4  ;;  %v17269_v4 = vld [vmem:[#allocation42_spill] sm:$0xff] }
0x12d7   :  { %14817 = vrcp.f32 %v6034_v35 }
0x12dc   :  { %v14812_v14 = vpop.eup %14811 }
0x12dd   :  { %v14814_v23 = vpop.eup %14813  ;;  %v6041_v5 = vadd.f32 1.0, %v14812_v14  ;;  %v17270_v14 = vld [vmem:[#allocation43_spill] sm:$0xff] }
0x12df   :  { %14819 = vrcp.f32 %v6041_v5 }
0x12e0   :  { %v14816_v22 = vpop.eup %14815 }
0x12e1   :  { %v14818_v24 = vpop.eup %14817  ;;  %v6045_v13 = vmul.f32 %v14816_v22, %v14814_v23 }
0x12e2   :  { %v6044_v49 = vmul.f32 %v14818_v24, %v17267_v36 }
0x12e4   :  { %v16347_v2 = vadd.f32 %v6045_v13, %v6044_v49 }
0x12e6   :  { %17268 = vst [vmem:[#allocation20_spill] sm:$0xff] %v16347_v2  ;;  %14821 = vtanh.f32 %v16347_v2 }
0x12e9   :  { %v14820_v31 = vpop.eup %14819 }
0x12f0   :  { %v14822_v15 = vpop.eup %14821 }
0x12f1   :  { %v16350_v8 = vmul.f32 %v14822_v15, %v14820_v31 }
0x12f3   :  { %12740 = vmatmul.mubr.f32.vlgmr.msra.gmra.mrb[52].mxu0 %v16350_v8 }
0x12f4   :  { %14105 = vmatpush3.bf16.xpose.msra.mxu0 %v15539_v52  ;;  %12760 = vmatprep.mubr.msk.f32.mxu0 %vm14963_vm1, %v17152_v55 }
0x12f5   :  { %14109 = vmatprep.subr.bf16.mxu0 %v17153_v33 }
0x13c6   :  { %v6115_v35 = vpop.f32.mrb[52].mxu0 }
0x13c7   :  { %v6127_v9 = vrot.slane %v6115_v35, %v17269_v4  ;;  %v12741_v54 = vpop.f32.mrb[53].mxu0  ;;  %v6120_v49 = vcombine.high %v6115_v35, %v6115_v35 }
0x13c9   :  { %v6143_v62 = vrot.slane %v6127_v9, %v17269_v4  ;;  %v6135_v23 = vcombine.high %v6127_v9, %v6127_v9  ;;  %v6134_v22 = vrot.slane %v6120_v49, %v17269_v4 }
0x13cb   :  { %v6165_v36 = vcombine.high %v6143_v62, %v6143_v62  ;;  %12747 = vmatmul.mubr.f32.vlgmr.msra.gmra.mrb[74].mxu1 %v6143_v62  ;;  %v6157_v24 = vrot.slane %v6135_v23, %v17269_v4  ;;  %v6150_v13 = vrot.slane %v6134_v22, %v17269_v4  ;;  %v6136_v15 = vcombine.high %v6134_v22, %v6134_v22 }
0x13cc   :  { %14102 = vmatpush3.bf16.xpose.msra.mxu1 %v17270_v14  ;;  %12753 = vmatprep.mubr.msk.f32.mxu1 %vm14963_vm1, %v17152_v55 }
0x13cd   :  { %12761 = vmatmul.mubr.f32.vlgmr.msra.gmra.mrb[54].mxu0 %v6165_v36  ;;  %14106 = vmatprep.subr.bf16.mxu1 %v17153_v33  ;;  %v6167_v5 = vcombine.high %v6157_v24, %v6157_v24  ;;  %v6166_v31 = vcombine.high %v6150_v13, %v6150_v13  ;;  %v6164_v35 = vrot.slane %v6136_v15, %v17269_v4 }
0x13ce   :  { %14111 = vmatpush3.bf16.xpose.msra.mxu0 %v15568_v6  ;;  %12774 = vmatprep.mubr.msk.f32.mxu0 %vm14963_vm1, %v17152_v55 }
0x13cf   :  { %14115 = vmatprep.subr.bf16.mxu0 %v17153_v33  ;;  %v6168_v9 = vcombine.high %v6164_v35, %v6164_v35 }
0x13d3   :  { %12754 = vmatmul.mubr.f32.vlgmr.msra.gmra.mrb[76].mxu1 %v6157_v24 }
0x13d4   :  { %14108 = vmatpush3.bf16.xpose.msra.mxu1 %v15556_v3  ;;  %12767 = vmatprep.mubr.msk.f32.mxu1 %vm14963_vm1, %v17152_v55 }
0x13d5   :  { %12775 = vmatmul.mubr.f32.vlgmr.msra.gmra.mrb[56].mxu0 %v6150_v13  ;;  %14112 = vmatprep.subr.bf16.mxu1 %v17153_v33 }
0x13d6   :  { %14117 = vmatpush3.bf16.xpose.msra.mxu0 %v15511_v28  ;;  %12788 = vmatprep.mubr.msk.f32.mxu0 %vm14963_vm1, %v17152_v55 }
0x13d7   :  { %14121 = vmatprep.subr.bf16.mxu0 %v17153_v33 }
0x13db   :  { %12768 = vmatmul.mubr.f32.vlgmr.msra.gmra.mrb[78].mxu1 %v6167_v5 }
0x13dc   :  { %14114 = vmatpush3.bf16.xpose.msra.mxu1 %v15580_v38  ;;  %12781 = vmatprep.mubr.msk.f32.mxu1 %vm14963_vm1, %v17152_v55 }
0x13dd   :  { %12789 = vmatmul.mubr.f32.vlgmr.msra.gmra.mrb[58].mxu0 %v6166_v31  ;;  %14118 = vmatprep.subr.bf16.mxu1 %v17153_v33 }
0x13de   :  { %14123 = vmatpush3.bf16.msra.mxu0 %v17262_v56  ;;  %12802 = vmatprep.mubr.msk.f32.mxu0 %vm14963_vm1, %v17152_v55 }
0x13df   :  { %14127 = vmatprep.subr.bf16.mxu0 %v17153_v33 }
0x13e3   :  { %12782 = vmatmul.mubr.f32.vlgmr.msra.gmra.mrb[80].mxu1 %v6164_v35 }
0x13e4   :  { %14120 = vmatpush3.bf16.xpose.msra.mxu1 %v15592_v11  ;;  %12795 = vmatprep.mubr.msk.f32.mxu1 %vm14963_vm1, %v17152_v55 }
0x13e5   :  { %14124 = vmatprep.subr.bf16.mxu1 %v17153_v33 }
0x13eb   :  { %12796 = vmatmul.mubr.f32.vlgmr.msra.gmra.mrb[82].mxu1 %v6168_v9 }
0x13ec   :  { %14126 = vmatpush3.bf16.msra.mxu1 %v17270_v14  ;;  %12809 = vmatprep.mubr.msk.f32.mxu1 %vm14963_vm1, %v17152_v55 }
0x13ed   :  { %14130 = vmatprep.subr.bf16.mxu1 %v17153_v33 }
0x149e   :  { %v6243_v54 = vpop.f32.mrb[74].mxu1 }
0x149f   :  { %v12748_v62 = vpop.f32.mrb[75].mxu1  ;;  %v6737_v49 = vsel %vm1205_vm2, %v6243_v54, -inf }
0x14a0   :  { %6738 = vmax.xlane.f32.xlu0 %v6737_v49  ;;  %v6383_v36 = vpop.f32.mrb[54].mxu0 }
0x14a1   :  { %v12762_v23 = vpop.f32.mrb[55].mxu0  ;;  %v6743_v22 = vsel %vm1205_vm2, %v6383_v36, -inf }
0x14a4   :  { %6744 = vmax.xlane.f32.xlu0 %v6743_v22 }
0x14a6   :  { %v6313_v24 = vpop.f32.mrb[76].mxu1 }
0x14a7   :  { %v12755_v13 = vpop.f32.mrb[77].mxu1  ;;  %v6740_v5 = vsel %vm1205_vm2, %v6313_v24, -inf }
0x14a8   :  { %6741 = vmax.xlane.f32.xlu1 %v6740_v5  ;;  %v6523_v31 = vpop.f32.mrb[56].mxu0 }
0x14a9   :  { %v12776_v15 = vpop.f32.mrb[57].mxu0  ;;  %v6749_v35 = vsel %vm1205_vm2, %v6523_v31, -inf }
0x14aa   :  { %6750 = vmax.xlane.f32.xlu0 %v6749_v35 }
0x14ae   :  { %v6453_v9 = vpop.f32.mrb[78].mxu1 }
0x14af   :  { %v12769_v62 = vpop.f32.mrb[79].mxu1  ;;  %v6746_v14 = vsel %vm1205_vm2, %v6453_v9, -inf }
0x14b0   :  { %6747 = vmax.xlane.f32.xlu1 %v6746_v14  ;;  %v6663_v49 = vpop.f32.mrb[58].mxu0 }
0x14b1   :  { %v12790_v23 = vpop.f32.mrb[59].mxu0  ;;  %v6755_v4 = vsel %vm1205_vm2, %v6663_v49, -inf }
0x14b2   :  { %6756 = vmax.xlane.f32.xlu0 %v6755_v4 }
0x14b6   :  { %v6593_v22 = vpop.f32.mrb[80].mxu1 }
0x14b7   :  { %v12783_v13 = vpop.f32.mrb[81].mxu1  ;;  %v6752_v2 = vsel %vm1205_vm2, %v6593_v22, -inf }
0x14b8   :  { %6753 = vmax.xlane.f32.xlu1 %v6752_v2 }
0x14be   :  { %v6733_v5 = vpop.f32.mrb[82].mxu1 }
0x14bf   :  { %v12797_v15 = vpop.f32.mrb[83].mxu1  ;;  %v6758_v47 = vsel %vm1205_vm2, %v6733_v5, -inf }
0x14c0   :  { %6759 = vmax.xlane.f32.xlu1 %v6758_v47 }
0x152d   :  { %v6739_v35 = vpop.xlane.xlu0 %6738 }
0x152e   :  { %v6761_v62 = vsub.f32 %v6243_v54, %v6739_v35 }
0x1530   :  { %v6769_v34 = vmul.f32 1.442695, %v6761_v62 }
0x1531   :  { %v6745_v56 = vpop.xlane.xlu0 %6744 }
0x1532   :  { %14823 = vpow2.f32 %v6769_v34  ;;  %v6763_v14 = vsub.f32 %v6383_v36, %v6745_v56 }
0x1534   :  { %v6773_v23 = vmul.f32 1.442695, %v6763_v14 }
0x1535   :  { %v6742_v53 = vpop.xlane.xlu1 %6741 }
0x1536   :  { %14825 = vpow2.f32 %v6773_v23  ;;  %v6762_v4 = vsub.f32 %v6313_v24, %v6742_v53 }
0x1537   :  { %v6751_v46 = vpop.xlane.xlu0 %6750 }
0x1538   :  { %v6771_v13 = vmul.f32 1.442695, %v6762_v4  ;;  %v6765_v37 = vsub.f32 %v6523_v31, %v6751_v46 }
0x153a   :  { %14827 = vpow2.f32 %v6771_v13  ;;  %v6777_v2 = vmul.f32 1.442695, %v6765_v37 }
0x153c   :  { %v14824_v27 = vpop.eup %14823  ;;  %14829 = vpow2.f32 %v6777_v2 }
0x153d   :  { %v6748_v15 = vpop.xlane.xlu1 %6747  ;;  %v6785_v47 = vsel %vm1205_vm2, %v14824_v27, 0.0 }
0x153e   :  { %v6764_v32 = vsub.f32 %v6453_v9, %v6748_v15  ;;  %6786 = vadd.xlane.f32.xlu0 %v6785_v47 }
0x153f   :  { %v6757_v54 = vpop.xlane.xlu0 %6756 }
0x1540   :  { %v14826_v35 = vpop.eup %14825  ;;  %v6775_v34 = vmul.f32 1.442695, %v6764_v32  ;;  %v6767_v56 = vsub.f32 %v6663_v49, %v6757_v54 }
0x1541   :  { %v6791_v36 = vsel %vm1205_vm2, %v14826_v35, 0.0 }
0x1542   :  { %14831 = vpow2.f32 %v6775_v34  ;;  %v6781_v53 = vmul.f32 1.442695, %v6767_v56  ;;  %6792 = vadd.xlane.f32.xlu0 %v6791_v36 }
0x1544   :  { %v14828_v24 = vpop.eup %14827  ;;  %14833 = vpow2.f32 %v6781_v53 }
0x1545   :  { %v6754_v46 = vpop.xlane.xlu1 %6753  ;;  %v6788_v37 = vsel %vm1205_vm2, %v14828_v24, 0.0 }
0x1546   :  { %v14830_v31 = vpop.eup %14829  ;;  %v6766_v62 = vsub.f32 %v6593_v22, %v6754_v46  ;;  %6789 = vadd.xlane.f32.xlu1 %v6788_v37 }
0x1547   :  { %v6797_v9 = vsel %vm1205_vm2, %v14830_v31, 0.0 }
0x1548   :  { %v6779_v14 = vmul.f32 1.442695, %v6766_v62  ;;  %6798 = vadd.xlane.f32.xlu0 %v6797_v9 }
0x154a   :  { %14835 = vpow2.f32 %v6779_v14 }
0x154c   :  { %v14832_v32 = vpop.eup %14831 }
0x154d   :  { %v6760_v49 = vpop.xlane.xlu1 %6759  ;;  %v6794_v23 = vsel %vm1205_vm2, %v14832_v32, 0.0 }
0x154e   :  { %v14834_v4 = vpop.eup %14833  ;;  %v6768_v13 = vsub.f32 %v6733_v5, %v6760_v49  ;;  %6795 = vadd.xlane.f32.xlu1 %v6794_v23 }
0x154f   :  { %v6803_v2 = vsel %vm1205_vm2, %v14834_v4, 0.0 }
0x1550   :  { %v6783_v15 = vmul.f32 1.442695, %v6768_v13  ;;  %6804 = vadd.xlane.f32.xlu0 %v6803_v2 }
0x1552   :  { %14837 = vpow2.f32 %v6783_v15 }
0x1554   :  { %v14836_v47 = vpop.eup %14835 }
0x1555   :  { %v6800_v22 = vsel %vm1205_vm2, %v14836_v47, 0.0 }
0x1556   :  { %6801 = vadd.xlane.f32.xlu1 %v6800_v22 }
0x155c   :  { %v16410_v54 = vpop.eup %14837 }
0x155d   :  { %v6806_v34 = vsel %vm1205_vm2, %v16410_v54, 0.0 }
0x155e   :  { %6807 = vadd.xlane.f32.xlu1 %v6806_v34 }
0x15cb   :  { %v6787_v56 = vpop.xlane.xlu0 %6786 }
0x15cc   :  { %14839 = vrcp.f32 %v6787_v56 }
0x15cf   :  { %v6793_v36 = vpop.xlane.xlu0 %6792 }
0x15d0   :  { %14841 = vrcp.f32 %v6793_v36 }
0x15d3   :  { %v6790_v5 = vpop.xlane.xlu1 %6789 }
0x15d4   :  { %14843 = vrcp.f32 %v6790_v5 }
0x15d5   :  { %v6799_v53 = vpop.xlane.xlu0 %6798 }
0x15d6   :  { %v14840_v46 = vpop.eup %14839  ;;  %14845 = vrcp.f32 %v6799_v53 }
0x15d7   :  { %v6817_v37 = vmul.f32 %v14840_v46, %v14824_v27 }
0x15d9   :  { %12803 = vmatmul.mubr.msk.f32.vlgmr.msra.gmra.mrb[60].mxu0 %vm1294_vm3, %v6817_v37 }
0x15da   :  { %v14842_v62 = vpop.eup %14841  ;;  %14129 = vmatpush3.bf16.msra.mxu0 %v15539_v52  ;;  %12816 = vmatprep.mubr.msk.f32.mxu0 %vm14963_vm1, %v17152_v55 }
0x15db   :  { %v6819_v9 = vmul.f32 %v14842_v62, %v14826_v35  ;;  %v6796_v14 = vpop.xlane.xlu1 %6795  ;;  %14133 = vmatprep.subr.bf16.mxu0 %v17153_v33 }
0x15dc   :  { %14847 = vrcp.f32 %v6796_v14 }
0x15dd   :  { %v6805_v49 = vpop.xlane.xlu0 %6804  ;;  %12817 = vmatmul.mubr.msk.f32.vlgmr.msra.gmra.mrb[62].mxu0 %vm1294_vm3, %v6819_v9 }
0x15de   :  { %v14844_v23 = vpop.eup %14843  ;;  %14849 = vrcp.f32 %v6805_v49  ;;  %14135 = vmatpush3.bf16.msra.mxu0 %v15568_v6  ;;  %12830 = vmatprep.mubr.msk.f32.mxu0 %vm14963_vm1, %v17152_v55 }
0x15df   :  { %v6818_v27 = vmul.f32 %v14844_v23, %v14828_v24  ;;  %14139 = vmatprep.subr.bf16.mxu0 %v17153_v33 }
0x15e0   :  { %v14846_v13 = vpop.eup %14845 }
0x15e1   :  { %v6821_v2 = vmul.f32 %v14846_v13, %v14830_v31  ;;  %12810 = vmatmul.mubr.msk.f32.vlgmr.msra.gmra.mrb[84].mxu1 %vm1294_vm3, %v6818_v27 }
0x15e2   :  { %14132 = vmatpush3.bf16.msra.mxu1 %v15556_v3  ;;  %12823 = vmatprep.mubr.msk.f32.mxu1 %vm14963_vm1, %v17152_v55 }
0x15e3   :  { %v6802_v35 = vpop.xlane.xlu1 %6801  ;;  %12831 = vmatmul.mubr.msk.f32.vlgmr.msra.gmra.mrb[64].mxu0 %vm1294_vm3, %v6821_v2  ;;  %14136 = vmatprep.subr.bf16.mxu1 %v17153_v33 }
0x15e4   :  { %14851 = vrcp.f32 %v6802_v35  ;;  %14141 = vmatpush3.bf16.msra.mxu0 %v15511_v28  ;;  %12844 = vmatprep.mubr.msk.f32.mxu0 %vm14963_vm1, %v17152_v55 }
0x15e5   :  { %14145 = vmatprep.subr.bf16.mxu0 %v17153_v33 }
0x15e6   :  { %v14848_v24 = vpop.eup %14847 }
0x15e7   :  { %v6820_v31 = vmul.f32 %v14848_v24, %v14832_v32 }
0x15e8   :  { %v14850_v15 = vpop.eup %14849 }
0x15e9   :  { %v6823_v22 = vmul.f32 %v14850_v15, %v14834_v4  ;;  %12824 = vmatmul.mubr.msk.f32.vlgmr.msra.gmra.mrb[86].mxu1 %vm1294_vm3, %v6820_v31 }
0x15ea   :  { %14138 = vmatpush3.bf16.msra.mxu1 %v15580_v38  ;;  %12837 = vmatprep.mubr.msk.f32.mxu1 %vm14963_vm1, %v17152_v55 }
0x15eb   :  { %v6808_v34 = vpop.xlane.xlu1 %6807  ;;  %12845 = vmatmul.mubr.msk.f32.vlgmr.msra.gmra.mrb[66].mxu0 %vm1294_vm3, %v6823_v22  ;;  %14142 = vmatprep.subr.bf16.mxu1 %v17153_v33 }
0x15ec   :  { %14853 = vrcp.f32 %v6808_v34  ;;  %14147 = vmatpush3.bf16.msra.mxu0 %v15655_v50  ;;  %12886 = vmatprep.mubr.msk.f32.mxu0 %vm14963_vm1, %v17152_v55 }
0x15ed   :  { %14148 = vmatprep.subr.bf16.mxu0 %v17153_v33 }
0x15ee   :  { %v14852_v32 = vpop.eup %14851 }
0x15ef   :  { %v6822_v4 = vmul.f32 %v14852_v32, %v14836_v47 }
0x15f0   :  { %14150 = vmatpush3.bf16.msra.mxu0 %v15666_v58 }
0x15f1   :  { %12838 = vmatmul.mubr.msk.f32.vlgmr.msra.gmra.mrb[88].mxu1 %vm1294_vm3, %v6822_v4  ;;  %14151 = vmatprep.subr.bf16.mxu0 %v17153_v33 }
0x15f2   :  { %14144 = vmatpush3.bf16.msra.mxu1 %v15592_v11  ;;  %12851 = vmatprep.mubr.msk.f32.mxu1 %vm14963_vm1, %v17152_v55 }
0x15f3   :  { %14194 = vmatprep.subr.bf16.mxu1 %v15063_v17 }
0x15f4   :  { %14153 = vmatpush3.bf16.msra.mxu0 %v15681_v1 }
0x15f5   :  { %14154 = vmatprep.subr.bf16.mxu0 %v17153_v33 }
0x15f6   :  { %v14854_v56 = vpop.eup %14853 }
0x15f7   :  { %v6824_v47 = vmul.f32 %v14854_v56, %v16410_v54  ;;  %v17272_v54 = vld [vmem:[#allocation49_spill] sm:$0xff] }
0x15f8   :  { %14156 = vmatpush3.bf16.msra.mxu0 %v15694_v0 }
0x15f9   :  { %12852 = vmatmul.mubr.msk.f32.vlgmr.msra.gmra.mrb[90].mxu1 %vm1294_vm3, %v6824_v47  ;;  %14157 = vmatprep.subr.bf16.mxu0 %v17153_v33 }
0x15fa   :  { %14196 = vmatpush1.bf16.msra.mxu1 %v15065_v18  ;;  %7639 = vmatprep.mubr.f32.mxu1 %v17152_v55 }
0x15fb   :  { %14198 = vmatprep.subr.bf16.mxu1 %v15089_v26 }
0x15fc   :  { %14159 = vmatpush3.bf16.msra.mxu0 %v15706_v41 }
0x15fd   :  { %14160 = vmatprep.subr.bf16.mxu0 %v17153_v33 }
0x15fe   :  { %14200 = vmatpush1.bf16.msra.mxu1 %v15101_v30 }
0x15ff   :  { %14202 = vmatprep.subr.bf16.mxu1 %v15128_v39 }
0x1600   :  { %14162 = vmatpush3.bf16.msra.mxu0 %v15719_v63 }
0x1601   :  { %14163 = vmatprep.subr.bf16.mxu0 %v17153_v33 }
0x1602   :  { %14204 = vmatpush1.bf16.msra.mxu1 %v15143_v44 }
0x1603   :  { %14206 = vmatprep.subr.bf16.mxu1 %v15155_v48 }
0x1604   :  { %14165 = vmatpush3.bf16.msra.mxu0 %v15731_v19 }
0x1605   :  { %14166 = vmatprep.subr.bf16.mxu0 %v17153_v33 }
0x1606   :  { %14208 = vmatpush1.bf16.msra.mxu1 %v15182_v57 }
0x1607   :  { %14210 = vmatprep.subr.bf16.mxu1 %v15191_v60 }
0x1608   :  { %14168 = vmatpush3.bf16.msra.mxu0 %v15743_v40 }
0x1609   :  { %14169 = vmatprep.subr.bf16.mxu0 %v17153_v33 }
0x160a   :  { %14212 = vmatpush1.bf16.msra.mxu1 %v15218_v7 }
0x160b   :  { %12887 = vmatmul.mubr.f32.vlgmr.msra.gmra.mrb[68].mxu0 %v16350_v8  ;;  %14214 = vmatprep.subr.bf16.mxu1 %v15227_v12  ;;  %v17271_v8 = vld [vmem:[#allocation48_spill] sm:$0xff] }
0x160c   :  { %14171 = vmatpush3.bf16.msra.mxu0 %v15767_v10  ;;  %12921 = vmatprep.mubr.msk.f32.mxu0 %vm14963_vm1, %v17152_v55 }
0x160d   :  { %14172 = vmatprep.subr.bf16.mxu0 %v17153_v33 }
0x160e   :  { %14216 = vmatpush1.bf16.msra.mxu1 %v15254_v25 }
0x160f   :  { %14218 = vmatprep.subr.bf16.mxu1 %v15263_v29 }
0x1610   :  { %14174 = vmatpush3.bf16.msra.mxu0 %v15777_v21 }
0x1611   :  { %14175 = vmatprep.subr.bf16.mxu0 %v17153_v33 }
0x1612   :  { %14220 = vmatpush1.bf16.msra.mxu1 %v15290_v42 }
0x1613   :  { %14222 = vmatprep.subr.bf16.mxu1 %v15296_v45 }
0x1614   :  { %14177 = vmatpush3.bf16.msra.mxu0 %v17187_v43 }
0x1615   :  { %14178 = vmatprep.subr.bf16.mxu0 %v17153_v33 }
0x1616   :  { %14224 = vmatpush1.bf16.msra.mxu1 %v17188_v61 }
0x1617   :  { %14226 = vmatprep.subr.bf16.mxu1 %v17189_v59 }
0x1618   :  { %14180 = vmatpush3.bf16.msra.mxu0 %v17190_v20 }
0x1619   :  { %14181 = vmatprep.subr.bf16.mxu0 %v17153_v33 }
0x161c   :  { %14183 = vmatpush3.bf16.msra.mxu0 %v17191_v16 }
0x161d   :  { %14184 = vmatprep.subr.bf16.mxu0 %v17153_v33 }
0x1620   :  { %14186 = vmatpush3.bf16.msra.mxu0 %v17229_v51 }
0x1621   :  { %14187 = vmatprep.subr.bf16.mxu0 %v17153_v33 }
0x1624   :  { %14189 = vmatpush3.bf16.msra.mxu0 %v17271_v8 }
0x1625   :  { %14190 = vmatprep.subr.bf16.mxu0 %v17153_v33 }
0x1628   :  { %14192 = vmatpush3.bf16.msra.mxu0 %v17272_v54 }
0x1629   :  { %14273 = vmatprep.subr.bf16.mxu0 %v17153_v33 }
0x16ac   :  { %v6894_v36 = vpop.f32.mrb[60].mxu0 }
0x16ad   :  { %v12804_v5 = vpop.f32.mrb[61].mxu0 }
0x16b0   :  { %v7040_v53 = vpop.f32.mrb[62].mxu0 }
0x16b1   :  { %v12818_v46 = vpop.f32.mrb[63].mxu0  ;;  %v7489_v14 = vrot.slane %v7040_v53, 6 }
0x16b4   :  { %v6967_v37 = vpop.f32.mrb[84].mxu1 }
0x16b5   :  { %v7487_v62 = vrot.slane %v6967_v37, 7  ;;  %v12811_v9 = vpop.f32.mrb[85].mxu1 }
0x16b6   :  { %v7186_v49 = vpop.f32.mrb[64].mxu0 }
0x16b7   :  { %v7488_v23 = vsel %vm1958_vm4, %v7487_v62, %v6894_v36  ;;  %v12832_v27 = vpop.f32.mrb[65].mxu0  ;;  %v7493_v31 = vrot.slane %v7186_v49, 4  ;;  %v17274_v49 = vld [vmem:[#allocation29_spill] sm:$0xff] }
0x16b8   :  { %v7490_v13 = vsel %vm1961_vm5, %v7489_v14, %v7488_v23  ;;  %v17273_v14 = vld [vmem:[#allocation28_spill] sm:$0xff]  ;;  %v17275_v23 = vld [vmem:[#allocation30_spill] sm:$0xff]  ;;  %v17276_v27 = vld [vmem:[#allocation31_spill] sm:$0xff] }
0x16bc   :  { %v7113_v2 = vpop.f32.mrb[86].mxu1 }
0x16bd   :  { %v7491_v35 = vrot.slane %v7113_v2, 5  ;;  %v12825_v24 = vpop.f32.mrb[87].mxu1  ;;  %v17278_v2 = vld [vmem:[#allocation33_spill] sm:$0xff] }
0x16be   :  { %v7332_v15 = vpop.f32.mrb[66].mxu0  ;;  %v17280_v24 = vld [vmem:[#allocation35_spill] sm:$0xff] }
0x16bf   :  { %v7492_v22 = vsel %vm1964_vm6, %v7491_v35, %v7490_v13  ;;  %v12846_v34 = vpop.f32.mrb[67].mxu0  ;;  %v7497_v5 = vrot.slane %v7332_v15, 2  ;;  %v17277_v13 = vld [vmem:[#allocation32_spill] sm:$0xff]  ;;  %v17279_v35 = vld [vmem:[#allocation34_spill] sm:$0xff] }
0x16c0   :  { %v7494_v32 = vsel %vm1967_vm7, %v7493_v31, %v7492_v22  ;;  %v17281_v34 = vld [vmem:[#allocation4_spill] sm:$0xff] }
0x16c4   :  { %v7259_v4 = vpop.f32.mrb[88].mxu1 }
0x16c5   :  { %v7495_v56 = vrot.slane %v7259_v4, 3  ;;  %v12839_v47 = vpop.f32.mrb[89].mxu1  ;;  %v17283_v4 = vld [vmem:[#allocation6_spill] sm:$0xff] }
0x16c6   :  { %v17285_v47 = vld [vmem:[#allocation8_spill] sm:$0xff] }
0x16c7   :  { %v7496_v53 = vsel %vm1970_vm8, %v7495_v56, %v7494_v32  ;;  %v17282_v32 = vld [vmem:[#allocation5_spill] sm:$0xff]  ;;  %v17284_v56 = vld [vmem:[#allocation7_spill] sm:$0xff] }
0x16c8   :  { %v7498_v36 = vsel %vm1973_vm9, %v7497_v5, %v7496_v53  ;;  %v17286_v5 = vld [vmem:[#allocation9_spill] sm:$0xff]  ;;  %v17287_v53 = vld [vmem:[#allocation10_spill] sm:$0xff] }
0x16cc   :  { %v7405_v46 = vpop.f32.mrb[90].mxu1 }
0x16cd   :  { %v7499_v37 = vrot.slane %v7405_v46, 1  ;;  %v12853_v62 = vpop.f32.mrb[91].mxu1  ;;  %v17289_v46 = vld [vmem:[#allocation12_spill] sm:$0xff] }
0x16ce   :  { %v17291_v62 = vld [vmem:[#allocation14_spill] sm:$0xff] }
0x16cf   :  { %v7500_v9 = vsel %vm1976_vm10, %v7499_v37, %v7498_v36  ;;  %v17288_v36 = vld [vmem:[#allocation11_spill] sm:$0xff]  ;;  %v17290_v37 = vld [vmem:[#allocation13_spill] sm:$0xff] }
0x16d0   :  { %12922 = vmatmul.mubr.f32.vlgmr.msra.gmra.mrb[68].mxu0 %v7500_v9  ;;  %v17292_v9 = vld [vmem:[#allocation15_spill] sm:$0xff] }
0x16d1   :  { %14275 = vmatpush3.bf16.msra.mxu0 %v17273_v14  ;;  %12956 = vmatprep.mubr.msk.f32.mxu0 %vm14963_vm1, %v17152_v55 }
0x16d2   :  { %14276 = vmatprep.subr.bf16.mxu0 %v17153_v33 }
0x16d5   :  { %14278 = vmatpush3.bf16.msra.mxu0 %v17274_v49 }
0x16d6   :  { %14279 = vmatprep.subr.bf16.mxu0 %v17153_v33 }
0x16d9   :  { %14281 = vmatpush3.bf16.msra.mxu0 %v17275_v23 }
0x16da   :  { %14282 = vmatprep.subr.bf16.mxu0 %v17153_v33 }
0x16dd   :  { %14284 = vmatpush3.bf16.msra.mxu0 %v17276_v27 }
0x16de   :  { %14285 = vmatprep.subr.bf16.mxu0 %v17153_v33 }
0x16e1   :  { %14287 = vmatpush3.bf16.msra.mxu0 %v17277_v13 }
0x16e2   :  { %14288 = vmatprep.subr.bf16.mxu0 %v17153_v33 }
0x16e5   :  { %14290 = vmatpush3.bf16.msra.mxu0 %v17278_v2 }
0x16e6   :  { %14291 = vmatprep.subr.bf16.mxu0 %v17153_v33 }
0x16e9   :  { %14293 = vmatpush3.bf16.msra.mxu0 %v17279_v35 }
0x16ea   :  { %14294 = vmatprep.subr.bf16.mxu0 %v17153_v33 }
0x16ed   :  { %14296 = vmatpush3.bf16.msra.mxu0 %v17280_v24 }
0x16ee   :  { %14303 = vmatprep.subr.bf16.mxu0 %v17153_v33 }
0x17a3   :  { %v7568_v31 = vpop.f32.mrb[68].mxu0 }
0x17a4   :  { %14855 = vtanh.f32 %v7568_v31  ;;  %v12923_v15 = vpop.f32.mrb[69].mxu0  ;;  %v17293_v31 = vld [vmem:[#allocation16_spill] sm:$0xff] }
0x17a5   :  { %v17294_v15 = vld [vmem:[#allocation17_spill] sm:$0xff] }
0x17ae   :  { %v14856_v22 = vpop.eup %14855 }
0x17af   :  { %7640 = vmatmul.mubr.f32.vlgmr.msra.gmra.mrb[92].mxu1 %v14856_v22 }
0x17b0   :  { %14228 = vmatpush1.bf16.msra.mxu1 %v17281_v34  ;;  %7710 = vmatprep.mubr.f32.mxu1 %v17152_v55  ;;  %v17308_v34 = vld [vmem:[#allocation40_spill] sm:$0xff] }
0x17b1   :  { %14230 = vmatprep.subr.bf16.mxu1 %v17282_v32 }
0x17b4   :  { %14232 = vmatpush1.bf16.msra.mxu1 %v17283_v4 }
0x17b5   :  { %14234 = vmatprep.subr.bf16.mxu1 %v17284_v56  ;;  %v17295_v56 = vld [vmem:[#allocation18_spill] sm:$0xff] }
0x17b8   :  { %14236 = vmatpush1.bf16.msra.mxu1 %v17285_v47  ;;  %v17296_v47 = vld [vmem:[#allocation19_spill] sm:$0xff] }
0x17b9   :  { %14238 = vmatprep.subr.bf16.mxu1 %v17286_v5 }
0x17bc   :  { %14240 = vmatpush1.bf16.msra.mxu1 %v17287_v53  ;;  %v17297_v53 = vld [vmem:[#allocation21_spill] sm:$0xff] }
0x17bd   :  { %14242 = vmatprep.subr.bf16.mxu1 %v17288_v36 }
0x17c0   :  { %14244 = vmatpush1.bf16.msra.mxu1 %v17289_v46  ;;  %v17298_v46 = vld [vmem:[#allocation22_spill] sm:$0xff] }
0x17c1   :  { %14246 = vmatprep.subr.bf16.mxu1 %v17290_v37  ;;  %v17299_v37 = vld [vmem:[#allocation23_spill] sm:$0xff] }
0x17c4   :  { %14248 = vmatpush1.bf16.msra.mxu1 %v17291_v62 }
0x17c5   :  { %14250 = vmatprep.subr.bf16.mxu1 %v17292_v9  ;;  %v11415_v9 = vld [vmem:[%s16992_s0 + $0x20] sm:$0xff] }
0x17c8   :  { %14252 = vmatpush1.bf16.msra.mxu1 %v17293_v31  ;;  %v17300_v31 = vld [vmem:[#allocation24_spill] sm:$0xff] }
0x17c9   :  { %14254 = vmatprep.subr.bf16.mxu1 %v17294_v15  ;;  %v17306_v15 = vld [vmem:[#allocation38_spill] sm:$0xff] }
0x17cc   :  { %14256 = vmatpush1.bf16.msra.mxu1 %v17295_v56  ;;  %v17301_v56 = vld [vmem:[#allocation25_spill] sm:$0xff] }
0x17cd   :  { %14258 = vmatprep.subr.bf16.mxu1 %v17296_v47 }
0x17cf   :  { %7711 = vmatmul.mubr.f32.vlgmr.msra.gmra.mrb[94].mxu1 %v14856_v22  ;;  %v17302_v22 = vld [vmem:[#allocation26_spill] sm:$0xff] }
0x17d0   :  { %14260 = vmatpush1.bf16.msra.mxu1 %v17297_v53  ;;  %7784 = vmatprep.mubr.f32.mxu1 %v17152_v55  ;;  %v17303_v53 = vld [vmem:[#allocation27_spill] sm:$0xff] }
0x17d1   :  { %14262 = vmatprep.subr.bf16.mxu1 %v17298_v46  ;;  %v17305_v46 = vld [vmem:[#allocation37_spill] sm:$0xff] }
0x17d4   :  { %14264 = vmatpush1.bf16.msra.mxu1 %v17299_v37  ;;  %v17304_v37 = vld [vmem:[#allocation36_spill] sm:$0xff] }
0x17d5   :  { %14266 = vmatprep.subr.bf16.mxu1 %v17300_v31 }
0x17d7   :  { %11416 = vmatmul.mubr.msk.f32.vlgmr.msra.gmra.mrb[92].mxu1 %vm322_vm0, %v11415_v9 }
0x17d8   :  { %14268 = vmatpush1.bf16.msra.mxu1 %v17301_v56  ;;  %7855 = vmatprep.mubr.f32.mxu1 %v17152_v55 }
0x17d9   :  { %14270 = vmatprep.subr.bf16.mxu1 %v17302_v22 }
0x17dc   :  { %14272 = vmatpush1.bf16.msra.mxu1 %v17303_v53 }
0x17dd   :  { %14297 = vmatprep.subr.bf16.mxu1 %v17153_v33 }
0x17df   :  { %11417 = vmatmul.mubr.msk.f32.vlgmr.msra.gmra.mrb[94].mxu1 %vm322_vm0, %v11415_v9  ;;  %v17307_v9 = vld [vmem:[#allocation39_spill] sm:$0xff] }
0x17e0   :  { %12963 = vmatprep.mubr.msk.f32.mxu1 %vm14963_vm1, %v17152_v55 }
0x17e5   :  { %14299 = vmatpush3.bf16.xpose.msra.mxu1 %v17304_v37 }
0x17e6   :  { %14300 = vmatprep.subr.bf16.mxu1 %v17153_v33 }
0x18aa   :  { %v7786_v31 = vpop.f32.mrb[92].mxu1 }
0x18ab   :  { %v7862_v56 = vadd.f32 %v7786_v31, %v17305_v46  ;;  %v7788_v47 = vpop.f32.mrb[93].mxu1 }
0x18ac   :  { %v7863_v62 = vadd.f32 %v7788_v47, %v17306_v15  ;;  %v17309_v15 = vld [vmem:[#allocation20_spill] sm:$0xff] }
0x18ad   :  { %v11418_v22 = vmul.f32 -1.442695, %v7862_v56 }
0x18ae   :  { %v11419_v36 = vmul.f32 -1.442695, %v7863_v62 }
0x18af   :  { %14857 = vpow2.f32 %v11418_v22 }
0x18b0   :  { %14859 = vpow2.f32 %v11419_v36 }
0x18b2   :  { %v7857_v53 = vpop.f32.mrb[94].mxu1 }
0x18b3   :  { %v7859_v5 = vpop.f32.mrb[95].mxu1  ;;  %v7864_v24 = vadd.f32 %v7857_v53, %v17308_v34 }
0x18b4   :  { %v7865_v4 = vadd.f32 %v7859_v5, %v17307_v9 }
0x18b6   :  { %v11420_v32 = vmul.f32 -1.442695, %v7865_v4 }
0x18b8   :  { %14861 = vpow2.f32 %v11420_v32 }
0x18b9   :  { %v14858_v35 = vpop.eup %14857  ;;  %14863 = vtanh.f32 %v7864_v24 }
0x18ba   :  { %v14860_v2 = vpop.eup %14859  ;;  %v7869_v13 = vadd.f32 1.0, %v14858_v35 }
0x18bb   :  { %v7875_v27 = vadd.f32 1.0, %v14860_v2 }
0x18bc   :  { %14865 = vrcp.f32 %v7869_v13  ;;  %v17311_v13 = vld [vmem:[#allocation42_spill] sm:$0xff] }
0x18bd   :  { %14867 = vrcp.f32 %v7875_v27 }
0x18c2   :  { %v14862_v47 = vpop.eup %14861 }
0x18c3   :  { %v14864_v56 = vpop.eup %14863  ;;  %v7882_v22 = vadd.f32 1.0, %v14862_v47  ;;  %v17312_v47 = vld [vmem:[#allocation43_spill] sm:$0xff] }
0x18c5   :  { %14869 = vrcp.f32 %v7882_v22 }
0x18c6   :  { %v14866_v62 = vpop.eup %14865 }
0x18c7   :  { %v14868_v31 = vpop.eup %14867  ;;  %v7886_v36 = vmul.f32 %v14866_v62, %v14864_v56 }
0x18c8   :  { %v7885_v46 = vmul.f32 %v14868_v31, %v17309_v15 }
0x18ca   :  { %v16567_v5 = vadd.f32 %v7886_v36, %v7885_v46 }
0x18cc   :  { %17310 = vst [vmem:[#allocation3_spill] sm:$0xff] %v16567_v5  ;;  %14871 = vtanh.f32 %v16567_v5 }
0x18cf   :  { %v14870_v4 = vpop.eup %14869 }
0x18d6   :  { %v14872_v35 = vpop.eup %14871 }
0x18d7   :  { %v16570_v32 = vmul.f32 %v14872_v35, %v14870_v4 }
0x18d9   :  { %12957 = vmatmul.mubr.f32.vlgmr.msra.gmra.mrb[70].mxu0 %v16570_v32 }
0x18da   :  { %14305 = vmatpush3.bf16.xpose.msra.mxu0 %v15539_v52  ;;  %12977 = vmatprep.mubr.msk.f32.mxu0 %vm14963_vm1, %v17152_v55 }
0x18db   :  { %14309 = vmatprep.subr.bf16.mxu0 %v17153_v33 }
0x19ac   :  { %v7956_v27 = vpop.f32.mrb[70].mxu0 }
0x19ad   :  { %v7968_v2 = vrot.slane %v7956_v27, %v17311_v13  ;;  %v12958_v24 = vpop.f32.mrb[71].mxu0  ;;  %v7961_v46 = vcombine.high %v7956_v27, %v7956_v27 }
0x19af   :  { %v7984_v53 = vrot.slane %v7968_v2, %v17311_v13  ;;  %v7976_v56 = vcombine.high %v7968_v2, %v7968_v2  ;;  %v7975_v62 = vrot.slane %v7961_v46, %v17311_v13 }
0x19b1   :  { %v8006_v15 = vcombine.high %v7984_v53, %v7984_v53  ;;  %12964 = vmatmul.mubr.f32.vlgmr.msra.gmra.mrb[96].mxu1 %v7984_v53  ;;  %v7998_v31 = vrot.slane %v7976_v56, %v17311_v13  ;;  %v7991_v36 = vrot.slane %v7975_v62, %v17311_v13  ;;  %v7977_v35 = vcombine.high %v7975_v62, %v7975_v62 }
0x19b2   :  { %14302 = vmatpush3.bf16.xpose.msra.mxu1 %v17312_v47  ;;  %12970 = vmatprep.mubr.msk.f32.mxu1 %vm14963_vm1, %v17152_v55 }
0x19b3   :  { %12978 = vmatmul.mubr.f32.vlgmr.msra.gmra.mrb[72].mxu0 %v8006_v15  ;;  %14306 = vmatprep.subr.bf16.mxu1 %v17153_v33  ;;  %v8008_v22 = vcombine.high %v7998_v31, %v7998_v31  ;;  %v8007_v4 = vcombine.high %v7991_v36, %v7991_v36  ;;  %v8005_v27 = vrot.slane %v7977_v35, %v17311_v13 }
0x19b4   :  { %14311 = vmatpush3.bf16.xpose.msra.mxu0 %v15568_v6  ;;  %12991 = vmatprep.mubr.msk.f32.mxu0 %vm14963_vm1, %v17152_v55 }
0x19b5   :  { %14315 = vmatprep.subr.bf16.mxu0 %v17153_v33  ;;  %v8009_v2 = vcombine.high %v8005_v27, %v8005_v27 }
0x19b9   :  { %12971 = vmatmul.mubr.f32.vlgmr.msra.gmra.mrb[98].mxu1 %v7998_v31 }
0x19ba   :  { %14308 = vmatpush3.bf16.xpose.msra.mxu1 %v15556_v3  ;;  %12984 = vmatprep.mubr.msk.f32.mxu1 %vm14963_vm1, %v17152_v55 }
0x19bb   :  { %12992 = vmatmul.mubr.f32.vlgmr.msra.gmra.mrb[74].mxu0 %v7991_v36  ;;  %14312 = vmatprep.subr.bf16.mxu1 %v17153_v33 }
0x19bc   :  { %14317 = vmatpush3.bf16.xpose.msra.mxu0 %v15511_v28  ;;  %13005 = vmatprep.mubr.msk.f32.mxu0 %vm14963_vm1, %v17152_v55 }
0x19bd   :  { %14321 = vmatprep.subr.bf16.mxu0 %v17153_v33 }
0x19c1   :  { %12985 = vmatmul.mubr.f32.vlgmr.msra.gmra.mrb[100].mxu1 %v8008_v22 }
0x19c2   :  { %14314 = vmatpush3.bf16.xpose.msra.mxu1 %v15580_v38  ;;  %12998 = vmatprep.mubr.msk.f32.mxu1 %vm14963_vm1, %v17152_v55 }
0x19c3   :  { %13006 = vmatmul.mubr.f32.vlgmr.msra.gmra.mrb[76].mxu0 %v8007_v4  ;;  %14318 = vmatprep.subr.bf16.mxu1 %v17153_v33 }
0x19c4   :  { %14323 = vmatpush3.bf16.msra.mxu0 %v17304_v37  ;;  %13019 = vmatprep.mubr.msk.f32.mxu0 %vm14963_vm1, %v17152_v55 }
0x19c5   :  { %14327 = vmatprep.subr.bf16.mxu0 %v17153_v33 }
0x19c9   :  { %12999 = vmatmul.mubr.f32.vlgmr.msra.gmra.mrb[102].mxu1 %v8005_v27 }
0x19ca   :  { %14320 = vmatpush3.bf16.xpose.msra.mxu1 %v15592_v11  ;;  %13012 = vmatprep.mubr.msk.f32.mxu1 %vm14963_vm1, %v17152_v55 }
0x19cb   :  { %14324 = vmatprep.subr.bf16.mxu1 %v17153_v33 }
0x19d1   :  { %13013 = vmatmul.mubr.f32.vlgmr.msra.gmra.mrb[104].mxu1 %v8009_v2 }
0x19d2   :  { %14326 = vmatpush3.bf16.msra.mxu1 %v17312_v47  ;;  %13026 = vmatprep.mubr.msk.f32.mxu1 %vm14963_vm1, %v17152_v55 }
0x19d3   :  { %14330 = vmatprep.subr.bf16.mxu1 %v17153_v33 }
0x1a84   :  { %v8084_v24 = vpop.f32.mrb[96].mxu1 }
0x1a85   :  { %v12965_v53 = vpop.f32.mrb[97].mxu1  ;;  %v8578_v46 = vsel %vm1205_vm2, %v8084_v24, -inf }
0x1a86   :  { %8579 = vmax.xlane.f32.xlu0 %v8578_v46  ;;  %v8224_v15 = vpop.f32.mrb[72].mxu0 }
0x1a87   :  { %v12979_v56 = vpop.f32.mrb[73].mxu0  ;;  %v8584_v62 = vsel %vm1205_vm2, %v8224_v15, -inf }
0x1a8a   :  { %8585 = vmax.xlane.f32.xlu0 %v8584_v62 }
0x1a8c   :  { %v8154_v31 = vpop.f32.mrb[98].mxu1 }
0x1a8d   :  { %v12972_v36 = vpop.f32.mrb[99].mxu1  ;;  %v8581_v22 = vsel %vm1205_vm2, %v8154_v31, -inf }
0x1a8e   :  { %8582 = vmax.xlane.f32.xlu1 %v8581_v22  ;;  %v8364_v4 = vpop.f32.mrb[74].mxu0 }
0x1a8f   :  { %v12993_v35 = vpop.f32.mrb[75].mxu0  ;;  %v8590_v27 = vsel %vm1205_vm2, %v8364_v4, -inf }
0x1a90   :  { %8591 = vmax.xlane.f32.xlu0 %v8590_v27 }
0x1a94   :  { %v8294_v2 = vpop.f32.mrb[100].mxu1 }
0x1a95   :  { %v12986_v53 = vpop.f32.mrb[101].mxu1  ;;  %v8587_v47 = vsel %vm1205_vm2, %v8294_v2, -inf }
0x1a96   :  { %8588 = vmax.xlane.f32.xlu1 %v8587_v47  ;;  %v8504_v46 = vpop.f32.mrb[76].mxu0 }
0x1a97   :  { %v13007_v56 = vpop.f32.mrb[77].mxu0  ;;  %v8596_v13 = vsel %vm1205_vm2, %v8504_v46, -inf }
0x1a98   :  { %8597 = vmax.xlane.f32.xlu0 %v8596_v13 }
0x1a9c   :  { %v8434_v62 = vpop.f32.mrb[102].mxu1 }
0x1a9d   :  { %v13000_v36 = vpop.f32.mrb[103].mxu1  ;;  %v8593_v5 = vsel %vm1205_vm2, %v8434_v62, -inf }
0x1a9e   :  { %8594 = vmax.xlane.f32.xlu1 %v8593_v5 }
0x1aa4   :  { %v8574_v22 = vpop.f32.mrb[104].mxu1 }
0x1aa5   :  { %v13014_v35 = vpop.f32.mrb[105].mxu1  ;;  %v8599_v34 = vsel %vm1205_vm2, %v8574_v22, -inf }
0x1aa6   :  { %8600 = vmax.xlane.f32.xlu1 %v8599_v34 }
0x1b13   :  { %v8580_v27 = vpop.xlane.xlu0 %8579 }
0x1b14   :  { %v8602_v53 = vsub.f32 %v8084_v24, %v8580_v27 }
0x1b16   :  { %v8610_v9 = vmul.f32 1.442695, %v8602_v53 }
0x1b17   :  { %v8586_v37 = vpop.xlane.xlu0 %8585 }
0x1b18   :  { %14873 = vpow2.f32 %v8610_v9  ;;  %v8604_v47 = vsub.f32 %v8224_v15, %v8586_v37 }
0x1b1a   :  { %v8614_v56 = vmul.f32 1.442695, %v8604_v47 }
0x1b1b   :  { %v8583_v23 = vpop.xlane.xlu1 %8582 }
0x1b1c   :  { %14875 = vpow2.f32 %v8614_v56  ;;  %v8603_v13 = vsub.f32 %v8154_v31, %v8583_v23 }
0x1b1d   :  { %v8592_v49 = vpop.xlane.xlu0 %8591 }
0x1b1e   :  { %v8612_v36 = vmul.f32 1.442695, %v8603_v13  ;;  %v8606_v14 = vsub.f32 %v8364_v4, %v8592_v49 }
0x1b20   :  { %14877 = vpow2.f32 %v8612_v36  ;;  %v8618_v5 = vmul.f32 1.442695, %v8606_v14 }
0x1b22   :  { %v14874_v54 = vpop.eup %14873  ;;  %14879 = vpow2.f32 %v8618_v5 }
0x1b23   :  { %v8589_v35 = vpop.xlane.xlu1 %8588  ;;  %v8626_v34 = vsel %vm1205_vm2, %v14874_v54, 0.0 }
0x1b24   :  { %v8605_v8 = vsub.f32 %v8294_v2, %v8589_v35  ;;  %8627 = vadd.xlane.f32.xlu0 %v8626_v34 }
0x1b25   :  { %v8598_v24 = vpop.xlane.xlu0 %8597 }
0x1b26   :  { %v14876_v27 = vpop.eup %14875  ;;  %v8616_v9 = vmul.f32 1.442695, %v8605_v8  ;;  %v8608_v37 = vsub.f32 %v8504_v46, %v8598_v24 }
0x1b27   :  { %v8632_v15 = vsel %vm1205_vm2, %v14876_v27, 0.0 }
0x1b28   :  { %14881 = vpow2.f32 %v8616_v9  ;;  %v8622_v23 = vmul.f32 1.442695, %v8608_v37  ;;  %8633 = vadd.xlane.f32.xlu0 %v8632_v15 }
0x1b2a   :  { %v14878_v31 = vpop.eup %14877  ;;  %14883 = vpow2.f32 %v8622_v23 }
0x1b2b   :  { %v8595_v49 = vpop.xlane.xlu1 %8594  ;;  %v8629_v14 = vsel %vm1205_vm2, %v14878_v31, 0.0 }
0x1b2c   :  { %v14880_v4 = vpop.eup %14879  ;;  %v8607_v53 = vsub.f32 %v8434_v62, %v8595_v49  ;;  %8630 = vadd.xlane.f32.xlu1 %v8629_v14 }
0x1b2d   :  { %v8638_v2 = vsel %vm1205_vm2, %v14880_v4, 0.0 }
0x1b2e   :  { %v8620_v47 = vmul.f32 1.442695, %v8607_v53  ;;  %8639 = vadd.xlane.f32.xlu0 %v8638_v2 }
0x1b30   :  { %14885 = vpow2.f32 %v8620_v47 }
0x1b32   :  { %v14882_v8 = vpop.eup %14881 }
0x1b33   :  { %v8601_v46 = vpop.xlane.xlu1 %8600  ;;  %v8635_v56 = vsel %vm1205_vm2, %v14882_v8, 0.0 }
0x1b34   :  { %v14884_v13 = vpop.eup %14883  ;;  %v8609_v36 = vsub.f32 %v8574_v22, %v8601_v46  ;;  %8636 = vadd.xlane.f32.xlu1 %v8635_v56 }
0x1b35   :  { %v8644_v5 = vsel %vm1205_vm2, %v14884_v13, 0.0 }
0x1b36   :  { %v8624_v35 = vmul.f32 1.442695, %v8609_v36  ;;  %8645 = vadd.xlane.f32.xlu0 %v8644_v5 }
0x1b38   :  { %14887 = vpow2.f32 %v8624_v35 }
0x1b3a   :  { %v14886_v34 = vpop.eup %14885 }
0x1b3b   :  { %v8641_v62 = vsel %vm1205_vm2, %v14886_v34, 0.0 }
0x1b3c   :  { %8642 = vadd.xlane.f32.xlu1 %v8641_v62 }
0x1b42   :  { %v16630_v24 = vpop.eup %14887 }
0x1b43   :  { %v8647_v9 = vsel %vm1205_vm2, %v16630_v24, 0.0 }
0x1b44   :  { %8648 = vadd.xlane.f32.xlu1 %v8647_v9 }
0x1bb1   :  { %v8628_v37 = vpop.xlane.xlu0 %8627 }
0x1bb2   :  { %14889 = vrcp.f32 %v8628_v37 }
0x1bb5   :  { %v8634_v15 = vpop.xlane.xlu0 %8633 }
0x1bb6   :  { %14891 = vrcp.f32 %v8634_v15 }
0x1bb9   :  { %v8631_v22 = vpop.xlane.xlu1 %8630 }
0x1bba   :  { %14893 = vrcp.f32 %v8631_v22 }
0x1bbb   :  { %v8640_v23 = vpop.xlane.xlu0 %8639 }
0x1bbc   :  { %v14890_v49 = vpop.eup %14889  ;;  %14895 = vrcp.f32 %v8640_v23 }
0x1bbd   :  { %v8658_v14 = vmul.f32 %v14890_v49, %v14874_v54 }
0x1bbf   :  { %13020 = vmatmul.mubr.msk.f32.vlgmr.msra.gmra.mrb[78].mxu0 %vm1294_vm3, %v8658_v14 }
0x1bc0   :  { %v14892_v53 = vpop.eup %14891  ;;  %14329 = vmatpush3.bf16.msra.mxu0 %v15539_v52  ;;  %13033 = vmatprep.mubr.msk.f32.mxu0 %vm14963_vm1, %v17152_v55 }
0x1bc1   :  { %v8660_v2 = vmul.f32 %v14892_v53, %v14876_v27  ;;  %v8637_v47 = vpop.xlane.xlu1 %8636  ;;  %14333 = vmatprep.subr.bf16.mxu0 %v17153_v33 }
0x1bc2   :  { %14897 = vrcp.f32 %v8637_v47 }
0x1bc3   :  { %v8646_v46 = vpop.xlane.xlu0 %8645  ;;  %13034 = vmatmul.mubr.msk.f32.vlgmr.msra.gmra.mrb[80].mxu0 %vm1294_vm3, %v8660_v2 }
0x1bc4   :  { %v14894_v56 = vpop.eup %14893  ;;  %14899 = vrcp.f32 %v8646_v46  ;;  %14335 = vmatpush3.bf16.msra.mxu0 %v15568_v6  ;;  %13047 = vmatprep.mubr.msk.f32.mxu0 %vm14963_vm1, %v17152_v55 }
0x1bc5   :  { %v8659_v54 = vmul.f32 %v14894_v56, %v14878_v31  ;;  %14339 = vmatprep.subr.bf16.mxu0 %v17153_v33 }
0x1bc6   :  { %v14896_v36 = vpop.eup %14895 }
0x1bc7   :  { %v8662_v5 = vmul.f32 %v14896_v36, %v14880_v4  ;;  %13027 = vmatmul.mubr.msk.f32.vlgmr.msra.gmra.mrb[106].mxu1 %vm1294_vm3, %v8659_v54 }
0x1bc8   :  { %14332 = vmatpush3.bf16.msra.mxu1 %v15556_v3  ;;  %13040 = vmatprep.mubr.msk.f32.mxu1 %vm14963_vm1, %v17152_v55 }
0x1bc9   :  { %v8643_v27 = vpop.xlane.xlu1 %8642  ;;  %13048 = vmatmul.mubr.msk.f32.vlgmr.msra.gmra.mrb[82].mxu0 %vm1294_vm3, %v8662_v5  ;;  %14336 = vmatprep.subr.bf16.mxu1 %v17153_v33 }
0x1bca   :  { %14901 = vrcp.f32 %v8643_v27  ;;  %14341 = vmatpush3.bf16.msra.mxu0 %v15511_v28  ;;  %13061 = vmatprep.mubr.msk.f32.mxu0 %vm14963_vm1, %v17152_v55  ;;  %v17315_v27 = vld [vmem:[#allocation28_spill] sm:$0xff] }
0x1bcb   :  { %14345 = vmatprep.subr.bf16.mxu0 %v17153_v33 }
0x1bcc   :  { %v14898_v31 = vpop.eup %14897 }
0x1bcd   :  { %v8661_v4 = vmul.f32 %v14898_v31, %v14882_v8  ;;  %v17316_v31 = vld [vmem:[#allocation29_spill] sm:$0xff] }
0x1bce   :  { %v14900_v35 = vpop.eup %14899 }
0x1bcf   :  { %v8664_v62 = vmul.f32 %v14900_v35, %v14884_v13  ;;  %13041 = vmatmul.mubr.msk.f32.vlgmr.msra.gmra.mrb[108].mxu1 %vm1294_vm3, %v8661_v4  ;;  %v17317_v4 = vld [vmem:[#allocation30_spill] sm:$0xff]  ;;  %v17318_v35 = vld [vmem:[#allocation31_spill] sm:$0xff] }
0x1bd0   :  { %14338 = vmatpush3.bf16.msra.mxu1 %v15580_v38  ;;  %13054 = vmatprep.mubr.msk.f32.mxu1 %vm14963_vm1, %v17152_v55 }
0x1bd1   :  { %v8649_v9 = vpop.xlane.xlu1 %8648  ;;  %13062 = vmatmul.mubr.msk.f32.vlgmr.msra.gmra.mrb[84].mxu0 %vm1294_vm3, %v8664_v62  ;;  %14342 = vmatprep.subr.bf16.mxu1 %v17153_v33  ;;  %v17319_v62 = vld [vmem:[#allocation32_spill] sm:$0xff] }
0x1bd2   :  { %14903 = vrcp.f32 %v8649_v9  ;;  %14347 = vmatpush3.bf16.msra.mxu0 %v15655_v50  ;;  %13103 = vmatprep.mubr.msk.f32.mxu0 %vm14963_vm1, %v17152_v55  ;;  %v17320_v9 = vld [vmem:[#allocation33_spill] sm:$0xff] }
0x1bd3   :  { %14348 = vmatprep.subr.bf16.mxu0 %v17153_v33 }
0x1bd4   :  { %v14902_v8 = vpop.eup %14901 }
0x1bd5   :  { %v8663_v13 = vmul.f32 %v14902_v8, %v14886_v34  ;;  %v17321_v8 = vld [vmem:[#allocation34_spill] sm:$0xff] }
0x1bd6   :  { %14350 = vmatpush3.bf16.msra.mxu0 %v15666_v58 }
0x1bd7   :  { %13055 = vmatmul.mubr.msk.f32.vlgmr.msra.gmra.mrb[110].mxu1 %vm1294_vm3, %v8663_v13  ;;  %14351 = vmatprep.subr.bf16.mxu0 %v17153_v33  ;;  %v17322_v13 = vld [vmem:[#allocation35_spill] sm:$0xff] }
0x1bd8   :  { %14344 = vmatpush3.bf16.msra.mxu1 %v15592_v11  ;;  %13068 = vmatprep.mubr.msk.f32.mxu1 %vm14963_vm1, %v17152_v55 }
0x1bd9   :  { %14394 = vmatprep.subr.bf16.mxu1 %v15063_v17  ;;  %v17313_v17 = vld [vmem:[#allocation48_spill] sm:$0xff] }
0x1bda   :  { %14353 = vmatpush3.bf16.msra.mxu0 %v15681_v1 }
0x1bdb   :  { %14354 = vmatprep.subr.bf16.mxu0 %v17153_v33 }
0x1bdc   :  { %v14904_v37 = vpop.eup %14903 }
0x1bdd   :  { %v8665_v34 = vmul.f32 %v14904_v37, %v16630_v24 }
0x1bde   :  { %14356 = vmatpush3.bf16.msra.mxu0 %v15694_v0 }
0x1bdf   :  { %13069 = vmatmul.mubr.msk.f32.vlgmr.msra.gmra.mrb[112].mxu1 %vm1294_vm3, %v8665_v34  ;;  %14357 = vmatprep.subr.bf16.mxu0 %v17153_v33 }
0x1be0   :  { %14396 = vmatpush1.bf16.msra.mxu1 %v15065_v18  ;;  %9480 = vmatprep.mubr.f32.mxu1 %v17152_v55  ;;  %v17314_v18 = vld [vmem:[#allocation49_spill] sm:$0xff] }
0x1be1   :  { %14398 = vmatprep.subr.bf16.mxu1 %v15089_v26 }
0x1be2   :  { %14359 = vmatpush3.bf16.msra.mxu0 %v15706_v41 }
0x1be3   :  { %14360 = vmatprep.subr.bf16.mxu0 %v17153_v33 }
0x1be4   :  { %14400 = vmatpush1.bf16.msra.mxu1 %v15101_v30 }
0x1be5   :  { %14402 = vmatprep.subr.bf16.mxu1 %v15128_v39 }
0x1be6   :  { %14362 = vmatpush3.bf16.msra.mxu0 %v15719_v63 }
0x1be7   :  { %14363 = vmatprep.subr.bf16.mxu0 %v17153_v33 }
0x1be8   :  { %14404 = vmatpush1.bf16.msra.mxu1 %v15143_v44 }
0x1be9   :  { %14406 = vmatprep.subr.bf16.mxu1 %v15155_v48 }
0x1bea   :  { %14365 = vmatpush3.bf16.msra.mxu0 %v15731_v19 }
0x1beb   :  { %14366 = vmatprep.subr.bf16.mxu0 %v17153_v33 }
0x1bec   :  { %14408 = vmatpush1.bf16.msra.mxu1 %v15182_v57 }
0x1bed   :  { %14410 = vmatprep.subr.bf16.mxu1 %v15191_v60 }
0x1bee   :  { %14368 = vmatpush3.bf16.msra.mxu0 %v15743_v40 }
0x1bef   :  { %14369 = vmatprep.subr.bf16.mxu0 %v17153_v33 }
0x1bf0   :  { %14412 = vmatpush1.bf16.msra.mxu1 %v15218_v7 }
0x1bf1   :  { %13104 = vmatmul.mubr.f32.vlgmr.msra.gmra.mrb[86].mxu0 %v16570_v32  ;;  %14414 = vmatprep.subr.bf16.mxu1 %v15227_v12 }
0x1bf2   :  { %14371 = vmatpush3.bf16.msra.mxu0 %v15767_v10  ;;  %13138 = vmatprep.mubr.msk.f32.mxu0 %vm14963_vm1, %v17152_v55 }
0x1bf3   :  { %14372 = vmatprep.subr.bf16.mxu0 %v17153_v33 }
0x1bf4   :  { %14416 = vmatpush1.bf16.msra.mxu1 %v15254_v25 }
0x1bf5   :  { %14418 = vmatprep.subr.bf16.mxu1 %v15263_v29 }
0x1bf6   :  { %14374 = vmatpush3.bf16.msra.mxu0 %v15777_v21 }
0x1bf7   :  { %14375 = vmatprep.subr.bf16.mxu0 %v17153_v33 }
0x1bf8   :  { %14420 = vmatpush1.bf16.msra.mxu1 %v15290_v42 }
0x1bf9   :  { %14422 = vmatprep.subr.bf16.mxu1 %v15296_v45 }
0x1bfa   :  { %14377 = vmatpush3.bf16.msra.mxu0 %v17187_v43 }
0x1bfb   :  { %14378 = vmatprep.subr.bf16.mxu0 %v17153_v33 }
0x1bfc   :  { %14424 = vmatpush1.bf16.msra.mxu1 %v17188_v61 }
0x1bfd   :  { %14426 = vmatprep.subr.bf16.mxu1 %v17189_v59 }
0x1bfe   :  { %14380 = vmatpush3.bf16.msra.mxu0 %v17190_v20 }
0x1bff   :  { %14381 = vmatprep.subr.bf16.mxu0 %v17153_v33 }
0x1c02   :  { %14383 = vmatpush3.bf16.msra.mxu0 %v17191_v16 }
0x1c03   :  { %14384 = vmatprep.subr.bf16.mxu0 %v17153_v33 }
0x1c06   :  { %14386 = vmatpush3.bf16.msra.mxu0 %v17229_v51 }
0x1c07   :  { %14387 = vmatprep.subr.bf16.mxu0 %v17153_v33 }
0x1c0a   :  { %14389 = vmatpush3.bf16.msra.mxu0 %v17313_v17 }
0x1c0b   :  { %14390 = vmatprep.subr.bf16.mxu0 %v17153_v33 }
0x1c0e   :  { %14392 = vmatpush3.bf16.msra.mxu0 %v17314_v18 }
0x1c0f   :  { %14473 = vmatprep.subr.bf16.mxu0 %v17153_v33 }
0x1c92   :  { %v8735_v26 = vpop.f32.mrb[78].mxu0 }
0x1c93   :  { %v13021_v30 = vpop.f32.mrb[79].mxu0 }
0x1c94   :  { %v17323_v30 = vld [vmem:[#allocation4_spill] sm:$0xff] }
0x1c96   :  { %v8881_v39 = vpop.f32.mrb[80].mxu0 }
0x1c97   :  { %v13035_v44 = vpop.f32.mrb[81].mxu0  ;;  %v9330_v7 = vrot.slane %v8881_v39, 6  ;;  %v17324_v39 = vld [vmem:[#allocation5_spill] sm:$0xff] }
0x1c98   :  { %v17325_v44 = vld [vmem:[#allocation6_spill] sm:$0xff] }
0x1c9a   :  { %v8808_v48 = vpop.f32.mrb[106].mxu1 }
0x1c9b   :  { %v9328_v57 = vrot.slane %v8808_v48, 7  ;;  %v13028_v60 = vpop.f32.mrb[107].mxu1  ;;  %v17326_v48 = vld [vmem:[#allocation7_spill] sm:$0xff] }
0x1c9c   :  { %v9027_v12 = vpop.f32.mrb[82].mxu0  ;;  %v17328_v60 = vld [vmem:[#allocation9_spill] sm:$0xff] }
0x1c9d   :  { %v9329_v25 = vsel %vm1958_vm4, %v9328_v57, %v8735_v26  ;;  %v13049_v29 = vpop.f32.mrb[83].mxu0  ;;  %v9334_v32 = vrot.slane %v9027_v12, 4  ;;  %v17327_v57 = vld [vmem:[#allocation8_spill] sm:$0xff]  ;;  %v17330_v12 = vld [vmem:[#allocation11_spill] sm:$0xff] }
0x1c9e   :  { %v9331_v42 = vsel %vm1961_vm5, %v9330_v7, %v9329_v25  ;;  %v17329_v7 = vld [vmem:[#allocation10_spill] sm:$0xff]  ;;  %v17331_v25 = vld [vmem:[#allocation12_spill] sm:$0xff]  ;;  %v17332_v29 = vld [vmem:[#allocation13_spill] sm:$0xff] }
0x1ca2   :  { %v8954_v45 = vpop.f32.mrb[108].mxu1 }
0x1ca3   :  { %v9332_v61 = vrot.slane %v8954_v45, 5  ;;  %v13042_v59 = vpop.f32.mrb[109].mxu1  ;;  %v17334_v45 = vld [vmem:[#allocation15_spill] sm:$0xff] }
0x1ca4   :  { %v9173_v24 = vpop.f32.mrb[84].mxu0  ;;  %v17336_v59 = vld [vmem:[#allocation17_spill] sm:$0xff] }
0x1ca5   :  { %v9333_v15 = vsel %vm1964_vm6, %v9332_v61, %v9331_v42  ;;  %v13063_v22 = vpop.f32.mrb[85].mxu0  ;;  %v9338_v2 = vrot.slane %v9173_v24, 2  ;;  %v17333_v42 = vld [vmem:[#allocation14_spill] sm:$0xff]  ;;  %v17335_v61 = vld [vmem:[#allocation16_spill] sm:$0xff]  ;;  %v17338_v24 = vld [vmem:[#allocation19_spill] sm:$0xff] }
0x1ca6   :  { %v9335_v23 = vsel %vm1967_vm7, %v9334_v32, %v9333_v15  ;;  %v17337_v32 = vld [vmem:[#allocation18_spill] sm:$0xff]  ;;  %v17339_v15 = vld [vmem:[#allocation21_spill] sm:$0xff] }
0x1ca7   :  { %v17340_v22 = vld [vmem:[#allocation22_spill] sm:$0xff] }
0x1caa   :  { %v9100_v49 = vpop.f32.mrb[110].mxu1 }
0x1cab   :  { %v9336_v14 = vrot.slane %v9100_v49, 3  ;;  %v13056_v53 = vpop.f32.mrb[111].mxu1  ;;  %v11429_v49 = vld [vmem:[%s16992_s0 + $0x28] sm:$0xff] }
0x1cac   :  { %v17343_v53 = vld [vmem:[#allocation25_spill] sm:$0xff] }
0x1cad   :  { %v9337_v47 = vsel %vm1970_vm8, %v9336_v14, %v9335_v23  ;;  %v17341_v23 = vld [vmem:[#allocation23_spill] sm:$0xff]  ;;  %v17342_v14 = vld [vmem:[#allocation24_spill] sm:$0xff] }
0x1cae   :  { %v9339_v46 = vsel %vm1973_vm9, %v9338_v2, %v9337_v47  ;;  %v17344_v2 = vld [vmem:[#allocation26_spill] sm:$0xff]  ;;  %v17345_v47 = vld [vmem:[#allocation27_spill] sm:$0xff] }
0x1cb2   :  { %v9246_v56 = vpop.f32.mrb[112].mxu1 }
0x1cb3   :  { %v9340_v54 = vrot.slane %v9246_v56, 1  ;;  %v13070_v36 = vpop.f32.mrb[113].mxu1 }
0x1cb5   :  { %v9341_v5 = vsel %vm1976_vm10, %v9340_v54, %v9339_v46  ;;  %v17346_v46 = vld [vmem:[#allocation36_spill] sm:$0xff]  ;;  %v17347_v54 = vld [vmem:[#allocation37_spill] sm:$0xff] }
0x1cb6   :  { %13139 = vmatmul.mubr.f32.vlgmr.msra.gmra.mrb[86].mxu0 %v9341_v5 }
0x1cb7   :  { %14475 = vmatpush3.bf16.msra.mxu0 %v17315_v27  ;;  %13173 = vmatprep.mubr.msk.f32.mxu0 %vm14963_vm1, %v17152_v55  ;;  %v17348_v27 = vld [vmem:[#allocation38_spill] sm:$0xff] }
0x1cb8   :  { %14476 = vmatprep.subr.bf16.mxu0 %v17153_v33 }
0x1cbb   :  { %14478 = vmatpush3.bf16.msra.mxu0 %v17316_v31 }
0x1cbc   :  { %14479 = vmatprep.subr.bf16.mxu0 %v17153_v33 }
0x1cbf   :  { %14481 = vmatpush3.bf16.msra.mxu0 %v17317_v4 }
0x1cc0   :  { %14482 = vmatprep.subr.bf16.mxu0 %v17153_v33 }
0x1cc3   :  { %14484 = vmatpush3.bf16.msra.mxu0 %v17318_v35 }
0x1cc4   :  { %14485 = vmatprep.subr.bf16.mxu0 %v17153_v33 }
0x1cc7   :  { %14487 = vmatpush3.bf16.msra.mxu0 %v17319_v62 }
0x1cc8   :  { %14488 = vmatprep.subr.bf16.mxu0 %v17153_v33 }
0x1ccb   :  { %14490 = vmatpush3.bf16.msra.mxu0 %v17320_v9 }
0x1ccc   :  { %14491 = vmatprep.subr.bf16.mxu0 %v17153_v33 }
0x1ccf   :  { %14493 = vmatpush3.bf16.msra.mxu0 %v17321_v8  ;;  %v17349_v8 = vld [vmem:[#allocation39_spill] sm:$0xff] }
0x1cd0   :  { %14494 = vmatprep.subr.bf16.mxu0 %v17153_v33 }
0x1cd3   :  { %14496 = vmatpush3.bf16.msra.mxu0 %v17322_v13 }
0x1cd4   :  { %14503 = vmatprep.subr.bf16.mxu0 %v17153_v33 }
0x1d89   :  { %v9409_v37 = vpop.f32.mrb[86].mxu0 }
0x1d8a   :  { %14905 = vtanh.f32 %v9409_v37  ;;  %v13140_v34 = vpop.f32.mrb[87].mxu0 }
0x1d8b   :  { %v17350_v34 = vld [vmem:[#allocation40_spill] sm:$0xff] }
0x1d94   :  { %v14906_v26 = vpop.eup %14905 }
0x1d95   :  { %9481 = vmatmul.mubr.f32.vlgmr.msra.gmra.mrb[114].mxu1 %v14906_v26 }
0x1d96   :  { %14428 = vmatpush1.bf16.msra.mxu1 %v17323_v30  ;;  %9551 = vmatprep.mubr.f32.mxu1 %v17152_v55 }
0x1d97   :  { %14430 = vmatprep.subr.bf16.mxu1 %v17324_v39 }
0x1d9a   :  { %14432 = vmatpush1.bf16.msra.mxu1 %v17325_v44 }
0x1d9b   :  { %14434 = vmatprep.subr.bf16.mxu1 %v17326_v48 }
0x1d9e   :  { %14436 = vmatpush1.bf16.msra.mxu1 %v17327_v57 }
0x1d9f   :  { %14438 = vmatprep.subr.bf16.mxu1 %v17328_v60 }
0x1da2   :  { %14440 = vmatpush1.bf16.msra.mxu1 %v17329_v7 }
0x1da3   :  { %14442 = vmatprep.subr.bf16.mxu1 %v17330_v12 }
0x1da6   :  { %14444 = vmatpush1.bf16.msra.mxu1 %v17331_v25 }
0x1da7   :  { %14446 = vmatprep.subr.bf16.mxu1 %v17332_v29 }
0x1daa   :  { %14448 = vmatpush1.bf16.msra.mxu1 %v17333_v42  ;;  %v17351_v42 = vld [vmem:[#allocation3_spill] sm:$0xff] }
0x1dab   :  { %14450 = vmatprep.subr.bf16.mxu1 %v17334_v45 }
0x1dae   :  { %14452 = vmatpush1.bf16.msra.mxu1 %v17335_v61 }
0x1daf   :  { %14454 = vmatprep.subr.bf16.mxu1 %v17336_v59 }
0x1db2   :  { %14456 = vmatpush1.bf16.msra.mxu1 %v17337_v32 }
0x1db3   :  { %14458 = vmatprep.subr.bf16.mxu1 %v17338_v24 }
0x1db5   :  { %9552 = vmatmul.mubr.f32.vlgmr.msra.gmra.mrb[116].mxu1 %v14906_v26 }
0x1db6   :  { %14460 = vmatpush1.bf16.msra.mxu1 %v17339_v15  ;;  %9625 = vmatprep.mubr.f32.mxu1 %v17152_v55 }
0x1db7   :  { %14462 = vmatprep.subr.bf16.mxu1 %v17340_v22  ;;  %v17352_v22 = vld [vmem:[#allocation42_spill] sm:$0xff] }
0x1dba   :  { %14464 = vmatpush1.bf16.msra.mxu1 %v17341_v23 }
0x1dbb   :  { %14466 = vmatprep.subr.bf16.mxu1 %v17342_v14 }
0x1dbd   :  { %11430 = vmatmul.mubr.msk.f32.vlgmr.msra.gmra.mrb[114].mxu1 %vm322_vm0, %v11429_v49 }
0x1dbe   :  { %14468 = vmatpush1.bf16.msra.mxu1 %v17343_v53  ;;  %9696 = vmatprep.mubr.f32.mxu1 %v17152_v55 }
0x1dbf   :  { %14470 = vmatprep.subr.bf16.mxu1 %v17344_v2 }
0x1dc2   :  { %14472 = vmatpush1.bf16.msra.mxu1 %v17345_v47  ;;  %v17353_v47 = vld [vmem:[#allocation43_spill] sm:$0xff] }
0x1dc3   :  { %14497 = vmatprep.subr.bf16.mxu1 %v17153_v33 }
0x1dc5   :  { %11431 = vmatmul.mubr.msk.f32.vlgmr.msra.gmra.mrb[116].mxu1 %vm322_vm0, %v11429_v49 }
0x1dc6   :  { %13180 = vmatprep.mubr.msk.f32.mxu1 %vm14963_vm1, %v17152_v55 }
0x1dcb   :  { %14499 = vmatpush3.bf16.xpose.msra.mxu1 %v17346_v46 }
0x1dcc   :  { %14500 = vmatprep.subr.bf16.mxu1 %v17153_v33 }
0x1e90   :  { %v9627_v56 = vpop.f32.mrb[114].mxu1 }
0x1e91   :  { %v9703_v36 = vadd.f32 %v9627_v56, %v17347_v54  ;;  %v9629_v5 = vpop.f32.mrb[115].mxu1 }
0x1e92   :  { %v9704_v31 = vadd.f32 %v9629_v5, %v17348_v27 }
0x1e93   :  { %v11432_v4 = vmul.f32 -1.442695, %v9703_v36 }
0x1e94   :  { %v11433_v35 = vmul.f32 -1.442695, %v9704_v31 }
0x1e95   :  { %14907 = vpow2.f32 %v11432_v4 }
0x1e96   :  { %14909 = vpow2.f32 %v11433_v35 }
0x1e98   :  { %v9698_v62 = vpop.f32.mrb[116].mxu1 }
0x1e99   :  { %v9700_v9 = vpop.f32.mrb[117].mxu1  ;;  %v9705_v26 = vadd.f32 %v9698_v62, %v17350_v34 }
0x1e9a   :  { %v9706_v13 = vadd.f32 %v9700_v9, %v17349_v8 }
0x1e9c   :  { %v11434_v37 = vmul.f32 -1.442695, %v9706_v13 }
0x1e9e   :  { %14911 = vpow2.f32 %v11434_v37 }
0x1e9f   :  { %v14908_v30 = vpop.eup %14907  ;;  %14913 = vtanh.f32 %v9705_v26 }
0x1ea0   :  { %v14910_v39 = vpop.eup %14909  ;;  %v9710_v44 = vadd.f32 1.0, %v14908_v30 }
0x1ea1   :  { %v9716_v48 = vadd.f32 1.0, %v14910_v39 }
0x1ea2   :  { %14915 = vrcp.f32 %v9710_v44 }
0x1ea3   :  { %14917 = vrcp.f32 %v9716_v48 }
0x1ea8   :  { %v14912_v57 = vpop.eup %14911 }
0x1ea9   :  { %v14914_v60 = vpop.eup %14913  ;;  %v9723_v29 = vadd.f32 1.0, %v14912_v57 }
0x1eab   :  { %14919 = vrcp.f32 %v9723_v29 }
0x1eac   :  { %v14916_v7 = vpop.eup %14915 }
0x1ead   :  { %v14918_v12 = vpop.eup %14917  ;;  %v9727_v25 = vmul.f32 %v14916_v7, %v14914_v60 }
0x1eae   :  { %v9726_v45 = vmul.f32 %v14918_v12, %v17351_v42 }
0x1eb0   :  { %v9728_v61 = vadd.f32 %v9727_v25, %v9726_v45 }
0x1eb2   :  { %14921 = vtanh.f32 %v9728_v61 }
0x1eb5   :  { %v14920_v59 = vpop.eup %14919 }
0x1ebc   :  { %v14922_v32 = vpop.eup %14921 }
0x1ebd   :  { %v16787_v24 = vmul.f32 %v14922_v32, %v14920_v59 }
0x1ebf   :  { %13174 = vmatmul.mubr.f32.vlgmr.msra.gmra.mrb[88].mxu0 %v16787_v24 }
0x1ec0   :  { %14505 = vmatpush3.bf16.xpose.msra.mxu0 %v15539_v52  ;;  %13194 = vmatprep.mubr.msk.f32.mxu0 %vm14963_vm1, %v17152_v55 }
0x1ec1   :  { %14509 = vmatprep.subr.bf16.mxu0 %v17153_v33 }
0x1f92   :  { %v9797_v15 = vpop.f32.mrb[88].mxu0 }
0x1f93   :  { %v9809_v23 = vrot.slane %v9797_v15, %v17352_v22  ;;  %v13175_v49 = vpop.f32.mrb[89].mxu0  ;;  %v9802_v53 = vcombine.high %v9797_v15, %v9797_v15 }
0x1f95   :  { %v9825_v14 = vrot.slane %v9809_v23, %v17352_v22  ;;  %v9817_v56 = vcombine.high %v9809_v23, %v9809_v23  ;;  %v9816_v54 = vrot.slane %v9802_v53, %v17352_v22 }
0x1f97   :  { %v9847_v2 = vcombine.high %v9825_v14, %v9825_v14  ;;  %13181 = vmatmul.mubr.f32.vlgmr.msra.gmra.mrb[118].mxu1 %v9825_v14  ;;  %v9839_v36 = vrot.slane %v9817_v56, %v17352_v22  ;;  %v9832_v5 = vrot.slane %v9816_v54, %v17352_v22  ;;  %v9818_v4 = vcombine.high %v9816_v54, %v9816_v54 }
0x1f98   :  { %14502 = vmatpush3.bf16.xpose.msra.mxu1 %v17353_v47  ;;  %13187 = vmatprep.mubr.msk.f32.mxu1 %vm14963_vm1, %v17152_v55 }
0x1f99   :  { %13195 = vmatmul.mubr.f32.vlgmr.msra.gmra.mrb[90].mxu0 %v9847_v2  ;;  %14506 = vmatprep.subr.bf16.mxu1 %v17153_v33  ;;  %v9849_v27 = vcombine.high %v9839_v36, %v9839_v36  ;;  %v9848_v31 = vcombine.high %v9832_v5, %v9832_v5  ;;  %v9846_v35 = vrot.slane %v9818_v4, %v17352_v22 }
0x1f9a   :  { %14511 = vmatpush3.bf16.xpose.msra.mxu0 %v15568_v6  ;;  %13208 = vmatprep.mubr.msk.f32.mxu0 %vm14963_vm1, %v17152_v55 }
0x1f9b   :  { %14515 = vmatprep.subr.bf16.mxu0 %v17153_v33  ;;  %v9850_v62 = vcombine.high %v9846_v35, %v9846_v35 }
0x1f9f   :  { %13188 = vmatmul.mubr.f32.vlgmr.msra.gmra.mrb[120].mxu1 %v9839_v36 }
0x1fa0   :  { %14508 = vmatpush3.bf16.xpose.msra.mxu1 %v15556_v3  ;;  %13201 = vmatprep.mubr.msk.f32.mxu1 %vm14963_vm1, %v17152_v55 }
0x1fa1   :  { %13209 = vmatmul.mubr.f32.vlgmr.msra.gmra.mrb[92].mxu0 %v9832_v5  ;;  %14512 = vmatprep.subr.bf16.mxu1 %v17153_v33 }
0x1fa2   :  { %14517 = vmatpush3.bf16.xpose.msra.mxu0 %v15511_v28  ;;  %13222 = vmatprep.mubr.msk.f32.mxu0 %vm14963_vm1, %v17152_v55 }
0x1fa3   :  { %14521 = vmatprep.subr.bf16.mxu0 %v17153_v33 }
0x1fa7   :  { %13202 = vmatmul.mubr.f32.vlgmr.msra.gmra.mrb[122].mxu1 %v9849_v27 }
0x1fa8   :  { %14514 = vmatpush3.bf16.xpose.msra.mxu1 %v15580_v38  ;;  %13215 = vmatprep.mubr.msk.f32.mxu1 %vm14963_vm1, %v17152_v55 }
0x1fa9   :  { %13223 = vmatmul.mubr.f32.vlgmr.msra.gmra.mrb[94].mxu0 %v9848_v31  ;;  %14518 = vmatprep.subr.bf16.mxu1 %v17153_v33 }
0x1faa   :  { %14523 = vmatpush3.bf16.msra.mxu0 %v17346_v46  ;;  %13236 = vmatprep.mubr.msk.f32.mxu0 %vm14963_vm1, %v17152_v55 }
0x1fab   :  { %14527 = vmatprep.subr.bf16.mxu0 %v17153_v33 }
0x1faf   :  { %13216 = vmatmul.mubr.f32.vlgmr.msra.gmra.mrb[124].mxu1 %v9846_v35 }
0x1fb0   :  { %14520 = vmatpush3.bf16.xpose.msra.mxu1 %v15592_v11  ;;  %13229 = vmatprep.mubr.msk.f32.mxu1 %vm14963_vm1, %v17152_v55 }
0x1fb1   :  { %14524 = vmatprep.subr.bf16.mxu1 %v17153_v33 }
0x1fb7   :  { %13230 = vmatmul.mubr.f32.vlgmr.msra.gmra.mrb[126].mxu1 %v9850_v62 }
0x1fb8   :  { %14526 = vmatpush3.bf16.msra.mxu1 %v17353_v47  ;;  %13243 = vmatprep.mubr.msk.f32.mxu1 %vm14963_vm1, %v17152_v55 }
0x1fb9   :  { %14530 = vmatprep.subr.bf16.mxu1 %v17153_v33 }
0x206a   :  { %v9925_v46 = vpop.f32.mrb[118].mxu1 }
0x206b   :  { %v13182_v9 = vpop.f32.mrb[119].mxu1  ;;  %v10419_v8 = vsel %vm1205_vm2, %v9925_v46, -inf }
0x206c   :  { %10420 = vmax.xlane.f32.xlu0 %v10419_v8  ;;  %v10065_v13 = vpop.f32.mrb[90].mxu0 }
0x206d   :  { %v13196_v37 = vpop.f32.mrb[91].mxu0  ;;  %v10425_v34 = vsel %vm1205_vm2, %v10065_v13, -inf }
0x2070   :  { %10426 = vmax.xlane.f32.xlu0 %v10425_v34 }
0x2072   :  { %v9995_v26 = vpop.f32.mrb[120].mxu1 }
0x2073   :  { %v13189_v30 = vpop.f32.mrb[121].mxu1  ;;  %v10422_v39 = vsel %vm1205_vm2, %v9995_v26, -inf }
0x2074   :  { %10423 = vmax.xlane.f32.xlu1 %v10422_v39  ;;  %v10205_v44 = vpop.f32.mrb[92].mxu0 }
0x2075   :  { %v13210_v48 = vpop.f32.mrb[93].mxu0  ;;  %v10431_v57 = vsel %vm1205_vm2, %v10205_v44, -inf }
0x2076   :  { %10432 = vmax.xlane.f32.xlu0 %v10431_v57 }
0x207a   :  { %v10135_v60 = vpop.f32.mrb[122].mxu1 }
0x207b   :  { %v13203_v7 = vpop.f32.mrb[123].mxu1  ;;  %v10428_v12 = vsel %vm1205_vm2, %v10135_v60, -inf }
0x207c   :  { %10429 = vmax.xlane.f32.xlu1 %v10428_v12  ;;  %v10345_v25 = vpop.f32.mrb[94].mxu0 }
0x207d   :  { %v13224_v29 = vpop.f32.mrb[95].mxu0  ;;  %v10437_v42 = vsel %vm1205_vm2, %v10345_v25, -inf }
0x207e   :  { %10438 = vmax.xlane.f32.xlu0 %v10437_v42 }
0x2082   :  { %v10275_v45 = vpop.f32.mrb[124].mxu1 }
0x2083   :  { %v13217_v61 = vpop.f32.mrb[125].mxu1  ;;  %v10434_v59 = vsel %vm1205_vm2, %v10275_v45, -inf }
0x2084   :  { %10435 = vmax.xlane.f32.xlu1 %v10434_v59 }
0x208a   :  { %v10415_v32 = vpop.f32.mrb[126].mxu1 }
0x208b   :  { %v13231_v15 = vpop.f32.mrb[127].mxu1  ;;  %v10440_v22 = vsel %vm1205_vm2, %v10415_v32, -inf }
0x208c   :  { %10441 = vmax.xlane.f32.xlu1 %v10440_v22 }
0x20f9   :  { %v10421_v23 = vpop.xlane.xlu0 %10420 }
0x20fa   :  { %v10443_v49 = vsub.f32 %v9925_v46, %v10421_v23 }
0x20fc   :  { %v10451_v14 = vmul.f32 1.442695, %v10443_v49 }
0x20fd   :  { %v10427_v53 = vpop.xlane.xlu0 %10426 }
0x20fe   :  { %14923 = vpow2.f32 %v10451_v14  ;;  %v10445_v2 = vsub.f32 %v10065_v13, %v10427_v53 }
0x2100   :  { %v10455_v47 = vmul.f32 1.442695, %v10445_v2 }
0x2101   :  { %v10424_v56 = vpop.xlane.xlu1 %10423 }
0x2102   :  { %14925 = vpow2.f32 %v10455_v47  ;;  %v10444_v54 = vsub.f32 %v9995_v26, %v10424_v56 }
0x2103   :  { %v10433_v36 = vpop.xlane.xlu0 %10432 }
0x2104   :  { %v10453_v5 = vmul.f32 1.442695, %v10444_v54  ;;  %v10447_v27 = vsub.f32 %v10205_v44, %v10433_v36 }
0x2106   :  { %14927 = vpow2.f32 %v10453_v5  ;;  %v10459_v31 = vmul.f32 1.442695, %v10447_v27 }
0x2108   :  { %v14924_v4 = vpop.eup %14923  ;;  %14929 = vpow2.f32 %v10459_v31 }
0x2109   :  { %v10430_v35 = vpop.xlane.xlu1 %10429  ;;  %v10467_v62 = vsel %vm1205_vm2, %v14924_v4, 0.0 }
0x210a   :  { %v10446_v9 = vsub.f32 %v10135_v60, %v10430_v35  ;;  %10468 = vadd.xlane.f32.xlu0 %v10467_v62 }
0x210b   :  { %v10439_v46 = vpop.xlane.xlu0 %10438 }
0x210c   :  { %v14926_v8 = vpop.eup %14925  ;;  %v10457_v37 = vmul.f32 1.442695, %v10446_v9  ;;  %v10449_v13 = vsub.f32 %v10345_v25, %v10439_v46 }
0x210d   :  { %v10473_v34 = vsel %vm1205_vm2, %v14926_v8, 0.0 }
0x210e   :  { %14931 = vpow2.f32 %v10457_v37  ;;  %v10463_v26 = vmul.f32 1.442695, %v10449_v13  ;;  %10474 = vadd.xlane.f32.xlu0 %v10473_v34 }
0x2110   :  { %v14928_v30 = vpop.eup %14927  ;;  %14933 = vpow2.f32 %v10463_v26 }
0x2111   :  { %v10436_v39 = vpop.xlane.xlu1 %10435  ;;  %v10470_v44 = vsel %vm1205_vm2, %v14928_v30, 0.0 }
0x2112   :  { %v14930_v48 = vpop.eup %14929  ;;  %v10448_v57 = vsub.f32 %v10275_v45, %v10436_v39  ;;  %10471 = vadd.xlane.f32.xlu1 %v10470_v44 }
0x2113   :  { %v10479_v60 = vsel %vm1205_vm2, %v14930_v48, 0.0 }
0x2114   :  { %v10461_v7 = vmul.f32 1.442695, %v10448_v57  ;;  %10480 = vadd.xlane.f32.xlu0 %v10479_v60 }
0x2116   :  { %14935 = vpow2.f32 %v10461_v7 }
0x2118   :  { %v14932_v12 = vpop.eup %14931 }
0x2119   :  { %v10442_v25 = vpop.xlane.xlu1 %10441  ;;  %v10476_v29 = vsel %vm1205_vm2, %v14932_v12, 0.0 }
0x211a   :  { %v14934_v42 = vpop.eup %14933  ;;  %v10450_v61 = vsub.f32 %v10415_v32, %v10442_v25  ;;  %10477 = vadd.xlane.f32.xlu1 %v10476_v29 }
0x211b   :  { %v10485_v59 = vsel %vm1205_vm2, %v14934_v42, 0.0 }
0x211c   :  { %v10465_v15 = vmul.f32 1.442695, %v10450_v61  ;;  %10486 = vadd.xlane.f32.xlu0 %v10485_v59 }
0x211e   :  { %14937 = vpow2.f32 %v10465_v15 }
0x2120   :  { %v14936_v22 = vpop.eup %14935 }
0x2121   :  { %v10482_v45 = vsel %vm1205_vm2, %v14936_v22, 0.0 }
0x2122   :  { %10483 = vadd.xlane.f32.xlu1 %v10482_v45 }
0x2128   :  { %v16847_v23 = vpop.eup %14937 }
0x2129   :  { %v10488_v49 = vsel %vm1205_vm2, %v16847_v23, 0.0 }
0x212a   :  { %10489 = vadd.xlane.f32.xlu1 %v10488_v49 }
0x2197   :  { %v10469_v14 = vpop.xlane.xlu0 %10468 }
0x2198   :  { %14939 = vrcp.f32 %v10469_v14 }
0x219b   :  { %v10475_v53 = vpop.xlane.xlu0 %10474 }
0x219c   :  { %14941 = vrcp.f32 %v10475_v53 }
0x219f   :  { %v10472_v32 = vpop.xlane.xlu1 %10471 }
0x21a0   :  { %14943 = vrcp.f32 %v10472_v32 }
0x21a1   :  { %v10481_v2 = vpop.xlane.xlu0 %10480 }
0x21a2   :  { %v14940_v47 = vpop.eup %14939  ;;  %14945 = vrcp.f32 %v10481_v2 }
0x21a3   :  { %v10499_v56 = vmul.f32 %v14940_v47, %v14924_v4 }
0x21a5   :  { %13237 = vmatmul.mubr.msk.f32.vlgmr.msra.gmra.mrb[96].mxu0 %vm1294_vm3, %v10499_v56 }
0x21a6   :  { %v14942_v54 = vpop.eup %14941  ;;  %14529 = vmatpush3.bf16.msra.mxu0 %v15539_v52  ;;  %13250 = vmatprep.mubr.msk.f32.mxu0 %vm14963_vm1, %v17152_v55 }
0x21a7   :  { %v10501_v36 = vmul.f32 %v14942_v54, %v14926_v8  ;;  %v10478_v5 = vpop.xlane.xlu1 %10477  ;;  %14533 = vmatprep.subr.bf16.mxu0 %v17153_v33  ;;  %v11265_v54 = vld [vmem:[%s16997_s7 + $0x50] sm:$0xff] }
0x21a8   :  { %14947 = vrcp.f32 %v10478_v5 }
0x21a9   :  { %v10487_v27 = vpop.xlane.xlu0 %10486  ;;  %13251 = vmatmul.mubr.msk.f32.vlgmr.msra.gmra.mrb[98].mxu0 %vm1294_vm3, %v10501_v36  ;;  %v11266_v36 = vld [vmem:[%s16997_s7 + $0x58] sm:$0xff] }
0x21aa   :  { %v14944_v31 = vpop.eup %14943  ;;  %14949 = vrcp.f32 %v10487_v27  ;;  %14535 = vmatpush3.bf16.msra.mxu0 %v15568_v6  ;;  %13264 = vmatprep.mubr.msk.f32.mxu0 %vm14963_vm1, %v17152_v55  ;;  %v14609_v5 = vpack.c.bf16 %v11266_v36, %v11265_v54  ;;  %v11267_v27 = vld [vmem:[%s16997_s7 + $0x60] sm:$0xff] }
0x21ab   :  { %v10500_v4 = vmul.f32 %v14944_v31, %v14928_v30  ;;  %14539 = vmatprep.subr.bf16.mxu0 %v17153_v33  ;;  %v11268_v31 = vld [vmem:[%s16997_s7 + $0x68] sm:$0xff] }
0x21ac   :  { %v14946_v52 = vpop.eup %14945 }
0x21ad   :  { %v10503_v35 = vmul.f32 %v14946_v52, %v14930_v48  ;;  %13244 = vmatmul.mubr.msk.f32.vlgmr.msra.gmra.mrb[128].mxu1 %vm1294_vm3, %v10500_v4  ;;  %v14612_v4 = vpack.c.bf16 %v11268_v31, %v11267_v27  ;;  %v11269_v52 = vld [vmem:[%s16997_s7 + $0x70] sm:$0xff] }
0x21ae   :  { %14532 = vmatpush3.bf16.msra.mxu1 %v15556_v3  ;;  %13257 = vmatprep.mubr.msk.f32.mxu1 %vm14963_vm1, %v17152_v55 }
0x21af   :  { %v10484_v62 = vpop.xlane.xlu1 %10483  ;;  %13265 = vmatmul.mubr.msk.f32.vlgmr.msra.gmra.mrb[100].mxu0 %vm1294_vm3, %v10503_v35  ;;  %14536 = vmatprep.subr.bf16.mxu1 %v17153_v33  ;;  %v11270_v35 = vld [vmem:[%s16997_s7 + $0x78] sm:$0xff] }
0x21b0   :  { %14951 = vrcp.f32 %v10484_v62  ;;  %14541 = vmatpush3.bf16.msra.mxu0 %v15511_v28  ;;  %13278 = vmatprep.mubr.msk.f32.mxu0 %vm14963_vm1, %v17152_v55  ;;  %v14615_v62 = vpack.c.bf16 %v11270_v35, %v11269_v52 }
0x21b1   :  { %14545 = vmatprep.subr.bf16.mxu0 %v17153_v33 }
0x21b2   :  { %v14948_v6 = vpop.eup %14947 }
0x21b3   :  { %v10502_v9 = vmul.f32 %v14948_v6, %v14932_v12  ;;  %v14_v6 = vstv %s16998_s8 }
0x21b4   :  { %v14950_v46 = vpop.eup %14949  ;;  %15 = vst [vmem:[#allocation2] sm:$0x1] %v14_v6 }
0x21b5   :  { %v10505_v3 = vmul.f32 %v14950_v46, %v14934_v42  ;;  %13258 = vmatmul.mubr.msk.f32.vlgmr.msra.gmra.mrb[130].mxu1 %vm1294_vm3, %v10502_v9 }
0x21b6   :  { %14538 = vmatpush3.bf16.msra.mxu1 %v15580_v38  ;;  %13271 = vmatprep.mubr.msk.f32.mxu1 %vm14963_vm1, %v17152_v55 }
0x21b7   :  { %v10490_v8 = vpop.xlane.xlu1 %10489  ;;  %13279 = vmatmul.mubr.msk.f32.vlgmr.msra.gmra.mrb[102].mxu0 %vm1294_vm3, %v10505_v3  ;;  %14542 = vmatprep.subr.bf16.mxu1 %v17153_v33 }
0x21b8   :  { %14953 = vrcp.f32 %v10490_v8  ;;  %14547 = vmatpush3.bf16.msra.mxu0 %v15655_v50  ;;  %13320 = vmatprep.mubr.msk.f32.mxu0 %vm14963_vm1, %v17152_v55 }
0x21b9   :  { %14548 = vmatprep.subr.bf16.mxu0 %v17153_v33 }
0x21ba   :  { %v14952_v28 = vpop.eup %14951 }
0x21bb   :  { %v10504_v37 = vmul.f32 %v14952_v28, %v14936_v22  ;;  %v11443_v8 = vld [vmem:[#allocation2] ss:$0 sm:$0xff] }
0x21bc   :  { %14550 = vmatpush3.bf16.msra.mxu0 %v15666_v58  ;;  %v11257_v58 = vld [vmem:[%s16997_s7 + $0x10] sm:$0xff] }
0x21bd   :  { %13272 = vmatmul.mubr.msk.f32.vlgmr.msra.gmra.mrb[132].mxu1 %vm1294_vm3, %v10504_v37  ;;  %14551 = vmatprep.subr.bf16.mxu0 %v17153_v33 }
0x21be   :  { %14544 = vmatpush3.bf16.msra.mxu1 %v15592_v11  ;;  %13285 = vmatprep.mubr.msk.f32.mxu1 %vm14963_vm1, %v17152_v55  ;;  %v11256_v11 = vld [vmem:[%s16997_s7 + $0x8] sm:$0xff] }
0x21bf   :  { %14593 = vmatprep.subr.bf16.mxu1 %v17153_v33 }
0x21c0   :  { %14553 = vmatpush3.bf16.msra.mxu0 %v15681_v1 }
0x21c1   :  { %14554 = vmatprep.subr.bf16.mxu0 %v17153_v33 }
0x21c2   :  { %v14954_v38 = vpop.eup %14953 }
0x21c3   :  { %v10506_v50 = vmul.f32 %v14954_v38, %v16847_v23 }
0x21c4   :  { %14556 = vmatpush3.bf16.msra.mxu0 %v15694_v0  ;;  %v11258_v0 = vld [vmem:[%s16997_s7 + $0x18] sm:$0xff] }
0x21c5   :  { %13286 = vmatmul.mubr.msk.f32.vlgmr.msra.gmra.mrb[134].mxu1 %vm1294_vm3, %v10506_v50  ;;  %14557 = vmatprep.subr.bf16.mxu0 %v17153_v33 }
0x21c6   :  { %13390 = vmatprep.mubr.msk.f32.mxu1 %vm14963_vm1, %v17152_v55 }
0x21c8   :  { %14559 = vmatpush3.bf16.msra.mxu0 %v15706_v41  ;;  %v14597_v41 = vpack.c.bf16 %v11258_v0, %v11257_v58 }
0x21c9   :  { %14560 = vmatprep.subr.bf16.mxu0 %v17153_v33 }
0x21cc   :  { %14562 = vmatpush3.bf16.msra.mxu0 %v15719_v63  ;;  %v11259_v63 = vld [vmem:[%s16997_s7 + $0x20] sm:$0xff] }
0x21cd   :  { %14563 = vmatprep.subr.bf16.mxu0 %v17153_v33 }
0x21d0   :  { %14565 = vmatpush3.bf16.msra.mxu0 %v15731_v19  ;;  %v11260_v19 = vld [vmem:[%s16997_s7 + $0x28] sm:$0xff] }
0x21d1   :  { %14566 = vmatprep.subr.bf16.mxu0 %v17153_v33 }
0x21d4   :  { %14568 = vmatpush3.bf16.msra.mxu0 %v15743_v40  ;;  %v14600_v40 = vpack.c.bf16 %v11260_v19, %v11259_v63 }
0x21d5   :  { %14569 = vmatprep.subr.bf16.mxu0 %v17153_v33 }
0x21d7   :  { %13321 = vmatmul.mubr.f32.vlgmr.msra.gmra.mrb[104].mxu0 %v16787_v24 }
0x21d8   :  { %14571 = vmatpush3.bf16.msra.mxu0 %v15767_v10  ;;  %13355 = vmatprep.mubr.msk.f32.mxu0 %vm14963_vm1, %v17152_v55  ;;  %v11255_v55 = vld [vmem:[%s16997_s7] sm:$0xff]  ;;  %v11261_v10 = vld [vmem:[%s16997_s7 + $0x30] sm:$0xff] }
0x21d9   :  { %14572 = vmatprep.subr.bf16.mxu0 %v17153_v33  ;;  %v14594_v1 = vpack.c.bf16 %v11256_v11, %v11255_v55 }
0x21db   :  { %14595 = vmatpush3.bf16.msra.mxu1 %v14594_v1 }
0x21dc   :  { %14574 = vmatpush3.bf16.msra.mxu0 %v15777_v21  ;;  %14596 = vmatprep.subr.bf16.mxu1 %v17153_v33  ;;  %v11262_v21 = vld [vmem:[%s16997_s7 + $0x38] sm:$0xff] }
0x21dd   :  { %14575 = vmatprep.subr.bf16.mxu0 %v17153_v33 }
0x21df   :  { %14598 = vmatpush3.bf16.msra.mxu1 %v14597_v41 }
0x21e0   :  { %14577 = vmatpush3.bf16.msra.mxu0 %v17187_v43  ;;  %14599 = vmatprep.subr.bf16.mxu1 %v17153_v33  ;;  %v14603_v43 = vpack.c.bf16 %v11262_v21, %v11261_v10 }
0x21e1   :  { %14578 = vmatprep.subr.bf16.mxu0 %v17153_v33 }
0x21e3   :  { %14601 = vmatpush3.bf16.msra.mxu1 %v14600_v40 }
0x21e4   :  { %14580 = vmatpush3.bf16.msra.mxu0 %v17190_v20  ;;  %14602 = vmatprep.subr.bf16.mxu1 %v17153_v33  ;;  %v11263_v20 = vld [vmem:[%s16997_s7 + $0x40] sm:$0xff] }
0x21e5   :  { %14581 = vmatprep.subr.bf16.mxu0 %v17153_v33 }
0x21e7   :  { %14604 = vmatpush3.bf16.msra.mxu1 %v14603_v43 }
0x21e8   :  { %14583 = vmatpush3.bf16.msra.mxu0 %v17191_v16  ;;  %v11264_v16 = vld [vmem:[%s16997_s7 + $0x48] sm:$0xff]  ;;  %14605 = vmatprep.subr.bf16.mxu1 %v17153_v33 }
0x21e9   :  { %14584 = vmatprep.subr.bf16.mxu0 %v17153_v33 }
0x21ec   :  { %14586 = vmatpush3.bf16.msra.mxu0 %v17229_v51  ;;  %v14606_v51 = vpack.c.bf16 %v11264_v16, %v11263_v20 }
0x21ed   :  { %14587 = vmatprep.subr.bf16.mxu0 %v17153_v33 }
0x21ee   :  { %14607 = vmatpush3.bf16.msra.mxu1 %v14606_v51 }
0x21ef   :  { %14608 = vmatprep.subr.bf16.mxu1 %v17153_v33 }
0x21f0   :  { %14589 = vmatpush3.bf16.msra.mxu0 %v17313_v17 }
0x21f1   :  { %14590 = vmatprep.subr.bf16.mxu0 %v17153_v33 }
0x21f2   :  { %14610 = vmatpush3.bf16.msra.mxu1 %v14609_v5 }
0x21f3   :  { %14611 = vmatprep.subr.bf16.mxu1 %v17153_v33 }
0x21f4   :  { %14592 = vmatpush3.bf16.msra.mxu0 %v17314_v18 }
0x21f6   :  { %14613 = vmatpush3.bf16.msra.mxu1 %v14612_v4 }
0x21f7   :  { %14614 = vmatprep.subr.bf16.mxu1 %v17153_v33 }
0x21fa   :  { %14616 = vmatpush3.bf16.msra.mxu1 %v14615_v62 }
0x2278   :  { %v10576_v17 = vpop.f32.mrb[96].mxu0 }
0x2279   :  { %v13238_v18 = vpop.f32.mrb[97].mxu0 }
0x227c   :  { %v10722_v24 = vpop.f32.mrb[98].mxu0 }
0x227d   :  { %v13252_v13 = vpop.f32.mrb[99].mxu0  ;;  %v11171_v39 = vrot.slane %v10722_v24, 6 }
0x2280   :  { %v10649_v34 = vpop.f32.mrb[128].mxu1 }
0x2281   :  { %v11169_v26 = vrot.slane %v10649_v34, 7  ;;  %v13245_v30 = vpop.f32.mrb[129].mxu1 }
0x2282   :  { %v10868_v44 = vpop.f32.mrb[100].mxu0 }
0x2283   :  { %v11170_v48 = vsel %vm1958_vm4, %v11169_v26, %v10576_v17  ;;  %v13266_v57 = vpop.f32.mrb[101].mxu0  ;;  %v11175_v29 = vrot.slane %v10868_v44, 4 }
0x2284   :  { %v11172_v60 = vsel %vm1961_vm5, %v11171_v39, %v11170_v48 }
0x2288   :  { %v10795_v7 = vpop.f32.mrb[130].mxu1 }
0x2289   :  { %v11173_v12 = vrot.slane %v10795_v7, 5  ;;  %v13259_v25 = vpop.f32.mrb[131].mxu1 }
0x228a   :  { %v11014_v42 = vpop.f32.mrb[102].mxu0 }
0x228b   :  { %v11174_v61 = vsel %vm1964_vm6, %v11173_v12, %v11172_v60  ;;  %v13280_v59 = vpop.f32.mrb[103].mxu0  ;;  %v11179_v49 = vrot.slane %v11014_v42, 2 }
0x228c   :  { %v11176_v15 = vsel %vm1967_vm7, %v11175_v29, %v11174_v61 }
0x2290   :  { %v10941_v22 = vpop.f32.mrb[132].mxu1 }
0x2291   :  { %v11177_v45 = vrot.slane %v10941_v22, 3  ;;  %v13273_v23 = vpop.f32.mrb[133].mxu1 }
0x2293   :  { %v11178_v14 = vsel %vm1970_vm8, %v11177_v45, %v11176_v15 }
0x2294   :  { %v11180_v53 = vsel %vm1973_vm9, %v11179_v49, %v11178_v14 }
0x2298   :  { %v11087_v32 = vpop.f32.mrb[134].mxu1 }
0x2299   :  { %v11181_v2 = vrot.slane %v11087_v32, 1  ;;  %v13287_v47 = vpop.f32.mrb[135].mxu1 }
0x229b   :  { %v11182_v56 = vsel %vm1976_vm10, %v11181_v2, %v11180_v53 }
0x229c   :  { %13356 = vmatmul.mubr.f32.vlgmr.msra.gmra.mrb[104].mxu0 %v11182_v56 }
0x236f   :  { %v11250_v9 = vpop.f32.mrb[104].mxu0 }
0x2370   :  { %14955 = vtanh.f32 %v11250_v9  ;;  %v13357_v46 = vpop.f32.mrb[105].mxu0 }
0x237a   :  { %v14956_v3 = vpop.eup %14955 }
0x237b   :  { %13391 = vmatmul.mubr.f32.vlgmr.msra.gmra.mrb[136].mxu1 %v14956_v3 }
0x244e   :  { %v11344_v28 = vpop.f32.mrb[136].mxu1 }
0x244f   :  { %v11345_v37 = vadd.f32 %v11443_v8, %v11344_v28  ;;  %v13392_v38 = vpop.f32.mrb[137].mxu1 }
0x2451   :  { %v11444_v50 = vmul.f32 -1.442695, %v11345_v37 }
0x2453   :  { %14957 = vpow2.f32 %v11444_v50 }
0x245d   :  { %v14958_v55 = vpop.eup %14957 }
0x245e   :  { %v11351_v11 = vadd.f32 1.0, %v14958_v55 }
0x2460   :  { %14959 = vrcp.f32 %v11351_v11 }
0x246a   :  { %v14960_v33 = vpop.eup %14959 }
0x246b   :  { %11355 = vst.msk [vmem:[%s16999_s9] sm:$0xff] %vm11354_vm11, %v14960_v33 }

</bundles_post_ra>
